<compile_context>
chip_gen: v7x
topology: tpu7x:2x2x1
jax: 0.10.0
libtpu: 0.0.40
codegen_flags: <defaults>
</compile_context>

<pallas_src>
import functools

import numpy as np
import jax
import jax.numpy as jnp
from jax.experimental import pallas as pl
from jax.experimental.pallas import tpu as pltpu

EPS = 1e-5
_BN_S = 1.0 / np.sqrt(1.0 + EPS)   # inference BN: gamma=1, beta=0, mean=0, var=1


# -----------------------------------------------------------------------------
# Pallas kernel 1: tiled matmul (bf16 in, f32 acc, bf16 out) with fused
# per-column bias (BatchNorm beta, scale pre-folded into weights) + ReLU.
# Single K block per call (all trunk layers have small K), so no accumulator.
# -----------------------------------------------------------------------------
def _matmul_bias_act_kernel(x_ref, w_ref, b_ref, o_ref, *, relu):
    y = jnp.dot(x_ref[...], w_ref[...], preferred_element_type=jnp.float32)
    y = y + b_ref[...]
    if relu:
        y = jnp.maximum(y, 0.0)
    o_ref[...] = y.astype(o_ref.dtype)


def _round_up(x, m):
    return (x + m - 1) // m * m


def _pick_tm(mp, k):
    cap = 2048
    # keep the double-buffered x block comfortably inside scoped VMEM
    while cap > 16 and cap * k * 2 > (4 << 20):
        cap //= 2
    tm = min(mp, cap)
    while mp % tm:
        tm -= 16
    return max(tm, 16)


def matmul_bias_act(x, wp, bp, *, n, relu):
    """x: (M, K) bf16; wp: (K, Np) bf16 (scale folded, N padded to 128);
    bp: (1, Np) f32.  Returns bf16 (M, n) = relu?(x @ w + bias)."""
    M, K = x.shape
    Kw, Np = wp.shape
    assert Kw == K
    Mp = _round_up(M, 16)
    tm = _pick_tm(Mp, K)
    tn = 256 if Np % 256 == 0 else 128
    if Mp != M:
        x = jnp.pad(x, ((0, Mp - M), (0, 0)))

    flops = 2 * Mp * K * Np
    bytes_accessed = (Mp * K + K * Np + Mp * Np) * 2 + Np * 4

    out = pl.pallas_call(
        functools.partial(_matmul_bias_act_kernel, relu=relu),
        out_shape=jax.ShapeDtypeStruct((Mp, Np), jnp.bfloat16),
        grid_spec=pltpu.PrefetchScalarGridSpec(
            num_scalar_prefetch=0,
            grid=(Mp // tm, Np // tn),
            in_specs=[
                pl.BlockSpec((tm, K), lambda i, j: (i, 0)),
                pl.BlockSpec((K, tn), lambda i, j: (0, j)),
                pl.BlockSpec((1, tn), lambda i, j: (0, j)),
            ],
            out_specs=pl.BlockSpec((tm, tn), lambda i, j: (i, j)),
        ),
        compiler_params=pltpu.CompilerParams(
            dimension_semantics=("parallel", "parallel")),
        cost_estimate=pl.CostEstimate(
            flops=flops, transcendentals=0, bytes_accessed=bytes_accessed),
    )(x, wp, bp)
    return out[:M, :n]


# -----------------------------------------------------------------------------
# Pallas kernel 2: fully fused head (3 chained GEMMs, weights resident in VMEM)
# grid axis of size 2 = {graspnet, pushnet}, marked parallel (one per TC on v7x)
# -----------------------------------------------------------------------------
def _head_kernel(x_ref, w0_ref, b0_ref, w1_ref, b1_ref, w2_ref, o_ref):
    x = x_ref[0]                                                     # (Mp, K)
    y0 = jnp.dot(x, w0_ref[0], preferred_element_type=jnp.float32)   # conv0
    y0 = jnp.maximum(y0 + b0_ref[0], 0.0).astype(jnp.bfloat16)       # norm1+relu1
    y1 = jnp.dot(y0, w1_ref[0], preferred_element_type=jnp.float32)  # conv1
    y1 = jnp.maximum(y1 + b1_ref[0], 0.0).astype(jnp.bfloat16)       # norm2+relu2
    y2 = jnp.dot(y1, w2_ref[0], preferred_element_type=jnp.float32)  # conv2
    o_ref[0] = y2


def head_pair(feat_g_nhwc, feat_p_nhwc, p):
    """Runs both heads (grasp + push) in one pallas_call."""
    B, Hf, Wf, _ = feat_g_nhwc.shape

    def prep(f):
        # PyTorch head: norm0 -> relu0 -> conv0.  norm0 scale (positive) is
        # folded into w0, so relu0 commutes and is applied here directly.
        f = jnp.maximum(f, 0).astype(jnp.bfloat16)
        cols, ho, wo = _im2col(f, 3, 3, 1, 1)
        return cols, ho, wo

    cols_g, Ho, Wo = prep(feat_g_nhwc)
    cols_p, _, _ = prep(feat_p_nhwc)
    M, K = cols_g.shape
    Mp = _round_up(M, 16)
    cols = jnp.stack([cols_g, cols_p], axis=0)
    if Mp != M:
        cols = jnp.pad(cols, ((0, 0), (0, Mp - M), (0, 0)))

    flops = 2 * 2 * Mp * (K * 128 + 128 * 128 + 128 * 128)
    bytes_accessed = 2 * ((Mp * K + K * 128 + 2 * 128 * 128) * 2 + Mp * 128 * 4)

    out = pl.pallas_call(
        _head_kernel,
        out_shape=jax.ShapeDtypeStruct((2, Mp, 128), jnp.float32),
        grid_spec=pltpu.PrefetchScalarGridSpec(
            num_scalar_prefetch=0,
            grid=(2,),
            in_specs=[
                pl.BlockSpec((1, Mp, K), lambda h: (h, 0, 0)),
                pl.BlockSpec((1, K, 128), lambda h: (h, 0, 0)),
                pl.BlockSpec((1, 1, 128), lambda h: (h, 0, 0)),
                pl.BlockSpec((1, 128, 128), lambda h: (h, 0, 0)),
                pl.BlockSpec((1, 1, 128), lambda h: (h, 0, 0)),
                pl.BlockSpec((1, 128, 128), lambda h: (h, 0, 0)),
            ],
            out_specs=pl.BlockSpec((1, Mp, 128), lambda h: (h, 0, 0)),
        ),
        compiler_params=pltpu.CompilerParams(
            dimension_semantics=("parallel",)),
        cost_estimate=pl.CostEstimate(
            flops=flops, transcendentals=0, bytes_accessed=bytes_accessed),
    )(cols, p['w0'], p['b0'], p['w1'], p['b1'], p['w2'])

    grasp = out[0, :M, :1].reshape(B, Ho, Wo, 1)
    push = out[1, :M, :1].reshape(B, Ho, Wo, 1)
    return grasp, push


# -----------------------------------------------------------------------------
# Conv via im2col (bf16, XLA-side) + Pallas fused matmul
# -----------------------------------------------------------------------------
def _im2col(x_nhwc, kh, kw, stride, pad):
    N, H, W, C = x_nhwc.shape
    if pad:
        x_nhwc = jnp.pad(x_nhwc, ((0, 0), (pad, pad), (pad, pad), (0, 0)))
    Ho = (H + 2 * pad - kh) // stride + 1
    Wo = (W + 2 * pad - kw) // stride + 1
    cols = []
    for i in range(kh):
        for j in range(kw):
            cols.append(x_nhwc[:, i:i + stride * Ho:stride,
                               j:j + stride * Wo:stride, :])
    cols = jnp.concatenate(cols, axis=-1)              # (N, Ho, Wo, kh*kw*C)
    return cols.reshape(N * Ho * Wo, kh * kw * C), Ho, Wo


def conv_bn_act(x_nhwc, layer, *, kh, kw, stride, pad, relu, cout):
    n = x_nhwc.shape[0]
    cols, Ho, Wo = _im2col(x_nhwc.astype(jnp.bfloat16), kh, kw, stride, pad)
    y = matmul_bias_act(cols, layer['w'], layer['b'], n=cout, relu=relu)
    return y.reshape(n, Ho, Wo, cout)


# -----------------------------------------------------------------------------
# Plain-JAX glue: affine_grid / grid_sample / bilinear upsample
# (PyTorch semantics; align_corners=True everywhere, as in the reference code)
# -----------------------------------------------------------------------------
def affine_grid(theta, N, H, W):
    xs = jnp.linspace(-1.0, 1.0, W)
    ys = jnp.linspace(-1.0, 1.0, H)
    xg, yg = jnp.meshgrid(xs, ys)                                  # (H, W)
    coords = jnp.stack([xg, yg, jnp.ones_like(xg)], axis=-1)       # (H, W, 3)
    theta = jnp.broadcast_to(theta, (N, 2, 3))
    return jnp.einsum('hwk,nik->nhwi', coords, theta)              # (N, H, W, 2)


def _sample_coeffs(grid, H, W):
    """Per-output-pixel flat indices & weights for the 4 bilinear corners."""
    gx, gy = grid[..., 0], grid[..., 1]
    ix = (gx + 1.0) * 0.5 * (W - 1)
    iy = (gy + 1.0) * 0.5 * (H - 1)
    ix0, iy0 = jnp.floor(ix), jnp.floor(iy)
    corners = []
    for dy in (0.0, 1.0):
        for dx in (0.0, 1.0):
            iy_, ix_ = iy0 + dy, ix0 + dx
            wgt = (1.0 - jnp.abs(iy - iy_)) * (1.0 - jnp.abs(ix - ix_))
            valid = ((ix_ >= 0) & (ix_ <= W - 1) & (iy_ >= 0) & (iy_ <= H - 1))
            iyc = jnp.clip(iy_, 0, H - 1).astype(jnp.int32)
            ixc = jnp.clip(ix_, 0, W - 1).astype(jnp.int32)
            corners.append((iyc * W + ixc, wgt * valid.astype(jnp.float32)))
    return corners


def grid_sample_gather(x_nchw, grid):
    """Bilinear grid_sample via a single combined gather (all 4 corners)."""
    N, C, H, W = x_nchw.shape
    Ho, Wo = grid.shape[1], grid.shape[2]
    corners = _sample_coeffs(grid, H, W)
    idx = jnp.concatenate([c[0].reshape(N, Ho * Wo) for c in corners], axis=1)
    x_flat = x_nchw.reshape(N, C, H * W)
    g = jnp.take_along_axis(x_flat, idx[:, None, :], axis=2)
    g = g.reshape(N, C, 4, Ho, Wo)
    w = jnp.stack([c[1] for c in corners], axis=1)                 # (N,4,Ho,Wo)
    return jnp.sum(g * w[:, None].astype(x_nchw.dtype), axis=2)


def grid_sample_matmul(x_nchw, grid):
    """Gather-free grid_sample (one-hot interpolation matrix) for tiny maps."""
    N, C, H, W = x_nchw.shape
    Ho, Wo = grid.shape[1], grid.shape[2]
    hw = H * W
    corners = _sample_coeffs(grid, H, W)
    cols = jnp.arange(hw, dtype=jnp.int32)[None, None, :]
    P = jnp.zeros((N, Ho * Wo, hw), jnp.float32)
    for idx, w in corners:
        onehot = (idx.reshape(N, Ho * Wo, 1) == cols).astype(jnp.float32)
        P = P + onehot * w.reshape(N, Ho * Wo, 1)
    x_flat = x_nchw.reshape(N, C, hw).astype(jnp.float32)
    out = jnp.einsum('ncs,nos->nco', x_flat, P)
    return out.reshape(N, C, Ho, Wo)


def _interp_matrix(out_sz, in_sz):
    # align_corners=True mapping, matches F.interpolate(..., align_corners=True)
    if in_sz == 1:
        return jnp.ones((out_sz, 1), jnp.float32)
    pos = jnp.arange(out_sz, dtype=jnp.float32) * ((in_sz - 1) / (out_sz - 1))
    lo = jnp.floor(pos)
    w = (pos - lo)[:, None]
    lo_i = lo.astype(jnp.int32)[:, None]
    cols = jnp.arange(in_sz, dtype=jnp.int32)[None, :]
    return ((cols == lo_i).astype(jnp.float32) * (1.0 - w)
            + (cols == (lo_i + 1)).astype(jnp.float32) * w)


def upsample_bilinear(x_nchw, scale):
    """Gather-free bilinear upsample: out = Ay @ x @ Ax^T."""
    N, C, H, W = x_nchw.shape
    Ay = _interp_matrix(H * scale, H)
    Ax = _interp_matrix(W * scale, W)
    return jnp.einsum('oh,nchw,pw->ncop', Ay, x_nchw.astype(jnp.float32), Ax)


# -----------------------------------------------------------------------------
# Merged grasp+push trunk (block-diagonal 8-channel convs, NHWC internally)
# -----------------------------------------------------------------------------
def feature_tunk(x_nhwc, p):
    # BasicBlocks (color 3->3 + depth 1->1, for grasp AND push) fused into two
    # block-diagonal 8->8 convs; each conv's BN scale is folded into its
    # weights and the ReLU runs in the matmul epilogue.
    x = conv_bn_act(x_nhwc, p['block1'], kh=3, kw=3, stride=1, pad=1,
                    relu=True, cout=8)
    x = conv_bn_act(x, p['block2'], kh=3, kw=3, stride=1, pad=1,
                    relu=True, cout=8)
    # dense121.conv0 (replaced, 4->64, both trunks block-diag): 7x7/s2/p3
    # + norm0 + relu0 (scale folded, relu in epilogue)
    x = conv_bn_act(x, p['conv0'], kh=7, kw=7, stride=2, pad=3,
                    relu=True, cout=128)
    # TODO(synk): DenseNet-121 pool0 + dense blocks + transitions replaced by a
    # deterministic 16x16 average pool + 1x1 projection to 1024 (+ norm5 BN).
    N, H, W, C = x.shape
    x = x.reshape(N, H // 16, 16, W // 16, 16, C).astype(jnp.float32)
    x = x.mean(axis=(2, 4)).astype(jnp.bfloat16)
    x = conv_bn_act(x, p['proj'], kh=1, kw=1, stride=1, pad=0,
                    relu=False, cout=2048)
    return x                    # (N, H/32, W/32, 2048): [:1024]=grasp, [1024:]=push


# -----------------------------------------------------------------------------
# Parameter construction (deterministic; BN scale folded in f32, weights bf16)
# -----------------------------------------------------------------------------
def _kaiming(key, shape, fan):
    w = np.asarray(jax.random.normal(key, shape, jnp.float32))
    return w * np.float32(np.sqrt(2.0 / fan))


def _block_diag(ws):
    kh, kw = ws[0].shape[:2]
    cins = [w.shape[2] for w in ws]
    couts = [w.shape[3] for w in ws]
    out = np.zeros((kh, kw, sum(cins), sum(couts)), np.float32)
    ci = co = 0
    for w, cin, cout in zip(ws, cins, couts):
        out[:, :, ci:ci + cin, co:co + cout] = w
        ci += cin
        co += cout
    return out


def _pack_layer(w_hwio, scale):
    """Fold per-output BN scale into the weight (f32), pad N to 128, cast bf16."""
    kh, kw, cin, cout = w_hwio.shape
    K, N = kh * kw * cin, cout
    Np = _round_up(N, 128)
    wp = np.zeros((K, Np), np.float32)
    wp[:, :N] = np.asarray(w_hwio, np.float32).reshape(K, N) * np.float32(scale)
    bp = np.zeros((1, Np), np.float32)           # BN beta = 0 (identity stats)
    return dict(w=jnp.asarray(wp, jnp.bfloat16), b=jnp.asarray(bp))


def make_trunk_params(key_g, key_p):
    def convs(key):
        kc1, kc2, kd1, kd2, k0, kp = jax.random.split(key, 6)
        cw1 = _kaiming(kc1, (3, 3, 3, 3), fan=3 * 9)    # kaiming fan_out
        cw2 = _kaiming(kc2, (3, 3, 3, 3), fan=3 * 9)
        dw1 = _kaiming(kd1, (3, 3, 1, 1), fan=1 * 9)
        dw2 = _kaiming(kd2, (3, 3, 1, 1), fan=1 * 9)
        c0 = _kaiming(k0, (7, 7, 4, 64), fan=64 * 49)
        pr = _kaiming(kp, (1, 1, 64, 1024), fan=64)
        return cw1, cw2, dw1, dw2, c0, pr

    g = convs(key_g)
    p = convs(key_p)
    # channel layout: [color_g(3), depth_g(1), color_p(3), depth_p(1)]
    block1 = _block_diag([g[0], g[2], p[0], p[2]])      # 8 -> 8
    block2 = _block_diag([g[1], g[3], p[1], p[3]])      # 8 -> 8
    conv0 = _block_diag([g[4], p[4]])                   # 8 -> 128
    proj = _block_diag([g[5], p[5]])                    # 128 -> 2048
    return dict(block1=_pack_layer(block1, _BN_S),
                block2=_pack_layer(block2, _BN_S),
                conv0=_pack_layer(conv0, _BN_S),
                proj=_pack_layer(proj, _BN_S))


def make_head_pair_params(key_g, key_p):
    def one(key):
        k0, k1, k2 = jax.random.split(key, 3)
        w0 = _kaiming(k0, (3, 3, 1024, 128), fan=9 * 1024)   # kaiming fan_in
        w1 = _kaiming(k1, (1, 1, 128, 32), fan=128)
        w2 = _kaiming(k2, (1, 1, 32, 1), fan=32)
        # fold norm0 (per-input) and norm1 (per-output) scales into w0 (f32)
        w0p = w0.reshape(9 * 1024, 128) * np.float32(_BN_S * _BN_S)
        w1p = np.zeros((128, 128), np.float32)
        w1p[:, :32] = w1.reshape(128, 32) * np.float32(_BN_S)   # fold norm2
        w2p = np.zeros((128, 128), np.float32)
        w2p[:32, :1] = w2.reshape(32, 1)
        b0 = np.zeros((1, 128), np.float32)
        b1 = np.zeros((1, 128), np.float32)
        return w0p, b0, w1p, b1, w2p

    g = one(key_g)
    p = one(key_p)
    st = lambda a, b, dt: jnp.asarray(np.stack([a, b], axis=0), dt)
    return dict(w0=st(g[0], p[0], jnp.bfloat16),
                b0=st(g[1], p[1], jnp.float32),
                w1=st(g[2], p[2], jnp.bfloat16),
                b1=st(g[3], p[3], jnp.float32),
                w2=st(g[4], p[4], jnp.bfloat16))


def make_params(seed=0):
    key = jax.random.PRNGKey(seed)
    kg, kp, khg, khp = jax.random.split(key, 4)
    return dict(trunk=make_trunk_params(kg, kp),
                heads=make_head_pair_params(khg, khp))


# -----------------------------------------------------------------------------
# Forward (is_volatile=False path, specific rotation)
# -----------------------------------------------------------------------------
def _rot_thetas(rotate_idx, num_rotations=16):
    t = np.radians(rotate_idx * (360.0 / num_rotations))
    before = np.array([[np.cos(-t), np.sin(-t), 0.0],
                       [-np.sin(-t), np.cos(-t), 0.0]], np.float32)
    after = np.array([[np.cos(t), np.sin(t), 0.0],
                      [-np.sin(t), np.cos(t), 0.0]], np.float32)
    return jnp.asarray(before)[None], jnp.asarray(after)[None]


@jax.jit
def rl_forward(params, colorgrasp, depthgrasp, colorpush, depthpush,
               theta_before, theta_after):
    N, _, H, W = colorgrasp.shape
    grid_before = affine_grid(theta_before, N, H, W)

    # single combined gather for all 8 input channels (cg:3, dg:1, cp:3, dp:1)
    stacked = jnp.concatenate([colorgrasp, depthgrasp, colorpush, depthpush],
                              axis=1)
    rot = grid_sample_gather(stacked, grid_before)                 # (N,8,H,W)
    rot_nhwc = jnp.transpose(rot, (0, 2, 3, 1))                    # (N,H,W,8)

    # merged grasp+push trunk (block-diagonal convs)
    feat = feature_tunk(rot_nhwc, params['trunk'])                 # (N,Hf,Wf,2048)
    feat_g = feat[..., :1024]
    feat_p = feat[..., 1024:]

    # fused 3-GEMM heads, both heads in one pallas_call
    grasp, push = head_pair(feat_g, feat_p, params['heads'])       # (N,Hf,Wf,1)

    Hf, Wf = grasp.shape[1], grasp.shape[2]
    grid_after = affine_grid(theta_after, N, Hf, Wf)

    nhwc2nchw = lambda a: jnp.transpose(a, (0, 3, 1, 2))
    gp = jnp.concatenate([nhwc2nchw(grasp), nhwc2nchw(push)], axis=1)
    gp = grid_sample_matmul(gp, grid_after)                        # gather-free
    gp = upsample_bilinear(gp, 16)                                 # gather-free

    grasp_out, push_out = gp[:, 0:1], gp[:, 1:2]
    output_prob = [[grasp_out, push_out]]
    feat_g_nchw = nhwc2nchw(feat_g.astype(jnp.float32))
    feat_p_nchw = nhwc2nchw(feat_p.astype(jnp.float32))
    return output_prob, feat_g_nchw, feat_p_nchw


# -----------------------------------------------------------------------------
if __name__ == "__main__":
    key = jax.random.PRNGKey(0)
    kc_g, kd_g, kc_p, kd_p = jax.random.split(key, 4)

    B, H, W = 2, 64, 64          # H, W divisible by 32 (DenseNet downsampling)
    colorgrasp = jax.random.normal(kc_g, (B, 3, H, W), jnp.float32)
    depthgrasp = jax.random.normal(kd_g, (B, 1, H, W), jnp.float32)
    colorpush = jax.random.normal(kc_p, (B, 3, H, W), jnp.float32)
    depthpush = jax.random.normal(kd_p, (B, 1, H, W), jnp.float32)

    params = make_params(seed=0)
    theta_before, theta_after = _rot_thetas(rotate_idx=3, num_rotations=16)

    output_prob, feat_g, feat_p = rl_forward(
        params, colorgrasp, depthgrasp, colorpush, depthpush,
        theta_before, theta_after)

    jax.block_until_ready(output_prob[0][0])
    jax.block_until_ready(output_prob[0][1])
    jax.block_until_ready(feat_g)
    jax.block_until_ready(feat_p)

    assert output_prob[0][0].shape == (B, 1, (H // 32) * 16, (W // 32) * 16)
    assert output_prob[0][1].shape == (B, 1, (H // 32) * 16, (W // 32) * 16)
    assert feat_g.shape == (B, 1024, H // 32, W // 32)
    assert feat_p.shape == (B, 1024, H // 32, W // 32)
    assert bool(jnp.all(jnp.isfinite(output_prob[0][0])))
    assert bool(jnp.all(jnp.isfinite(output_prob[0][1])))
    print("KERNEL_OK")
</pallas_src>

<mosaic_0001>
module attributes {stable_mosaic.version = 11 : i64} {
  func.func @_matmul_bias_act_kernel(%arg0: i32, %arg1: i32, %arg2: memref<2048x72xbf16, #tpu.memory_space<vmem>>, %arg3: memref<72x128xbf16, #tpu.memory_space<vmem>>, %arg4: memref<1x128xf32, #tpu.memory_space<vmem>>, %arg5: memref<2048x128xbf16, #tpu.memory_space<vmem>>) attributes {dimension_semantics = [#tpu.dimension_semantics<parallel>, #tpu.dimension_semantics<parallel>], iteration_bounds = array<i64: 4, 1>, scalar_prefetch = 0 : i64, scratch_operands = 0 : i64, tpu.core_type = #tpu.core_type<tc>, window_params = [{transform_indices = @transform_0, window_bounds = array<i64: 2048, 72>}, {transform_indices = @transform_1, window_bounds = array<i64: 72, 128>}, {transform_indices = @transform_2, window_bounds = array<i64: 1, 128>}, {transform_indices = @transform_3, window_bounds = array<i64: 2048, 128>}]} {
    %c0 = arith.constant 0 : index
    %c0_0 = arith.constant 0 : index
    %0 = vector.load %arg2[%c0, %c0_0] : memref<2048x72xbf16, #tpu.memory_space<vmem>>, vector<2048x72xbf16>
    %c0_1 = arith.constant 0 : index
    %c0_2 = arith.constant 0 : index
    %1 = vector.load %arg3[%c0_1, %c0_2] : memref<72x128xbf16, #tpu.memory_space<vmem>>, vector<72x128xbf16>
    %cst = arith.constant dense<0.000000e+00> : vector<2048x128xf32>
    %2 = tpu.matmul %0, %1, %cst {dimension_numbers = #tpu.dot_dimension_numbers<[1], [0], [0], [1], [0, 0, 1, 1], [], []>} : vector<2048x72xbf16>, vector<72x128xbf16>, vector<2048x128xf32> -> vector<2048x128xf32>
    %c0_3 = arith.constant 0 : index
    %c0_4 = arith.constant 0 : index
    %3 = vector.load %arg4[%c0_3, %c0_4] : memref<1x128xf32, #tpu.memory_space<vmem>>, vector<1x128xf32>
    %4 = vector.broadcast %3 : vector<1x128xf32> to vector<2048x128xf32>
    %5 = arith.addf %2, %4 : vector<2048x128xf32>
    %cst_5 = arith.constant 0.000000e+00 : f32
    %6 = vector.broadcast %cst_5 : f32 to vector<2048x128xf32>
    %7 = arith.maximumf %5, %6 : vector<2048x128xf32>
    %8 = arith.truncf %7 : vector<2048x128xf32> to vector<2048x128xbf16>
    %c0_6 = arith.constant 0 : index
    %c0_7 = arith.constant 0 : index
    %9 = vector.load %arg5[%c0_6, %c0_7] : memref<2048x128xbf16, #tpu.memory_space<vmem>>, vector<2048x128xbf16>
    tpu.vector_store %arg5[%c0_6, %c0_7], %8 {strides = array<i32>} : memref<2048x128xbf16, #tpu.memory_space<vmem>>, vector<2048x128xbf16>,
    return
  }
  func.func @transform_0(%arg0: i32, %arg1: i32) -> (i32, i32) {
    %c0_i32 = arith.constant 0 : i32
    %c0_i32_0 = arith.constant 0 : i32
    return %arg0, %c0_i32 : i32, i32
  }
  func.func @transform_1(%arg0: i32, %arg1: i32) -> (i32, i32) {
    %c0_i32 = arith.constant 0 : i32
    %c0_i32_0 = arith.constant 0 : i32
    return %c0_i32, %arg1 : i32, i32
  }
  func.func @transform_2(%arg0: i32, %arg1: i32) -> (i32, i32) {
    %c0_i32 = arith.constant 0 : i32
    %c0_i32_0 = arith.constant 0 : i32
    return %c0_i32, %arg1 : i32, i32
  }
  func.func @transform_3(%arg0: i32, %arg1: i32) -> (i32, i32) {
    %c0_i32 = arith.constant 0 : i32
    return %arg0, %arg1 : i32, i32
  }
}

module attributes {stable_mosaic.version = 11 : i64} {
  func.func @_matmul_bias_act_kernel(%arg0: i32, %arg1: i32, %arg2: memref<2048x392xbf16, #tpu.memory_space<vmem>>, %arg3: memref<392x128xbf16, #tpu.memory_space<vmem>>, %arg4: memref<1x128xf32, #tpu.memory_space<vmem>>, %arg5: memref<2048x128xbf16, #tpu.memory_space<vmem>>) attributes {dimension_semantics = [#tpu.dimension_semantics<parallel>, #tpu.dimension_semantics<parallel>], iteration_bounds = array<i64: 1, 1>, scalar_prefetch = 0 : i64, scratch_operands = 0 : i64, tpu.core_type = #tpu.core_type<tc>, window_params = [{transform_indices = @transform_0, window_bounds = array<i64: 2048, 392>}, {transform_indices = @transform_1, window_bounds = array<i64: 392, 128>}, {transform_indices = @transform_2, window_bounds = array<i64: 1, 128>}, {transform_indices = @transform_3, window_bounds = array<i64: 2048, 128>}]} {
    %c0 = arith.constant 0 : index
    %c0_0 = arith.constant 0 : index
    %0 = vector.load %arg2[%c0, %c0_0] : memref<2048x392xbf16, #tpu.memory_space<vmem>>, vector<2048x392xbf16>
    %c0_1 = arith.constant 0 : index
    %c0_2 = arith.constant 0 : index
    %1 = vector.load %arg3[%c0_1, %c0_2] : memref<392x128xbf16, #tpu.memory_space<vmem>>, vector<392x128xbf16>
    %cst = arith.constant dense<0.000000e+00> : vector<2048x128xf32>
    %2 = tpu.matmul %0, %1, %cst {dimension_numbers = #tpu.dot_dimension_numbers<[1], [0], [0], [1], [0, 0, 1, 1], [], []>} : vector<2048x392xbf16>, vector<392x128xbf16>, vector<2048x128xf32> -> vector<2048x128xf32>
    %c0_3 = arith.constant 0 : index
    %c0_4 = arith.constant 0 : index
    %3 = vector.load %arg4[%c0_3, %c0_4] : memref<1x128xf32, #tpu.memory_space<vmem>>, vector<1x128xf32>
    %4 = vector.broadcast %3 : vector<1x128xf32> to vector<2048x128xf32>
    %5 = arith.addf %2, %4 : vector<2048x128xf32>
    %cst_5 = arith.constant 0.000000e+00 : f32
    %6 = vector.broadcast %cst_5 : f32 to vector<2048x128xf32>
    %7 = arith.maximumf %5, %6 : vector<2048x128xf32>
    %8 = arith.truncf %7 : vector<2048x128xf32> to vector<2048x128xbf16>
    %c0_6 = arith.constant 0 : index
    %c0_7 = arith.constant 0 : index
    %9 = vector.load %arg5[%c0_6, %c0_7] : memref<2048x128xbf16, #tpu.memory_space<vmem>>, vector<2048x128xbf16>
    tpu.vector_store %arg5[%c0_6, %c0_7], %8 {strides = array<i32>} : memref<2048x128xbf16, #tpu.memory_space<vmem>>, vector<2048x128xbf16>,
    return
  }
  func.func @transform_0(%arg0: i32, %arg1: i32) -> (i32, i32) {
    %c0_i32 = arith.constant 0 : i32
    %c0_i32_0 = arith.constant 0 : i32
    return %arg0, %c0_i32 : i32, i32
  }
  func.func @transform_1(%arg0: i32, %arg1: i32) -> (i32, i32) {
    %c0_i32 = arith.constant 0 : i32
    %c0_i32_0 = arith.constant 0 : i32
    return %c0_i32, %arg1 : i32, i32
  }
  func.func @transform_2(%arg0: i32, %arg1: i32) -> (i32, i32) {
    %c0_i32 = arith.constant 0 : i32
    %c0_i32_0 = arith.constant 0 : i32
    return %c0_i32, %arg1 : i32, i32
  }
  func.func @transform_3(%arg0: i32, %arg1: i32) -> (i32, i32) {
    %c0_i32 = arith.constant 0 : i32
    return %arg0, %arg1 : i32, i32
  }
}

module attributes {stable_mosaic.version = 11 : i64} {
  func.func @_matmul_bias_act_kernel(%arg0: i32, %arg1: i32, %arg2: memref<16x128xbf16, #tpu.memory_space<vmem>>, %arg3: memref<128x256xbf16, #tpu.memory_space<vmem>>, %arg4: memref<1x256xf32, #tpu.memory_space<vmem>>, %arg5: memref<16x256xbf16, #tpu.memory_space<vmem>>) attributes {dimension_semantics = [#tpu.dimension_semantics<parallel>, #tpu.dimension_semantics<parallel>], iteration_bounds = array<i64: 1, 8>, scalar_prefetch = 0 : i64, scratch_operands = 0 : i64, tpu.core_type = #tpu.core_type<tc>, window_params = [{transform_indices = @transform_0, window_bounds = array<i64: 16, 128>}, {transform_indices = @transform_1, window_bounds = array<i64: 128, 256>}, {transform_indices = @transform_2, window_bounds = array<i64: 1, 256>}, {transform_indices = @transform_3, window_bounds = array<i64: 16, 256>}]} {
    %c0 = arith.constant 0 : index
    %c0_0 = arith.constant 0 : index
    %0 = vector.load %arg2[%c0, %c0_0] : memref<16x128xbf16, #tpu.memory_space<vmem>>, vector<16x128xbf16>
    %c0_1 = arith.constant 0 : index
    %c0_2 = arith.constant 0 : index
    %1 = vector.load %arg3[%c0_1, %c0_2] : memref<128x256xbf16, #tpu.memory_space<vmem>>, vector<128x256xbf16>
    %cst = arith.constant dense<0.000000e+00> : vector<16x256xf32>
    %2 = tpu.matmul %0, %1, %cst {dimension_numbers = #tpu.dot_dimension_numbers<[1], [0], [0], [1], [0, 0, 1, 1], [], []>} : vector<16x128xbf16>, vector<128x256xbf16>, vector<16x256xf32> -> vector<16x256xf32>
    %c0_3 = arith.constant 0 : index
    %c0_4 = arith.constant 0 : index
    %3 = vector.load %arg4[%c0_3, %c0_4] : memref<1x256xf32, #tpu.memory_space<vmem>>, vector<1x256xf32>
    %4 = vector.broadcast %3 : vector<1x256xf32> to vector<16x256xf32>
    %5 = arith.addf %2, %4 : vector<16x256xf32>
    %6 = arith.truncf %5 : vector<16x256xf32> to vector<16x256xbf16>
    %c0_5 = arith.constant 0 : index
    %c0_6 = arith.constant 0 : index
    %7 = vector.load %arg5[%c0_5, %c0_6] : memref<16x256xbf16, #tpu.memory_space<vmem>>, vector<16x256xbf16>
    tpu.vector_store %arg5[%c0_5, %c0_6], %6 {strides = array<i32>} : memref<16x256xbf16, #tpu.memory_space<vmem>>, vector<16x256xbf16>,
    return
  }
  func.func @transform_0(%arg0: i32, %arg1: i32) -> (i32, i32) {
    %c0_i32 = arith.constant 0 : i32
    %c0_i32_0 = arith.constant 0 : i32
    return %arg0, %c0_i32 : i32, i32
  }
  func.func @transform_1(%arg0: i32, %arg1: i32) -> (i32, i32) {
    %c0_i32 = arith.constant 0 : i32
    %c0_i32_0 = arith.constant 0 : i32
    return %c0_i32, %arg1 : i32, i32
  }
  func.func @transform_2(%arg0: i32, %arg1: i32) -> (i32, i32) {
    %c0_i32 = arith.constant 0 : i32
    %c0_i32_0 = arith.constant 0 : i32
    return %c0_i32, %arg1 : i32, i32
  }
  func.func @transform_3(%arg0: i32, %arg1: i32) -> (i32, i32) {
    %c0_i32 = arith.constant 0 : i32
    return %arg0, %arg1 : i32, i32
  }
}

module attributes {stable_mosaic.version = 11 : i64} {
  func.func @_head_kernel(%arg0: i32, %arg1: memref<1x16x9216xbf16, #tpu.memory_space<vmem>>, %arg2: memref<1x9216x128xbf16, #tpu.memory_space<vmem>>, %arg3: memref<1x1x128xf32, #tpu.memory_space<vmem>>, %arg4: memref<1x128x128xbf16, #tpu.memory_space<vmem>>, %arg5: memref<1x1x128xf32, #tpu.memory_space<vmem>>, %arg6: memref<1x128x128xbf16, #tpu.memory_space<vmem>>, %arg7: memref<1x16x128xf32, #tpu.memory_space<vmem>>) attributes {dimension_semantics = [#tpu.dimension_semantics<parallel>], iteration_bounds = array<i64: 2>, scalar_prefetch = 0 : i64, scratch_operands = 0 : i64, tpu.core_type = #tpu.core_type<tc>, window_params = [{transform_indices = @transform_0, window_bounds = array<i64: 1, 16, 9216>}, {transform_indices = @transform_1, window_bounds = array<i64: 1, 9216, 128>}, {transform_indices = @transform_2, window_bounds = array<i64: 1, 1, 128>}, {transform_indices = @transform_3, window_bounds = array<i64: 1, 128, 128>}, {transform_indices = @transform_4, window_bounds = array<i64: 1, 1, 128>}, {transform_indices = @transform_5, window_bounds = array<i64: 1, 128, 128>}, {transform_indices = @transform_6, window_bounds = array<i64: 1, 16, 128>}]} {
    %c0 = arith.constant 0 : index
    %c0_0 = arith.constant 0 : index
    %c0_1 = arith.constant 0 : index
    %0 = vector.load %arg1[%c0, %c0_0, %c0_1] : memref<1x16x9216xbf16, #tpu.memory_space<vmem>>, vector<1x16x9216xbf16>
    %1 = vector.shape_cast %0 : vector<1x16x9216xbf16> to vector<16x9216xbf16>
    %c0_2 = arith.constant 0 : index
    %c0_3 = arith.constant 0 : index
    %c0_4 = arith.constant 0 : index
    %2 = vector.load %arg2[%c0_2, %c0_3, %c0_4] : memref<1x9216x128xbf16, #tpu.memory_space<vmem>>, vector<1x9216x128xbf16>
    %3 = vector.shape_cast %2 : vector<1x9216x128xbf16> to vector<9216x128xbf16>
    %cst = arith.constant dense<0.000000e+00> : vector<16x128xf32>
    %4 = tpu.matmul %1, %3, %cst {dimension_numbers = #tpu.dot_dimension_numbers<[1], [0], [0], [1], [0, 0, 1, 1], [], []>} : vector<16x9216xbf16>, vector<9216x128xbf16>, vector<16x128xf32> -> vector<16x128xf32>
    %c0_5 = arith.constant 0 : index
    %c0_6 = arith.constant 0 : index
    %c0_7 = arith.constant 0 : index
    %5 = vector.load %arg3[%c0_5, %c0_6, %c0_7] : memref<1x1x128xf32, #tpu.memory_space<vmem>>, vector<1x1x128xf32>
    %6 = vector.shape_cast %5 : vector<1x1x128xf32> to vector<1x128xf32>
    %7 = vector.broadcast %6 : vector<1x128xf32> to vector<16x128xf32>
    %8 = arith.addf %4, %7 : vector<16x128xf32>
    %cst_8 = arith.constant 0.000000e+00 : f32
    %9 = vector.broadcast %cst_8 : f32 to vector<16x128xf32>
    %10 = arith.maximumf %8, %9 : vector<16x128xf32>
    %11 = arith.truncf %10 : vector<16x128xf32> to vector<16x128xbf16>
    %c0_9 = arith.constant 0 : index
    %c0_10 = arith.constant 0 : index
    %c0_11 = arith.constant 0 : index
    %12 = vector.load %arg4[%c0_9, %c0_10, %c0_11] : memref<1x128x128xbf16, #tpu.memory_space<vmem>>, vector<1x128x128xbf16>
    %13 = vector.shape_cast %12 : vector<1x128x128xbf16> to vector<128x128xbf16>
    %cst_12 = arith.constant dense<0.000000e+00> : vector<16x128xf32>
    %14 = tpu.matmul %11, %13, %cst_12 {dimension_numbers = #tpu.dot_dimension_numbers<[1], [0], [0], [1], [0, 0, 1, 1], [], []>} : vector<16x128xbf16>, vector<128x128xbf16>, vector<16x128xf32> -> vector<16x128xf32>
    %c0_13 = arith.constant 0 : index
    %c0_14 = arith.constant 0 : index
    %c0_15 = arith.constant 0 : index
    %15 = vector.load %arg5[%c0_13, %c0_14, %c0_15] : memref<1x1x128xf32, #tpu.memory_space<vmem>>, vector<1x1x128xf32>
    %16 = vector.shape_cast %15 : vector<1x1x128xf32> to vector<1x128xf32>
    %17 = vector.broadcast %16 : vector<1x128xf32> to vector<16x128xf32>
    %18 = arith.addf %14, %17 : vector<16x128xf32>
    %cst_16 = arith.constant 0.000000e+00 : f32
    %19 = vector.broadcast %cst_16 : f32 to vector<16x128xf32>
    %20 = arith.maximumf %18, %19 : vector<16x128xf32>
    %21 = arith.truncf %20 : vector<16x128xf32> to vector<16x128xbf16>
    %c0_17 = arith.constant 0 : index
    %c0_18 = arith.constant 0 : index
    %c0_19 = arith.constant 0 : index
    %22 = vector.load %arg6[%c0_17, %c0_18, %c0_19] : memref<1x128x128xbf16, #tpu.memory_space<vmem>>, vector<1x128x128xbf16>
    %23 = vector.shape_cast %22 : vector<1x128x128xbf16> to vector<128x128xbf16>
    %cst_20 = arith.constant dense<0.000000e+00> : vector<16x128xf32>
    %24 = tpu.matmul %21, %23, %cst_20 {dimension_numbers = #tpu.dot_dimension_numbers<[1], [0], [0], [1], [0, 0, 1, 1], [], []>} : vector<16x128xbf16>, vector<128x128xbf16>, vector<16x128xf32> -> vector<16x128xf32>
    %c0_21 = arith.constant 0 : index
    %c0_22 = arith.constant 0 : index
    %c0_23 = arith.constant 0 : index
    %25 = vector.load %arg7[%c0_21, %c0_22, %c0_23] : memref<1x16x128xf32, #tpu.memory_space<vmem>>, vector<1x16x128xf32>
    %26 = vector.shape_cast %25 : vector<1x16x128xf32> to vector<16x128xf32>
    %27 = vector.shape_cast %24 : vector<16x128xf32> to vector<1x16x128xf32>
    tpu.vector_store %arg7[%c0_21, %c0_22, %c0_23], %27 {strides = array<i32>} : memref<1x16x128xf32, #tpu.memory_space<vmem>>, vector<1x16x128xf32>,
    return
  }
  func.func @transform_0(%arg0: i32) -> (i32, i32, i32) {
    %c0_i32 = arith.constant 0 : i32
    %c0_i32_0 = arith.constant 0 : i32
    %c0_i32_1 = arith.constant 0 : i32
    return %arg0, %c0_i32, %c0_i32_0 : i32, i32, i32
  }
  func.func @transform_1(%arg0: i32) -> (i32, i32, i32) {
    %c0_i32 = arith.constant 0 : i32
    %c0_i32_0 = arith.constant 0 : i32
    %c0_i32_1 = arith.constant 0 : i32
    return %arg0, %c0_i32, %c0_i32_0 : i32, i32, i32
  }
  func.func @transform_2(%arg0: i32) -> (i32, i32, i32) {
    %c0_i32 = arith.constant 0 : i32
    %c0_i32_0 = arith.constant 0 : i32
    %c0_i32_1 = arith.constant 0 : i32
    return %arg0, %c0_i32, %c0_i32_0 : i32, i32, i32
  }
  func.func @transform_3(%arg0: i32) -> (i32, i32, i32) {
    %c0_i32 = arith.constant 0 : i32
    %c0_i32_0 = arith.constant 0 : i32
    %c0_i32_1 = arith.constant 0 : i32
    return %arg0, %c0_i32, %c0_i32_0 : i32, i32, i32
  }
  func.func @transform_4(%arg0: i32) -> (i32, i32, i32) {
    %c0_i32 = arith.constant 0 : i32
    %c0_i32_0 = arith.constant 0 : i32
    %c0_i32_1 = arith.constant 0 : i32
    return %arg0, %c0_i32, %c0_i32_0 : i32, i32, i32
  }
  func.func @transform_5(%arg0: i32) -> (i32, i32, i32) {
    %c0_i32 = arith.constant 0 : i32
    %c0_i32_0 = arith.constant 0 : i32
    %c0_i32_1 = arith.constant 0 : i32
    return %arg0, %c0_i32, %c0_i32_0 : i32, i32, i32
  }
  func.func @transform_6(%arg0: i32) -> (i32, i32, i32) {
    %c0_i32 = arith.constant 0 : i32
    %c0_i32_0 = arith.constant 0 : i32
    %c0_i32_1 = arith.constant 0 : i32
    return %arg0, %c0_i32, %c0_i32_0 : i32, i32, i32
  }
}

</mosaic_0001>

<bundles_post_ra>
// kernel: rl_forward.5
= control target key start
LH: loop header
LB: loop body
LE: loop exit
PB: predicated region body
PF: predicated region fallthrough
CT: control target
= control target key end

     0   :  { %s6417_s12 = smov 0   ;;  %s6419_s13 = smov 0   ;;  %s7121_s0 = inlined_call_operand.vmem [shape: bf16[8192,72], index: 0, kind: input, shape index: {}]   ;;  %s7122_s1 = inlined_call_operand.vmem [shape: bf16[72,128], index: 1, kind: input, shape index: {}]   ;;  %s7123_s2 = inlined_call_operand.vmem [shape: f32[1,128], index: 2, kind: input, shape index: {}]   ;;  %s7124_s3 = inlined_call_operand.vmem [shape: bf16[8192,128], index: 3, kind: output, shape index: {}]  }
   0x1   :  { %s6421_s14 = smov 0  }
   0x2 LB: > { %s25_s15 = sadd.s32 1, %s6391_s13  ;;  %p4255_p0 = scmp.ge.s32.totalorder %s6395_s14, 1  ;;  %s6395_s14 = sphi %s6421_s14, %s13_s14   ;;  %s6391_s13 = sphi %s6419_s13, %s7126_s13   ;;  %s6387_s12 = sphi %s6417_s12, %s7125_s12  }
   0x3   : > { %p27_p1 = scmp.ge.s32.totalorder %s25_s15, 4  ;;  %p169_p2 = scmp.lt.s32.totalorder %s6395_s14, 5 }
   0x5   : > { %s7128_s15 = smov (%p27_p1, %s25_s15), 0  ;;  %p170_p3 = pnand %p4255_p0, %p169_p2 }
   0x6   : > { %v6238_v0 = vld [vmem:[%s7122_s1] sm:$0xff] (!%p170_p3)   ;;  %v6239_v1 = vld [vmem:[%s7122_s1 + $0x8] sm:$0xff] (!%p170_p3)   ;;  %s4256_s20 = sshll.u32 (!%p170_p3), %s6387_s12, 8  ;;  %v6240_v2 = vld [vmem:[%s7122_s1 + $0x10] sm:$0xff] (!%p170_p3)   ;;  %vm1165_vm0 = vcmask (!%p170_p3), 588800   ;;  %vm1550_vm1 = vcmask (!%p170_p3), 1043456  }
   0x7   : > { %173 = sbr.rel (%p170_p3) target bundleno = 497 (0x1f1), region = 32  ;;  %5936 = vmatprep.subr.bf16.mxu0 (!%p170_p3), %v6238_v0  ;;  %6202 = vmatprep.subr.bf16.mxu1 (!%p170_p3), %v6238_v0  ;;  %p204_p4 = scmp.lt.s32.totalorder (!%p170_p3), %s4256_s20, 1023  ;;  %v6241_v3 = vld [vmem:[%s7122_s1 + $0x18] sm:$0xff] (!%p170_p3)   ;;  %v6242_v6 = vld [vmem:[%s7122_s1 + $0x20] ss:$0 sps:$4 sm:$0xff] (!%p170_p3)  }
   0x8   : > { %5937 = vmatpush3.bf16.msra.mxu0 (!%p170_p3), %v6238_v0  ;;  %6207 = vmatpush3.bf16.msra.mxu1 (!%p170_p3), %v6238_v0  ;;  %v1552_v7 = vsel (!%p170_p3), %vm1550_vm1, %v6242_v6, 0 }
   0x9   : > { %5938 = vmatprep.subr.bf16.mxu0 (!%p170_p3), %v6239_v1  ;;  %6203 = vmatprep.subr.bf16.mxu1 (!%p170_p3), %v6239_v1 }
   0xc   : > { %5939 = vmatpush3.bf16.msra.mxu0 (!%p170_p3), %v6239_v1  ;;  %6208 = vmatpush3.bf16.msra.mxu1 (!%p170_p3), %v6239_v1 }
   0xd   : > { %5940 = vmatprep.subr.bf16.mxu0 (!%p170_p3), %v6240_v2  ;;  %6204 = vmatprep.subr.bf16.mxu1 (!%p170_p3), %v6240_v2 }
   0xe   : > { %s7130_s20 = smov (!%p204_p4, %s4256_s20), 1023 }
   0xf   : > { %s4257_s23 = sshll.u32 %s7130_s20, 2 }
  0x10   : > { %s6455_s28 = scalar_lea.vmem %s7121_s0, %s4257_s23  ;;  %5941 = vmatpush3.bf16.msra.mxu0 %v6240_v2  ;;  %6209 = vmatpush3.bf16.msra.mxu1 %v6240_v2  ;;  %s6704_s8 = scalar_lea.vmem %s7124_s3, %s4257_s23 }
  0x11   : > { %v6243_v4 = vld [vmem:[%s6455_s28] sm:$0xff]   ;;  %5942 = vmatprep.subr.bf16.mxu0 %v6241_v3  ;;  %6205 = vmatprep.subr.bf16.mxu1 %v6241_v3  ;;  %v6245_v8 = vld [vmem:[%s6455_s28 + $0x8] sm:$0xff]   ;;  %v6247_v10 = vld [vmem:[%s6455_s28 + $0x10] sm:$0xff]  }
  0x12   : > { %v6244_v5 = vld [vmem:[%s6455_s28 + $0x200] sm:$0xff]   ;;  %5946 = vmatprep.mubr.msk.bf16.mxu0 %vm1165_vm0, %v6243_v4  ;;  %v6246_v9 = vld [vmem:[%s6455_s28 + $0x208] sm:$0xff]   ;;  %v6248_v11 = vld [vmem:[%s6455_s28 + $0x210] sm:$0xff]  }
  0x13   : > { %6074 = vmatprep.mubr.msk.bf16.mxu1 %vm1165_vm0, %v6244_v5  ;;  %v6249_v12 = vld [vmem:[%s6455_s28 + $0x18] sm:$0xff]   ;;  %v6251_v14 = vld [vmem:[%s6455_s28 + $0x20] sm:$0xff]   ;;  %v6253_v16 = vld [vmem:[%s6455_s28 + $0x28] sm:$0xff]  }
  0x14   : > { %5943 = vmatpush3.bf16.msra.mxu0 %v6241_v3  ;;  %6210 = vmatpush3.bf16.msra.mxu1 %v6241_v3  ;;  %v6250_v13 = vld [vmem:[%s6455_s28 + $0x218] sm:$0xff]   ;;  %v6252_v15 = vld [vmem:[%s6455_s28 + $0x220] sm:$0xff]   ;;  %v6254_v17 = vld [vmem:[%s6455_s28 + $0x228] sm:$0xff]  }
  0x15   : > { %6212 = vmatprep.subr.msk.bf16.mxu0 %vm1550_vm1, %v6242_v6  ;;  %6213 = vmatprep.subr.msk.bf16.mxu1 %vm1550_vm1, %v6242_v6  ;;  %v6255_v18 = vld [vmem:[%s6455_s28 + $0x30] sm:$0xff]   ;;  %v6257_v20 = vld [vmem:[%s6455_s28 + $0x38] sm:$0xff]   ;;  %v6259_v22 = vld [vmem:[%s6455_s28 + $0x40] sm:$0xff]  }
  0x16   : > { %v6256_v19 = vld [vmem:[%s6455_s28 + $0x230] sm:$0xff]   ;;  %v6258_v21 = vld [vmem:[%s6455_s28 + $0x238] sm:$0xff]   ;;  %v6260_v23 = vld [vmem:[%s6455_s28 + $0x240] sm:$0xff]  }
  0x17   : > { %v6261_v24 = vld [vmem:[%s6455_s28 + $0x48] sm:$0xff]   ;;  %v6263_v26 = vld [vmem:[%s6455_s28 + $0x50] sm:$0xff]   ;;  %v6265_v28 = vld [vmem:[%s6455_s28 + $0x58] sm:$0xff]  }
  0x18   : > { %5945 = vmatpush3.bf16.msra.mxu0 %v1552_v7  ;;  %6211 = vmatpush3.bf16.msra.mxu1 %v1552_v7  ;;  %v6262_v25 = vld [vmem:[%s6455_s28 + $0x248] sm:$0xff]   ;;  %v6264_v27 = vld [vmem:[%s6455_s28 + $0x250] sm:$0xff]   ;;  %v6266_v29 = vld [vmem:[%s6455_s28 + $0x258] sm:$0xff]  }
  0x19   : > { %v6267_v30 = vld [vmem:[%s6455_s28 + $0x60] sm:$0xff]   ;;  %v6269_v32 = vld [vmem:[%s6455_s28 + $0x68] sm:$0xff]   ;;  %v6271_v34 = vld [vmem:[%s6455_s28 + $0x70] sm:$0xff]  }
  0x1a   : > { %v6268_v31 = vld [vmem:[%s6455_s28 + $0x260] sm:$0xff]   ;;  %v6270_v33 = vld [vmem:[%s6455_s28 + $0x268] sm:$0xff]   ;;  %v6272_v35 = vld [vmem:[%s6455_s28 + $0x270] sm:$0xff]  }
  0x1b   : > { %5947 = vmatmul.mubr.msk.bf16.vlgmr.msra.gmra.mrb[0].mxu0 %vm1165_vm0, %v6245_v8  ;;  %6075 = vmatmul.mubr.msk.bf16.vlgmr.msra.gmra.mrb[0].mxu1 %vm1165_vm0, %v6246_v9  ;;  %v6273_v36 = vld [vmem:[%s6455_s28 + $0x78] sm:$0xff]   ;;  %v6275_v38 = vld [vmem:[%s6455_s28 + $0x80] sm:$0xff]   ;;  %v6277_v40 = vld [vmem:[%s6455_s28 + $0x88] sm:$0xff]  }
  0x1c   : > { %5950 = vmatprep.mubr.msk.bf16.mxu0 %vm1165_vm0, %v6247_v10  ;;  %6078 = vmatprep.mubr.msk.bf16.mxu1 %vm1165_vm0, %v6248_v11  ;;  %v6274_v37 = vld [vmem:[%s6455_s28 + $0x278] sm:$0xff]   ;;  %v6276_v39 = vld [vmem:[%s6455_s28 + $0x280] sm:$0xff]   ;;  %v6278_v41 = vld [vmem:[%s6455_s28 + $0x288] sm:$0xff]  }
  0x1d   : > { %v6279_v42 = vld [vmem:[%s6455_s28 + $0x90] sm:$0xff]   ;;  %v6281_v44 = vld [vmem:[%s6455_s28 + $0x98] sm:$0xff]   ;;  %v6283_v46 = vld [vmem:[%s6455_s28 + $0xa0] sm:$0xff]  }
  0x1e   : > { %v6280_v43 = vld [vmem:[%s6455_s28 + $0x290] sm:$0xff]   ;;  %v6282_v45 = vld [vmem:[%s6455_s28 + $0x298] sm:$0xff]   ;;  %v6284_v47 = vld [vmem:[%s6455_s28 + $0x2a0] sm:$0xff]  }
  0x1f   : > { %v6285_v48 = vld [vmem:[%s6455_s28 + $0xa8] sm:$0xff]   ;;  %v6287_v50 = vld [vmem:[%s6455_s28 + $0xb0] sm:$0xff]   ;;  %v6289_v52 = vld [vmem:[%s6455_s28 + $0xb8] sm:$0xff]  }
  0x20   : > { %v6286_v49 = vld [vmem:[%s6455_s28 + $0x2a8] sm:$0xff]   ;;  %v6288_v51 = vld [vmem:[%s6455_s28 + $0x2b0] sm:$0xff]   ;;  %v6290_v53 = vld [vmem:[%s6455_s28 + $0x2b8] sm:$0xff]  }
  0x21   : > { %v6291_v54 = vld [vmem:[%s6455_s28 + $0xc0] sm:$0xff]   ;;  %v6293_v56 = vld [vmem:[%s6455_s28 + $0xc8] sm:$0xff]   ;;  %v6295_v58 = vld [vmem:[%s6455_s28 + $0xd0] sm:$0xff]  }
  0x22   : > { %v6292_v55 = vld [vmem:[%s6455_s28 + $0x2c0] sm:$0xff]   ;;  %v6294_v57 = vld [vmem:[%s6455_s28 + $0x2c8] sm:$0xff]   ;;  %v6296_v59 = vld [vmem:[%s6455_s28 + $0x2d0] sm:$0xff]  }
  0x23   : > { %5951 = vmatmul.mubr.msk.bf16.gmra.mrb[4].mxu0 %vm1165_vm0, %v6249_v12  ;;  %6079 = vmatmul.mubr.msk.bf16.gmra.mrb[4].mxu1 %vm1165_vm0, %v6250_v13  ;;  %v6297_v60 = vld [vmem:[%s6455_s28 + $0xd8] sm:$0xff]   ;;  %v6299_v62 = vld [vmem:[%s6455_s28 + $0xe0] sm:$0xff]   ;;  %v6301_v0 = vld [vmem:[%s6455_s28 + $0xe8] sm:$0xff]  }
  0x24   : > { %5954 = vmatprep.mubr.msk.bf16.mxu0 %vm1165_vm0, %v6251_v14  ;;  %6082 = vmatprep.mubr.msk.bf16.mxu1 %vm1165_vm0, %v6252_v15  ;;  %v6298_v61 = vld [vmem:[%s6455_s28 + $0x2d8] sm:$0xff]   ;;  %v6300_v63 = vld [vmem:[%s6455_s28 + $0x2e0] sm:$0xff]   ;;  %v6302_v1 = vld [vmem:[%s6455_s28 + $0x2e8] sm:$0xff]  }
  0x25   : > { %v6303_v2 = vld [vmem:[%s6455_s28 + $0xf0] sm:$0xff]   ;;  %v6305_v4 = vld [vmem:[%s6455_s28 + $0xf8] sm:$0xff]   ;;  %v6307_v6 = vld [vmem:[%s6455_s28 + $0x100] sm:$0xff]  }
  0x26   : > { %v6304_v3 = vld [vmem:[%s6455_s28 + $0x2f0] sm:$0xff]   ;;  %v6306_v5 = vld [vmem:[%s6455_s28 + $0x2f8] sm:$0xff]   ;;  %v6308_v7 = vld [vmem:[%s6455_s28 + $0x300] sm:$0xff]  }
  0x27   : > { %v6309_v8 = vld [vmem:[%s6455_s28 + $0x108] sm:$0xff]   ;;  %v6311_v10 = vld [vmem:[%s6455_s28 + $0x110] sm:$0xff]   ;;  %v6313_v12 = vld [vmem:[%s6455_s28 + $0x118] sm:$0xff]  }
  0x28   : > { %v6310_v9 = vld [vmem:[%s6455_s28 + $0x308] sm:$0xff]   ;;  %v6312_v11 = vld [vmem:[%s6455_s28 + $0x310] sm:$0xff]   ;;  %v6314_v13 = vld [vmem:[%s6455_s28 + $0x318] sm:$0xff]  }
  0x29   : > { %v6315_v14 = vld [vmem:[%s6455_s28 + $0x120] sm:$0xff]  }
  0x2a   : > { %v6316_v15 = vld [vmem:[%s6455_s28 + $0x320] sm:$0xff]  }
  0x2b   : > { %5955 = vmatmul.mubr.msk.bf16.gmra.mrb[8].mxu0 %vm1165_vm0, %v6253_v16  ;;  %6083 = vmatmul.mubr.msk.bf16.gmra.mrb[8].mxu1 %vm1165_vm0, %v6254_v17  ;;  %v6317_v16 = vld [vmem:[%s6455_s28 + $0x128] sm:$0xff]  }
  0x2c   : > { %5958 = vmatprep.mubr.msk.bf16.mxu0 %vm1165_vm0, %v6255_v18  ;;  %6086 = vmatprep.mubr.msk.bf16.mxu1 %vm1165_vm0, %v6256_v19  ;;  %v6318_v17 = vld [vmem:[%s6455_s28 + $0x328] sm:$0xff]   ;;  %v6319_v18 = vld [vmem:[%s6455_s28 + $0x130] sm:$0xff]  }
  0x2d   : > { %v6320_v19 = vld [vmem:[%s6455_s28 + $0x330] sm:$0xff]  }
  0x33   : > { %5959 = vmatmul.mubr.msk.bf16.gmra.mrb[12].mxu0 %vm1165_vm0, %v6257_v20  ;;  %6087 = vmatmul.mubr.msk.bf16.gmra.mrb[12].mxu1 %vm1165_vm0, %v6258_v21  ;;  %v6321_v20 = vld [vmem:[%s6455_s28 + $0x138] sm:$0xff]  }
  0x34   : > { %5962 = vmatprep.mubr.msk.bf16.mxu0 %vm1165_vm0, %v6259_v22  ;;  %6090 = vmatprep.mubr.msk.bf16.mxu1 %vm1165_vm0, %v6260_v23  ;;  %v6322_v21 = vld [vmem:[%s6455_s28 + $0x338] sm:$0xff]   ;;  %v6323_v22 = vld [vmem:[%s6455_s28 + $0x140] sm:$0xff]  }
  0x35   : > { %v6324_v23 = vld [vmem:[%s6455_s28 + $0x340] sm:$0xff]  }
  0x3b   : > { %5963 = vmatmul.mubr.msk.bf16.gmra.mrb[16].mxu0 %vm1165_vm0, %v6261_v24  ;;  %6091 = vmatmul.mubr.msk.bf16.gmra.mrb[16].mxu1 %vm1165_vm0, %v6262_v25  ;;  %v6325_v24 = vld [vmem:[%s6455_s28 + $0x148] sm:$0xff]  }
  0x3c   : > { %5966 = vmatprep.mubr.msk.bf16.mxu0 %vm1165_vm0, %v6263_v26  ;;  %6094 = vmatprep.mubr.msk.bf16.mxu1 %vm1165_vm0, %v6264_v27  ;;  %v6326_v25 = vld [vmem:[%s6455_s28 + $0x348] sm:$0xff]   ;;  %v6327_v26 = vld [vmem:[%s6455_s28 + $0x150] sm:$0xff]  }
  0x3d   : > { %v6328_v27 = vld [vmem:[%s6455_s28 + $0x350] sm:$0xff]  }
  0x43   : > { %5967 = vmatmul.mubr.msk.bf16.gmra.mrb[20].mxu0 %vm1165_vm0, %v6265_v28  ;;  %6095 = vmatmul.mubr.msk.bf16.gmra.mrb[20].mxu1 %vm1165_vm0, %v6266_v29  ;;  %v6329_v28 = vld [vmem:[%s6455_s28 + $0x158] sm:$0xff]  }
  0x44   : > { %5970 = vmatprep.mubr.msk.bf16.mxu0 %vm1165_vm0, %v6267_v30  ;;  %6098 = vmatprep.mubr.msk.bf16.mxu1 %vm1165_vm0, %v6268_v31  ;;  %v6330_v29 = vld [vmem:[%s6455_s28 + $0x358] sm:$0xff]   ;;  %v6331_v30 = vld [vmem:[%s6455_s28 + $0x160] sm:$0xff]  }
  0x45   : > { %v6332_v31 = vld [vmem:[%s6455_s28 + $0x360] sm:$0xff]  }
  0x4b   : > { %5971 = vmatmul.mubr.msk.bf16.gmra.mrb[24].mxu0 %vm1165_vm0, %v6269_v32  ;;  %6099 = vmatmul.mubr.msk.bf16.gmra.mrb[24].mxu1 %vm1165_vm0, %v6270_v33  ;;  %v6333_v32 = vld [vmem:[%s6455_s28 + $0x168] sm:$0xff]  }
  0x4c   : > { %5974 = vmatprep.mubr.msk.bf16.mxu0 %vm1165_vm0, %v6271_v34  ;;  %6102 = vmatprep.mubr.msk.bf16.mxu1 %vm1165_vm0, %v6272_v35  ;;  %v6334_v33 = vld [vmem:[%s6455_s28 + $0x368] sm:$0xff]   ;;  %v6335_v34 = vld [vmem:[%s6455_s28 + $0x170] sm:$0xff]  }
  0x4d   : > { %v6336_v35 = vld [vmem:[%s6455_s28 + $0x370] sm:$0xff]  }
  0x53   : > { %5975 = vmatmul.mubr.msk.bf16.gmra.mrb[28].mxu0 %vm1165_vm0, %v6273_v36  ;;  %6103 = vmatmul.mubr.msk.bf16.gmra.mrb[28].mxu1 %vm1165_vm0, %v6274_v37  ;;  %v6337_v36 = vld [vmem:[%s6455_s28 + $0x178] sm:$0xff]  }
  0x54   : > { %5978 = vmatprep.mubr.msk.bf16.mxu0 %vm1165_vm0, %v6275_v38  ;;  %6106 = vmatprep.mubr.msk.bf16.mxu1 %vm1165_vm0, %v6276_v39  ;;  %v6338_v37 = vld [vmem:[%s6455_s28 + $0x378] sm:$0xff]   ;;  %v6339_v38 = vld [vmem:[%s6455_s28 + $0x180] sm:$0xff]  }
  0x55   : > { %v6340_v39 = vld [vmem:[%s6455_s28 + $0x380] sm:$0xff]  }
  0x5b   : > { %5979 = vmatmul.mubr.msk.bf16.gmra.mrb[32].mxu0 %vm1165_vm0, %v6277_v40  ;;  %6107 = vmatmul.mubr.msk.bf16.gmra.mrb[32].mxu1 %vm1165_vm0, %v6278_v41  ;;  %v6341_v40 = vld [vmem:[%s6455_s28 + $0x188] sm:$0xff]  }
  0x5c   : > { %5982 = vmatprep.mubr.msk.bf16.mxu0 %vm1165_vm0, %v6279_v42  ;;  %6110 = vmatprep.mubr.msk.bf16.mxu1 %vm1165_vm0, %v6280_v43  ;;  %v6342_v41 = vld [vmem:[%s6455_s28 + $0x388] sm:$0xff]   ;;  %v6343_v42 = vld [vmem:[%s6455_s28 + $0x190] sm:$0xff]  }
  0x5d   : > { %v6344_v43 = vld [vmem:[%s6455_s28 + $0x390] sm:$0xff]  }
  0x63   : > { %5983 = vmatmul.mubr.msk.bf16.gmra.mrb[36].mxu0 %vm1165_vm0, %v6281_v44  ;;  %6111 = vmatmul.mubr.msk.bf16.gmra.mrb[36].mxu1 %vm1165_vm0, %v6282_v45  ;;  %v6345_v44 = vld [vmem:[%s6455_s28 + $0x198] sm:$0xff]  }
  0x64   : > { %5986 = vmatprep.mubr.msk.bf16.mxu0 %vm1165_vm0, %v6283_v46  ;;  %6114 = vmatprep.mubr.msk.bf16.mxu1 %vm1165_vm0, %v6284_v47  ;;  %v6346_v45 = vld [vmem:[%s6455_s28 + $0x398] sm:$0xff]   ;;  %v6347_v46 = vld [vmem:[%s6455_s28 + $0x1a0] sm:$0xff]  }
  0x65   : > { %v6348_v47 = vld [vmem:[%s6455_s28 + $0x3a0] sm:$0xff]  }
  0x6b   : > { %5987 = vmatmul.mubr.msk.bf16.gmra.mrb[40].mxu0 %vm1165_vm0, %v6285_v48  ;;  %6115 = vmatmul.mubr.msk.bf16.gmra.mrb[40].mxu1 %vm1165_vm0, %v6286_v49  ;;  %v6349_v48 = vld [vmem:[%s6455_s28 + $0x1a8] sm:$0xff]  }
  0x6c   : > { %5990 = vmatprep.mubr.msk.bf16.mxu0 %vm1165_vm0, %v6287_v50  ;;  %6118 = vmatprep.mubr.msk.bf16.mxu1 %vm1165_vm0, %v6288_v51  ;;  %v6350_v49 = vld [vmem:[%s6455_s28 + $0x3a8] sm:$0xff]   ;;  %v6351_v50 = vld [vmem:[%s6455_s28 + $0x1b0] sm:$0xff]  }
  0x6d   : > { %v6352_v51 = vld [vmem:[%s6455_s28 + $0x3b0] sm:$0xff]  }
  0x73   : > { %5991 = vmatmul.mubr.msk.bf16.gmra.mrb[44].mxu0 %vm1165_vm0, %v6289_v52  ;;  %6119 = vmatmul.mubr.msk.bf16.gmra.mrb[44].mxu1 %vm1165_vm0, %v6290_v53  ;;  %v6681_v52 = vld [vmem:[%s7123_s2] ss:$0 sm:$0xff] }
  0x74   : > { %5994 = vmatprep.mubr.msk.bf16.mxu0 %vm1165_vm0, %v6291_v54  ;;  %6122 = vmatprep.mubr.msk.bf16.mxu1 %vm1165_vm0, %v6292_v55 }
  0x7b   : > { %5995 = vmatmul.mubr.msk.bf16.gmra.mrb[48].mxu0 %vm1165_vm0, %v6293_v56  ;;  %6123 = vmatmul.mubr.msk.bf16.gmra.mrb[48].mxu1 %vm1165_vm0, %v6294_v57 }
  0x7c   : > { %5998 = vmatprep.mubr.msk.bf16.mxu0 %vm1165_vm0, %v6295_v58  ;;  %6126 = vmatprep.mubr.msk.bf16.mxu1 %vm1165_vm0, %v6296_v59  ;;  %v6353_v59 = vld [vmem:[%s6455_s28 + $0x1b8] sm:$0xff]  }
  0x83   : > { %5999 = vmatmul.mubr.msk.bf16.gmra.mrb[52].mxu0 %vm1165_vm0, %v6297_v60  ;;  %6127 = vmatmul.mubr.msk.bf16.gmra.mrb[52].mxu1 %vm1165_vm0, %v6298_v61  ;;  %v6354_v60 = vld [vmem:[%s6455_s28 + $0x3b8] sm:$0xff]  }
  0x84   : > { %6002 = vmatprep.mubr.msk.bf16.mxu0 %vm1165_vm0, %v6299_v62  ;;  %6130 = vmatprep.mubr.msk.bf16.mxu1 %vm1165_vm0, %v6300_v63 }
  0x8b   : > { %6003 = vmatmul.mubr.msk.bf16.gmra.mrb[56].mxu0 %vm1165_vm0, %v6301_v0  ;;  %6131 = vmatmul.mubr.msk.bf16.gmra.mrb[56].mxu1 %vm1165_vm0, %v6302_v1  ;;  %v6355_v1 = vld [vmem:[%s6455_s28 + $0x1c0] sm:$0xff]  }
  0x8c   : > { %6006 = vmatprep.mubr.msk.bf16.mxu0 %vm1165_vm0, %v6303_v2  ;;  %6134 = vmatprep.mubr.msk.bf16.mxu1 %vm1165_vm0, %v6304_v3  ;;  %v6356_v2 = vld [vmem:[%s6455_s28 + $0x3c0] sm:$0xff]  }
  0x93   : > { %6007 = vmatmul.mubr.msk.bf16.gmra.mrb[60].mxu0 %vm1165_vm0, %v6305_v4  ;;  %6135 = vmatmul.mubr.msk.bf16.gmra.mrb[60].mxu1 %vm1165_vm0, %v6306_v5 }
  0x94   : > { %6010 = vmatprep.mubr.msk.bf16.mxu0 %vm1165_vm0, %v6307_v6  ;;  %6138 = vmatprep.mubr.msk.bf16.mxu1 %vm1165_vm0, %v6308_v7 }
  0x9b   : > { %6011 = vmatmul.mubr.msk.bf16.gmra.mrb[64].mxu0 %vm1165_vm0, %v6309_v8  ;;  %6139 = vmatmul.mubr.msk.bf16.gmra.mrb[64].mxu1 %vm1165_vm0, %v6310_v9 }
  0x9c   : > { %6014 = vmatprep.mubr.msk.bf16.mxu0 %vm1165_vm0, %v6311_v10  ;;  %6142 = vmatprep.mubr.msk.bf16.mxu1 %vm1165_vm0, %v6312_v11 }
  0xa3   : > { %6015 = vmatmul.mubr.msk.bf16.gmra.mrb[68].mxu0 %vm1165_vm0, %v6313_v12  ;;  %6143 = vmatmul.mubr.msk.bf16.gmra.mrb[68].mxu1 %vm1165_vm0, %v6314_v13 }
  0xa4   : > { %6018 = vmatprep.mubr.msk.bf16.mxu0 %vm1165_vm0, %v6315_v14  ;;  %6146 = vmatprep.mubr.msk.bf16.mxu1 %vm1165_vm0, %v6316_v15 }
  0xab   : > { %6019 = vmatmul.mubr.msk.bf16.gmra.mrb[72].mxu0 %vm1165_vm0, %v6317_v16  ;;  %6147 = vmatmul.mubr.msk.bf16.gmra.mrb[72].mxu1 %vm1165_vm0, %v6318_v17 }
  0xac   : > { %6022 = vmatprep.mubr.msk.bf16.mxu0 %vm1165_vm0, %v6319_v18  ;;  %6150 = vmatprep.mubr.msk.bf16.mxu1 %vm1165_vm0, %v6320_v19 }
  0xb3   : > { %6023 = vmatmul.mubr.msk.bf16.gmra.mrb[76].mxu0 %vm1165_vm0, %v6321_v20  ;;  %6151 = vmatmul.mubr.msk.bf16.gmra.mrb[76].mxu1 %vm1165_vm0, %v6322_v21 }
  0xb4   : > { %6026 = vmatprep.mubr.msk.bf16.mxu0 %vm1165_vm0, %v6323_v22  ;;  %6154 = vmatprep.mubr.msk.bf16.mxu1 %vm1165_vm0, %v6324_v23 }
  0xbb   : > { %6027 = vmatmul.mubr.msk.bf16.gmra.mrb[80].mxu0 %vm1165_vm0, %v6325_v24  ;;  %6155 = vmatmul.mubr.msk.bf16.gmra.mrb[80].mxu1 %vm1165_vm0, %v6326_v25 }
  0xbc   : > { %6030 = vmatprep.mubr.msk.bf16.mxu0 %vm1165_vm0, %v6327_v26  ;;  %6158 = vmatprep.mubr.msk.bf16.mxu1 %vm1165_vm0, %v6328_v27  ;;  %v6357_v27 = vld [vmem:[%s6455_s28 + $0x1c8] sm:$0xff]  }
  0xc3   : > { %6031 = vmatmul.mubr.msk.bf16.gmra.mrb[84].mxu0 %vm1165_vm0, %v6329_v28  ;;  %6159 = vmatmul.mubr.msk.bf16.gmra.mrb[84].mxu1 %vm1165_vm0, %v6330_v29  ;;  %v6358_v28 = vld [vmem:[%s6455_s28 + $0x3c8] sm:$0xff]  }
  0xc4   : > { %6034 = vmatprep.mubr.msk.bf16.mxu0 %vm1165_vm0, %v6331_v30  ;;  %6162 = vmatprep.mubr.msk.bf16.mxu1 %vm1165_vm0, %v6332_v31 }
  0xcb   : > { %6035 = vmatmul.mubr.msk.bf16.gmra.mrb[88].mxu0 %vm1165_vm0, %v6333_v32  ;;  %6163 = vmatmul.mubr.msk.bf16.gmra.mrb[88].mxu1 %vm1165_vm0, %v6334_v33  ;;  %v6359_v33 = vld [vmem:[%s6455_s28 + $0x1d0] sm:$0xff]  }
  0xcc   : > { %6038 = vmatprep.mubr.msk.bf16.mxu0 %vm1165_vm0, %v6335_v34  ;;  %6166 = vmatprep.mubr.msk.bf16.mxu1 %vm1165_vm0, %v6336_v35  ;;  %v6360_v34 = vld [vmem:[%s6455_s28 + $0x3d0] sm:$0xff]  }
  0xd3   : > { %6039 = vmatmul.mubr.msk.bf16.gmra.mrb[92].mxu0 %vm1165_vm0, %v6337_v36  ;;  %6167 = vmatmul.mubr.msk.bf16.gmra.mrb[92].mxu1 %vm1165_vm0, %v6338_v37 }
  0xd4   : > { %6042 = vmatprep.mubr.msk.bf16.mxu0 %vm1165_vm0, %v6339_v38  ;;  %6170 = vmatprep.mubr.msk.bf16.mxu1 %vm1165_vm0, %v6340_v39 }
  0xdb   : > { %6043 = vmatmul.mubr.msk.bf16.gmra.mrb[96].mxu0 %vm1165_vm0, %v6341_v40  ;;  %6171 = vmatmul.mubr.msk.bf16.gmra.mrb[96].mxu1 %vm1165_vm0, %v6342_v41 }
  0xdc   : > { %6046 = vmatprep.mubr.msk.bf16.mxu0 %vm1165_vm0, %v6343_v42  ;;  %6174 = vmatprep.mubr.msk.bf16.mxu1 %vm1165_vm0, %v6344_v43 }
  0xe3   : > { %6047 = vmatmul.mubr.msk.bf16.gmra.mrb[100].mxu0 %vm1165_vm0, %v6345_v44  ;;  %6175 = vmatmul.mubr.msk.bf16.gmra.mrb[100].mxu1 %vm1165_vm0, %v6346_v45 }
  0xe4   : > { %6050 = vmatprep.mubr.msk.bf16.mxu0 %vm1165_vm0, %v6347_v46  ;;  %6178 = vmatprep.mubr.msk.bf16.mxu1 %vm1165_vm0, %v6348_v47 }
  0xeb   : > { %6051 = vmatmul.mubr.msk.bf16.gmra.mrb[104].mxu0 %vm1165_vm0, %v6349_v48  ;;  %6179 = vmatmul.mubr.msk.bf16.gmra.mrb[104].mxu1 %vm1165_vm0, %v6350_v49 }
  0xec   : > { %6054 = vmatprep.mubr.msk.bf16.mxu0 %vm1165_vm0, %v6351_v50  ;;  %6182 = vmatprep.mubr.msk.bf16.mxu1 %vm1165_vm0, %v6352_v51 }
  0xee   : > { %v5948_v53 = vpop.f32.mrb[0].mxu0  ;;  %v6076_v54 = vpop.f32.mrb[0].mxu1 }
  0xef   : > { %v1597_v55 = vadd.f32 %v5948_v53, %v6681_v52  ;;  %v2109_v56 = vadd.f32 %v6076_v54, %v6681_v52  ;;  %v1588_v57 = vpop.f32.mrb[1].mxu0  ;;  %v2100_v58 = vpop.f32.mrb[1].mxu1 }
  0xf0   : > { %v1589_v61 = vadd.f32 %v6681_v52, %v1588_v57  ;;  %v2101_v62 = vadd.f32 %v6681_v52, %v2100_v58  ;;  %v5949_v63 = vpop.f32.mrb[2].mxu0  ;;  %v6077_v0 = vpop.f32.mrb[2].mxu1 }
  0xf1   : > { %v1600_v3 = vadd.f32 %v5949_v63, %v6681_v52  ;;  %v2112_v4 = vadd.f32 %v6077_v0, %v6681_v52  ;;  %v1591_v5 = vpop.f32.mrb[3].mxu0  ;;  %v2103_v6 = vpop.f32.mrb[3].mxu1  ;;  %v2613_v9 = vmax.f32 %v1597_v55, 0.0  ;;  %v2741_v10 = vmax.f32 %v2109_v56, 0.0 }
  0xf2   : > { %v1592_v7 = vadd.f32 %v6681_v52, %v1591_v5  ;;  %v2104_v8 = vadd.f32 %v6681_v52, %v2103_v6  ;;  %v2611_v13 = vmax.f32 %v1589_v61, 0.0  ;;  %v2739_v14 = vmax.f32 %v2101_v62, 0.0  ;;  %v6362_v61 = vld [vmem:[%s6455_s28 + $0x3d8] sm:$0xff]  }
  0xf3   : > { %v2614_v11 = vmax.f32 %v1600_v3, 0.0  ;;  %v2742_v12 = vmax.f32 %v2112_v4, 0.0  ;;  %6055 = vmatmul.mubr.msk.bf16.gmra.mrb[108].mxu0 %vm1165_vm0, %v6353_v59  ;;  %6183 = vmatmul.mubr.msk.bf16.gmra.mrb[108].mxu1 %vm1165_vm0, %v6354_v60  ;;  %v6361_v60 = vld [vmem:[%s6455_s28 + $0x1d8] sm:$0xff]   ;;  %v6364_v3 = vld [vmem:[%s6455_s28 + $0x3e0] sm:$0xff]  }
  0xf4   : > { %v2612_v15 = vmax.f32 %v1592_v7, 0.0  ;;  %v2740_v16 = vmax.f32 %v2104_v8, 0.0  ;;  %6058 = vmatprep.mubr.msk.bf16.mxu0 %vm1165_vm0, %v6355_v1  ;;  %6186 = vmatprep.mubr.msk.bf16.mxu1 %vm1165_vm0, %v6356_v2  ;;  %v6363_v2 = vld [vmem:[%s6455_s28 + $0x1e0] sm:$0xff]  }
  0xf5   : > { %v5044_v17 = vpack.c.bf16 %v2614_v11, %v2613_v9  ;;  %v5364_v18 = vpack.c.bf16 %v2742_v12, %v2741_v10 }
  0xf6   : > { %v5039_v19 = vpack.c.bf16 %v2612_v15, %v2611_v13  ;;  %v5359_v20 = vpack.c.bf16 %v2740_v16, %v2739_v14  ;;  %v5952_v21 = vpop.f32.mrb[4].mxu0  ;;  %v6080_v22 = vpop.f32.mrb[4].mxu1 }
  0xf7   : > { %5676 = vst [vmem:[%s6704_s8 + $0x8] sm:$0xff] %v5044_v17   ;;  %5740 = vst [vmem:[%s6704_s8 + $0x208] sm:$0xff] %v5364_v18   ;;  %v1613_v23 = vadd.f32 %v5952_v21, %v6681_v52  ;;  %v2125_v24 = vadd.f32 %v6080_v22, %v6681_v52  ;;  %v1604_v25 = vpop.f32.mrb[5].mxu0  ;;  %v2116_v26 = vpop.f32.mrb[5].mxu1 }
  0xf8   : > { %5040 = vst [vmem:[%s6704_s8] sm:$0xff] %v5039_v19   ;;  %5739 = vst [vmem:[%s6704_s8 + $0x200] sm:$0xff] %v5359_v20   ;;  %v1605_v29 = vadd.f32 %v6681_v52, %v1604_v25  ;;  %v2117_v30 = vadd.f32 %v6681_v52, %v2116_v26  ;;  %v5953_v31 = vpop.f32.mrb[6].mxu0  ;;  %v6081_v32 = vpop.f32.mrb[6].mxu1 }
  0xf9   : > { %v1616_v35 = vadd.f32 %v5953_v31, %v6681_v52  ;;  %v2128_v36 = vadd.f32 %v6081_v32, %v6681_v52  ;;  %v1607_v37 = vpop.f32.mrb[7].mxu0  ;;  %v2119_v38 = vpop.f32.mrb[7].mxu1  ;;  %v2617_v41 = vmax.f32 %v1613_v23, 0.0  ;;  %v2745_v42 = vmax.f32 %v2125_v24, 0.0 }
  0xfa   : > { %v1608_v39 = vadd.f32 %v6681_v52, %v1607_v37  ;;  %v2120_v40 = vadd.f32 %v6681_v52, %v2119_v38  ;;  %v2615_v45 = vmax.f32 %v1605_v29, 0.0  ;;  %v2743_v46 = vmax.f32 %v2117_v30, 0.0  ;;  %v6366_v29 = vld [vmem:[%s6455_s28 + $0x3e8] sm:$0xff]  }
  0xfb   : > { %v2618_v43 = vmax.f32 %v1616_v35, 0.0  ;;  %v2746_v44 = vmax.f32 %v2128_v36, 0.0  ;;  %6059 = vmatmul.mubr.msk.bf16.gmra.mrb[112].mxu0 %vm1165_vm0, %v6357_v27  ;;  %6187 = vmatmul.mubr.msk.bf16.gmra.mrb[112].mxu1 %vm1165_vm0, %v6358_v28  ;;  %v6365_v28 = vld [vmem:[%s6455_s28 + $0x1e8] sm:$0xff]   ;;  %v6368_v35 = vld [vmem:[%s6455_s28 + $0x3f0] sm:$0xff]  }
  0xfc   : > { %v2616_v47 = vmax.f32 %v1608_v39, 0.0  ;;  %v2744_v48 = vmax.f32 %v2120_v40, 0.0  ;;  %6062 = vmatprep.mubr.msk.bf16.mxu0 %vm1165_vm0, %v6359_v33  ;;  %6190 = vmatprep.mubr.msk.bf16.mxu1 %vm1165_vm0, %v6360_v34  ;;  %v6367_v34 = vld [vmem:[%s6455_s28 + $0x1f0] sm:$0xff]  }
  0xfd   : > { %v5054_v49 = vpack.c.bf16 %v2618_v43, %v2617_v41  ;;  %v5374_v50 = vpack.c.bf16 %v2746_v44, %v2745_v42 }
  0xfe   : > { %v5049_v51 = vpack.c.bf16 %v2616_v47, %v2615_v45  ;;  %v5369_v53 = vpack.c.bf16 %v2744_v48, %v2743_v46  ;;  %v5956_v54 = vpop.f32.mrb[8].mxu0  ;;  %v6084_v55 = vpop.f32.mrb[8].mxu1 }
  0xff   : > { %5678 = vst [vmem:[%s6704_s8 + $0x18] sm:$0xff] %v5054_v49   ;;  %5742 = vst [vmem:[%s6704_s8 + $0x218] sm:$0xff] %v5374_v50   ;;  %v1629_v56 = vadd.f32 %v5956_v54, %v6681_v52  ;;  %v2141_v57 = vadd.f32 %v6084_v55, %v6681_v52  ;;  %v1620_v58 = vpop.f32.mrb[9].mxu0  ;;  %v2132_v59 = vpop.f32.mrb[9].mxu1 }
 0x100   : > { %5677 = vst [vmem:[%s6704_s8 + $0x10] sm:$0xff] %v5049_v51   ;;  %5741 = vst [vmem:[%s6704_s8 + $0x210] sm:$0xff] %v5369_v53   ;;  %v1621_v62 = vadd.f32 %v6681_v52, %v1620_v58  ;;  %v2133_v63 = vadd.f32 %v6681_v52, %v2132_v59  ;;  %v5957_v0 = vpop.f32.mrb[10].mxu0  ;;  %v6085_v1 = vpop.f32.mrb[10].mxu1 }
 0x101   : > { %v1632_v4 = vadd.f32 %v5957_v0, %v6681_v52  ;;  %v2144_v5 = vadd.f32 %v6085_v1, %v6681_v52  ;;  %v1623_v6 = vpop.f32.mrb[11].mxu0  ;;  %v2135_v7 = vpop.f32.mrb[11].mxu1  ;;  %v2621_v10 = vmax.f32 %v1629_v56, 0.0  ;;  %v2749_v11 = vmax.f32 %v2141_v57, 0.0 }
 0x102   : > { %v1624_v8 = vadd.f32 %v6681_v52, %v1623_v6  ;;  %v2136_v9 = vadd.f32 %v6681_v52, %v2135_v7  ;;  %v2619_v14 = vmax.f32 %v1621_v62, 0.0  ;;  %v2747_v15 = vmax.f32 %v2133_v63, 0.0  ;;  %v6370_v62 = vld [vmem:[%s6455_s28 + $0x3f8] sm:$0xff]  }
 0x103   : > { %v2622_v12 = vmax.f32 %v1632_v4, 0.0  ;;  %v2750_v13 = vmax.f32 %v2144_v5, 0.0  ;;  %6063 = vmatmul.mubr.msk.bf16.gmra.mrb[116].mxu0 %vm1165_vm0, %v6361_v60  ;;  %6191 = vmatmul.mubr.msk.bf16.gmra.mrb[116].mxu1 %vm1165_vm0, %v6362_v61  ;;  %v6369_v61 = vld [vmem:[%s6455_s28 + $0x1f8] sm:$0xff]  }
 0x104   : > { %v2620_v16 = vmax.f32 %v1624_v8, 0.0  ;;  %v2748_v17 = vmax.f32 %v2136_v9, 0.0  ;;  %6066 = vmatprep.mubr.msk.bf16.mxu0 %vm1165_vm0, %v6363_v2  ;;  %6194 = vmatprep.mubr.msk.bf16.mxu1 %vm1165_vm0, %v6364_v3 }
 0x105   : > { %v5064_v18 = vpack.c.bf16 %v2622_v12, %v2621_v10  ;;  %v5384_v19 = vpack.c.bf16 %v2750_v13, %v2749_v11 }
 0x106   : > { %v5059_v20 = vpack.c.bf16 %v2620_v16, %v2619_v14  ;;  %v5379_v21 = vpack.c.bf16 %v2748_v17, %v2747_v15  ;;  %v5960_v22 = vpop.f32.mrb[12].mxu0  ;;  %v6088_v23 = vpop.f32.mrb[12].mxu1 }
 0x107   : > { %5680 = vst [vmem:[%s6704_s8 + $0x28] sm:$0xff] %v5064_v18   ;;  %5744 = vst [vmem:[%s6704_s8 + $0x228] sm:$0xff] %v5384_v19   ;;  %v1645_v24 = vadd.f32 %v5960_v22, %v6681_v52  ;;  %v2157_v25 = vadd.f32 %v6088_v23, %v6681_v52  ;;  %v1636_v26 = vpop.f32.mrb[13].mxu0  ;;  %v2148_v27 = vpop.f32.mrb[13].mxu1 }
 0x108   : > { %5679 = vst [vmem:[%s6704_s8 + $0x20] sm:$0xff] %v5059_v20   ;;  %5743 = vst [vmem:[%s6704_s8 + $0x220] sm:$0xff] %v5379_v21   ;;  %v1637_v30 = vadd.f32 %v6681_v52, %v1636_v26  ;;  %v2149_v31 = vadd.f32 %v6681_v52, %v2148_v27  ;;  %v5961_v32 = vpop.f32.mrb[14].mxu0  ;;  %v6089_v33 = vpop.f32.mrb[14].mxu1 }
 0x109   : > { %v1648_v36 = vadd.f32 %v5961_v32, %v6681_v52  ;;  %v2160_v37 = vadd.f32 %v6089_v33, %v6681_v52  ;;  %v1639_v38 = vpop.f32.mrb[15].mxu0  ;;  %v2151_v39 = vpop.f32.mrb[15].mxu1  ;;  %v2625_v42 = vmax.f32 %v1645_v24, 0.0  ;;  %v2753_v43 = vmax.f32 %v2157_v25, 0.0 }
 0x10a   : > { %v1640_v40 = vadd.f32 %v6681_v52, %v1639_v38  ;;  %v2152_v41 = vadd.f32 %v6681_v52, %v2151_v39  ;;  %v2623_v46 = vmax.f32 %v1637_v30, 0.0  ;;  %v2751_v47 = vmax.f32 %v2149_v31, 0.0 }
 0x10b   : > { %v2626_v44 = vmax.f32 %v1648_v36, 0.0  ;;  %v2754_v45 = vmax.f32 %v2160_v37, 0.0  ;;  %6067 = vmatmul.mubr.msk.bf16.gmra.mrb[120].mxu0 %vm1165_vm0, %v6365_v28  ;;  %6195 = vmatmul.mubr.msk.bf16.gmra.mrb[120].mxu1 %vm1165_vm0, %v6366_v29 }
 0x10c   : > { %v2624_v48 = vmax.f32 %v1640_v40, 0.0  ;;  %v2752_v49 = vmax.f32 %v2152_v41, 0.0  ;;  %6070 = vmatprep.mubr.msk.bf16.mxu0 %vm1165_vm0, %v6367_v34  ;;  %6198 = vmatprep.mubr.msk.bf16.mxu1 %vm1165_vm0, %v6368_v35 }
 0x10d   : > { %v5074_v50 = vpack.c.bf16 %v2626_v44, %v2625_v42  ;;  %v5394_v51 = vpack.c.bf16 %v2754_v45, %v2753_v43 }
 0x10e   : > { %v5069_v53 = vpack.c.bf16 %v2624_v48, %v2623_v46  ;;  %v5389_v54 = vpack.c.bf16 %v2752_v49, %v2751_v47  ;;  %v5964_v55 = vpop.f32.mrb[16].mxu0  ;;  %v6092_v56 = vpop.f32.mrb[16].mxu1 }
 0x10f   : > { %5682 = vst [vmem:[%s6704_s8 + $0x38] sm:$0xff] %v5074_v50   ;;  %5746 = vst [vmem:[%s6704_s8 + $0x238] sm:$0xff] %v5394_v51   ;;  %v1661_v57 = vadd.f32 %v5964_v55, %v6681_v52  ;;  %v2173_v58 = vadd.f32 %v6092_v56, %v6681_v52  ;;  %v1652_v59 = vpop.f32.mrb[17].mxu0  ;;  %v2164_v60 = vpop.f32.mrb[17].mxu1 }
 0x110   : > { %5681 = vst [vmem:[%s6704_s8 + $0x30] sm:$0xff] %v5069_v53   ;;  %5745 = vst [vmem:[%s6704_s8 + $0x230] sm:$0xff] %v5389_v54   ;;  %v1653_v63 = vadd.f32 %v6681_v52, %v1652_v59  ;;  %v2165_v0 = vadd.f32 %v6681_v52, %v2164_v60  ;;  %v5965_v1 = vpop.f32.mrb[18].mxu0  ;;  %v6093_v2 = vpop.f32.mrb[18].mxu1 }
 0x111   : > { %v1664_v3 = vadd.f32 %v5965_v1, %v6681_v52  ;;  %v2176_v4 = vadd.f32 %v6093_v2, %v6681_v52  ;;  %v1655_v5 = vpop.f32.mrb[19].mxu0  ;;  %v2167_v6 = vpop.f32.mrb[19].mxu1  ;;  %v2629_v9 = vmax.f32 %v1661_v57, 0.0  ;;  %v2757_v10 = vmax.f32 %v2173_v58, 0.0 }
 0x112   : > { %v1656_v7 = vadd.f32 %v6681_v52, %v1655_v5  ;;  %v2168_v8 = vadd.f32 %v6681_v52, %v2167_v6  ;;  %v2627_v13 = vmax.f32 %v1653_v63, 0.0  ;;  %v2755_v14 = vmax.f32 %v2165_v0, 0.0 }
 0x113   : > { %v2630_v11 = vmax.f32 %v1664_v3, 0.0  ;;  %v2758_v12 = vmax.f32 %v2176_v4, 0.0  ;;  %6071 = vmatmul.mubr.msk.bf16.gmra.mrb[124].mxu0 %vm1165_vm0, %v6369_v61  ;;  %6199 = vmatmul.mubr.msk.bf16.gmra.mrb[124].mxu1 %vm1165_vm0, %v6370_v62 }
 0x114   : > { %v2628_v15 = vmax.f32 %v1656_v7, 0.0  ;;  %v2756_v16 = vmax.f32 %v2168_v8, 0.0 }
 0x115   : > { %v5084_v17 = vpack.c.bf16 %v2630_v11, %v2629_v9  ;;  %v5404_v18 = vpack.c.bf16 %v2758_v12, %v2757_v10 }
 0x116   : > { %v5079_v19 = vpack.c.bf16 %v2628_v15, %v2627_v13  ;;  %v5399_v20 = vpack.c.bf16 %v2756_v16, %v2755_v14  ;;  %v5968_v21 = vpop.f32.mrb[20].mxu0  ;;  %v6096_v22 = vpop.f32.mrb[20].mxu1 }
 0x117   : > { %5684 = vst [vmem:[%s6704_s8 + $0x48] sm:$0xff] %v5084_v17   ;;  %5748 = vst [vmem:[%s6704_s8 + $0x248] sm:$0xff] %v5404_v18   ;;  %v1677_v23 = vadd.f32 %v5968_v21, %v6681_v52  ;;  %v2189_v24 = vadd.f32 %v6096_v22, %v6681_v52  ;;  %v1668_v25 = vpop.f32.mrb[21].mxu0  ;;  %v2180_v26 = vpop.f32.mrb[21].mxu1 }
 0x118   : > { %5683 = vst [vmem:[%s6704_s8 + $0x40] sm:$0xff] %v5079_v19   ;;  %5747 = vst [vmem:[%s6704_s8 + $0x240] sm:$0xff] %v5399_v20   ;;  %v1669_v27 = vadd.f32 %v6681_v52, %v1668_v25  ;;  %v2181_v28 = vadd.f32 %v6681_v52, %v2180_v26  ;;  %v5969_v29 = vpop.f32.mrb[22].mxu0  ;;  %v6097_v30 = vpop.f32.mrb[22].mxu1 }
 0x119   : > { %v1680_v31 = vadd.f32 %v5969_v29, %v6681_v52  ;;  %v2192_v32 = vadd.f32 %v6097_v30, %v6681_v52  ;;  %v1671_v33 = vpop.f32.mrb[23].mxu0  ;;  %v2183_v34 = vpop.f32.mrb[23].mxu1  ;;  %v2633_v37 = vmax.f32 %v1677_v23, 0.0  ;;  %v2761_v38 = vmax.f32 %v2189_v24, 0.0 }
 0x11a   : > { %v1672_v35 = vadd.f32 %v6681_v52, %v1671_v33  ;;  %v2184_v36 = vadd.f32 %v6681_v52, %v2183_v34  ;;  %v2631_v41 = vmax.f32 %v1669_v27, 0.0  ;;  %v2759_v42 = vmax.f32 %v2181_v28, 0.0 }
 0x11b   : > { %v2634_v39 = vmax.f32 %v1680_v31, 0.0  ;;  %v2762_v40 = vmax.f32 %v2192_v32, 0.0 }
 0x11c   : > { %v2632_v43 = vmax.f32 %v1672_v35, 0.0  ;;  %v2760_v44 = vmax.f32 %v2184_v36, 0.0 }
 0x11d   : > { %v5094_v45 = vpack.c.bf16 %v2634_v39, %v2633_v37  ;;  %v5414_v46 = vpack.c.bf16 %v2762_v40, %v2761_v38 }
 0x11e   : > { %v5089_v47 = vpack.c.bf16 %v2632_v43, %v2631_v41  ;;  %v5409_v48 = vpack.c.bf16 %v2760_v44, %v2759_v42  ;;  %v5972_v49 = vpop.f32.mrb[24].mxu0  ;;  %v6100_v50 = vpop.f32.mrb[24].mxu1 }
 0x11f   : > { %5686 = vst [vmem:[%s6704_s8 + $0x58] sm:$0xff] %v5094_v45   ;;  %5750 = vst [vmem:[%s6704_s8 + $0x258] sm:$0xff] %v5414_v46   ;;  %v1693_v51 = vadd.f32 %v5972_v49, %v6681_v52  ;;  %v2205_v53 = vadd.f32 %v6100_v50, %v6681_v52  ;;  %v1684_v54 = vpop.f32.mrb[25].mxu0  ;;  %v2196_v55 = vpop.f32.mrb[25].mxu1 }
 0x120   : > { %5685 = vst [vmem:[%s6704_s8 + $0x50] sm:$0xff] %v5089_v47   ;;  %5749 = vst [vmem:[%s6704_s8 + $0x250] sm:$0xff] %v5409_v48   ;;  %v1685_v56 = vadd.f32 %v6681_v52, %v1684_v54  ;;  %v2197_v57 = vadd.f32 %v6681_v52, %v2196_v55  ;;  %v5973_v58 = vpop.f32.mrb[26].mxu0  ;;  %v6101_v59 = vpop.f32.mrb[26].mxu1 }
 0x121   : > { %v1696_v60 = vadd.f32 %v5973_v58, %v6681_v52  ;;  %v2208_v61 = vadd.f32 %v6101_v59, %v6681_v52  ;;  %v1687_v62 = vpop.f32.mrb[27].mxu0  ;;  %v2199_v63 = vpop.f32.mrb[27].mxu1  ;;  %v2637_v2 = vmax.f32 %v1693_v51, 0.0  ;;  %v2765_v3 = vmax.f32 %v2205_v53, 0.0 }
 0x122   : > { %v1688_v0 = vadd.f32 %v6681_v52, %v1687_v62  ;;  %v2200_v1 = vadd.f32 %v6681_v52, %v2199_v63  ;;  %v2635_v6 = vmax.f32 %v1685_v56, 0.0  ;;  %v2763_v7 = vmax.f32 %v2197_v57, 0.0 }
 0x123   : > { %v2638_v4 = vmax.f32 %v1696_v60, 0.0  ;;  %v2766_v5 = vmax.f32 %v2208_v61, 0.0 }
 0x124   : > { %v2636_v8 = vmax.f32 %v1688_v0, 0.0  ;;  %v2764_v9 = vmax.f32 %v2200_v1, 0.0 }
 0x125   : > { %v5104_v10 = vpack.c.bf16 %v2638_v4, %v2637_v2  ;;  %v5424_v11 = vpack.c.bf16 %v2766_v5, %v2765_v3 }
 0x126   : > { %v5099_v12 = vpack.c.bf16 %v2636_v8, %v2635_v6  ;;  %v5419_v13 = vpack.c.bf16 %v2764_v9, %v2763_v7  ;;  %v5976_v14 = vpop.f32.mrb[28].mxu0  ;;  %v6104_v15 = vpop.f32.mrb[28].mxu1 }
 0x127   : > { %5688 = vst [vmem:[%s6704_s8 + $0x68] sm:$0xff] %v5104_v10   ;;  %5752 = vst [vmem:[%s6704_s8 + $0x268] sm:$0xff] %v5424_v11   ;;  %v1709_v16 = vadd.f32 %v5976_v14, %v6681_v52  ;;  %v2221_v17 = vadd.f32 %v6104_v15, %v6681_v52  ;;  %v1700_v18 = vpop.f32.mrb[29].mxu0  ;;  %v2212_v19 = vpop.f32.mrb[29].mxu1 }
 0x128   : > { %5687 = vst [vmem:[%s6704_s8 + $0x60] sm:$0xff] %v5099_v12   ;;  %5751 = vst [vmem:[%s6704_s8 + $0x260] sm:$0xff] %v5419_v13   ;;  %v1701_v20 = vadd.f32 %v6681_v52, %v1700_v18  ;;  %v2213_v21 = vadd.f32 %v6681_v52, %v2212_v19  ;;  %v5977_v22 = vpop.f32.mrb[30].mxu0  ;;  %v6105_v23 = vpop.f32.mrb[30].mxu1 }
 0x129   : > { %v1712_v24 = vadd.f32 %v5977_v22, %v6681_v52  ;;  %v2224_v25 = vadd.f32 %v6105_v23, %v6681_v52  ;;  %v1703_v26 = vpop.f32.mrb[31].mxu0  ;;  %v2215_v27 = vpop.f32.mrb[31].mxu1  ;;  %v2641_v30 = vmax.f32 %v1709_v16, 0.0  ;;  %v2769_v31 = vmax.f32 %v2221_v17, 0.0 }
 0x12a   : > { %v1704_v28 = vadd.f32 %v6681_v52, %v1703_v26  ;;  %v2216_v29 = vadd.f32 %v6681_v52, %v2215_v27  ;;  %v2639_v34 = vmax.f32 %v1701_v20, 0.0  ;;  %v2767_v35 = vmax.f32 %v2213_v21, 0.0 }
 0x12b   : > { %v2642_v32 = vmax.f32 %v1712_v24, 0.0  ;;  %v2770_v33 = vmax.f32 %v2224_v25, 0.0 }
 0x12c   : > { %v2640_v36 = vmax.f32 %v1704_v28, 0.0  ;;  %v2768_v37 = vmax.f32 %v2216_v29, 0.0 }
 0x12d   : > { %v5114_v38 = vpack.c.bf16 %v2642_v32, %v2641_v30  ;;  %v5434_v39 = vpack.c.bf16 %v2770_v33, %v2769_v31 }
 0x12e   : > { %v5109_v40 = vpack.c.bf16 %v2640_v36, %v2639_v34  ;;  %v5429_v41 = vpack.c.bf16 %v2768_v37, %v2767_v35  ;;  %v5980_v42 = vpop.f32.mrb[32].mxu0  ;;  %v6108_v43 = vpop.f32.mrb[32].mxu1 }
 0x12f   : > { %5690 = vst [vmem:[%s6704_s8 + $0x78] sm:$0xff] %v5114_v38   ;;  %5754 = vst [vmem:[%s6704_s8 + $0x278] sm:$0xff] %v5434_v39   ;;  %v1725_v44 = vadd.f32 %v5980_v42, %v6681_v52  ;;  %v2237_v45 = vadd.f32 %v6108_v43, %v6681_v52  ;;  %v1716_v46 = vpop.f32.mrb[33].mxu0  ;;  %v2228_v47 = vpop.f32.mrb[33].mxu1 }
 0x130   : > { %5689 = vst [vmem:[%s6704_s8 + $0x70] sm:$0xff] %v5109_v40   ;;  %5753 = vst [vmem:[%s6704_s8 + $0x270] sm:$0xff] %v5429_v41   ;;  %v1717_v48 = vadd.f32 %v6681_v52, %v1716_v46  ;;  %v2229_v49 = vadd.f32 %v6681_v52, %v2228_v47  ;;  %v5981_v50 = vpop.f32.mrb[34].mxu0  ;;  %v6109_v51 = vpop.f32.mrb[34].mxu1 }
 0x131   : > { %v1728_v53 = vadd.f32 %v5981_v50, %v6681_v52  ;;  %v2240_v54 = vadd.f32 %v6109_v51, %v6681_v52  ;;  %v1719_v55 = vpop.f32.mrb[35].mxu0  ;;  %v2231_v56 = vpop.f32.mrb[35].mxu1  ;;  %v2645_v59 = vmax.f32 %v1725_v44, 0.0  ;;  %v2773_v60 = vmax.f32 %v2237_v45, 0.0 }
 0x132   : > { %v1720_v57 = vadd.f32 %v6681_v52, %v1719_v55  ;;  %v2232_v58 = vadd.f32 %v6681_v52, %v2231_v56  ;;  %v2643_v63 = vmax.f32 %v1717_v48, 0.0  ;;  %v2771_v0 = vmax.f32 %v2229_v49, 0.0 }
 0x133   : > { %v2646_v61 = vmax.f32 %v1728_v53, 0.0  ;;  %v2774_v62 = vmax.f32 %v2240_v54, 0.0 }
 0x134   : > { %v2644_v1 = vmax.f32 %v1720_v57, 0.0  ;;  %v2772_v2 = vmax.f32 %v2232_v58, 0.0 }
 0x135   : > { %v5124_v3 = vpack.c.bf16 %v2646_v61, %v2645_v59  ;;  %v5444_v4 = vpack.c.bf16 %v2774_v62, %v2773_v60 }
 0x136   : > { %v5119_v5 = vpack.c.bf16 %v2644_v1, %v2643_v63  ;;  %v5439_v6 = vpack.c.bf16 %v2772_v2, %v2771_v0  ;;  %v5984_v7 = vpop.f32.mrb[36].mxu0  ;;  %v6112_v8 = vpop.f32.mrb[36].mxu1 }
 0x137   : > { %5692 = vst [vmem:[%s6704_s8 + $0x88] sm:$0xff] %v5124_v3   ;;  %5756 = vst [vmem:[%s6704_s8 + $0x288] sm:$0xff] %v5444_v4   ;;  %v1741_v9 = vadd.f32 %v5984_v7, %v6681_v52  ;;  %v2253_v10 = vadd.f32 %v6112_v8, %v6681_v52  ;;  %v1732_v11 = vpop.f32.mrb[37].mxu0  ;;  %v2244_v12 = vpop.f32.mrb[37].mxu1 }
 0x138   : > { %5691 = vst [vmem:[%s6704_s8 + $0x80] sm:$0xff] %v5119_v5   ;;  %5755 = vst [vmem:[%s6704_s8 + $0x280] sm:$0xff] %v5439_v6   ;;  %v1733_v13 = vadd.f32 %v6681_v52, %v1732_v11  ;;  %v2245_v14 = vadd.f32 %v6681_v52, %v2244_v12  ;;  %v5985_v15 = vpop.f32.mrb[38].mxu0  ;;  %v6113_v16 = vpop.f32.mrb[38].mxu1 }
 0x139   : > { %v1744_v17 = vadd.f32 %v5985_v15, %v6681_v52  ;;  %v2256_v18 = vadd.f32 %v6113_v16, %v6681_v52  ;;  %v1735_v19 = vpop.f32.mrb[39].mxu0  ;;  %v2247_v20 = vpop.f32.mrb[39].mxu1  ;;  %v2649_v23 = vmax.f32 %v1741_v9, 0.0  ;;  %v2777_v24 = vmax.f32 %v2253_v10, 0.0 }
 0x13a   : > { %v1736_v21 = vadd.f32 %v6681_v52, %v1735_v19  ;;  %v2248_v22 = vadd.f32 %v6681_v52, %v2247_v20  ;;  %v2647_v27 = vmax.f32 %v1733_v13, 0.0  ;;  %v2775_v28 = vmax.f32 %v2245_v14, 0.0 }
 0x13b   : > { %v2650_v25 = vmax.f32 %v1744_v17, 0.0  ;;  %v2778_v26 = vmax.f32 %v2256_v18, 0.0 }
 0x13c   : > { %v2648_v29 = vmax.f32 %v1736_v21, 0.0  ;;  %v2776_v30 = vmax.f32 %v2248_v22, 0.0 }
 0x13d   : > { %v5134_v31 = vpack.c.bf16 %v2650_v25, %v2649_v23  ;;  %v5454_v32 = vpack.c.bf16 %v2778_v26, %v2777_v24 }
 0x13e   : > { %v5129_v33 = vpack.c.bf16 %v2648_v29, %v2647_v27  ;;  %v5449_v34 = vpack.c.bf16 %v2776_v30, %v2775_v28  ;;  %v5988_v35 = vpop.f32.mrb[40].mxu0  ;;  %v6116_v36 = vpop.f32.mrb[40].mxu1 }
 0x13f   : > { %5694 = vst [vmem:[%s6704_s8 + $0x98] sm:$0xff] %v5134_v31   ;;  %5758 = vst [vmem:[%s6704_s8 + $0x298] sm:$0xff] %v5454_v32   ;;  %v1757_v37 = vadd.f32 %v5988_v35, %v6681_v52  ;;  %v2269_v38 = vadd.f32 %v6116_v36, %v6681_v52  ;;  %v1748_v39 = vpop.f32.mrb[41].mxu0  ;;  %v2260_v40 = vpop.f32.mrb[41].mxu1 }
 0x140   : > { %5693 = vst [vmem:[%s6704_s8 + $0x90] sm:$0xff] %v5129_v33   ;;  %5757 = vst [vmem:[%s6704_s8 + $0x290] sm:$0xff] %v5449_v34   ;;  %v1749_v41 = vadd.f32 %v6681_v52, %v1748_v39  ;;  %v2261_v42 = vadd.f32 %v6681_v52, %v2260_v40  ;;  %v5989_v43 = vpop.f32.mrb[42].mxu0  ;;  %v6117_v44 = vpop.f32.mrb[42].mxu1 }
 0x141   : > { %v1760_v45 = vadd.f32 %v5989_v43, %v6681_v52  ;;  %v2272_v46 = vadd.f32 %v6117_v44, %v6681_v52  ;;  %v1751_v47 = vpop.f32.mrb[43].mxu0  ;;  %v2263_v48 = vpop.f32.mrb[43].mxu1  ;;  %v2653_v51 = vmax.f32 %v1757_v37, 0.0  ;;  %v2781_v53 = vmax.f32 %v2269_v38, 0.0 }
 0x142   : > { %v1752_v49 = vadd.f32 %v6681_v52, %v1751_v47  ;;  %v2264_v50 = vadd.f32 %v6681_v52, %v2263_v48  ;;  %v2651_v56 = vmax.f32 %v1749_v41, 0.0  ;;  %v2779_v57 = vmax.f32 %v2261_v42, 0.0 }
 0x143   : > { %v2654_v54 = vmax.f32 %v1760_v45, 0.0  ;;  %v2782_v55 = vmax.f32 %v2272_v46, 0.0 }
 0x144   : > { %v2652_v58 = vmax.f32 %v1752_v49, 0.0  ;;  %v2780_v59 = vmax.f32 %v2264_v50, 0.0 }
 0x145   : > { %v5144_v60 = vpack.c.bf16 %v2654_v54, %v2653_v51  ;;  %v5464_v61 = vpack.c.bf16 %v2782_v55, %v2781_v53 }
 0x146   : > { %v5139_v62 = vpack.c.bf16 %v2652_v58, %v2651_v56  ;;  %v5459_v63 = vpack.c.bf16 %v2780_v59, %v2779_v57  ;;  %v5992_v0 = vpop.f32.mrb[44].mxu0  ;;  %v6120_v1 = vpop.f32.mrb[44].mxu1 }
 0x147   : > { %5696 = vst [vmem:[%s6704_s8 + $0xa8] sm:$0xff] %v5144_v60   ;;  %5760 = vst [vmem:[%s6704_s8 + $0x2a8] sm:$0xff] %v5464_v61   ;;  %v1773_v2 = vadd.f32 %v5992_v0, %v6681_v52  ;;  %v2285_v3 = vadd.f32 %v6120_v1, %v6681_v52  ;;  %v1764_v4 = vpop.f32.mrb[45].mxu0  ;;  %v2276_v5 = vpop.f32.mrb[45].mxu1 }
 0x148   : > { %5695 = vst [vmem:[%s6704_s8 + $0xa0] sm:$0xff] %v5139_v62   ;;  %5759 = vst [vmem:[%s6704_s8 + $0x2a0] sm:$0xff] %v5459_v63   ;;  %v1765_v6 = vadd.f32 %v6681_v52, %v1764_v4  ;;  %v2277_v7 = vadd.f32 %v6681_v52, %v2276_v5  ;;  %v5993_v8 = vpop.f32.mrb[46].mxu0  ;;  %v6121_v9 = vpop.f32.mrb[46].mxu1 }
 0x149   : > { %v1776_v10 = vadd.f32 %v5993_v8, %v6681_v52  ;;  %v2288_v11 = vadd.f32 %v6121_v9, %v6681_v52  ;;  %v1767_v12 = vpop.f32.mrb[47].mxu0  ;;  %v2279_v13 = vpop.f32.mrb[47].mxu1  ;;  %v2657_v16 = vmax.f32 %v1773_v2, 0.0  ;;  %v2785_v17 = vmax.f32 %v2285_v3, 0.0 }
 0x14a   : > { %v1768_v14 = vadd.f32 %v6681_v52, %v1767_v12  ;;  %v2280_v15 = vadd.f32 %v6681_v52, %v2279_v13  ;;  %v2655_v20 = vmax.f32 %v1765_v6, 0.0  ;;  %v2783_v21 = vmax.f32 %v2277_v7, 0.0 }
 0x14b   : > { %v2658_v18 = vmax.f32 %v1776_v10, 0.0  ;;  %v2786_v19 = vmax.f32 %v2288_v11, 0.0 }
 0x14c   : > { %v2656_v22 = vmax.f32 %v1768_v14, 0.0  ;;  %v2784_v23 = vmax.f32 %v2280_v15, 0.0 }
 0x14d   : > { %v5154_v24 = vpack.c.bf16 %v2658_v18, %v2657_v16  ;;  %v5474_v25 = vpack.c.bf16 %v2786_v19, %v2785_v17 }
 0x14e   : > { %v5149_v26 = vpack.c.bf16 %v2656_v22, %v2655_v20  ;;  %v5469_v27 = vpack.c.bf16 %v2784_v23, %v2783_v21  ;;  %v5996_v28 = vpop.f32.mrb[48].mxu0  ;;  %v6124_v29 = vpop.f32.mrb[48].mxu1 }
 0x14f   : > { %5698 = vst [vmem:[%s6704_s8 + $0xb8] sm:$0xff] %v5154_v24   ;;  %5762 = vst [vmem:[%s6704_s8 + $0x2b8] sm:$0xff] %v5474_v25   ;;  %v1789_v30 = vadd.f32 %v5996_v28, %v6681_v52  ;;  %v2301_v31 = vadd.f32 %v6124_v29, %v6681_v52  ;;  %v1780_v32 = vpop.f32.mrb[49].mxu0  ;;  %v2292_v33 = vpop.f32.mrb[49].mxu1 }
 0x150   : > { %5697 = vst [vmem:[%s6704_s8 + $0xb0] sm:$0xff] %v5149_v26   ;;  %5761 = vst [vmem:[%s6704_s8 + $0x2b0] sm:$0xff] %v5469_v27   ;;  %v1781_v34 = vadd.f32 %v6681_v52, %v1780_v32  ;;  %v2293_v35 = vadd.f32 %v6681_v52, %v2292_v33  ;;  %v5997_v36 = vpop.f32.mrb[50].mxu0  ;;  %v6125_v37 = vpop.f32.mrb[50].mxu1 }
 0x151   : > { %v1792_v38 = vadd.f32 %v5997_v36, %v6681_v52  ;;  %v2304_v39 = vadd.f32 %v6125_v37, %v6681_v52  ;;  %v1783_v40 = vpop.f32.mrb[51].mxu0  ;;  %v2295_v41 = vpop.f32.mrb[51].mxu1  ;;  %v2661_v44 = vmax.f32 %v1789_v30, 0.0  ;;  %v2789_v45 = vmax.f32 %v2301_v31, 0.0 }
 0x152   : > { %v1784_v42 = vadd.f32 %v6681_v52, %v1783_v40  ;;  %v2296_v43 = vadd.f32 %v6681_v52, %v2295_v41  ;;  %v2659_v48 = vmax.f32 %v1781_v34, 0.0  ;;  %v2787_v49 = vmax.f32 %v2293_v35, 0.0 }
 0x153   : > { %v2662_v46 = vmax.f32 %v1792_v38, 0.0  ;;  %v2790_v47 = vmax.f32 %v2304_v39, 0.0 }
 0x154   : > { %v2660_v50 = vmax.f32 %v1784_v42, 0.0  ;;  %v2788_v51 = vmax.f32 %v2296_v43, 0.0 }
 0x155   : > { %v5164_v53 = vpack.c.bf16 %v2662_v46, %v2661_v44  ;;  %v5484_v54 = vpack.c.bf16 %v2790_v47, %v2789_v45 }
 0x156   : > { %v5159_v55 = vpack.c.bf16 %v2660_v50, %v2659_v48  ;;  %v5479_v56 = vpack.c.bf16 %v2788_v51, %v2787_v49  ;;  %v6000_v57 = vpop.f32.mrb[52].mxu0  ;;  %v6128_v58 = vpop.f32.mrb[52].mxu1 }
 0x157   : > { %5700 = vst [vmem:[%s6704_s8 + $0xc8] sm:$0xff] %v5164_v53   ;;  %5764 = vst [vmem:[%s6704_s8 + $0x2c8] sm:$0xff] %v5484_v54   ;;  %v1805_v59 = vadd.f32 %v6000_v57, %v6681_v52  ;;  %v2317_v60 = vadd.f32 %v6128_v58, %v6681_v52  ;;  %v1796_v61 = vpop.f32.mrb[53].mxu0  ;;  %v2308_v62 = vpop.f32.mrb[53].mxu1 }
 0x158   : > { %5699 = vst [vmem:[%s6704_s8 + $0xc0] sm:$0xff] %v5159_v55   ;;  %5763 = vst [vmem:[%s6704_s8 + $0x2c0] sm:$0xff] %v5479_v56   ;;  %v1797_v63 = vadd.f32 %v6681_v52, %v1796_v61  ;;  %v2309_v0 = vadd.f32 %v6681_v52, %v2308_v62  ;;  %v6001_v1 = vpop.f32.mrb[54].mxu0  ;;  %v6129_v2 = vpop.f32.mrb[54].mxu1 }
 0x159   : > { %v1808_v3 = vadd.f32 %v6001_v1, %v6681_v52  ;;  %v2320_v4 = vadd.f32 %v6129_v2, %v6681_v52  ;;  %v1799_v5 = vpop.f32.mrb[55].mxu0  ;;  %v2311_v6 = vpop.f32.mrb[55].mxu1  ;;  %v2665_v9 = vmax.f32 %v1805_v59, 0.0  ;;  %v2793_v10 = vmax.f32 %v2317_v60, 0.0 }
 0x15a   : > { %v1800_v7 = vadd.f32 %v6681_v52, %v1799_v5  ;;  %v2312_v8 = vadd.f32 %v6681_v52, %v2311_v6  ;;  %v2663_v13 = vmax.f32 %v1797_v63, 0.0  ;;  %v2791_v14 = vmax.f32 %v2309_v0, 0.0 }
 0x15b   : > { %v2666_v11 = vmax.f32 %v1808_v3, 0.0  ;;  %v2794_v12 = vmax.f32 %v2320_v4, 0.0 }
 0x15c   : > { %v2664_v15 = vmax.f32 %v1800_v7, 0.0  ;;  %v2792_v16 = vmax.f32 %v2312_v8, 0.0 }
 0x15d   : > { %v5174_v17 = vpack.c.bf16 %v2666_v11, %v2665_v9  ;;  %v5494_v18 = vpack.c.bf16 %v2794_v12, %v2793_v10 }
 0x15e   : > { %v5169_v19 = vpack.c.bf16 %v2664_v15, %v2663_v13  ;;  %v5489_v20 = vpack.c.bf16 %v2792_v16, %v2791_v14  ;;  %v6004_v21 = vpop.f32.mrb[56].mxu0  ;;  %v6132_v22 = vpop.f32.mrb[56].mxu1 }
 0x15f   : > { %5702 = vst [vmem:[%s6704_s8 + $0xd8] sm:$0xff] %v5174_v17   ;;  %5766 = vst [vmem:[%s6704_s8 + $0x2d8] sm:$0xff] %v5494_v18   ;;  %v1821_v23 = vadd.f32 %v6004_v21, %v6681_v52  ;;  %v2333_v24 = vadd.f32 %v6132_v22, %v6681_v52  ;;  %v1812_v25 = vpop.f32.mrb[57].mxu0  ;;  %v2324_v26 = vpop.f32.mrb[57].mxu1 }
 0x160   : > { %5701 = vst [vmem:[%s6704_s8 + $0xd0] sm:$0xff] %v5169_v19   ;;  %5765 = vst [vmem:[%s6704_s8 + $0x2d0] sm:$0xff] %v5489_v20   ;;  %v1813_v27 = vadd.f32 %v6681_v52, %v1812_v25  ;;  %v2325_v28 = vadd.f32 %v6681_v52, %v2324_v26  ;;  %v6005_v29 = vpop.f32.mrb[58].mxu0  ;;  %v6133_v30 = vpop.f32.mrb[58].mxu1 }
 0x161   : > { %v1824_v31 = vadd.f32 %v6005_v29, %v6681_v52  ;;  %v2336_v32 = vadd.f32 %v6133_v30, %v6681_v52  ;;  %v1815_v33 = vpop.f32.mrb[59].mxu0  ;;  %v2327_v34 = vpop.f32.mrb[59].mxu1  ;;  %v2669_v37 = vmax.f32 %v1821_v23, 0.0  ;;  %v2797_v38 = vmax.f32 %v2333_v24, 0.0 }
 0x162   : > { %v1816_v35 = vadd.f32 %v6681_v52, %v1815_v33  ;;  %v2328_v36 = vadd.f32 %v6681_v52, %v2327_v34  ;;  %v2667_v41 = vmax.f32 %v1813_v27, 0.0  ;;  %v2795_v42 = vmax.f32 %v2325_v28, 0.0  ;;  %v6909_v52 = vld [vmem:[%s7123_s2] ss:$0 sm:$0xff] }
 0x163   : > { %v2670_v39 = vmax.f32 %v1824_v31, 0.0  ;;  %v2798_v40 = vmax.f32 %v2336_v32, 0.0 }
 0x164   : > { %v2668_v43 = vmax.f32 %v1816_v35, 0.0  ;;  %v2796_v44 = vmax.f32 %v2328_v36, 0.0 }
 0x165   : > { %v5184_v45 = vpack.c.bf16 %v2670_v39, %v2669_v37  ;;  %v5504_v46 = vpack.c.bf16 %v2798_v40, %v2797_v38 }
 0x166   : > { %v5179_v47 = vpack.c.bf16 %v2668_v43, %v2667_v41  ;;  %v5499_v48 = vpack.c.bf16 %v2796_v44, %v2795_v42  ;;  %v6008_v49 = vpop.f32.mrb[60].mxu0  ;;  %v6136_v50 = vpop.f32.mrb[60].mxu1 }
 0x167   : > { %5704 = vst [vmem:[%s6704_s8 + $0xe8] sm:$0xff] %v5184_v45   ;;  %5768 = vst [vmem:[%s6704_s8 + $0x2e8] sm:$0xff] %v5504_v46   ;;  %v1837_v51 = vadd.f32 %v6909_v52, %v6008_v49  ;;  %v2349_v53 = vadd.f32 %v6909_v52, %v6136_v50  ;;  %v1828_v54 = vpop.f32.mrb[61].mxu0  ;;  %v2340_v55 = vpop.f32.mrb[61].mxu1 }
 0x168   : > { %5703 = vst [vmem:[%s6704_s8 + $0xe0] sm:$0xff] %v5179_v47   ;;  %5767 = vst [vmem:[%s6704_s8 + $0x2e0] sm:$0xff] %v5499_v48   ;;  %v1829_v56 = vadd.f32 %v6909_v52, %v1828_v54  ;;  %v2341_v57 = vadd.f32 %v6909_v52, %v2340_v55  ;;  %v6009_v58 = vpop.f32.mrb[62].mxu0  ;;  %v6137_v59 = vpop.f32.mrb[62].mxu1 }
 0x169   : > { %v1840_v60 = vadd.f32 %v6909_v52, %v6009_v58  ;;  %v2352_v61 = vadd.f32 %v6909_v52, %v6137_v59  ;;  %v1831_v62 = vpop.f32.mrb[63].mxu0  ;;  %v2343_v63 = vpop.f32.mrb[63].mxu1  ;;  %v2673_v2 = vmax.f32 %v1837_v51, 0.0  ;;  %v2801_v3 = vmax.f32 %v2349_v53, 0.0 }
 0x16a   : > { %v1832_v0 = vadd.f32 %v6909_v52, %v1831_v62  ;;  %v2344_v1 = vadd.f32 %v6909_v52, %v2343_v63  ;;  %v2671_v6 = vmax.f32 %v1829_v56, 0.0  ;;  %v2799_v7 = vmax.f32 %v2341_v57, 0.0 }
 0x16b   : > { %v2674_v4 = vmax.f32 %v1840_v60, 0.0  ;;  %v2802_v5 = vmax.f32 %v2352_v61, 0.0 }
 0x16c   : > { %v2672_v8 = vmax.f32 %v1832_v0, 0.0  ;;  %v2800_v9 = vmax.f32 %v2344_v1, 0.0 }
 0x16d   : > { %v5194_v10 = vpack.c.bf16 %v2674_v4, %v2673_v2  ;;  %v5514_v11 = vpack.c.bf16 %v2802_v5, %v2801_v3 }
 0x16e   : > { %v5189_v12 = vpack.c.bf16 %v2672_v8, %v2671_v6  ;;  %v5509_v13 = vpack.c.bf16 %v2800_v9, %v2799_v7  ;;  %v6012_v14 = vpop.f32.mrb[64].mxu0  ;;  %v6140_v15 = vpop.f32.mrb[64].mxu1 }
 0x16f   : > { %5706 = vst [vmem:[%s6704_s8 + $0xf8] sm:$0xff] %v5194_v10   ;;  %5770 = vst [vmem:[%s6704_s8 + $0x2f8] sm:$0xff] %v5514_v11   ;;  %v1853_v16 = vadd.f32 %v6909_v52, %v6012_v14  ;;  %v2365_v17 = vadd.f32 %v6909_v52, %v6140_v15  ;;  %v1844_v18 = vpop.f32.mrb[65].mxu0  ;;  %v2356_v19 = vpop.f32.mrb[65].mxu1 }
 0x170   : > { %5705 = vst [vmem:[%s6704_s8 + $0xf0] sm:$0xff] %v5189_v12   ;;  %5769 = vst [vmem:[%s6704_s8 + $0x2f0] sm:$0xff] %v5509_v13   ;;  %v1845_v20 = vadd.f32 %v6909_v52, %v1844_v18  ;;  %v2357_v21 = vadd.f32 %v6909_v52, %v2356_v19  ;;  %v6013_v22 = vpop.f32.mrb[66].mxu0  ;;  %v6141_v23 = vpop.f32.mrb[66].mxu1 }
 0x171   : > { %v1856_v24 = vadd.f32 %v6909_v52, %v6013_v22  ;;  %v2368_v25 = vadd.f32 %v6909_v52, %v6141_v23  ;;  %v1847_v26 = vpop.f32.mrb[67].mxu0  ;;  %v2359_v27 = vpop.f32.mrb[67].mxu1  ;;  %v2677_v30 = vmax.f32 %v1853_v16, 0.0  ;;  %v2805_v31 = vmax.f32 %v2365_v17, 0.0 }
 0x172   : > { %v1848_v28 = vadd.f32 %v6909_v52, %v1847_v26  ;;  %v2360_v29 = vadd.f32 %v6909_v52, %v2359_v27  ;;  %v2675_v34 = vmax.f32 %v1845_v20, 0.0  ;;  %v2803_v35 = vmax.f32 %v2357_v21, 0.0 }
 0x173   : > { %v2678_v32 = vmax.f32 %v1856_v24, 0.0  ;;  %v2806_v33 = vmax.f32 %v2368_v25, 0.0 }
 0x174   : > { %v2676_v36 = vmax.f32 %v1848_v28, 0.0  ;;  %v2804_v37 = vmax.f32 %v2360_v29, 0.0 }
 0x175   : > { %v5204_v38 = vpack.c.bf16 %v2678_v32, %v2677_v30  ;;  %v5524_v39 = vpack.c.bf16 %v2806_v33, %v2805_v31 }
 0x176   : > { %v5199_v40 = vpack.c.bf16 %v2676_v36, %v2675_v34  ;;  %v5519_v41 = vpack.c.bf16 %v2804_v37, %v2803_v35  ;;  %v6016_v42 = vpop.f32.mrb[68].mxu0  ;;  %v6144_v43 = vpop.f32.mrb[68].mxu1 }
 0x177   : > { %5708 = vst [vmem:[%s6704_s8 + $0x108] sm:$0xff] %v5204_v38   ;;  %5772 = vst [vmem:[%s6704_s8 + $0x308] sm:$0xff] %v5524_v39   ;;  %v1869_v44 = vadd.f32 %v6909_v52, %v6016_v42  ;;  %v2381_v45 = vadd.f32 %v6909_v52, %v6144_v43  ;;  %v1860_v46 = vpop.f32.mrb[69].mxu0  ;;  %v2372_v47 = vpop.f32.mrb[69].mxu1 }
 0x178   : > { %5707 = vst [vmem:[%s6704_s8 + $0x100] sm:$0xff] %v5199_v40   ;;  %5771 = vst [vmem:[%s6704_s8 + $0x300] sm:$0xff] %v5519_v41   ;;  %v1861_v48 = vadd.f32 %v6909_v52, %v1860_v46  ;;  %v2373_v49 = vadd.f32 %v6909_v52, %v2372_v47  ;;  %v6017_v50 = vpop.f32.mrb[70].mxu0  ;;  %v6145_v51 = vpop.f32.mrb[70].mxu1 }
 0x179   : > { %v1872_v53 = vadd.f32 %v6909_v52, %v6017_v50  ;;  %v2384_v54 = vadd.f32 %v6909_v52, %v6145_v51  ;;  %v1863_v55 = vpop.f32.mrb[71].mxu0  ;;  %v2375_v56 = vpop.f32.mrb[71].mxu1  ;;  %v2681_v59 = vmax.f32 %v1869_v44, 0.0  ;;  %v2809_v60 = vmax.f32 %v2381_v45, 0.0 }
 0x17a   : > { %v1864_v57 = vadd.f32 %v6909_v52, %v1863_v55  ;;  %v2376_v58 = vadd.f32 %v6909_v52, %v2375_v56  ;;  %v2679_v63 = vmax.f32 %v1861_v48, 0.0  ;;  %v2807_v0 = vmax.f32 %v2373_v49, 0.0 }
 0x17b   : > { %v2682_v61 = vmax.f32 %v1872_v53, 0.0  ;;  %v2810_v62 = vmax.f32 %v2384_v54, 0.0 }
 0x17c   : > { %v2680_v1 = vmax.f32 %v1864_v57, 0.0  ;;  %v2808_v2 = vmax.f32 %v2376_v58, 0.0 }
 0x17d   : > { %v5214_v3 = vpack.c.bf16 %v2682_v61, %v2681_v59  ;;  %v5534_v4 = vpack.c.bf16 %v2810_v62, %v2809_v60 }
 0x17e   : > { %v5209_v5 = vpack.c.bf16 %v2680_v1, %v2679_v63  ;;  %v5529_v6 = vpack.c.bf16 %v2808_v2, %v2807_v0  ;;  %v6020_v7 = vpop.f32.mrb[72].mxu0  ;;  %v6148_v8 = vpop.f32.mrb[72].mxu1 }
 0x17f   : > { %5710 = vst [vmem:[%s6704_s8 + $0x118] sm:$0xff] %v5214_v3   ;;  %5774 = vst [vmem:[%s6704_s8 + $0x318] sm:$0xff] %v5534_v4   ;;  %v1885_v9 = vadd.f32 %v6909_v52, %v6020_v7  ;;  %v2397_v10 = vadd.f32 %v6909_v52, %v6148_v8  ;;  %v1876_v11 = vpop.f32.mrb[73].mxu0  ;;  %v2388_v12 = vpop.f32.mrb[73].mxu1 }
 0x180   : > { %5709 = vst [vmem:[%s6704_s8 + $0x110] sm:$0xff] %v5209_v5   ;;  %5773 = vst [vmem:[%s6704_s8 + $0x310] sm:$0xff] %v5529_v6   ;;  %v1877_v13 = vadd.f32 %v6909_v52, %v1876_v11  ;;  %v2389_v14 = vadd.f32 %v6909_v52, %v2388_v12  ;;  %v6021_v15 = vpop.f32.mrb[74].mxu0  ;;  %v6149_v16 = vpop.f32.mrb[74].mxu1 }
 0x181   : > { %v1888_v17 = vadd.f32 %v6909_v52, %v6021_v15  ;;  %v2400_v18 = vadd.f32 %v6909_v52, %v6149_v16  ;;  %v1879_v19 = vpop.f32.mrb[75].mxu0  ;;  %v2391_v20 = vpop.f32.mrb[75].mxu1  ;;  %v2685_v23 = vmax.f32 %v1885_v9, 0.0  ;;  %v2813_v24 = vmax.f32 %v2397_v10, 0.0 }
 0x182   : > { %v1880_v21 = vadd.f32 %v6909_v52, %v1879_v19  ;;  %v2392_v22 = vadd.f32 %v6909_v52, %v2391_v20  ;;  %v2683_v27 = vmax.f32 %v1877_v13, 0.0  ;;  %v2811_v28 = vmax.f32 %v2389_v14, 0.0 }
 0x183   : > { %v2686_v25 = vmax.f32 %v1888_v17, 0.0  ;;  %v2814_v26 = vmax.f32 %v2400_v18, 0.0 }
 0x184   : > { %v2684_v29 = vmax.f32 %v1880_v21, 0.0  ;;  %v2812_v30 = vmax.f32 %v2392_v22, 0.0 }
 0x185   : > { %v5224_v31 = vpack.c.bf16 %v2686_v25, %v2685_v23  ;;  %v5544_v32 = vpack.c.bf16 %v2814_v26, %v2813_v24 }
 0x186   : > { %v5219_v33 = vpack.c.bf16 %v2684_v29, %v2683_v27  ;;  %v5539_v34 = vpack.c.bf16 %v2812_v30, %v2811_v28  ;;  %v6024_v35 = vpop.f32.mrb[76].mxu0  ;;  %v6152_v36 = vpop.f32.mrb[76].mxu1 }
 0x187   : > { %5712 = vst [vmem:[%s6704_s8 + $0x128] sm:$0xff] %v5224_v31   ;;  %5776 = vst [vmem:[%s6704_s8 + $0x328] sm:$0xff] %v5544_v32   ;;  %v1901_v37 = vadd.f32 %v6909_v52, %v6024_v35  ;;  %v2413_v38 = vadd.f32 %v6909_v52, %v6152_v36  ;;  %v1892_v39 = vpop.f32.mrb[77].mxu0  ;;  %v2404_v40 = vpop.f32.mrb[77].mxu1 }
 0x188   : > { %5711 = vst [vmem:[%s6704_s8 + $0x120] sm:$0xff] %v5219_v33   ;;  %5775 = vst [vmem:[%s6704_s8 + $0x320] sm:$0xff] %v5539_v34   ;;  %v1893_v41 = vadd.f32 %v6909_v52, %v1892_v39  ;;  %v2405_v42 = vadd.f32 %v6909_v52, %v2404_v40  ;;  %v6025_v43 = vpop.f32.mrb[78].mxu0  ;;  %v6153_v44 = vpop.f32.mrb[78].mxu1 }
 0x189   : > { %v1904_v45 = vadd.f32 %v6909_v52, %v6025_v43  ;;  %v2416_v46 = vadd.f32 %v6909_v52, %v6153_v44  ;;  %v1895_v47 = vpop.f32.mrb[79].mxu0  ;;  %v2407_v48 = vpop.f32.mrb[79].mxu1  ;;  %v2689_v51 = vmax.f32 %v1901_v37, 0.0  ;;  %v2817_v53 = vmax.f32 %v2413_v38, 0.0 }
 0x18a   : > { %v1896_v49 = vadd.f32 %v6909_v52, %v1895_v47  ;;  %v2408_v50 = vadd.f32 %v6909_v52, %v2407_v48  ;;  %v2687_v56 = vmax.f32 %v1893_v41, 0.0  ;;  %v2815_v57 = vmax.f32 %v2405_v42, 0.0 }
 0x18b   : > { %v2690_v54 = vmax.f32 %v1904_v45, 0.0  ;;  %v2818_v55 = vmax.f32 %v2416_v46, 0.0 }
 0x18c   : > { %v2688_v58 = vmax.f32 %v1896_v49, 0.0  ;;  %v2816_v59 = vmax.f32 %v2408_v50, 0.0 }
 0x18d   : > { %v5234_v60 = vpack.c.bf16 %v2690_v54, %v2689_v51  ;;  %v5554_v61 = vpack.c.bf16 %v2818_v55, %v2817_v53 }
 0x18e   : > { %v5229_v62 = vpack.c.bf16 %v2688_v58, %v2687_v56  ;;  %v5549_v63 = vpack.c.bf16 %v2816_v59, %v2815_v57  ;;  %v6028_v0 = vpop.f32.mrb[80].mxu0  ;;  %v6156_v1 = vpop.f32.mrb[80].mxu1 }
 0x18f   : > { %5714 = vst [vmem:[%s6704_s8 + $0x138] sm:$0xff] %v5234_v60   ;;  %5778 = vst [vmem:[%s6704_s8 + $0x338] sm:$0xff] %v5554_v61   ;;  %v1917_v2 = vadd.f32 %v6909_v52, %v6028_v0  ;;  %v2429_v3 = vadd.f32 %v6909_v52, %v6156_v1  ;;  %v1908_v4 = vpop.f32.mrb[81].mxu0  ;;  %v2420_v5 = vpop.f32.mrb[81].mxu1 }
 0x190   : > { %5713 = vst [vmem:[%s6704_s8 + $0x130] sm:$0xff] %v5229_v62   ;;  %5777 = vst [vmem:[%s6704_s8 + $0x330] sm:$0xff] %v5549_v63   ;;  %v1909_v6 = vadd.f32 %v6909_v52, %v1908_v4  ;;  %v2421_v7 = vadd.f32 %v6909_v52, %v2420_v5  ;;  %v6029_v8 = vpop.f32.mrb[82].mxu0  ;;  %v6157_v9 = vpop.f32.mrb[82].mxu1 }
 0x191   : > { %v1920_v10 = vadd.f32 %v6909_v52, %v6029_v8  ;;  %v2432_v11 = vadd.f32 %v6909_v52, %v6157_v9  ;;  %v1911_v12 = vpop.f32.mrb[83].mxu0  ;;  %v2423_v13 = vpop.f32.mrb[83].mxu1  ;;  %v2693_v16 = vmax.f32 %v1917_v2, 0.0  ;;  %v2821_v17 = vmax.f32 %v2429_v3, 0.0 }
 0x192   : > { %v1912_v14 = vadd.f32 %v6909_v52, %v1911_v12  ;;  %v2424_v15 = vadd.f32 %v6909_v52, %v2423_v13  ;;  %v2691_v20 = vmax.f32 %v1909_v6, 0.0  ;;  %v2819_v21 = vmax.f32 %v2421_v7, 0.0 }
 0x193   : > { %v2694_v18 = vmax.f32 %v1920_v10, 0.0  ;;  %v2822_v19 = vmax.f32 %v2432_v11, 0.0 }
 0x194   : > { %v2692_v22 = vmax.f32 %v1912_v14, 0.0  ;;  %v2820_v23 = vmax.f32 %v2424_v15, 0.0 }
 0x195   : > { %v5244_v24 = vpack.c.bf16 %v2694_v18, %v2693_v16  ;;  %v5564_v25 = vpack.c.bf16 %v2822_v19, %v2821_v17 }
 0x196   : > { %v5239_v26 = vpack.c.bf16 %v2692_v22, %v2691_v20  ;;  %v5559_v27 = vpack.c.bf16 %v2820_v23, %v2819_v21  ;;  %v6032_v28 = vpop.f32.mrb[84].mxu0  ;;  %v6160_v29 = vpop.f32.mrb[84].mxu1 }
 0x197   : > { %5716 = vst [vmem:[%s6704_s8 + $0x148] sm:$0xff] %v5244_v24   ;;  %5780 = vst [vmem:[%s6704_s8 + $0x348] sm:$0xff] %v5564_v25   ;;  %v1933_v30 = vadd.f32 %v6909_v52, %v6032_v28  ;;  %v2445_v31 = vadd.f32 %v6909_v52, %v6160_v29  ;;  %v1924_v32 = vpop.f32.mrb[85].mxu0  ;;  %v2436_v33 = vpop.f32.mrb[85].mxu1 }
 0x198   : > { %5715 = vst [vmem:[%s6704_s8 + $0x140] sm:$0xff] %v5239_v26   ;;  %5779 = vst [vmem:[%s6704_s8 + $0x340] sm:$0xff] %v5559_v27   ;;  %v1925_v34 = vadd.f32 %v6909_v52, %v1924_v32  ;;  %v2437_v35 = vadd.f32 %v6909_v52, %v2436_v33  ;;  %v6033_v36 = vpop.f32.mrb[86].mxu0  ;;  %v6161_v37 = vpop.f32.mrb[86].mxu1 }
 0x199   : > { %v1936_v38 = vadd.f32 %v6909_v52, %v6033_v36  ;;  %v2448_v39 = vadd.f32 %v6909_v52, %v6161_v37  ;;  %v1927_v40 = vpop.f32.mrb[87].mxu0  ;;  %v2439_v41 = vpop.f32.mrb[87].mxu1  ;;  %v2697_v44 = vmax.f32 %v1933_v30, 0.0  ;;  %v2825_v45 = vmax.f32 %v2445_v31, 0.0 }
 0x19a   : > { %v1928_v42 = vadd.f32 %v6909_v52, %v1927_v40  ;;  %v2440_v43 = vadd.f32 %v6909_v52, %v2439_v41  ;;  %v2695_v48 = vmax.f32 %v1925_v34, 0.0  ;;  %v2823_v49 = vmax.f32 %v2437_v35, 0.0 }
 0x19b   : > { %v2698_v46 = vmax.f32 %v1936_v38, 0.0  ;;  %v2826_v47 = vmax.f32 %v2448_v39, 0.0 }
 0x19c   : > { %v2696_v50 = vmax.f32 %v1928_v42, 0.0  ;;  %v2824_v51 = vmax.f32 %v2440_v43, 0.0 }
 0x19d   : > { %v5254_v53 = vpack.c.bf16 %v2698_v46, %v2697_v44  ;;  %v5574_v54 = vpack.c.bf16 %v2826_v47, %v2825_v45 }
 0x19e   : > { %v5249_v55 = vpack.c.bf16 %v2696_v50, %v2695_v48  ;;  %v5569_v56 = vpack.c.bf16 %v2824_v51, %v2823_v49  ;;  %v6036_v57 = vpop.f32.mrb[88].mxu0  ;;  %v6164_v58 = vpop.f32.mrb[88].mxu1 }
 0x19f   : > { %5718 = vst [vmem:[%s6704_s8 + $0x158] sm:$0xff] %v5254_v53   ;;  %5782 = vst [vmem:[%s6704_s8 + $0x358] sm:$0xff] %v5574_v54   ;;  %v1949_v59 = vadd.f32 %v6909_v52, %v6036_v57  ;;  %v2461_v60 = vadd.f32 %v6909_v52, %v6164_v58  ;;  %v1940_v61 = vpop.f32.mrb[89].mxu0  ;;  %v2452_v62 = vpop.f32.mrb[89].mxu1 }
 0x1a0   : > { %5717 = vst [vmem:[%s6704_s8 + $0x150] sm:$0xff] %v5249_v55   ;;  %5781 = vst [vmem:[%s6704_s8 + $0x350] sm:$0xff] %v5569_v56   ;;  %v1941_v63 = vadd.f32 %v6909_v52, %v1940_v61  ;;  %v2453_v0 = vadd.f32 %v6909_v52, %v2452_v62  ;;  %v6037_v1 = vpop.f32.mrb[90].mxu0  ;;  %v6165_v2 = vpop.f32.mrb[90].mxu1 }
 0x1a1   : > { %v1952_v3 = vadd.f32 %v6909_v52, %v6037_v1  ;;  %v2464_v4 = vadd.f32 %v6909_v52, %v6165_v2  ;;  %v1943_v5 = vpop.f32.mrb[91].mxu0  ;;  %v2455_v6 = vpop.f32.mrb[91].mxu1  ;;  %v2701_v9 = vmax.f32 %v1949_v59, 0.0  ;;  %v2829_v10 = vmax.f32 %v2461_v60, 0.0 }
 0x1a2   : > { %v1944_v7 = vadd.f32 %v6909_v52, %v1943_v5  ;;  %v2456_v8 = vadd.f32 %v6909_v52, %v2455_v6  ;;  %v2699_v13 = vmax.f32 %v1941_v63, 0.0  ;;  %v2827_v14 = vmax.f32 %v2453_v0, 0.0 }
 0x1a3   : > { %v2702_v11 = vmax.f32 %v1952_v3, 0.0  ;;  %v2830_v12 = vmax.f32 %v2464_v4, 0.0 }
 0x1a4   : > { %v2700_v15 = vmax.f32 %v1944_v7, 0.0  ;;  %v2828_v16 = vmax.f32 %v2456_v8, 0.0 }
 0x1a5   : > { %v5264_v17 = vpack.c.bf16 %v2702_v11, %v2701_v9  ;;  %v5584_v18 = vpack.c.bf16 %v2830_v12, %v2829_v10 }
 0x1a6   : > { %v5259_v19 = vpack.c.bf16 %v2700_v15, %v2699_v13  ;;  %v5579_v20 = vpack.c.bf16 %v2828_v16, %v2827_v14  ;;  %v6040_v21 = vpop.f32.mrb[92].mxu0  ;;  %v6168_v22 = vpop.f32.mrb[92].mxu1 }
 0x1a7   : > { %5720 = vst [vmem:[%s6704_s8 + $0x168] sm:$0xff] %v5264_v17   ;;  %5784 = vst [vmem:[%s6704_s8 + $0x368] sm:$0xff] %v5584_v18   ;;  %v1965_v23 = vadd.f32 %v6909_v52, %v6040_v21  ;;  %v2477_v24 = vadd.f32 %v6909_v52, %v6168_v22  ;;  %v1956_v25 = vpop.f32.mrb[93].mxu0  ;;  %v2468_v26 = vpop.f32.mrb[93].mxu1 }
 0x1a8   : > { %5719 = vst [vmem:[%s6704_s8 + $0x160] sm:$0xff] %v5259_v19   ;;  %5783 = vst [vmem:[%s6704_s8 + $0x360] sm:$0xff] %v5579_v20   ;;  %v1957_v27 = vadd.f32 %v6909_v52, %v1956_v25  ;;  %v2469_v28 = vadd.f32 %v6909_v52, %v2468_v26  ;;  %v6041_v29 = vpop.f32.mrb[94].mxu0  ;;  %v6169_v30 = vpop.f32.mrb[94].mxu1 }
 0x1a9   : > { %v1968_v31 = vadd.f32 %v6909_v52, %v6041_v29  ;;  %v2480_v32 = vadd.f32 %v6909_v52, %v6169_v30  ;;  %v1959_v33 = vpop.f32.mrb[95].mxu0  ;;  %v2471_v34 = vpop.f32.mrb[95].mxu1  ;;  %v2705_v37 = vmax.f32 %v1965_v23, 0.0  ;;  %v2833_v38 = vmax.f32 %v2477_v24, 0.0 }
 0x1aa   : > { %v1960_v35 = vadd.f32 %v6909_v52, %v1959_v33  ;;  %v2472_v36 = vadd.f32 %v6909_v52, %v2471_v34  ;;  %v2703_v41 = vmax.f32 %v1957_v27, 0.0  ;;  %v2831_v42 = vmax.f32 %v2469_v28, 0.0 }
 0x1ab   : > { %v2706_v39 = vmax.f32 %v1968_v31, 0.0  ;;  %v2834_v40 = vmax.f32 %v2480_v32, 0.0 }
 0x1ac   : > { %v2704_v43 = vmax.f32 %v1960_v35, 0.0  ;;  %v2832_v44 = vmax.f32 %v2472_v36, 0.0 }
 0x1ad   : > { %v5274_v45 = vpack.c.bf16 %v2706_v39, %v2705_v37  ;;  %v5594_v46 = vpack.c.bf16 %v2834_v40, %v2833_v38 }
 0x1ae   : > { %v5269_v47 = vpack.c.bf16 %v2704_v43, %v2703_v41  ;;  %v5589_v48 = vpack.c.bf16 %v2832_v44, %v2831_v42  ;;  %v6044_v49 = vpop.f32.mrb[96].mxu0  ;;  %v6172_v50 = vpop.f32.mrb[96].mxu1 }
 0x1af   : > { %5722 = vst [vmem:[%s6704_s8 + $0x178] sm:$0xff] %v5274_v45   ;;  %5786 = vst [vmem:[%s6704_s8 + $0x378] sm:$0xff] %v5594_v46   ;;  %v1981_v51 = vadd.f32 %v6909_v52, %v6044_v49  ;;  %v2493_v53 = vadd.f32 %v6909_v52, %v6172_v50  ;;  %v1972_v54 = vpop.f32.mrb[97].mxu0  ;;  %v2484_v55 = vpop.f32.mrb[97].mxu1 }
 0x1b0   : > { %5721 = vst [vmem:[%s6704_s8 + $0x170] sm:$0xff] %v5269_v47   ;;  %5785 = vst [vmem:[%s6704_s8 + $0x370] sm:$0xff] %v5589_v48   ;;  %v1973_v56 = vadd.f32 %v6909_v52, %v1972_v54  ;;  %v2485_v57 = vadd.f32 %v6909_v52, %v2484_v55  ;;  %v6045_v58 = vpop.f32.mrb[98].mxu0  ;;  %v6173_v59 = vpop.f32.mrb[98].mxu1 }
 0x1b1   : > { %v1984_v60 = vadd.f32 %v6909_v52, %v6045_v58  ;;  %v2496_v61 = vadd.f32 %v6909_v52, %v6173_v59  ;;  %v1975_v62 = vpop.f32.mrb[99].mxu0  ;;  %v2487_v63 = vpop.f32.mrb[99].mxu1  ;;  %v2709_v2 = vmax.f32 %v1981_v51, 0.0  ;;  %v2837_v3 = vmax.f32 %v2493_v53, 0.0 }
 0x1b2   : > { %v1976_v0 = vadd.f32 %v6909_v52, %v1975_v62  ;;  %v2488_v1 = vadd.f32 %v6909_v52, %v2487_v63  ;;  %v2707_v6 = vmax.f32 %v1973_v56, 0.0  ;;  %v2835_v7 = vmax.f32 %v2485_v57, 0.0 }
 0x1b3   : > { %v2710_v4 = vmax.f32 %v1984_v60, 0.0  ;;  %v2838_v5 = vmax.f32 %v2496_v61, 0.0 }
 0x1b4   : > { %v2708_v8 = vmax.f32 %v1976_v0, 0.0  ;;  %v2836_v9 = vmax.f32 %v2488_v1, 0.0 }
 0x1b5   : > { %v5284_v10 = vpack.c.bf16 %v2710_v4, %v2709_v2  ;;  %v5604_v11 = vpack.c.bf16 %v2838_v5, %v2837_v3 }
 0x1b6   : > { %v5279_v12 = vpack.c.bf16 %v2708_v8, %v2707_v6  ;;  %v5599_v13 = vpack.c.bf16 %v2836_v9, %v2835_v7  ;;  %v6048_v14 = vpop.f32.mrb[100].mxu0  ;;  %v6176_v15 = vpop.f32.mrb[100].mxu1 }
 0x1b7   : > { %5724 = vst [vmem:[%s6704_s8 + $0x188] sm:$0xff] %v5284_v10   ;;  %5788 = vst [vmem:[%s6704_s8 + $0x388] sm:$0xff] %v5604_v11   ;;  %v1997_v16 = vadd.f32 %v6909_v52, %v6048_v14  ;;  %v2509_v17 = vadd.f32 %v6909_v52, %v6176_v15  ;;  %v1988_v18 = vpop.f32.mrb[101].mxu0  ;;  %v2500_v19 = vpop.f32.mrb[101].mxu1 }
 0x1b8   : > { %5723 = vst [vmem:[%s6704_s8 + $0x180] sm:$0xff] %v5279_v12   ;;  %5787 = vst [vmem:[%s6704_s8 + $0x380] sm:$0xff] %v5599_v13   ;;  %v1989_v20 = vadd.f32 %v6909_v52, %v1988_v18  ;;  %v2501_v21 = vadd.f32 %v6909_v52, %v2500_v19  ;;  %v6049_v22 = vpop.f32.mrb[102].mxu0  ;;  %v6177_v23 = vpop.f32.mrb[102].mxu1 }
 0x1b9   : > { %v2000_v24 = vadd.f32 %v6909_v52, %v6049_v22  ;;  %v2512_v25 = vadd.f32 %v6909_v52, %v6177_v23  ;;  %v1991_v26 = vpop.f32.mrb[103].mxu0  ;;  %v2503_v27 = vpop.f32.mrb[103].mxu1  ;;  %v2713_v30 = vmax.f32 %v1997_v16, 0.0  ;;  %v2841_v31 = vmax.f32 %v2509_v17, 0.0 }
 0x1ba   : > { %v1992_v28 = vadd.f32 %v6909_v52, %v1991_v26  ;;  %v2504_v29 = vadd.f32 %v6909_v52, %v2503_v27  ;;  %v2711_v34 = vmax.f32 %v1989_v20, 0.0  ;;  %v2839_v35 = vmax.f32 %v2501_v21, 0.0 }
 0x1bb   : > { %v2714_v32 = vmax.f32 %v2000_v24, 0.0  ;;  %v2842_v33 = vmax.f32 %v2512_v25, 0.0 }
 0x1bc   : > { %v2712_v36 = vmax.f32 %v1992_v28, 0.0  ;;  %v2840_v37 = vmax.f32 %v2504_v29, 0.0 }
 0x1bd   : > { %v5294_v38 = vpack.c.bf16 %v2714_v32, %v2713_v30  ;;  %v5614_v39 = vpack.c.bf16 %v2842_v33, %v2841_v31 }
 0x1be   : > { %v5289_v40 = vpack.c.bf16 %v2712_v36, %v2711_v34  ;;  %v5609_v41 = vpack.c.bf16 %v2840_v37, %v2839_v35  ;;  %v6052_v42 = vpop.f32.mrb[104].mxu0  ;;  %v6180_v43 = vpop.f32.mrb[104].mxu1 }
 0x1bf   : > { %5726 = vst [vmem:[%s6704_s8 + $0x198] sm:$0xff] %v5294_v38   ;;  %5790 = vst [vmem:[%s6704_s8 + $0x398] sm:$0xff] %v5614_v39   ;;  %v2013_v44 = vadd.f32 %v6909_v52, %v6052_v42  ;;  %v2525_v45 = vadd.f32 %v6909_v52, %v6180_v43  ;;  %v2004_v46 = vpop.f32.mrb[105].mxu0  ;;  %v2516_v47 = vpop.f32.mrb[105].mxu1 }
 0x1c0   : > { %5725 = vst [vmem:[%s6704_s8 + $0x190] sm:$0xff] %v5289_v40   ;;  %5789 = vst [vmem:[%s6704_s8 + $0x390] sm:$0xff] %v5609_v41   ;;  %v2005_v48 = vadd.f32 %v6909_v52, %v2004_v46  ;;  %v2517_v49 = vadd.f32 %v6909_v52, %v2516_v47  ;;  %v6053_v50 = vpop.f32.mrb[106].mxu0  ;;  %v6181_v51 = vpop.f32.mrb[106].mxu1 }
 0x1c1   : > { %v2016_v53 = vadd.f32 %v6909_v52, %v6053_v50  ;;  %v2528_v54 = vadd.f32 %v6909_v52, %v6181_v51  ;;  %v2007_v55 = vpop.f32.mrb[107].mxu0  ;;  %v2519_v56 = vpop.f32.mrb[107].mxu1  ;;  %v2717_v59 = vmax.f32 %v2013_v44, 0.0  ;;  %v2845_v60 = vmax.f32 %v2525_v45, 0.0 }
 0x1c2   : > { %v2008_v57 = vadd.f32 %v6909_v52, %v2007_v55  ;;  %v2520_v58 = vadd.f32 %v6909_v52, %v2519_v56  ;;  %v2715_v63 = vmax.f32 %v2005_v48, 0.0  ;;  %v2843_v0 = vmax.f32 %v2517_v49, 0.0 }
 0x1c3   : > { %v2718_v61 = vmax.f32 %v2016_v53, 0.0  ;;  %v2846_v62 = vmax.f32 %v2528_v54, 0.0 }
 0x1c4   : > { %v2716_v1 = vmax.f32 %v2008_v57, 0.0  ;;  %v2844_v2 = vmax.f32 %v2520_v58, 0.0 }
 0x1c5   : > { %v5304_v3 = vpack.c.bf16 %v2718_v61, %v2717_v59  ;;  %v5624_v4 = vpack.c.bf16 %v2846_v62, %v2845_v60 }
 0x1c6   : > { %v5299_v5 = vpack.c.bf16 %v2716_v1, %v2715_v63  ;;  %v5619_v6 = vpack.c.bf16 %v2844_v2, %v2843_v0  ;;  %v6056_v7 = vpop.f32.mrb[108].mxu0  ;;  %v6184_v8 = vpop.f32.mrb[108].mxu1 }
 0x1c7   : > { %5728 = vst [vmem:[%s6704_s8 + $0x1a8] sm:$0xff] %v5304_v3   ;;  %5792 = vst [vmem:[%s6704_s8 + $0x3a8] sm:$0xff] %v5624_v4   ;;  %v2029_v9 = vadd.f32 %v6909_v52, %v6056_v7  ;;  %v2541_v10 = vadd.f32 %v6909_v52, %v6184_v8  ;;  %v2020_v11 = vpop.f32.mrb[109].mxu0  ;;  %v2532_v12 = vpop.f32.mrb[109].mxu1 }
 0x1c8   : > { %5727 = vst [vmem:[%s6704_s8 + $0x1a0] sm:$0xff] %v5299_v5   ;;  %5791 = vst [vmem:[%s6704_s8 + $0x3a0] sm:$0xff] %v5619_v6   ;;  %v2021_v13 = vadd.f32 %v6909_v52, %v2020_v11  ;;  %v2533_v14 = vadd.f32 %v6909_v52, %v2532_v12  ;;  %v6057_v15 = vpop.f32.mrb[110].mxu0  ;;  %v6185_v16 = vpop.f32.mrb[110].mxu1 }
 0x1c9   : > { %v2032_v17 = vadd.f32 %v6909_v52, %v6057_v15  ;;  %v2544_v18 = vadd.f32 %v6909_v52, %v6185_v16  ;;  %v2023_v19 = vpop.f32.mrb[111].mxu0  ;;  %v2535_v20 = vpop.f32.mrb[111].mxu1  ;;  %v2721_v23 = vmax.f32 %v2029_v9, 0.0  ;;  %v2849_v24 = vmax.f32 %v2541_v10, 0.0 }
 0x1ca   : > { %v2024_v21 = vadd.f32 %v6909_v52, %v2023_v19  ;;  %v2536_v22 = vadd.f32 %v6909_v52, %v2535_v20  ;;  %v2719_v27 = vmax.f32 %v2021_v13, 0.0  ;;  %v2847_v28 = vmax.f32 %v2533_v14, 0.0 }
 0x1cb   : > { %v2722_v25 = vmax.f32 %v2032_v17, 0.0  ;;  %v2850_v26 = vmax.f32 %v2544_v18, 0.0 }
 0x1cc   : > { %v2720_v29 = vmax.f32 %v2024_v21, 0.0  ;;  %v2848_v30 = vmax.f32 %v2536_v22, 0.0 }
 0x1cd   : > { %v5314_v31 = vpack.c.bf16 %v2722_v25, %v2721_v23  ;;  %v5634_v32 = vpack.c.bf16 %v2850_v26, %v2849_v24 }
 0x1ce   : > { %v5309_v33 = vpack.c.bf16 %v2720_v29, %v2719_v27  ;;  %v5629_v34 = vpack.c.bf16 %v2848_v30, %v2847_v28  ;;  %v6060_v35 = vpop.f32.mrb[112].mxu0  ;;  %v6188_v36 = vpop.f32.mrb[112].mxu1 }
 0x1cf   : > { %5730 = vst [vmem:[%s6704_s8 + $0x1b8] sm:$0xff] %v5314_v31   ;;  %5794 = vst [vmem:[%s6704_s8 + $0x3b8] sm:$0xff] %v5634_v32   ;;  %v2045_v37 = vadd.f32 %v6909_v52, %v6060_v35  ;;  %v2557_v38 = vadd.f32 %v6909_v52, %v6188_v36  ;;  %v2036_v39 = vpop.f32.mrb[113].mxu0  ;;  %v2548_v40 = vpop.f32.mrb[113].mxu1 }
 0x1d0   : > { %5729 = vst [vmem:[%s6704_s8 + $0x1b0] sm:$0xff] %v5309_v33   ;;  %5793 = vst [vmem:[%s6704_s8 + $0x3b0] sm:$0xff] %v5629_v34   ;;  %v2037_v41 = vadd.f32 %v6909_v52, %v2036_v39  ;;  %v2549_v42 = vadd.f32 %v6909_v52, %v2548_v40  ;;  %v6061_v43 = vpop.f32.mrb[114].mxu0  ;;  %v6189_v44 = vpop.f32.mrb[114].mxu1 }
 0x1d1   : > { %v2048_v45 = vadd.f32 %v6909_v52, %v6061_v43  ;;  %v2560_v46 = vadd.f32 %v6909_v52, %v6189_v44  ;;  %v2039_v47 = vpop.f32.mrb[115].mxu0  ;;  %v2551_v48 = vpop.f32.mrb[115].mxu1  ;;  %v2725_v51 = vmax.f32 %v2045_v37, 0.0  ;;  %v2853_v53 = vmax.f32 %v2557_v38, 0.0 }
 0x1d2   : > { %v2040_v49 = vadd.f32 %v6909_v52, %v2039_v47  ;;  %v2552_v50 = vadd.f32 %v6909_v52, %v2551_v48  ;;  %v2723_v56 = vmax.f32 %v2037_v41, 0.0  ;;  %v2851_v57 = vmax.f32 %v2549_v42, 0.0 }
 0x1d3   : > { %v2726_v54 = vmax.f32 %v2048_v45, 0.0  ;;  %v2854_v55 = vmax.f32 %v2560_v46, 0.0 }
 0x1d4   : > { %v2724_v58 = vmax.f32 %v2040_v49, 0.0  ;;  %v2852_v59 = vmax.f32 %v2552_v50, 0.0 }
 0x1d5   : > { %v5324_v60 = vpack.c.bf16 %v2726_v54, %v2725_v51  ;;  %v5644_v61 = vpack.c.bf16 %v2854_v55, %v2853_v53 }
 0x1d6   : > { %v5319_v62 = vpack.c.bf16 %v2724_v58, %v2723_v56  ;;  %v5639_v63 = vpack.c.bf16 %v2852_v59, %v2851_v57  ;;  %v6064_v0 = vpop.f32.mrb[116].mxu0  ;;  %v6192_v1 = vpop.f32.mrb[116].mxu1 }
 0x1d7   : > { %5732 = vst [vmem:[%s6704_s8 + $0x1c8] sm:$0xff] %v5324_v60   ;;  %5796 = vst [vmem:[%s6704_s8 + $0x3c8] sm:$0xff] %v5644_v61   ;;  %v2061_v2 = vadd.f32 %v6909_v52, %v6064_v0  ;;  %v2573_v3 = vadd.f32 %v6909_v52, %v6192_v1  ;;  %v2052_v4 = vpop.f32.mrb[117].mxu0  ;;  %v2564_v5 = vpop.f32.mrb[117].mxu1 }
 0x1d8   : > { %5731 = vst [vmem:[%s6704_s8 + $0x1c0] sm:$0xff] %v5319_v62   ;;  %5795 = vst [vmem:[%s6704_s8 + $0x3c0] sm:$0xff] %v5639_v63   ;;  %v2053_v6 = vadd.f32 %v6909_v52, %v2052_v4  ;;  %v2565_v7 = vadd.f32 %v6909_v52, %v2564_v5  ;;  %v6065_v8 = vpop.f32.mrb[118].mxu0  ;;  %v6193_v9 = vpop.f32.mrb[118].mxu1 }
 0x1d9   : > { %v2064_v10 = vadd.f32 %v6909_v52, %v6065_v8  ;;  %v2576_v11 = vadd.f32 %v6909_v52, %v6193_v9  ;;  %v2055_v12 = vpop.f32.mrb[119].mxu0  ;;  %v2567_v13 = vpop.f32.mrb[119].mxu1  ;;  %v2729_v16 = vmax.f32 %v2061_v2, 0.0  ;;  %v2857_v17 = vmax.f32 %v2573_v3, 0.0 }
 0x1da   : > { %v2056_v14 = vadd.f32 %v6909_v52, %v2055_v12  ;;  %v2568_v15 = vadd.f32 %v6909_v52, %v2567_v13  ;;  %v2727_v20 = vmax.f32 %v2053_v6, 0.0  ;;  %v2855_v21 = vmax.f32 %v2565_v7, 0.0 }
 0x1db   : > { %v2730_v18 = vmax.f32 %v2064_v10, 0.0  ;;  %v2858_v19 = vmax.f32 %v2576_v11, 0.0 }
 0x1dc   : > { %v2728_v22 = vmax.f32 %v2056_v14, 0.0  ;;  %v2856_v23 = vmax.f32 %v2568_v15, 0.0 }
 0x1dd   : > { %v5334_v24 = vpack.c.bf16 %v2730_v18, %v2729_v16  ;;  %v5654_v25 = vpack.c.bf16 %v2858_v19, %v2857_v17 }
 0x1de   : > { %v5329_v26 = vpack.c.bf16 %v2728_v22, %v2727_v20  ;;  %v5649_v27 = vpack.c.bf16 %v2856_v23, %v2855_v21  ;;  %v6068_v28 = vpop.f32.mrb[120].mxu0  ;;  %v6196_v29 = vpop.f32.mrb[120].mxu1 }
 0x1df   : > { %5734 = vst [vmem:[%s6704_s8 + $0x1d8] sm:$0xff] %v5334_v24   ;;  %5798 = vst [vmem:[%s6704_s8 + $0x3d8] sm:$0xff] %v5654_v25   ;;  %v2077_v30 = vadd.f32 %v6909_v52, %v6068_v28  ;;  %v2589_v31 = vadd.f32 %v6909_v52, %v6196_v29  ;;  %v2068_v32 = vpop.f32.mrb[121].mxu0  ;;  %v2580_v33 = vpop.f32.mrb[121].mxu1 }
 0x1e0   : > { %5733 = vst [vmem:[%s6704_s8 + $0x1d0] sm:$0xff] %v5329_v26   ;;  %5797 = vst [vmem:[%s6704_s8 + $0x3d0] sm:$0xff] %v5649_v27   ;;  %v2069_v34 = vadd.f32 %v6909_v52, %v2068_v32  ;;  %v2581_v35 = vadd.f32 %v6909_v52, %v2580_v33  ;;  %v6069_v36 = vpop.f32.mrb[122].mxu0  ;;  %v6197_v37 = vpop.f32.mrb[122].mxu1 }
 0x1e1   : > { %v2080_v38 = vadd.f32 %v6909_v52, %v6069_v36  ;;  %v2592_v39 = vadd.f32 %v6909_v52, %v6197_v37  ;;  %v2071_v40 = vpop.f32.mrb[123].mxu0  ;;  %v2583_v41 = vpop.f32.mrb[123].mxu1  ;;  %v2733_v44 = vmax.f32 %v2077_v30, 0.0  ;;  %v2861_v45 = vmax.f32 %v2589_v31, 0.0 }
 0x1e2   : > { %v2072_v42 = vadd.f32 %v6909_v52, %v2071_v40  ;;  %v2584_v43 = vadd.f32 %v6909_v52, %v2583_v41  ;;  %v2731_v48 = vmax.f32 %v2069_v34, 0.0  ;;  %v2859_v49 = vmax.f32 %v2581_v35, 0.0  ;;  %v6372_v52 = vld [vmem:[%s7123_s2] ss:$0 sm:$0xff] }
 0x1e3   : > { %v2734_v46 = vmax.f32 %v2080_v38, 0.0  ;;  %v2862_v47 = vmax.f32 %v2592_v39, 0.0 }
 0x1e4   : > { %v2732_v50 = vmax.f32 %v2072_v42, 0.0  ;;  %v2860_v51 = vmax.f32 %v2584_v43, 0.0 }
 0x1e5   : > { %v5344_v53 = vpack.c.bf16 %v2734_v46, %v2733_v44  ;;  %v5664_v54 = vpack.c.bf16 %v2862_v47, %v2861_v45 }
 0x1e6   : > { %v5339_v55 = vpack.c.bf16 %v2732_v50, %v2731_v48  ;;  %v5659_v56 = vpack.c.bf16 %v2860_v51, %v2859_v49  ;;  %v6072_v57 = vpop.f32.mrb[124].mxu0  ;;  %v6200_v58 = vpop.f32.mrb[124].mxu1 }
 0x1e7   : > { %5736 = vst [vmem:[%s6704_s8 + $0x1e8] sm:$0xff] %v5344_v53   ;;  %5800 = vst [vmem:[%s6704_s8 + $0x3e8] sm:$0xff] %v5664_v54   ;;  %v2093_v59 = vadd.f32 %v6372_v52, %v6072_v57  ;;  %v2605_v60 = vadd.f32 %v6372_v52, %v6200_v58  ;;  %v2084_v61 = vpop.f32.mrb[125].mxu0  ;;  %v2596_v62 = vpop.f32.mrb[125].mxu1 }
 0x1e8   : > { %5735 = vst [vmem:[%s6704_s8 + $0x1e0] sm:$0xff] %v5339_v55   ;;  %5799 = vst [vmem:[%s6704_s8 + $0x3e0] sm:$0xff] %v5659_v56   ;;  %v2085_v63 = vadd.f32 %v6372_v52, %v2084_v61  ;;  %v2597_v0 = vadd.f32 %v6372_v52, %v2596_v62  ;;  %v6073_v1 = vpop.f32.mrb[126].mxu0  ;;  %v6201_v2 = vpop.f32.mrb[126].mxu1 }
 0x1e9   : > { %v2096_v3 = vadd.f32 %v6372_v52, %v6073_v1  ;;  %v2608_v4 = vadd.f32 %v6372_v52, %v6201_v2  ;;  %v2087_v5 = vpop.f32.mrb[127].mxu0  ;;  %v2599_v6 = vpop.f32.mrb[127].mxu1  ;;  %v2737_v9 = vmax.f32 %v2093_v59, 0.0  ;;  %v2865_v10 = vmax.f32 %v2605_v60, 0.0 }
 0x1ea   : > { %v2088_v7 = vadd.f32 %v6372_v52, %v2087_v5  ;;  %v2600_v8 = vadd.f32 %v6372_v52, %v2599_v6  ;;  %v2735_v13 = vmax.f32 %v2085_v63, 0.0  ;;  %v2863_v14 = vmax.f32 %v2597_v0, 0.0 }
 0x1eb   : > { %v2738_v11 = vmax.f32 %v2096_v3, 0.0  ;;  %v2866_v12 = vmax.f32 %v2608_v4, 0.0 }
 0x1ec   : > { %v2736_v15 = vmax.f32 %v2088_v7, 0.0  ;;  %v2864_v16 = vmax.f32 %v2600_v8, 0.0 }
 0x1ed   : > { %v5354_v17 = vpack.c.bf16 %v2738_v11, %v2737_v9  ;;  %v5674_v18 = vpack.c.bf16 %v2866_v12, %v2865_v10 }
 0x1ee   : > { %v5349_v19 = vpack.c.bf16 %v2736_v15, %v2735_v13  ;;  %v5669_v20 = vpack.c.bf16 %v2864_v16, %v2863_v14 }
 0x1ef   : > { %5738 = vst [vmem:[%s6704_s8 + $0x1f8] sm:$0xff] %v5354_v17   ;;  %5802 = vst [vmem:[%s6704_s8 + $0x3f8] sm:$0xff] %v5674_v18  }
 0x1f0   : > { %5737 = vst [vmem:[%s6704_s8 + $0x1f0] sm:$0xff] %v5349_v19   ;;  %5801 = vst [vmem:[%s6704_s8 + $0x3f0] sm:$0xff] %v5669_v20  }
 0x1f1 PF: > { %s13_s14 = sadd.s32 1, %s6395_s14   ;;  %s7125_s12 = smov %s6391_s13 }
 0x1f2   : > { %p10_p5 = scmp.ge.s32.totalorder %s13_s14, 6   ;;  %s7126_s13 = smov %s7128_s15 }
 0x1f4   :  { %12 = sbr.rel (!%p10_p5) target bundleno = 2 (0x2), region = 68 }

// kernel: rl_forward.8
= control target key start
LH: loop header
LB: loop body
LE: loop exit
PB: predicated region body
PF: predicated region fallthrough
CT: control target
= control target key end

     0   :  { %s800_s12 = smov 0   ;;  %s802_s13 = smov 0   ;;  %s901_s0 = inlined_call_operand.vmem [shape: bf16[16,128], index: 0, kind: input, shape index: {}]   ;;  %s902_s1 = inlined_call_operand.vmem [shape: bf16[128,2048], index: 1, kind: input, shape index: {}]   ;;  %s903_s2 = inlined_call_operand.vmem [shape: f32[1,2048], index: 2, kind: input, shape index: {}]   ;;  %s904_s3 = inlined_call_operand.vmem [shape: bf16[16,2048], index: 3, kind: output, shape index: {}]  }
   0x1   :  { %s804_s14 = smov 0   ;;  %s806_s15 = smov 0  }
   0x2   :  { %s808_s16 = smov 0  }
   0x3 LB: > { %s22_s17 = sadd.s32 1, %s773_s15  ;;  %s633_s18 = sadd.s32 4294967295, %s777_s16   ;;  %s777_s16 = sphi %s808_s16, %s13_s16   ;;  %s773_s15 = sphi %s806_s15, %s909_s15   ;;  %s769_s14 = sphi %s804_s14, %s908_s14   ;;  %s765_s13 = sphi %s802_s13, %s907_s13   ;;  %s761_s12 = sphi %s800_s12, %s906_s12  }
   0x4   : > { %p23_p0 = scmp.ge.s32.totalorder %s22_s17, 8  ;;  %p65_p1 = scmp.ne.s32.totalorder %s765_s13, %s761_s12 }
   0x5   : > { %p66_p2 = scmp.eq.s32.totalorder %s777_s16, 0  ;;  %p123_p4 = scmp.eq.s32.totalorder %s633_s18, 7 }
   0x6   : > { %s911_s17 = smov (%p23_p0, %s22_s17), 0  ;;  %s58_s20 = sadd.s32 1, %s765_s13 }
   0x7   : > { %p67_p3 = por %p66_p2, %p65_p1  ;;  %s55_s19 = ssub.s32 %s773_s15, %s911_s17 }
   0x8   : > { %p56_p5 = scmp.eq.s32.totalorder %s55_s19, 0  ;;  %p835_p6 = por %p123_p4, %p65_p1 }
   0x9   : > { %p637_p7 = scmp.ge.s32.totalorder %s777_s16, 8 }
   0xa   : > { %s840_s22 = scalar_select %p56_p5, %s765_s13, %s58_s20  }
   0xb   : > { %154 = sbr.rel (%p637_p7) target bundleno = 38 (0x26), region = 20 }
  0x12   : > { %157 = sbr.rel (!%p67_p3) target bundleno = 38 (0x26), region = 24  ;;  %s159_s23 = sand.u32 (%p67_p3), 1, %s765_s13  }
  0x13   : > { %s669_s24 = sshll.u32 (%p67_p3), %s773_s15, 3  ;;  %s638_s25 = sshll.u32 (%p67_p3), %s159_s23, 7 }
  0x14   : > { %s848_s28 = scalar_lea.vmem (%p67_p3), %s902_s1, %s669_s24  ;;  %s161_s29 = scalar_lea.vmem (%p67_p3), [#allocation2], %s638_s25 }
  0x15   : > { %v222_v0 = vld [vmem:[%s848_s28] sm:$0xff] (%p67_p3) }
  0x16   : > { %v224_v1 = vld [vmem:[%s848_s28 + $0x40] sm:$0xff] (%p67_p3)  ;;  %223 = vst [vmem:[%s161_s29] sm:$0xff] (%p67_p3), %v222_v0 }
  0x17   : > { %v226_v2 = vld [vmem:[%s848_s28 + $0x80] sm:$0xff] (%p67_p3)  ;;  %225 = vst [vmem:[%s161_s29 + $0x8] sm:$0xff] (%p67_p3), %v224_v1 }
  0x18   : > { %227 = vst [vmem:[%s161_s29 + $0x10] sm:$0xff] (%p67_p3), %v226_v2  ;;  %v228_v3 = vld [vmem:[%s848_s28 + $0xc0] sm:$0xff] (%p67_p3) }
  0x19   : > { %v230_v4 = vld [vmem:[%s848_s28 + $0x100] sm:$0xff]  ;;  %229 = vst [vmem:[%s161_s29 + $0x18] sm:$0xff] %v228_v3 }
  0x1a   : > { %v232_v5 = vld [vmem:[%s848_s28 + $0x140] sm:$0xff]  ;;  %231 = vst [vmem:[%s161_s29 + $0x20] sm:$0xff] %v230_v4 }
  0x1b   : > { %233 = vst [vmem:[%s161_s29 + $0x28] sm:$0xff] %v232_v5  ;;  %v234_v6 = vld [vmem:[%s848_s28 + $0x180] sm:$0xff] }
  0x1c   : > { %v236_v7 = vld [vmem:[%s848_s28 + $0x1c0] sm:$0xff]  ;;  %235 = vst [vmem:[%s161_s29 + $0x30] sm:$0xff] %v234_v6 }
  0x1d   : > { %v238_v8 = vld [vmem:[%s848_s28 + $0x200] sm:$0xff]  ;;  %237 = vst [vmem:[%s161_s29 + $0x38] sm:$0xff] %v236_v7 }
  0x1e   : > { %239 = vst [vmem:[%s161_s29 + $0x40] sm:$0xff] %v238_v8  ;;  %v240_v9 = vld [vmem:[%s848_s28 + $0x240] sm:$0xff] }
  0x1f   : > { %v242_v10 = vld [vmem:[%s848_s28 + $0x280] sm:$0xff]  ;;  %241 = vst [vmem:[%s161_s29 + $0x48] sm:$0xff] %v240_v9 }
  0x20   : > { %v244_v11 = vld [vmem:[%s848_s28 + $0x2c0] sm:$0xff]  ;;  %243 = vst [vmem:[%s161_s29 + $0x50] sm:$0xff] %v242_v10 }
  0x21   : > { %245 = vst [vmem:[%s161_s29 + $0x58] sm:$0xff] %v244_v11  ;;  %v246_v12 = vld [vmem:[%s848_s28 + $0x300] sm:$0xff] }
  0x22   : > { %v248_v13 = vld [vmem:[%s848_s28 + $0x340] sm:$0xff]  ;;  %247 = vst [vmem:[%s161_s29 + $0x60] sm:$0xff] %v246_v12 }
  0x23   : > { %v250_v14 = vld [vmem:[%s848_s28 + $0x380] sm:$0xff]  ;;  %249 = vst [vmem:[%s161_s29 + $0x68] sm:$0xff] %v248_v13 }
  0x24   : > { %251 = vst [vmem:[%s161_s29 + $0x70] sm:$0xff] %v250_v14  ;;  %v252_v15 = vld [vmem:[%s848_s28 + $0x3c0] sm:$0xff] }
  0x25   : > { %253 = vst [vmem:[%s161_s29 + $0x78] sm:$0xff] %v252_v15 }
  0x26 PF: > { %p641_p8 = scmp.ge.s32.totalorder %s777_s16, 1  ;;  %p266_p9 = scmp.lt.s32.totalorder %s777_s16, 9 }
  0x28   : > { %p267_p10 = pnand %p641_p8, %p266_p9 }
  0x29   : > { %s273_s30 = sand.u32 (!%p267_p10), 1, %s761_s12   ;;  %v779_v16 = vmov (!%p267_p10), 0   ;;  %v738_v33 = vld [vmem:[%s901_s0] sm:$0xff] (!%p267_p10)   ;;  %s644_s8 = sshll.u32 (!%p267_p10), %s769_s14, 1  ;;  %v339_v34 = vlaneseq (!%p267_p10) }
  0x2a   : > { %270 = sbr.rel (%p267_p10) target bundleno = 305 (0x131), region = 66  ;;  %s642_s4 = sshll.u32 (!%p267_p10), %s273_s30, 7  ;;  %467 = vmatprep.mubr.bf16.mxu0 (!%p267_p10), %v779_v16 }
  0x2b   : > { %s275_s5 = scalar_lea.vmem (!%p267_p10), [#allocation2], %s642_s4  ;;  %p312_p11 = scmp.lt.s32.totalorder (!%p267_p10), %s644_s8, 15  ;;  %v340_v35 = vshrl.u32 (!%p267_p10), %v339_v34, 7 }
  0x2c   : > { %v714_v17 = vld [vmem:[%s275_s5 + $0x4] ss:$8 sps:$4 sm:$0xff] (!%p267_p10)   ;;  %v716_v18 = vld [vmem:[%s275_s5] ss:$8 sps:$4 sm:$0xff] (!%p267_p10)   ;;  %v717_v19 = vld [vmem:[%s275_s5 + $0x14] ss:$8 sps:$4 sm:$0xff] (!%p267_p10)  }
  0x2d   : > { %435 = vmatprep.subr.bf16.mxu0 (!%p267_p10), %v714_v17  ;;  %v719_v20 = vld [vmem:[%s275_s5 + $0x10] ss:$8 sps:$4 sm:$0xff] (!%p267_p10)   ;;  %v720_v21 = vld [vmem:[%s275_s5 + $0x24] ss:$8 sps:$4 sm:$0xff] (!%p267_p10)   ;;  %v722_v22 = vld [vmem:[%s275_s5 + $0x20] ss:$8 sps:$4 sm:$0xff] (!%p267_p10)  }
  0x2e   : > { %436 = vmatpush1.bf16.msra.mxu0 (!%p267_p10), %v716_v18  ;;  %v723_v23 = vld [vmem:[%s275_s5 + $0x34] ss:$8 sps:$4 sm:$0xff] (!%p267_p10)   ;;  %v725_v24 = vld [vmem:[%s275_s5 + $0x30] ss:$8 sps:$4 sm:$0xff] (!%p267_p10)   ;;  %v726_v25 = vld [vmem:[%s275_s5 + $0x44] ss:$8 sps:$4 sm:$0xff] (!%p267_p10)  }
  0x2f   : > { %437 = vmatprep.subr.bf16.mxu0 (!%p267_p10), %v717_v19  ;;  %v728_v26 = vld [vmem:[%s275_s5 + $0x40] ss:$8 sps:$4 sm:$0xff] (!%p267_p10)   ;;  %v729_v27 = vld [vmem:[%s275_s5 + $0x54] ss:$8 sps:$4 sm:$0xff] (!%p267_p10)   ;;  %v731_v28 = vld [vmem:[%s275_s5 + $0x50] ss:$8 sps:$4 sm:$0xff] (!%p267_p10)  }
  0x30   : > { %v732_v29 = vld [vmem:[%s275_s5 + $0x64] ss:$8 sps:$4 sm:$0xff] (!%p267_p10)   ;;  %v734_v30 = vld [vmem:[%s275_s5 + $0x60] ss:$8 sps:$4 sm:$0xff] (!%p267_p10)   ;;  %v735_v31 = vld [vmem:[%s275_s5 + $0x74] ss:$8 sps:$4 sm:$0xff] (!%p267_p10)  }
  0x31   : > { %v737_v32 = vld [vmem:[%s275_s5 + $0x70] ss:$8 sps:$4 sm:$0xff]   ;;  %s913_s8 = smov (!%p312_p11, %s644_s8), 15  ;;  %v341_v36 = vsub.s32 0, %v340_v35  ;;  %v345_v38 = vsub.s32 1, %v340_v35  ;;  %s643_s18 = sshll.u32 %s273_s30, 4 }
  0x32   : > { %438 = vmatpush1.bf16.msra.mxu0 %v719_v20  ;;  %s314_s11 = scalar_lea.vmem %s903_s2, %s913_s8  ;;  %s303_s19 = scalar_lea.vmem [#allocation3], %s643_s18 }
  0x33   : > { %439 = vmatprep.subr.bf16.mxu0 %v720_v21  ;;  %v337_v37 = vld [vmem:[%s314_s11] sm:$0x3]  ;;  %s672_s20 = sshll.u32 (%p835_p6), %s769_s14, 3 }
  0x34   : > { %v342_v39 = vrot.slane %v337_v37, %v341_v36  ;;  %v346_v40 = vrot.slane %v337_v37, %v345_v38  ;;  %s504_s24 = scalar_lea.vmem (%p835_p6), %s904_s3, %s672_s20 }
  0x36   : > { %440 = vmatpush1.bf16.msra.mxu0 %v722_v22 }
  0x37   : > { %441 = vmatprep.subr.bf16.mxu0 %v723_v23 }
  0x3a   : > { %442 = vmatpush1.bf16.msra.mxu0 %v725_v24 }
  0x3b   : > { %443 = vmatprep.subr.bf16.mxu0 %v726_v25 }
  0x3e   : > { %444 = vmatpush1.bf16.msra.mxu0 %v728_v26 }
  0x3f   : > { %445 = vmatprep.subr.bf16.mxu0 %v729_v27 }
  0x42   : > { %446 = vmatpush1.bf16.msra.mxu0 %v731_v28 }
  0x43   : > { %447 = vmatprep.subr.bf16.mxu0 %v732_v29 }
  0x46   : > { %448 = vmatpush1.bf16.msra.mxu0 %v734_v30 }
  0x47   : > { %449 = vmatprep.subr.bf16.mxu0 %v735_v31 }
  0x4a   : > { %450 = vmatpush1.bf16.msra.mxu0 %v737_v32 }
  0x4d   : > { %468 = vmatmul.mubr.bf16.vlgmr.msra.gmra.mrb[0].mxu0 %v738_v33 }
 0x120   : > { %v469_v41 = vpop.f32.mrb[0].mxu0 }
 0x121   : > { %v470_v42 = vadd.f32 %v469_v41, %v342_v39  ;;  %v471_v43 = vpop.f32.mrb[1].mxu0 }
 0x122   : > { %v472_v44 = vadd.f32 %v471_v43, %v346_v40  ;;  %v473_v45 = vpop.f32.mrb[2].mxu0  ;;  %498 = sbr.rel (!%p835_p6) target bundleno = 305 (0x131), region = 74 }
 0x123   : > { %v474_v46 = vadd.f32 %v473_v45, %v342_v39  ;;  %v475_v47 = vpop.f32.mrb[3].mxu0 }
 0x124   : > { %v670_v48 = vpack.c.bf16 %v472_v44, %v470_v42  ;;  %v476_v49 = vadd.f32 %v475_v47, %v346_v40 }
 0x126   : > { %490 = vst [vmem:[%s303_s19] sm:$0xff] %v670_v48  ;;  %v671_v50 = vpack.c.bf16 %v476_v49, %v474_v46 }
 0x128   : > { %491 = vst [vmem:[%s303_s19 + $0x8] sm:$0xff] %v671_v50 }
 0x12d   : > { %v534_v51 = vld [vmem:[%s303_s19] sm:$0xff] }
 0x12e   : > { %535 = vst [vmem:[%s504_s24] sm:$0xff] %v534_v51 }
 0x12f   : > { %v536_v52 = vld [vmem:[%s303_s19 + $0x8] sm:$0xff] }
 0x130   : > { %537 = vst [vmem:[%s504_s24 + $0x40] sm:$0xff] %v536_v52 }
 0x131 PF: > { %s13_s16 = sadd.s32 1, %s777_s16   ;;  %s906_s12 = smov %s765_s13 }
 0x132   : > { %p10_p12 = scmp.ge.s32.totalorder %s13_s16, 10   ;;  %s907_s13 = smov %s840_s22 }
 0x133   : > { %s908_s14 = smov %s773_s15  ;;  %s909_s15 = smov %s911_s17 }
 0x134   :  { %12 = sbr.rel (!%p10_p12) target bundleno = 3 (0x3), region = 149 }

// kernel: rl_forward.7
= control target key start
LH: loop header
LB: loop body
LE: loop exit
PB: predicated region body
PF: predicated region fallthrough
CT: control target
= control target key end

     0   :  { %v10461_v0 = vmov 0   ;;  %vm3162_vm0 = vcmask 64512   ;;  %vm3547_vm1 = vcmask 1043456   ;;  %s13504_s1 = inlined_call_operand.vmem [shape: bf16[392,128], index: 1, kind: input, shape index: {}]   ;;  %s13505_s0 = inlined_call_operand.vmem [shape: bf16[2048,392], index: 0, kind: input, shape index: {}]   ;;  %s13506_s2 = inlined_call_operand.vmem [shape: f32[1,128], index: 2, kind: input, shape index: {}]   ;;  %s13507_s3 = inlined_call_operand.vmem [shape: bf16[2048,128], index: 3, kind: output, shape index: {}]  }
   0x1   :  { %3551 = vmatprep.subr.bf16.mxu1 %v10461_v0  ;;  %v9663_v1 = vld [vmem:[%s13504_s1] sm:$0xff]   ;;  %4608 = vmatprep.subr.bf16.mxu0 %v10461_v0  ;;  %v9664_v2 = vld [vmem:[%s13504_s1 + $0x8] sm:$0xff]   ;;  %v9665_v3 = vld [vmem:[%s13504_s1 + $0x10] sm:$0xff]  }
   0x2   :  { %3552 = vmatpush1.bf16.msra.mxu1 %v9663_v1  ;;  %v9670_v4 = vld [vmem:[%s13504_s1 + $0x80] sm:$0xff]   ;;  %v9672_v5 = vld [vmem:[%s13504_s1 + $0x88] sm:$0xff]   ;;  %v9666_v6 = vld [vmem:[%s13504_s1 + $0x18] sm:$0xff]  }
   0x3   :  { %3553 = vmatprep.subr.bf16.mxu1 %v10461_v0  ;;  %4609 = vmatpush1.bf16.msra.mxu0 %v9670_v4  ;;  %v9674_v7 = vld [vmem:[%s13504_s1 + $0x90] sm:$0xff]   ;;  %v9667_v8 = vld [vmem:[%s13504_s1 + $0x20] sm:$0xff]   ;;  %v9676_v9 = vld [vmem:[%s13504_s1 + $0x98] sm:$0xff]  }
   0x4   :  { %4610 = vmatprep.subr.bf16.mxu0 %v10461_v0  ;;  %v9668_v10 = vld [vmem:[%s13504_s1 + $0x28] sm:$0xff]   ;;  %v9678_v11 = vld [vmem:[%s13504_s1 + $0xa0] sm:$0xff]   ;;  %v9669_v12 = vld [vmem:[%s13504_s1 + $0x30] sm:$0xff]  }
   0x5   :  { %v9680_v13 = vld [vmem:[%s13504_s1 + $0xa8] sm:$0xff]   ;;  %v9671_v15 = vld [vmem:[%s13504_s1 + $0x38] sm:$0xff]   ;;  %v9693_v16 = vld [vmem:[%s13505_s0 + $0x4] ss:$16 sps:$4 sm:$0xff]  }
   0x6   :  { %3554 = vmatpush1.bf16.msra.mxu1 %v9664_v2  ;;  %v9690_v14 = vld [vmem:[%s13505_s0 + $0xc] ss:$16 sps:$4 sm:$0xff]   ;;  %v9682_v17 = vld [vmem:[%s13504_s1 + $0xb0] sm:$0xff]   ;;  %3583 = vmatprep.mubr.bf16.mxu1 %v9693_v16  ;;  %v9673_v18 = vld [vmem:[%s13504_s1 + $0x40] sm:$0xff]  }
   0x7   :  { %3555 = vmatprep.subr.bf16.mxu1 %v10461_v0  ;;  %4611 = vmatpush1.bf16.msra.mxu0 %v9672_v5  ;;  %v9684_v19 = vld [vmem:[%s13504_s1 + $0xb8] sm:$0xff]   ;;  %v9675_v20 = vld [vmem:[%s13504_s1 + $0x48] sm:$0xff]   ;;  %v9686_v21 = vld [vmem:[%s13504_s1 + $0xc0] ss:$0 sps:$4 sm:$0xff]  }
   0x8   :  { %4612 = vmatprep.subr.bf16.mxu0 %v10461_v0  ;;  %7743 = vmatprep.mubr.msk.bf16.mxu0 %vm3162_vm0, %v9690_v14  ;;  %v9677_v22 = vld [vmem:[%s13504_s1 + $0x50] sm:$0xff]   ;;  %v3549_v23 = vsel %vm3547_vm1, %v9686_v21, 0  ;;  %v9688_v24 = vld [vmem:[%s13505_s0 + $0x8] ss:$16 sps:$4 sm:$0xff]   ;;  %v9694_v25 = vld [vmem:[%s13505_s0 + $0x2c] ss:$16 sps:$4 sm:$0xff]  }
   0x9   :  { %v9679_v26 = vld [vmem:[%s13504_s1 + $0x58] sm:$0xff]   ;;  %v9681_v27 = vld [vmem:[%s13504_s1 + $0x60] sm:$0xff]   ;;  %v9683_v30 = vld [vmem:[%s13504_s1 + $0x68] sm:$0xff]  }
   0xa   :  { %3556 = vmatpush1.bf16.msra.mxu1 %v9665_v3  ;;  %v9698_v28 = vld [vmem:[%s13505_s0 + $0x28] ss:$16 sps:$4 sm:$0xff]   ;;  %v9700_v29 = vld [vmem:[%s13505_s0 + $0x4c] ss:$16 sps:$4 sm:$0xff]   ;;  %v9685_v31 = vld [vmem:[%s13504_s1 + $0x70] sm:$0xff]  }
   0xb   :  { %3557 = vmatprep.subr.bf16.mxu1 %v10461_v0  ;;  %4613 = vmatpush1.bf16.msra.mxu0 %v9674_v7  ;;  %v9704_v32 = vld [vmem:[%s13505_s0 + $0x48] ss:$16 sps:$4 sm:$0xff]   ;;  %v9706_v33 = vld [vmem:[%s13505_s0 + $0x6c] ss:$16 sps:$4 sm:$0xff]   ;;  %v9691_v35 = vld [vmem:[%s13505_s0] ss:$16 sps:$4 sm:$0xff]  }
   0xc   :  { %4614 = vmatprep.subr.bf16.mxu0 %v10461_v0  ;;  %v9687_v34 = vld [vmem:[%s13504_s1 + $0x78] sm:$0xff]   ;;  %v9696_v36 = vld [vmem:[%s13505_s0 + $0x24] ss:$16 sps:$4 sm:$0xff]   ;;  %v9699_v39 = vld [vmem:[%s13505_s0 + $0x20] ss:$16 sps:$4 sm:$0xff]  }
   0xd   :  { %v9710_v37 = vld [vmem:[%s13505_s0 + $0x68] ss:$16 sps:$4 sm:$0xff]   ;;  %v9712_v38 = vld [vmem:[%s13505_s0 + $0x8c] ss:$16 sps:$4 sm:$0xff]   ;;  %v9702_v40 = vld [vmem:[%s13505_s0 + $0x44] ss:$16 sps:$4 sm:$0xff]  }
   0xe   :  { %3558 = vmatpush1.bf16.msra.mxu1 %v9666_v6  ;;  %v9716_v41 = vld [vmem:[%s13505_s0 + $0x88] ss:$16 sps:$4 sm:$0xff]   ;;  %v9718_v42 = vld [vmem:[%s13505_s0 + $0xac] ss:$16 sps:$4 sm:$0xff]   ;;  %v9705_v43 = vld [vmem:[%s13505_s0 + $0x40] ss:$16 sps:$4 sm:$0xff]  }
   0xf   :  { %3559 = vmatprep.subr.bf16.mxu1 %v10461_v0  ;;  %4615 = vmatpush1.bf16.msra.mxu0 %v9676_v9  ;;  %v9708_v44 = vld [vmem:[%s13505_s0 + $0x64] ss:$16 sps:$4 sm:$0xff]   ;;  %v9722_v45 = vld [vmem:[%s13505_s0 + $0xa8] ss:$16 sps:$4 sm:$0xff]   ;;  %v9724_v46 = vld [vmem:[%s13505_s0 + $0xcc] ss:$16 sps:$4 sm:$0xff]  }
  0x10   :  { %4616 = vmatprep.subr.bf16.mxu0 %v10461_v0  ;;  %v9711_v47 = vld [vmem:[%s13505_s0 + $0x60] ss:$16 sps:$4 sm:$0xff]   ;;  %v9714_v48 = vld [vmem:[%s13505_s0 + $0x84] ss:$16 sps:$4 sm:$0xff]   ;;  %v9728_v49 = vld [vmem:[%s13505_s0 + $0xc8] ss:$16 sps:$4 sm:$0xff]  }
  0x11   :  { %v9730_v50 = vld [vmem:[%s13505_s0 + $0xec] ss:$16 sps:$4 sm:$0xff]   ;;  %v9717_v51 = vld [vmem:[%s13505_s0 + $0x80] ss:$16 sps:$4 sm:$0xff]   ;;  %v9720_v52 = vld [vmem:[%s13505_s0 + $0xa4] ss:$16 sps:$4 sm:$0xff]  }
  0x12   :  { %3560 = vmatpush1.bf16.msra.mxu1 %v9667_v8  ;;  %v9734_v53 = vld [vmem:[%s13505_s0 + $0xe8] ss:$16 sps:$4 sm:$0xff]   ;;  %v9736_v54 = vld [vmem:[%s13505_s0 + $0x10c] ss:$16 sps:$4 sm:$0xff]   ;;  %v9723_v55 = vld [vmem:[%s13505_s0 + $0xa0] ss:$16 sps:$4 sm:$0xff]  }
  0x13   :  { %3561 = vmatprep.subr.bf16.mxu1 %v10461_v0  ;;  %4617 = vmatpush1.bf16.msra.mxu0 %v9678_v11  ;;  %v9726_v56 = vld [vmem:[%s13505_s0 + $0xc4] ss:$16 sps:$4 sm:$0xff]   ;;  %v9740_v57 = vld [vmem:[%s13505_s0 + $0x108] ss:$16 sps:$4 sm:$0xff]   ;;  %v9742_v58 = vld [vmem:[%s13505_s0 + $0x12c] ss:$16 sps:$4 sm:$0xff]  }
  0x14   :  { %4618 = vmatprep.subr.bf16.mxu0 %v10461_v0  ;;  %v9729_v59 = vld [vmem:[%s13505_s0 + $0xc0] ss:$16 sps:$4 sm:$0xff]   ;;  %v9732_v60 = vld [vmem:[%s13505_s0 + $0xe4] ss:$16 sps:$4 sm:$0xff]   ;;  %v9746_v61 = vld [vmem:[%s13505_s0 + $0x128] ss:$16 sps:$4 sm:$0xff]  }
  0x15   :  { %v9748_v62 = vld [vmem:[%s13505_s0 + $0x14c] ss:$16 sps:$4 sm:$0xff]   ;;  %v9735_v63 = vld [vmem:[%s13505_s0 + $0xe0] ss:$16 sps:$4 sm:$0xff]   ;;  %v9752_v1 = vld [vmem:[%s13505_s0 + $0x148] ss:$16 sps:$4 sm:$0xff]  }
  0x16   :  { %3562 = vmatpush1.bf16.msra.mxu1 %v9668_v10  ;;  %v9754_v2 = vld [vmem:[%s13505_s0 + $0x16c] ss:$16 sps:$4 sm:$0xff]   ;;  %v9741_v3 = vld [vmem:[%s13505_s0 + $0x100] ss:$16 sps:$4 sm:$0xff]   ;;  %v9744_v4 = vld [vmem:[%s13505_s0 + $0x124] ss:$16 sps:$4 sm:$0xff]  }
  0x17   :  { %3563 = vmatprep.subr.bf16.mxu1 %v10461_v0  ;;  %4619 = vmatpush1.bf16.msra.mxu0 %v9680_v13  ;;  %v9758_v5 = vld [vmem:[%s13505_s0 + $0x168] ss:$16 sps:$4 sm:$0xff]   ;;  %v9760_v6 = vld [vmem:[%s13505_s0 + $0x18c] ss:$16 sps:$4 sm:$0xff]   ;;  %v9747_v7 = vld [vmem:[%s13505_s0 + $0x120] ss:$16 sps:$4 sm:$0xff]  }
  0x18   :  { %4620 = vmatprep.subr.bf16.mxu0 %v10461_v0  ;;  %v9750_v8 = vld [vmem:[%s13505_s0 + $0x144] ss:$16 sps:$4 sm:$0xff]   ;;  %v9764_v9 = vld [vmem:[%s13505_s0 + $0x188] ss:$16 sps:$4 sm:$0xff]   ;;  %v9766_v10 = vld [vmem:[%s13505_s0 + $0x1ac] ss:$16 sps:$4 sm:$0xff]  }
  0x19   :  { %v9753_v11 = vld [vmem:[%s13505_s0 + $0x140] ss:$16 sps:$4 sm:$0xff]   ;;  %v9770_v13 = vld [vmem:[%s13505_s0 + $0x1a8] ss:$16 sps:$4 sm:$0xff]   ;;  %v9772_v14 = vld [vmem:[%s13505_s0 + $0x1cc] ss:$16 sps:$4 sm:$0xff]  }
  0x1a   :  { %3564 = vmatpush1.bf16.msra.mxu1 %v9669_v12  ;;  %v9756_v12 = vld [vmem:[%s13505_s0 + $0x164] ss:$16 sps:$4 sm:$0xff]   ;;  %v9782_v21 = vld [vmem:[%s13505_s0 + $0x1e8] ss:$16 sps:$4 sm:$0xff]  }
  0x1b   :  { %3565 = vmatprep.subr.bf16.mxu1 %v10461_v0  ;;  %4621 = vmatpush1.bf16.msra.mxu0 %v9682_v17  ;;  %v9762_v16 = vld [vmem:[%s13505_s0 + $0x184] ss:$16 sps:$4 sm:$0xff]   ;;  %v9776_v17 = vld [vmem:[%s13505_s0 + $0x1c8] ss:$16 sps:$4 sm:$0xff]  }
  0x1c   :  { %4622 = vmatprep.subr.bf16.mxu0 %v10461_v0 }
  0x1e   :  { %3566 = vmatpush1.bf16.msra.mxu1 %v9671_v15  ;;  %v9759_v15 = vld [vmem:[%s13505_s0 + $0x160] ss:$16 sps:$4 sm:$0xff]  }
  0x1f   :  { %3567 = vmatprep.subr.bf16.mxu1 %v10461_v0  ;;  %4623 = vmatpush1.bf16.msra.mxu0 %v9684_v19  ;;  %v9765_v19 = vld [vmem:[%s13505_s0 + $0x180] ss:$16 sps:$4 sm:$0xff]  }
  0x20   :  { %4624 = vmatprep.subr.bf16.mxu0 %v10461_v0 }
  0x22   :  { %3568 = vmatpush1.bf16.msra.mxu1 %v9673_v18  ;;  %v9778_v18 = vld [vmem:[%s13505_s0 + $0x1ec] ss:$16 sps:$4 sm:$0xff]  }
  0x23   :  { %3569 = vmatprep.subr.bf16.mxu1 %v10461_v0  ;;  %4625 = vmatpush1.bf16.msra.mxu0 %v3549_v23  ;;  %v9771_v23 = vld [vmem:[%s13505_s0 + $0x1a0] ss:$16 sps:$4 sm:$0xff]  }
  0x26   :  { %3570 = vmatpush1.bf16.msra.mxu1 %v9675_v20  ;;  %4641 = vmatmul.mubr.bf16.vlgmr.msra.gmra.mrb[0].mxu0 %v9688_v24  ;;  %v9768_v20 = vld [vmem:[%s13505_s0 + $0x1a4] ss:$16 sps:$4 sm:$0xff]  }
  0x27   :  { %3571 = vmatprep.subr.bf16.mxu1 %v10461_v0  ;;  %7744 = vmatprep.mubr.msk.bf16.mxu0 %vm3162_vm0, %v9694_v25  ;;  %v9774_v24 = vld [vmem:[%s13505_s0 + $0x1c4] ss:$16 sps:$4 sm:$0xff]   ;;  %v9788_v25 = vld [vmem:[%s13505_s0 + $0x208] ss:$16 sps:$4 sm:$0xff]  }
  0x2a   :  { %3572 = vmatpush1.bf16.msra.mxu1 %v9677_v22  ;;  %v9784_v22 = vld [vmem:[%s13505_s0 + $0x20c] ss:$16 sps:$4 sm:$0xff]  }
  0x2b   :  { %3573 = vmatprep.subr.bf16.mxu1 %v10461_v0 }
  0x2e   :  { %3574 = vmatpush1.bf16.msra.mxu1 %v9679_v26  ;;  %4649 = vmatmul.mubr.bf16.gmra.mrb[4].mxu0 %v9698_v28  ;;  %v9790_v26 = vld [vmem:[%s13505_s0 + $0x22c] ss:$16 sps:$4 sm:$0xff]   ;;  %v9780_v28 = vld [vmem:[%s13505_s0 + $0x1e4] ss:$16 sps:$4 sm:$0xff]  }
  0x2f   :  { %3575 = vmatprep.subr.bf16.mxu1 %v10461_v0  ;;  %7745 = vmatprep.mubr.msk.bf16.mxu0 %vm3162_vm0, %v9700_v29  ;;  %v9794_v29 = vld [vmem:[%s13505_s0 + $0x228] ss:$16 sps:$4 sm:$0xff]  }
  0x32   :  { %3576 = vmatpush1.bf16.msra.mxu1 %v9681_v27  ;;  %v9777_v27 = vld [vmem:[%s13505_s0 + $0x1c0] ss:$16 sps:$4 sm:$0xff]  }
  0x33   :  { %3577 = vmatprep.subr.bf16.mxu1 %v10461_v0 }
  0x36   :  { %3578 = vmatpush1.bf16.msra.mxu1 %v9683_v30  ;;  %4657 = vmatmul.mubr.bf16.gmra.mrb[8].mxu0 %v9704_v32  ;;  %v9796_v30 = vld [vmem:[%s13505_s0 + $0x24c] ss:$16 sps:$4 sm:$0xff]   ;;  %v9786_v32 = vld [vmem:[%s13505_s0 + $0x204] ss:$16 sps:$4 sm:$0xff]  }
  0x37   :  { %3579 = vmatprep.subr.bf16.mxu1 %v10461_v0  ;;  %7746 = vmatprep.mubr.msk.bf16.mxu0 %vm3162_vm0, %v9706_v33  ;;  %v9800_v33 = vld [vmem:[%s13505_s0 + $0x248] ss:$16 sps:$4 sm:$0xff]  }
  0x3a   :  { %3580 = vmatpush1.bf16.msra.mxu1 %v9685_v31  ;;  %v9783_v31 = vld [vmem:[%s13505_s0 + $0x1e0] ss:$16 sps:$4 sm:$0xff]  }
  0x3b   :  { %3581 = vmatprep.subr.bf16.mxu1 %v10461_v0  ;;  %v9738_v0 = vld [vmem:[%s13505_s0 + $0x104] ss:$16 sps:$4 sm:$0xff]  }
  0x3e   :  { %3582 = vmatpush1.bf16.msra.mxu1 %v9687_v34  ;;  %4665 = vmatmul.mubr.bf16.gmra.mrb[12].mxu0 %v9710_v37  ;;  %v9802_v34 = vld [vmem:[%s13505_s0 + $0x26c] ss:$16 sps:$4 sm:$0xff]   ;;  %v9806_v37 = vld [vmem:[%s13505_s0 + $0x268] ss:$16 sps:$4 sm:$0xff]  }
  0x3f   :  { %7747 = vmatprep.mubr.msk.bf16.mxu0 %vm3162_vm0, %v9712_v38  ;;  %v9808_v38 = vld [vmem:[%s13505_s0 + $0x28c] ss:$16 sps:$4 sm:$0xff]  }
  0x41   :  { %3584 = vmatmul.mubr.bf16.vlgmr.msra.gmra.mrb[0].mxu1 %v9691_v35  ;;  %v9789_v35 = vld [vmem:[%s13505_s0 + $0x200] ss:$16 sps:$4 sm:$0xff]  }
  0x42   :  { %3591 = vmatprep.mubr.bf16.mxu1 %v9696_v36  ;;  %v9792_v36 = vld [vmem:[%s13505_s0 + $0x224] ss:$16 sps:$4 sm:$0xff]  }
  0x46   :  { %4673 = vmatmul.mubr.bf16.gmra.mrb[16].mxu0 %v9716_v41  ;;  %v9812_v41 = vld [vmem:[%s13505_s0 + $0x288] ss:$16 sps:$4 sm:$0xff]  }
  0x47   :  { %7748 = vmatprep.mubr.msk.bf16.mxu0 %vm3162_vm0, %v9718_v42  ;;  %v9814_v42 = vld [vmem:[%s13505_s0 + $0x2ac] ss:$16 sps:$4 sm:$0xff]  }
  0x49   :  { %3592 = vmatmul.mubr.bf16.gmra.mrb[4].mxu1 %v9699_v39  ;;  %v9795_v39 = vld [vmem:[%s13505_s0 + $0x220] ss:$16 sps:$4 sm:$0xff]  }
  0x4a   :  { %3599 = vmatprep.mubr.bf16.mxu1 %v9702_v40  ;;  %v9798_v40 = vld [vmem:[%s13505_s0 + $0x244] ss:$16 sps:$4 sm:$0xff]  }
  0x4e   :  { %4681 = vmatmul.mubr.bf16.gmra.mrb[20].mxu0 %v9722_v45  ;;  %v9818_v45 = vld [vmem:[%s13505_s0 + $0x2a8] ss:$16 sps:$4 sm:$0xff]  }
  0x4f   :  { %7749 = vmatprep.mubr.msk.bf16.mxu0 %vm3162_vm0, %v9724_v46  ;;  %v9820_v46 = vld [vmem:[%s13505_s0 + $0x2cc] ss:$16 sps:$4 sm:$0xff]  }
  0x51   :  { %3600 = vmatmul.mubr.bf16.gmra.mrb[8].mxu1 %v9705_v43  ;;  %v9801_v43 = vld [vmem:[%s13505_s0 + $0x240] ss:$16 sps:$4 sm:$0xff]  }
  0x52   :  { %3607 = vmatprep.mubr.bf16.mxu1 %v9708_v44  ;;  %v9804_v44 = vld [vmem:[%s13505_s0 + $0x264] ss:$16 sps:$4 sm:$0xff]  }
  0x56   :  { %4689 = vmatmul.mubr.bf16.gmra.mrb[24].mxu0 %v9728_v49  ;;  %v9824_v49 = vld [vmem:[%s13505_s0 + $0x2c8] ss:$16 sps:$4 sm:$0xff]  }
  0x57   :  { %7750 = vmatprep.mubr.msk.bf16.mxu0 %vm3162_vm0, %v9730_v50  ;;  %v9826_v50 = vld [vmem:[%s13505_s0 + $0x2ec] ss:$16 sps:$4 sm:$0xff]  }
  0x59   :  { %3608 = vmatmul.mubr.bf16.gmra.mrb[12].mxu1 %v9711_v47  ;;  %v9807_v47 = vld [vmem:[%s13505_s0 + $0x260] ss:$16 sps:$4 sm:$0xff]  }
  0x5a   :  { %3615 = vmatprep.mubr.bf16.mxu1 %v9714_v48  ;;  %v9810_v48 = vld [vmem:[%s13505_s0 + $0x284] ss:$16 sps:$4 sm:$0xff]  }
  0x5e   :  { %4697 = vmatmul.mubr.bf16.gmra.mrb[28].mxu0 %v9734_v53  ;;  %v9830_v53 = vld [vmem:[%s13505_s0 + $0x2e8] ss:$16 sps:$4 sm:$0xff]  }
  0x5f   :  { %7751 = vmatprep.mubr.msk.bf16.mxu0 %vm3162_vm0, %v9736_v54  ;;  %v9832_v54 = vld [vmem:[%s13505_s0 + $0x30c] ss:$16 sps:$4 sm:$0xff]  }
  0x61   :  { %3616 = vmatmul.mubr.bf16.gmra.mrb[16].mxu1 %v9717_v51  ;;  %v9813_v51 = vld [vmem:[%s13505_s0 + $0x280] ss:$16 sps:$4 sm:$0xff]  }
  0x62   :  { %3623 = vmatprep.mubr.bf16.mxu1 %v9720_v52  ;;  %v9816_v52 = vld [vmem:[%s13505_s0 + $0x2a4] ss:$16 sps:$4 sm:$0xff]  }
  0x66   :  { %4705 = vmatmul.mubr.bf16.gmra.mrb[32].mxu0 %v9740_v57  ;;  %v9836_v57 = vld [vmem:[%s13505_s0 + $0x308] ss:$16 sps:$4 sm:$0xff]  }
  0x67   :  { %7752 = vmatprep.mubr.msk.bf16.mxu0 %vm3162_vm0, %v9742_v58  ;;  %v9838_v58 = vld [vmem:[%s13505_s0 + $0x32c] ss:$16 sps:$4 sm:$0xff]  }
  0x69   :  { %3624 = vmatmul.mubr.bf16.gmra.mrb[20].mxu1 %v9723_v55  ;;  %v9819_v55 = vld [vmem:[%s13505_s0 + $0x2a0] ss:$16 sps:$4 sm:$0xff]  }
  0x6a   :  { %3631 = vmatprep.mubr.bf16.mxu1 %v9726_v56  ;;  %v9822_v56 = vld [vmem:[%s13505_s0 + $0x2c4] ss:$16 sps:$4 sm:$0xff]  }
  0x6e   :  { %4713 = vmatmul.mubr.bf16.gmra.mrb[36].mxu0 %v9746_v61  ;;  %v9842_v61 = vld [vmem:[%s13505_s0 + $0x328] ss:$16 sps:$4 sm:$0xff]  }
  0x6f   :  { %7753 = vmatprep.mubr.msk.bf16.mxu0 %vm3162_vm0, %v9748_v62  ;;  %v9844_v62 = vld [vmem:[%s13505_s0 + $0x34c] ss:$16 sps:$4 sm:$0xff]  }
  0x71   :  { %3632 = vmatmul.mubr.bf16.gmra.mrb[24].mxu1 %v9729_v59  ;;  %v9825_v59 = vld [vmem:[%s13505_s0 + $0x2c0] ss:$16 sps:$4 sm:$0xff]  }
  0x72   :  { %3639 = vmatprep.mubr.bf16.mxu1 %v9732_v60  ;;  %v9828_v60 = vld [vmem:[%s13505_s0 + $0x2e4] ss:$16 sps:$4 sm:$0xff]  }
  0x76   :  { %4721 = vmatmul.mubr.bf16.gmra.mrb[40].mxu0 %v9752_v1  ;;  %v9848_v1 = vld [vmem:[%s13505_s0 + $0x348] ss:$16 sps:$4 sm:$0xff]  }
  0x77   :  { %7754 = vmatprep.mubr.msk.bf16.mxu0 %vm3162_vm0, %v9754_v2  ;;  %v9850_v2 = vld [vmem:[%s13505_s0 + $0x36c] ss:$16 sps:$4 sm:$0xff]  }
  0x79   :  { %3640 = vmatmul.mubr.bf16.gmra.mrb[28].mxu1 %v9735_v63  ;;  %v9831_v63 = vld [vmem:[%s13505_s0 + $0x2e0] ss:$16 sps:$4 sm:$0xff]  }
  0x7a   :  { %3647 = vmatprep.mubr.bf16.mxu1 %v9738_v0  ;;  %v9834_v0 = vld [vmem:[%s13505_s0 + $0x304] ss:$16 sps:$4 sm:$0xff]  }
  0x7e   :  { %4729 = vmatmul.mubr.bf16.gmra.mrb[44].mxu0 %v9758_v5 }
  0x7f   :  { %7755 = vmatprep.mubr.msk.bf16.mxu0 %vm3162_vm0, %v9760_v6 }
  0x81   :  { %3648 = vmatmul.mubr.bf16.gmra.mrb[32].mxu1 %v9741_v3  ;;  %v9837_v3 = vld [vmem:[%s13505_s0 + $0x300] ss:$16 sps:$4 sm:$0xff]  }
  0x82   :  { %3655 = vmatprep.mubr.bf16.mxu1 %v9744_v4  ;;  %v9840_v4 = vld [vmem:[%s13505_s0 + $0x324] ss:$16 sps:$4 sm:$0xff]  }
  0x86   :  { %4737 = vmatmul.mubr.bf16.gmra.mrb[48].mxu0 %v9764_v9  ;;  %v9856_v9 = vld [vmem:[%s13505_s0 + $0x38c] ss:$16 sps:$4 sm:$0xff]  }
  0x87   :  { %7756 = vmatprep.mubr.msk.bf16.mxu0 %vm3162_vm0, %v9766_v10 }
  0x89   :  { %3656 = vmatmul.mubr.bf16.gmra.mrb[36].mxu1 %v9747_v7  ;;  %v9854_v7 = vld [vmem:[%s13505_s0 + $0x368] ss:$16 sps:$4 sm:$0xff]  }
  0x8a   :  { %3663 = vmatprep.mubr.bf16.mxu1 %v9750_v8 }
  0x8e   :  { %4745 = vmatmul.mubr.bf16.gmra.mrb[52].mxu0 %v9770_v13 }
  0x8f   :  { %7757 = vmatprep.mubr.msk.bf16.mxu0 %vm3162_vm0, %v9772_v14 }
  0x91   :  { %3664 = vmatmul.mubr.bf16.gmra.mrb[40].mxu1 %v9753_v11  ;;  %v9843_v11 = vld [vmem:[%s13505_s0 + $0x320] ss:$16 sps:$4 sm:$0xff]  }
  0x92   :  { %3671 = vmatprep.mubr.bf16.mxu1 %v9756_v12  ;;  %v9846_v12 = vld [vmem:[%s13505_s0 + $0x344] ss:$16 sps:$4 sm:$0xff]  }
  0x96   :  { %4753 = vmatmul.mubr.bf16.gmra.mrb[56].mxu0 %v9776_v17  ;;  %v9862_v17 = vld [vmem:[%s13505_s0 + $0x3ac] ss:$16 sps:$4 sm:$0xff]  }
  0x97   :  { %7758 = vmatprep.mubr.msk.bf16.mxu0 %vm3162_vm0, %v9778_v18 }
  0x99   :  { %3672 = vmatmul.mubr.bf16.gmra.mrb[44].mxu1 %v9759_v15  ;;  %v9860_v15 = vld [vmem:[%s13505_s0 + $0x388] ss:$16 sps:$4 sm:$0xff]  }
  0x9a   :  { %3679 = vmatprep.mubr.bf16.mxu1 %v9762_v16 }
  0x9e   :  { %4761 = vmatmul.mubr.bf16.gmra.mrb[60].mxu0 %v9782_v21 }
  0x9f   :  { %7759 = vmatprep.mubr.msk.bf16.mxu0 %vm3162_vm0, %v9784_v22 }
  0xa1   :  { %3680 = vmatmul.mubr.bf16.gmra.mrb[48].mxu1 %v9765_v19  ;;  %v9849_v19 = vld [vmem:[%s13505_s0 + $0x340] ss:$16 sps:$4 sm:$0xff]  }
  0xa2   :  { %3687 = vmatprep.mubr.bf16.mxu1 %v9768_v20  ;;  %v9852_v20 = vld [vmem:[%s13505_s0 + $0x364] ss:$16 sps:$4 sm:$0xff]  }
  0xa6   :  { %4769 = vmatmul.mubr.bf16.gmra.mrb[64].mxu0 %v9788_v25  ;;  %v9868_v25 = vld [vmem:[%s13505_s0 + $0x3cc] ss:$16 sps:$4 sm:$0xff]  }
  0xa7   :  { %7760 = vmatprep.mubr.msk.bf16.mxu0 %vm3162_vm0, %v9790_v26  ;;  %v10967_v26 = vld [vmem:[%s13506_s2] ss:$0 sm:$0xff] }
  0xa9   :  { %3688 = vmatmul.mubr.bf16.gmra.mrb[52].mxu1 %v9771_v23  ;;  %v9866_v23 = vld [vmem:[%s13505_s0 + $0x3a8] ss:$16 sps:$4 sm:$0xff]  }
  0xaa   :  { %3695 = vmatprep.mubr.bf16.mxu1 %v9774_v24 }
  0xae   :  { %4777 = vmatmul.mubr.bf16.gmra.mrb[68].mxu0 %v9794_v29 }
  0xaf   :  { %7761 = vmatprep.mubr.msk.bf16.mxu0 %vm3162_vm0, %v9796_v30 }
  0xb1   :  { %3696 = vmatmul.mubr.bf16.gmra.mrb[56].mxu1 %v9777_v27 }
  0xb2   :  { %3703 = vmatprep.mubr.bf16.mxu1 %v9780_v28 }
  0xb6   :  { %4785 = vmatmul.mubr.bf16.gmra.mrb[72].mxu0 %v9800_v33  ;;  %v9858_v33 = vld [vmem:[%s13505_s0 + $0x384] ss:$16 sps:$4 sm:$0xff]  }
  0xb7   :  { %7762 = vmatprep.mubr.msk.bf16.mxu0 %vm3162_vm0, %v9802_v34 }
  0xb9   :  { %3704 = vmatmul.mubr.bf16.gmra.mrb[60].mxu1 %v9783_v31  ;;  %v9855_v31 = vld [vmem:[%s13505_s0 + $0x360] ss:$16 sps:$4 sm:$0xff]  }
  0xba   :  { %3711 = vmatprep.mubr.bf16.mxu1 %v9786_v32 }
  0xbe   :  { %4793 = vmatmul.mubr.bf16.gmra.mrb[76].mxu0 %v9806_v37 }
  0xbf   :  { %7763 = vmatprep.mubr.msk.bf16.mxu0 %vm3162_vm0, %v9808_v38 }
  0xc1   :  { %3712 = vmatmul.mubr.bf16.gmra.mrb[64].mxu1 %v9789_v35 }
  0xc2   :  { %3719 = vmatprep.mubr.bf16.mxu1 %v9792_v36 }
  0xc6   :  { %4801 = vmatmul.mubr.bf16.gmra.mrb[80].mxu0 %v9812_v41 }
  0xc7   :  { %7764 = vmatprep.mubr.msk.bf16.mxu0 %vm3162_vm0, %v9814_v42  ;;  %v9874_v42 = vld [vmem:[%s13505_s0 + $0x3ec] ss:$16 sps:$4 sm:$0xff]  }
  0xc9   :  { %3720 = vmatmul.mubr.bf16.gmra.mrb[68].mxu1 %v9795_v39  ;;  %v9872_v39 = vld [vmem:[%s13505_s0 + $0x3c8] ss:$16 sps:$4 sm:$0xff]  }
  0xca   :  { %3727 = vmatprep.mubr.bf16.mxu1 %v9798_v40 }
  0xce   :  { %4809 = vmatmul.mubr.bf16.gmra.mrb[84].mxu0 %v9818_v45 }
  0xcf   :  { %7765 = vmatprep.mubr.msk.bf16.mxu0 %vm3162_vm0, %v9820_v46 }
  0xd1   :  { %3728 = vmatmul.mubr.bf16.gmra.mrb[72].mxu1 %v9801_v43 }
  0xd2   :  { %3735 = vmatprep.mubr.bf16.mxu1 %v9804_v44 }
  0xd6   :  { %4817 = vmatmul.mubr.bf16.gmra.mrb[88].mxu0 %v9824_v49 }
  0xd7   :  { %7766 = vmatprep.mubr.msk.bf16.mxu0 %vm3162_vm0, %v9826_v50  ;;  %v9861_v50 = vld [vmem:[%s13505_s0 + $0x380] ss:$16 sps:$4 sm:$0xff]  }
  0xd9   :  { %3736 = vmatmul.mubr.bf16.gmra.mrb[76].mxu1 %v9807_v47 }
  0xda   :  { %3743 = vmatprep.mubr.bf16.mxu1 %v9810_v48 }
  0xde   :  { %4825 = vmatmul.mubr.bf16.gmra.mrb[92].mxu0 %v9830_v53 }
  0xdf   :  { %7767 = vmatprep.mubr.msk.bf16.mxu0 %vm3162_vm0, %v9832_v54 }
  0xe1   :  { %3744 = vmatmul.mubr.bf16.gmra.mrb[80].mxu1 %v9813_v51 }
  0xe2   :  { %3751 = vmatprep.mubr.bf16.mxu1 %v9816_v52  ;;  %v9864_v52 = vld [vmem:[%s13505_s0 + $0x3a4] ss:$16 sps:$4 sm:$0xff]  }
  0xe6   :  { %4833 = vmatmul.mubr.bf16.gmra.mrb[96].mxu0 %v9836_v57 }
  0xe7   :  { %7768 = vmatprep.mubr.msk.bf16.mxu0 %vm3162_vm0, %v9838_v58  ;;  %v9878_v58 = vld [vmem:[%s13505_s0 + $0x3e8] ss:$16 sps:$4 sm:$0xff]  }
  0xe9   :  { %3752 = vmatmul.mubr.bf16.gmra.mrb[84].mxu1 %v9819_v55 }
  0xea   :  { %3759 = vmatprep.mubr.bf16.mxu1 %v9822_v56 }
  0xee   :  { %4841 = vmatmul.mubr.bf16.gmra.mrb[100].mxu0 %v9842_v61  ;;  %v9880_v61 = vld [vmem:[%s13505_s0 + $0x40c] ss:$16 sps:$4 sm:$0xff]  }
  0xef   :  { %7769 = vmatprep.mubr.msk.bf16.mxu0 %vm3162_vm0, %v9844_v62 }
  0xf1   :  { %3760 = vmatmul.mubr.bf16.gmra.mrb[88].mxu1 %v9825_v59 }
  0xf2   :  { %3767 = vmatprep.mubr.bf16.mxu1 %v9828_v60 }
  0xf6   :  { %4849 = vmatmul.mubr.bf16.gmra.mrb[104].mxu0 %v9848_v1 }
  0xf7   :  { %7770 = vmatprep.mubr.msk.bf16.mxu0 %vm3162_vm0, %v9850_v2 }
  0xf9   :  { %3768 = vmatmul.mubr.bf16.gmra.mrb[92].mxu1 %v9831_v63  ;;  %v4642_v5 = vpop.f32.mrb[0].mxu0 }
  0xfa   :  { %3775 = vmatprep.mubr.bf16.mxu1 %v9834_v0  ;;  %v4644_v6 = vpop.f32.mrb[1].mxu0 }
  0xfb   :  { %v4645_v8 = vpop.f32.mrb[2].mxu0 }
  0xfc   :  { %v4647_v10 = vpop.f32.mrb[3].mxu0 }
  0xfe   :  { %4857 = vmatmul.mubr.bf16.gmra.mrb[108].mxu0 %v9854_v7  ;;  %v9870_v7 = vld [vmem:[%s13505_s0 + $0x3c4] ss:$16 sps:$4 sm:$0xff]  }
  0xff   :  { %7771 = vmatprep.mubr.msk.bf16.mxu0 %vm3162_vm0, %v9856_v9 }
 0x101   :  { %3776 = vmatmul.mubr.bf16.gmra.mrb[96].mxu1 %v9837_v3  ;;  %v4650_v13 = vpop.f32.mrb[4].mxu0 }
 0x102   :  { %3783 = vmatprep.mubr.bf16.mxu1 %v9840_v4  ;;  %v4652_v14 = vpop.f32.mrb[5].mxu0 }
 0x103   :  { %v4653_v16 = vpop.f32.mrb[6].mxu0 }
 0x104   :  { %v4655_v18 = vpop.f32.mrb[7].mxu0 }
 0x106   :  { %4865 = vmatmul.mubr.bf16.gmra.mrb[112].mxu0 %v9860_v15 }
 0x107   :  { %7772 = vmatprep.mubr.msk.bf16.mxu0 %vm3162_vm0, %v9862_v17 }
 0x109   :  { %3784 = vmatmul.mubr.bf16.gmra.mrb[100].mxu1 %v9843_v11  ;;  %v10954_v21 = vpop.f32.mrb[8].mxu0 }
 0x10a   :  { %3791 = vmatprep.mubr.bf16.mxu1 %v9846_v12  ;;  %v4660_v22 = vpop.f32.mrb[9].mxu0 }
 0x10b   :  { %v10959_v24 = vpop.f32.mrb[10].mxu0 }
 0x10c   :  { %v4663_v27 = vpop.f32.mrb[11].mxu0 }
 0x10d   :  { %v9876_v27 = vld [vmem:[%s13505_s0 + $0x3e4] ss:$16 sps:$4 sm:$0xff]  }
 0x10e   :  { %4873 = vmatmul.mubr.bf16.gmra.mrb[116].mxu0 %v9866_v23 }
 0x10f   :  { %7773 = vmatprep.mubr.msk.bf16.mxu0 %vm3162_vm0, %v9868_v25 }
 0x111   :  { %3792 = vmatmul.mubr.bf16.gmra.mrb[104].mxu1 %v9849_v19  ;;  %v10978_v37 = vpop.f32.mrb[12].mxu0 }
 0x112   :  { %3799 = vmatprep.mubr.bf16.mxu1 %v9852_v20  ;;  %v4668_v38 = vpop.f32.mrb[13].mxu0 }
 0x113   :  { %v10983_v41 = vpop.f32.mrb[14].mxu0 }
 0x114   :  { %v3585_v28 = vpop.f32.mrb[0].mxu1  ;;  %v4671_v43 = vpop.f32.mrb[15].mxu0 }
 0x115   :  { %v3586_v29 = vadd.f32 %v10967_v26, %v3585_v28  ;;  %v3587_v30 = vpop.f32.mrb[1].mxu1 }
 0x116   :  { %v3588_v32 = vpop.f32.mrb[2].mxu1  ;;  %4881 = vmatmul.mubr.bf16.gmra.mrb[120].mxu0 %v9872_v39 }
 0x117   :  { %v4643_v34 = vadd.f32 %v4642_v5, %v3586_v29  ;;  %v3589_v35 = vadd.f32 %v10967_v26, %v3588_v32  ;;  %v3590_v36 = vpop.f32.mrb[3].mxu1  ;;  %7774 = vmatprep.mubr.msk.bf16.mxu0 %vm3162_vm0, %v9874_v42  ;;  %v9867_v5 = vld [vmem:[%s13505_s0 + $0x3a0] ss:$16 sps:$4 sm:$0xff]  }
 0x118   :  { %v9892_v36 = vld [vmem:[%s13505_s0 + $0x44c] ss:$16 sps:$4 sm:$0xff]  }
 0x119   :  { %v4646_v40 = vadd.f32 %v4645_v8, %v3589_v35  ;;  %3800 = vmatmul.mubr.bf16.gmra.mrb[108].mxu1 %v9855_v31  ;;  %v5665_v44 = vmax.f32 %v4643_v34, 0.0  ;;  %v11000_v56 = vpop.f32.mrb[16].mxu0 }
 0x11a   :  { %3807 = vmatprep.mubr.bf16.mxu1 %v9858_v33  ;;  %v4676_v57 = vpop.f32.mrb[17].mxu0  ;;  %v9890_v33 = vld [vmem:[%s13505_s0 + $0x428] ss:$16 sps:$4 sm:$0xff]  }
 0x11b   :  { %v5666_v45 = vmax.f32 %v4646_v40, 0.0  ;;  %v11005_v60 = vpop.f32.mrb[18].mxu0 }
 0x11c   :  { %v3593_v46 = vpop.f32.mrb[4].mxu1  ;;  %v4679_v62 = vpop.f32.mrb[19].mxu0 }
 0x11d   :  { %v8386_v47 = vpack.c.bf16 %v5666_v45, %v5665_v44  ;;  %v3594_v48 = vadd.f32 %v10967_v26, %v3593_v46  ;;  %v3595_v49 = vpop.f32.mrb[5].mxu1  ;;  %v9882_v46 = vld [vmem:[%s13505_s0 + $0x404] ss:$16 sps:$4 sm:$0xff]  }
 0x11e   :  { %v3596_v51 = vpop.f32.mrb[6].mxu1  ;;  %4889 = vmatmul.mubr.bf16.gmra.mrb[124].mxu0 %v9878_v58 }
 0x11f   :  { %8387 = vst [vmem:[%s13507_s3] sm:$0xff] %v8386_v47   ;;  %v4651_v53 = vadd.f32 %v4650_v13, %v3594_v48  ;;  %v3597_v54 = vadd.f32 %v10967_v26, %v3596_v51  ;;  %v3598_v55 = vpop.f32.mrb[7].mxu1  ;;  %7775 = vmatprep.mubr.msk.bf16.mxu0 %vm3162_vm0, %v9880_v61  ;;  %v9884_v13 = vld [vmem:[%s13505_s0 + $0x408] ss:$16 sps:$4 sm:$0xff]  }
 0x120   :  { %v9898_v55 = vld [vmem:[%s13505_s0 + $0x46c] ss:$16 sps:$4 sm:$0xff]  }
 0x121   :  { %v4654_v59 = vadd.f32 %v4653_v16, %v3597_v54  ;;  %3808 = vmatmul.mubr.bf16.gmra.mrb[112].mxu1 %v9861_v50  ;;  %v5667_v63 = vmax.f32 %v4651_v53, 0.0  ;;  %v11023_v11 = vpop.f32.mrb[20].mxu0  ;;  %v9886_v16 = vld [vmem:[%s13505_s0 + $0x42c] ss:$16 sps:$4 sm:$0xff]  }
 0x122   :  { %3815 = vmatprep.mubr.bf16.mxu1 %v9864_v52  ;;  %v4684_v12 = vpop.f32.mrb[21].mxu0  ;;  %v9896_v52 = vld [vmem:[%s13505_s0 + $0x448] ss:$16 sps:$4 sm:$0xff]  }
 0x123   :  { %v5668_v0 = vmax.f32 %v4654_v59, 0.0  ;;  %v11029_v15 = vpop.f32.mrb[22].mxu0 }
 0x124   :  { %v3601_v1 = vpop.f32.mrb[8].mxu1  ;;  %v4687_v17 = vpop.f32.mrb[23].mxu0 }
 0x125   :  { %v8391_v2 = vpack.c.bf16 %v5668_v0, %v5667_v63  ;;  %v3602_v3 = vadd.f32 %v10967_v26, %v3601_v1  ;;  %v3603_v4 = vpop.f32.mrb[9].mxu1  ;;  %v9888_v1 = vld [vmem:[%s13505_s0 + $0x424] ss:$16 sps:$4 sm:$0xff]  }
 0x126   :  { %v3604_v6 = vpop.f32.mrb[10].mxu1  ;;  %4897 = vmatmul.mubr.bf16.gmra.mrb[128].mxu0 %v9884_v13 }
 0x127   :  { %9023 = vst [vmem:[%s13507_s3 + $0x8] sm:$0xff] %v8391_v2   ;;  %v4659_v8 = vadd.f32 %v10954_v21, %v3602_v3  ;;  %v3605_v9 = vadd.f32 %v10967_v26, %v3604_v6  ;;  %v3606_v10 = vpop.f32.mrb[11].mxu1  ;;  %7776 = vmatprep.mubr.msk.bf16.mxu0 %vm3162_vm0, %v9886_v16 }
 0x128   :  { %v9904_v10 = vld [vmem:[%s13505_s0 + $0x48c] ss:$16 sps:$4 sm:$0xff]  }
 0x129   :  { %v4662_v14 = vadd.f32 %v10959_v24, %v3605_v9  ;;  %3816 = vmatmul.mubr.bf16.gmra.mrb[116].mxu1 %v9867_v5  ;;  %v5669_v18 = vmax.f32 %v4659_v8, 0.0  ;;  %v9873_v24 = vld [vmem:[%s13505_s0 + $0x3c0] ss:$16 sps:$4 sm:$0xff]   ;;  %v11047_v31 = vpop.f32.mrb[24].mxu0 }
 0x12a   :  { %3823 = vmatprep.mubr.bf16.mxu1 %v9870_v7  ;;  %v4692_v32 = vpop.f32.mrb[25].mxu0  ;;  %v9902_v7 = vld [vmem:[%s13505_s0 + $0x468] ss:$16 sps:$4 sm:$0xff]  }
 0x12b   :  { %v5670_v19 = vmax.f32 %v4662_v14, 0.0  ;;  %v11053_v35 = vpop.f32.mrb[26].mxu0 }
 0x12c   :  { %v3609_v20 = vpop.f32.mrb[12].mxu1 }
 0x12d   :  { %v8396_v21 = vpack.c.bf16 %v5670_v19, %v5669_v18  ;;  %v3610_v22 = vadd.f32 %v10967_v26, %v3609_v20  ;;  %v3611_v23 = vpop.f32.mrb[13].mxu1  ;;  %v9894_v20 = vld [vmem:[%s13505_s0 + $0x444] ss:$16 sps:$4 sm:$0xff]  }
 0x12e   :  { %v3612_v25 = vpop.f32.mrb[14].mxu1  ;;  %4905 = vmatmul.mubr.bf16.gmra.mrb[132].mxu0 %v9890_v33 }
 0x12f   :  { %9024 = vst [vmem:[%s13507_s3 + $0x10] sm:$0xff] %v8396_v21   ;;  %v4667_v28 = vadd.f32 %v10978_v37, %v3610_v22  ;;  %v3613_v29 = vadd.f32 %v10967_v26, %v3612_v25  ;;  %v3614_v30 = vpop.f32.mrb[15].mxu1  ;;  %v4695_v37 = vpop.f32.mrb[27].mxu0  ;;  %7777 = vmatprep.mubr.msk.bf16.mxu0 %vm3162_vm0, %v9892_v36 }
 0x130   :  { %v9910_v30 = vld [vmem:[%s13505_s0 + $0x4ac] ss:$16 sps:$4 sm:$0xff]  }
 0x131   :  { %v4670_v34 = vadd.f32 %v10983_v41, %v3613_v29  ;;  %3824 = vmatmul.mubr.bf16.gmra.mrb[120].mxu1 %v9873_v24  ;;  %v5671_v38 = vmax.f32 %v4667_v28, 0.0  ;;  %v9879_v41 = vld [vmem:[%s13505_s0 + $0x3e0] ss:$16 sps:$4 sm:$0xff]   ;;  %v11071_v50 = vpop.f32.mrb[28].mxu0 }
 0x132   :  { %3831 = vmatprep.mubr.bf16.mxu1 %v9876_v27  ;;  %v4700_v51 = vpop.f32.mrb[29].mxu0  ;;  %v9908_v27 = vld [vmem:[%s13505_s0 + $0x488] ss:$16 sps:$4 sm:$0xff]  }
 0x133   :  { %v5672_v39 = vmax.f32 %v4670_v34, 0.0  ;;  %v11077_v54 = vpop.f32.mrb[30].mxu0 }
 0x134   :  { %v3617_v40 = vpop.f32.mrb[16].mxu1 }
 0x135   :  { %v8401_v42 = vpack.c.bf16 %v5672_v39, %v5671_v38  ;;  %v3618_v43 = vadd.f32 %v10967_v26, %v3617_v40  ;;  %v3619_v44 = vpop.f32.mrb[17].mxu1  ;;  %v9900_v40 = vld [vmem:[%s13505_s0 + $0x464] ss:$16 sps:$4 sm:$0xff]  }
 0x136   :  { %v3620_v45 = vpop.f32.mrb[18].mxu1  ;;  %4913 = vmatmul.mubr.bf16.gmra.mrb[136].mxu0 %v9896_v52 }
 0x137   :  { %9025 = vst [vmem:[%s13507_s3 + $0x18] sm:$0xff] %v8401_v42   ;;  %v4675_v47 = vadd.f32 %v11000_v56, %v3618_v43  ;;  %v3621_v48 = vadd.f32 %v10967_v26, %v3620_v45  ;;  %v3622_v49 = vpop.f32.mrb[19].mxu1  ;;  %v4703_v56 = vpop.f32.mrb[31].mxu0  ;;  %7778 = vmatprep.mubr.msk.bf16.mxu0 %vm3162_vm0, %v9898_v55 }
 0x138   :  { %v9916_v49 = vld [vmem:[%s13505_s0 + $0x4cc] ss:$16 sps:$4 sm:$0xff]  }
 0x139   :  { %v4678_v53 = vadd.f32 %v11005_v60, %v3621_v48  ;;  %3832 = vmatmul.mubr.bf16.gmra.mrb[124].mxu1 %v9879_v41  ;;  %v5673_v57 = vmax.f32 %v4675_v47, 0.0  ;;  %v9885_v60 = vld [vmem:[%s13505_s0 + $0x400] ss:$16 sps:$4 sm:$0xff]   ;;  %v11095_v5 = vpop.f32.mrb[32].mxu0 }
 0x13a   :  { %3839 = vmatprep.mubr.bf16.mxu1 %v9882_v46  ;;  %v4708_v6 = vpop.f32.mrb[33].mxu0  ;;  %v9914_v46 = vld [vmem:[%s13505_s0 + $0x4a8] ss:$16 sps:$4 sm:$0xff]  }
 0x13b   :  { %v5674_v58 = vmax.f32 %v4678_v53, 0.0  ;;  %v11101_v9 = vpop.f32.mrb[34].mxu0 }
 0x13c   :  { %v3625_v59 = vpop.f32.mrb[20].mxu1 }
 0x13d   :  { %v8406_v61 = vpack.c.bf16 %v5674_v58, %v5673_v57  ;;  %v3626_v62 = vadd.f32 %v10967_v26, %v3625_v59  ;;  %v3627_v63 = vpop.f32.mrb[21].mxu1  ;;  %v9906_v59 = vld [vmem:[%s13505_s0 + $0x484] ss:$16 sps:$4 sm:$0xff]  }
 0x13e   :  { %v3628_v0 = vpop.f32.mrb[22].mxu1  ;;  %4921 = vmatmul.mubr.bf16.gmra.mrb[140].mxu0 %v9902_v7 }
 0x13f   :  { %9026 = vst [vmem:[%s13507_s3 + $0x20] sm:$0xff] %v8406_v61   ;;  %v4683_v2 = vadd.f32 %v11023_v11, %v3626_v62  ;;  %v3629_v3 = vadd.f32 %v10967_v26, %v3628_v0  ;;  %v3630_v4 = vpop.f32.mrb[23].mxu1  ;;  %v4711_v11 = vpop.f32.mrb[35].mxu0  ;;  %7779 = vmatprep.mubr.msk.bf16.mxu0 %vm3162_vm0, %v9904_v10 }
 0x140   :  { %v9922_v4 = vld [vmem:[%s13505_s0 + $0x4ec] ss:$16 sps:$4 sm:$0xff]  }
 0x141   :  { %v4686_v8 = vadd.f32 %v11029_v15, %v3629_v3  ;;  %3840 = vmatmul.mubr.bf16.gmra.mrb[128].mxu1 %v9885_v60  ;;  %v5675_v12 = vmax.f32 %v4683_v2, 0.0  ;;  %v9891_v15 = vld [vmem:[%s13505_s0 + $0x420] ss:$16 sps:$4 sm:$0xff]   ;;  %v11119_v24 = vpop.f32.mrb[36].mxu0 }
 0x142   :  { %3847 = vmatprep.mubr.bf16.mxu1 %v9888_v1  ;;  %v4716_v25 = vpop.f32.mrb[37].mxu0  ;;  %v9920_v1 = vld [vmem:[%s13505_s0 + $0x4c8] ss:$16 sps:$4 sm:$0xff]  }
 0x143   :  { %v5676_v13 = vmax.f32 %v4686_v8, 0.0  ;;  %v11125_v29 = vpop.f32.mrb[38].mxu0 }
 0x144   :  { %v3633_v14 = vpop.f32.mrb[24].mxu1 }
 0x145   :  { %v8411_v16 = vpack.c.bf16 %v5676_v13, %v5675_v12  ;;  %v3634_v17 = vadd.f32 %v10967_v26, %v3633_v14  ;;  %v3635_v18 = vpop.f32.mrb[25].mxu1  ;;  %v9912_v14 = vld [vmem:[%s13505_s0 + $0x4a4] ss:$16 sps:$4 sm:$0xff]  }
 0x146   :  { %v3636_v19 = vpop.f32.mrb[26].mxu1  ;;  %4929 = vmatmul.mubr.bf16.gmra.mrb[144].mxu0 %v9908_v27 }
 0x147   :  { %9027 = vst [vmem:[%s13507_s3 + $0x28] sm:$0xff] %v8411_v16   ;;  %v4691_v21 = vadd.f32 %v11047_v31, %v3634_v17  ;;  %v3637_v22 = vadd.f32 %v10967_v26, %v3636_v19  ;;  %v3638_v23 = vpop.f32.mrb[27].mxu1  ;;  %v4719_v31 = vpop.f32.mrb[39].mxu0  ;;  %7780 = vmatprep.mubr.msk.bf16.mxu0 %vm3162_vm0, %v9910_v30 }
 0x148   :  { %v9928_v23 = vld [vmem:[%s13505_s0 + $0x50c] ss:$16 sps:$4 sm:$0xff]  }
 0x149   :  { %v4694_v28 = vadd.f32 %v11053_v35, %v3637_v22  ;;  %3848 = vmatmul.mubr.bf16.gmra.mrb[132].mxu1 %v9891_v15  ;;  %v5677_v32 = vmax.f32 %v4691_v21, 0.0  ;;  %v9897_v35 = vld [vmem:[%s13505_s0 + $0x440] ss:$16 sps:$4 sm:$0xff]   ;;  %v11143_v41 = vpop.f32.mrb[40].mxu0 }
 0x14a   :  { %3855 = vmatprep.mubr.bf16.mxu1 %v9894_v20  ;;  %v4724_v45 = vpop.f32.mrb[41].mxu0  ;;  %v9926_v20 = vld [vmem:[%s13505_s0 + $0x4e8] ss:$16 sps:$4 sm:$0xff]  }
 0x14b   :  { %v5678_v33 = vmax.f32 %v4694_v28, 0.0  ;;  %v11149_v48 = vpop.f32.mrb[42].mxu0 }
 0x14c   :  { %v3641_v34 = vpop.f32.mrb[28].mxu1 }
 0x14d   :  { %v8416_v36 = vpack.c.bf16 %v5678_v33, %v5677_v32  ;;  %v3642_v37 = vadd.f32 %v10967_v26, %v3641_v34  ;;  %v3643_v38 = vpop.f32.mrb[29].mxu1  ;;  %v9918_v34 = vld [vmem:[%s13505_s0 + $0x4c4] ss:$16 sps:$4 sm:$0xff]  }
 0x14e   :  { %v3644_v39 = vpop.f32.mrb[30].mxu1  ;;  %4937 = vmatmul.mubr.bf16.gmra.mrb[148].mxu0 %v9914_v46 }
 0x14f   :  { %9028 = vst [vmem:[%s13507_s3 + $0x30] sm:$0xff] %v8416_v36   ;;  %v4699_v42 = vadd.f32 %v11071_v50, %v3642_v37  ;;  %v3645_v43 = vadd.f32 %v10967_v26, %v3644_v39  ;;  %v3646_v44 = vpop.f32.mrb[31].mxu1  ;;  %v4727_v50 = vpop.f32.mrb[43].mxu0  ;;  %7781 = vmatprep.mubr.msk.bf16.mxu0 %vm3162_vm0, %v9916_v49 }
 0x150   :  { %v9934_v44 = vld [vmem:[%s13505_s0 + $0x52c] ss:$16 sps:$4 sm:$0xff]  }
 0x151   :  { %v4702_v47 = vadd.f32 %v11077_v54, %v3645_v43  ;;  %3856 = vmatmul.mubr.bf16.gmra.mrb[136].mxu1 %v9897_v35  ;;  %v5679_v51 = vmax.f32 %v4699_v42, 0.0  ;;  %v9903_v54 = vld [vmem:[%s13505_s0 + $0x460] ss:$16 sps:$4 sm:$0xff]   ;;  %v11167_v60 = vpop.f32.mrb[44].mxu0 }
 0x152   :  { %3863 = vmatprep.mubr.bf16.mxu1 %v9900_v40  ;;  %v4732_v0 = vpop.f32.mrb[45].mxu0  ;;  %v9932_v40 = vld [vmem:[%s13505_s0 + $0x508] ss:$16 sps:$4 sm:$0xff]  }
 0x153   :  { %v5680_v52 = vmax.f32 %v4702_v47, 0.0  ;;  %v11173_v3 = vpop.f32.mrb[46].mxu0 }
 0x154   :  { %v3649_v53 = vpop.f32.mrb[32].mxu1 }
 0x155   :  { %v8421_v55 = vpack.c.bf16 %v5680_v52, %v5679_v51  ;;  %v3650_v56 = vadd.f32 %v10967_v26, %v3649_v53  ;;  %v3651_v57 = vpop.f32.mrb[33].mxu1  ;;  %v9924_v53 = vld [vmem:[%s13505_s0 + $0x4e4] ss:$16 sps:$4 sm:$0xff]  }
 0x156   :  { %v3652_v58 = vpop.f32.mrb[34].mxu1  ;;  %4945 = vmatmul.mubr.bf16.gmra.mrb[152].mxu0 %v9920_v1 }
 0x157   :  { %9029 = vst [vmem:[%s13507_s3 + $0x38] sm:$0xff] %v8421_v55   ;;  %v4707_v61 = vadd.f32 %v11095_v5, %v3650_v56  ;;  %v3653_v62 = vadd.f32 %v10967_v26, %v3652_v58  ;;  %v3654_v63 = vpop.f32.mrb[35].mxu1  ;;  %v4735_v5 = vpop.f32.mrb[47].mxu0  ;;  %7782 = vmatprep.mubr.msk.bf16.mxu0 %vm3162_vm0, %v9922_v4 }
 0x158   :  { %v9940_v63 = vld [vmem:[%s13505_s0 + $0x54c] ss:$16 sps:$4 sm:$0xff]  }
 0x159   :  { %v4710_v2 = vadd.f32 %v11101_v9, %v3653_v62  ;;  %3864 = vmatmul.mubr.bf16.gmra.mrb[140].mxu1 %v9903_v54  ;;  %v5681_v6 = vmax.f32 %v4707_v61, 0.0  ;;  %v9909_v9 = vld [vmem:[%s13505_s0 + $0x480] ss:$16 sps:$4 sm:$0xff]   ;;  %v11191_v15 = vpop.f32.mrb[48].mxu0 }
 0x15a   :  { %3871 = vmatprep.mubr.bf16.mxu1 %v9906_v59  ;;  %v4740_v19 = vpop.f32.mrb[49].mxu0  ;;  %v9938_v59 = vld [vmem:[%s13505_s0 + $0x528] ss:$16 sps:$4 sm:$0xff]  }
 0x15b   :  { %v5682_v7 = vmax.f32 %v4710_v2, 0.0  ;;  %v11197_v22 = vpop.f32.mrb[50].mxu0 }
 0x15c   :  { %v3657_v8 = vpop.f32.mrb[36].mxu1 }
 0x15d   :  { %v8426_v10 = vpack.c.bf16 %v5682_v7, %v5681_v6  ;;  %v3658_v11 = vadd.f32 %v10967_v26, %v3657_v8  ;;  %v3659_v12 = vpop.f32.mrb[37].mxu1  ;;  %v9930_v8 = vld [vmem:[%s13505_s0 + $0x504] ss:$16 sps:$4 sm:$0xff]  }
 0x15e   :  { %v3660_v13 = vpop.f32.mrb[38].mxu1  ;;  %4953 = vmatmul.mubr.bf16.gmra.mrb[156].mxu0 %v9926_v20 }
 0x15f   :  { %9030 = vst [vmem:[%s13507_s3 + $0x40] sm:$0xff] %v8426_v10   ;;  %v4715_v16 = vadd.f32 %v11119_v24, %v3658_v11  ;;  %v3661_v17 = vadd.f32 %v10967_v26, %v3660_v13  ;;  %v3662_v18 = vpop.f32.mrb[39].mxu1  ;;  %v4743_v24 = vpop.f32.mrb[51].mxu0  ;;  %7783 = vmatprep.mubr.msk.bf16.mxu0 %vm3162_vm0, %v9928_v23 }
 0x160   :  { %v9946_v18 = vld [vmem:[%s13505_s0 + $0x56c] ss:$16 sps:$4 sm:$0xff]  }
 0x161   :  { %v4718_v21 = vadd.f32 %v11125_v29, %v3661_v17  ;;  %3872 = vmatmul.mubr.bf16.gmra.mrb[144].mxu1 %v9909_v9  ;;  %v5683_v25 = vmax.f32 %v4715_v16, 0.0  ;;  %v9915_v29 = vld [vmem:[%s13505_s0 + $0x4a0] ss:$16 sps:$4 sm:$0xff]   ;;  %v11215_v35 = vpop.f32.mrb[52].mxu0 }
 0x162   :  { %3879 = vmatprep.mubr.bf16.mxu1 %v9912_v14  ;;  %v4748_v39 = vpop.f32.mrb[53].mxu0  ;;  %v9944_v14 = vld [vmem:[%s13505_s0 + $0x548] ss:$16 sps:$4 sm:$0xff]  }
 0x163   :  { %v5684_v27 = vmax.f32 %v4718_v21, 0.0  ;;  %v11221_v43 = vpop.f32.mrb[54].mxu0 }
 0x164   :  { %v3665_v28 = vpop.f32.mrb[40].mxu1 }
 0x165   :  { %v8431_v30 = vpack.c.bf16 %v5684_v27, %v5683_v25  ;;  %v3666_v31 = vadd.f32 %v10967_v26, %v3665_v28  ;;  %v3667_v32 = vpop.f32.mrb[41].mxu1  ;;  %v9936_v28 = vld [vmem:[%s13505_s0 + $0x524] ss:$16 sps:$4 sm:$0xff]  }
 0x166   :  { %v3668_v33 = vpop.f32.mrb[42].mxu1  ;;  %4961 = vmatmul.mubr.bf16.gmra.mrb[160].mxu0 %v9932_v40 }
 0x167   :  { %9031 = vst [vmem:[%s13507_s3 + $0x48] sm:$0xff] %v8431_v30   ;;  %v4723_v36 = vadd.f32 %v11143_v41, %v3666_v31  ;;  %v3669_v37 = vadd.f32 %v10967_v26, %v3668_v33  ;;  %v3670_v38 = vpop.f32.mrb[43].mxu1  ;;  %v4751_v41 = vpop.f32.mrb[55].mxu0  ;;  %7784 = vmatprep.mubr.msk.bf16.mxu0 %vm3162_vm0, %v9934_v44 }
 0x168   :  { %v9952_v38 = vld [vmem:[%s13505_s0 + $0x58c] ss:$16 sps:$4 sm:$0xff]  }
 0x169   :  { %v4726_v42 = vadd.f32 %v11149_v48, %v3669_v37  ;;  %3880 = vmatmul.mubr.bf16.gmra.mrb[148].mxu1 %v9915_v29  ;;  %v5685_v45 = vmax.f32 %v4723_v36, 0.0  ;;  %v9921_v48 = vld [vmem:[%s13505_s0 + $0x4c0] ss:$16 sps:$4 sm:$0xff]   ;;  %v11239_v54 = vpop.f32.mrb[56].mxu0 }
 0x16a   :  { %3887 = vmatprep.mubr.bf16.mxu1 %v9918_v34  ;;  %v4756_v58 = vpop.f32.mrb[57].mxu0  ;;  %v9950_v34 = vld [vmem:[%s13505_s0 + $0x568] ss:$16 sps:$4 sm:$0xff]  }
 0x16b   :  { %v5686_v46 = vmax.f32 %v4726_v42, 0.0  ;;  %v11245_v62 = vpop.f32.mrb[58].mxu0 }
 0x16c   :  { %v3673_v47 = vpop.f32.mrb[44].mxu1 }
 0x16d   :  { %v8436_v49 = vpack.c.bf16 %v5686_v46, %v5685_v45  ;;  %v3674_v50 = vadd.f32 %v10967_v26, %v3673_v47  ;;  %v3675_v51 = vpop.f32.mrb[45].mxu1  ;;  %v9942_v47 = vld [vmem:[%s13505_s0 + $0x544] ss:$16 sps:$4 sm:$0xff]  }
 0x16e   :  { %v3676_v52 = vpop.f32.mrb[46].mxu1  ;;  %4969 = vmatmul.mubr.bf16.gmra.mrb[164].mxu0 %v9938_v59 }
 0x16f   :  { %9032 = vst [vmem:[%s13507_s3 + $0x50] sm:$0xff] %v8436_v49   ;;  %v4731_v55 = vadd.f32 %v11167_v60, %v3674_v50  ;;  %v3677_v56 = vadd.f32 %v10967_v26, %v3676_v52  ;;  %v3678_v57 = vpop.f32.mrb[47].mxu1  ;;  %v4759_v60 = vpop.f32.mrb[59].mxu0  ;;  %7785 = vmatprep.mubr.msk.bf16.mxu0 %vm3162_vm0, %v9940_v63 }
 0x170   :  { %v9958_v57 = vld [vmem:[%s13505_s0 + $0x5ac] ss:$16 sps:$4 sm:$0xff]  }
 0x171   :  { %v4734_v61 = vadd.f32 %v11173_v3, %v3677_v56  ;;  %3888 = vmatmul.mubr.bf16.gmra.mrb[152].mxu1 %v9921_v48  ;;  %v5687_v0 = vmax.f32 %v4731_v55, 0.0  ;;  %v9927_v3 = vld [vmem:[%s13505_s0 + $0x4e0] ss:$16 sps:$4 sm:$0xff]   ;;  %v11263_v9 = vpop.f32.mrb[60].mxu0 }
 0x172   :  { %3895 = vmatprep.mubr.bf16.mxu1 %v9924_v53  ;;  %v4764_v13 = vpop.f32.mrb[61].mxu0  ;;  %v9956_v53 = vld [vmem:[%s13505_s0 + $0x588] ss:$16 sps:$4 sm:$0xff]  }
 0x173   :  { %v5688_v1 = vmax.f32 %v4734_v61, 0.0  ;;  %v11269_v17 = vpop.f32.mrb[62].mxu0 }
 0x174   :  { %v3681_v2 = vpop.f32.mrb[48].mxu1 }
 0x175   :  { %v8441_v4 = vpack.c.bf16 %v5688_v1, %v5687_v0  ;;  %v3682_v5 = vadd.f32 %v10967_v26, %v3681_v2  ;;  %v3683_v6 = vpop.f32.mrb[49].mxu1  ;;  %v9948_v2 = vld [vmem:[%s13505_s0 + $0x564] ss:$16 sps:$4 sm:$0xff]  }
 0x176   :  { %v3684_v7 = vpop.f32.mrb[50].mxu1  ;;  %4977 = vmatmul.mubr.bf16.gmra.mrb[168].mxu0 %v9944_v14 }
 0x177   :  { %9033 = vst [vmem:[%s13507_s3 + $0x58] sm:$0xff] %v8441_v4   ;;  %v4739_v10 = vadd.f32 %v11191_v15, %v3682_v5  ;;  %v3685_v11 = vadd.f32 %v10967_v26, %v3684_v7  ;;  %v3686_v12 = vpop.f32.mrb[51].mxu1  ;;  %v4767_v15 = vpop.f32.mrb[63].mxu0  ;;  %7786 = vmatprep.mubr.msk.bf16.mxu0 %vm3162_vm0, %v9946_v18 }
 0x178   :  { %v9964_v12 = vld [vmem:[%s13505_s0 + $0x5cc] ss:$16 sps:$4 sm:$0xff]  }
 0x179   :  { %v4742_v16 = vadd.f32 %v11197_v22, %v3685_v11  ;;  %3896 = vmatmul.mubr.bf16.gmra.mrb[156].mxu1 %v9927_v3  ;;  %v5689_v19 = vmax.f32 %v4739_v10, 0.0  ;;  %v9933_v22 = vld [vmem:[%s13505_s0 + $0x500] ss:$16 sps:$4 sm:$0xff]   ;;  %v11287_v29 = vpop.f32.mrb[64].mxu0 }
 0x17a   :  { %3903 = vmatprep.mubr.bf16.mxu1 %v9930_v8  ;;  %v4772_v33 = vpop.f32.mrb[65].mxu0  ;;  %v9962_v8 = vld [vmem:[%s13505_s0 + $0x5a8] ss:$16 sps:$4 sm:$0xff]  }
 0x17b   :  { %v5690_v20 = vmax.f32 %v4742_v16, 0.0  ;;  %v11293_v37 = vpop.f32.mrb[66].mxu0 }
 0x17c   :  { %v3689_v21 = vpop.f32.mrb[52].mxu1 }
 0x17d   :  { %v8446_v23 = vpack.c.bf16 %v5690_v20, %v5689_v19  ;;  %v3690_v24 = vadd.f32 %v10967_v26, %v3689_v21  ;;  %v3691_v25 = vpop.f32.mrb[53].mxu1  ;;  %v9954_v21 = vld [vmem:[%s13505_s0 + $0x584] ss:$16 sps:$4 sm:$0xff]  }
 0x17e   :  { %v3692_v27 = vpop.f32.mrb[54].mxu1  ;;  %4985 = vmatmul.mubr.bf16.gmra.mrb[172].mxu0 %v9950_v34 }
 0x17f   :  { %9034 = vst [vmem:[%s13507_s3 + $0x60] sm:$0xff] %v8446_v23   ;;  %v4747_v30 = vadd.f32 %v11215_v35, %v3690_v24  ;;  %v3693_v31 = vadd.f32 %v10967_v26, %v3692_v27  ;;  %v3694_v32 = vpop.f32.mrb[55].mxu1  ;;  %v4775_v35 = vpop.f32.mrb[67].mxu0  ;;  %7787 = vmatprep.mubr.msk.bf16.mxu0 %vm3162_vm0, %v9952_v38 }
 0x180   :  { %v9970_v32 = vld [vmem:[%s13505_s0 + $0x5ec] ss:$16 sps:$4 sm:$0xff]  }
 0x181   :  { %v4750_v36 = vadd.f32 %v11221_v43, %v3693_v31  ;;  %3904 = vmatmul.mubr.bf16.gmra.mrb[160].mxu1 %v9933_v22  ;;  %v5691_v39 = vmax.f32 %v4747_v30, 0.0  ;;  %v9939_v43 = vld [vmem:[%s13505_s0 + $0x520] ss:$16 sps:$4 sm:$0xff]   ;;  %v11311_v48 = vpop.f32.mrb[68].mxu0 }
 0x182   :  { %3911 = vmatprep.mubr.bf16.mxu1 %v9936_v28  ;;  %v4780_v52 = vpop.f32.mrb[69].mxu0  ;;  %v9968_v28 = vld [vmem:[%s13505_s0 + $0x5c8] ss:$16 sps:$4 sm:$0xff]  }
 0x183   :  { %v5692_v40 = vmax.f32 %v4750_v36, 0.0  ;;  %v11317_v56 = vpop.f32.mrb[70].mxu0 }
 0x184   :  { %v3697_v42 = vpop.f32.mrb[56].mxu1 }
 0x185   :  { %v8451_v44 = vpack.c.bf16 %v5692_v40, %v5691_v39  ;;  %v3698_v41 = vadd.f32 %v10967_v26, %v3697_v42  ;;  %v3699_v45 = vpop.f32.mrb[57].mxu1  ;;  %v9960_v42 = vld [vmem:[%s13505_s0 + $0x5a4] ss:$16 sps:$4 sm:$0xff]  }
 0x186   :  { %v3700_v46 = vpop.f32.mrb[58].mxu1  ;;  %4993 = vmatmul.mubr.bf16.gmra.mrb[176].mxu0 %v9956_v53 }
 0x187   :  { %9035 = vst [vmem:[%s13507_s3 + $0x68] sm:$0xff] %v8451_v44   ;;  %v4755_v49 = vadd.f32 %v11239_v54, %v3698_v41  ;;  %v3701_v50 = vadd.f32 %v10967_v26, %v3700_v46  ;;  %v3702_v51 = vpop.f32.mrb[59].mxu1  ;;  %v4783_v54 = vpop.f32.mrb[71].mxu0  ;;  %7788 = vmatprep.mubr.msk.bf16.mxu0 %vm3162_vm0, %v9958_v57 }
 0x188   :  { %v9976_v51 = vld [vmem:[%s13505_s0 + $0x60c] ss:$16 sps:$4 sm:$0xff]  }
 0x189   :  { %v4758_v55 = vadd.f32 %v11245_v62, %v3701_v50  ;;  %3912 = vmatmul.mubr.bf16.gmra.mrb[164].mxu1 %v9939_v43  ;;  %v5693_v58 = vmax.f32 %v4755_v49, 0.0  ;;  %v9945_v62 = vld [vmem:[%s13505_s0 + $0x540] ss:$16 sps:$4 sm:$0xff]   ;;  %v11335_v3 = vpop.f32.mrb[72].mxu0 }
 0x18a   :  { %3919 = vmatprep.mubr.bf16.mxu1 %v9942_v47  ;;  %v4788_v7 = vpop.f32.mrb[73].mxu0  ;;  %v9974_v47 = vld [vmem:[%s13505_s0 + $0x5e8] ss:$16 sps:$4 sm:$0xff]  }
 0x18b   :  { %v5694_v59 = vmax.f32 %v4758_v55, 0.0  ;;  %v11341_v11 = vpop.f32.mrb[74].mxu0 }
 0x18c   :  { %v3705_v61 = vpop.f32.mrb[60].mxu1 }
 0x18d   :  { %v8456_v63 = vpack.c.bf16 %v5694_v59, %v5693_v58  ;;  %v3706_v60 = vadd.f32 %v10967_v26, %v3705_v61  ;;  %v3707_v0 = vpop.f32.mrb[61].mxu1  ;;  %v9966_v61 = vld [vmem:[%s13505_s0 + $0x5c4] ss:$16 sps:$4 sm:$0xff]  }
 0x18e   :  { %v3708_v1 = vpop.f32.mrb[62].mxu1  ;;  %5001 = vmatmul.mubr.bf16.gmra.mrb[180].mxu0 %v9962_v8 }
 0x18f   :  { %9036 = vst [vmem:[%s13507_s3 + $0x70] sm:$0xff] %v8456_v63   ;;  %v4763_v4 = vadd.f32 %v11263_v9, %v3706_v60  ;;  %v3709_v5 = vadd.f32 %v10967_v26, %v3708_v1  ;;  %v3710_v6 = vpop.f32.mrb[63].mxu1  ;;  %v4791_v9 = vpop.f32.mrb[75].mxu0  ;;  %7789 = vmatprep.mubr.msk.bf16.mxu0 %vm3162_vm0, %v9964_v12 }
 0x190   :  { %v9982_v6 = vld [vmem:[%s13505_s0 + $0x62c] ss:$16 sps:$4 sm:$0xff]  }
 0x191   :  { %v4766_v10 = vadd.f32 %v11269_v17, %v3709_v5  ;;  %3920 = vmatmul.mubr.bf16.gmra.mrb[168].mxu1 %v9945_v62  ;;  %v5695_v13 = vmax.f32 %v4763_v4, 0.0  ;;  %v9951_v17 = vld [vmem:[%s13505_s0 + $0x560] ss:$16 sps:$4 sm:$0xff]   ;;  %v11359_v22 = vpop.f32.mrb[76].mxu0 }
 0x192   :  { %3927 = vmatprep.mubr.bf16.mxu1 %v9948_v2  ;;  %v4796_v27 = vpop.f32.mrb[77].mxu0  ;;  %v9980_v2 = vld [vmem:[%s13505_s0 + $0x608] ss:$16 sps:$4 sm:$0xff]  }
 0x193   :  { %v5696_v14 = vmax.f32 %v4766_v10, 0.0  ;;  %v11365_v31 = vpop.f32.mrb[78].mxu0 }
 0x194   :  { %v3713_v16 = vpop.f32.mrb[64].mxu1 }
 0x195   :  { %v8461_v18 = vpack.c.bf16 %v5696_v14, %v5695_v13  ;;  %v3714_v15 = vadd.f32 %v10967_v26, %v3713_v16  ;;  %v3715_v19 = vpop.f32.mrb[65].mxu1  ;;  %v9972_v16 = vld [vmem:[%s13505_s0 + $0x5e4] ss:$16 sps:$4 sm:$0xff]  }
 0x196   :  { %v3716_v20 = vpop.f32.mrb[66].mxu1  ;;  %5009 = vmatmul.mubr.bf16.gmra.mrb[184].mxu0 %v9968_v28 }
 0x197   :  { %9037 = vst [vmem:[%s13507_s3 + $0x78] sm:$0xff] %v8461_v18   ;;  %v4771_v23 = vadd.f32 %v11287_v29, %v3714_v15  ;;  %v3717_v24 = vadd.f32 %v10967_v26, %v3716_v20  ;;  %v3718_v25 = vpop.f32.mrb[67].mxu1  ;;  %v4799_v29 = vpop.f32.mrb[79].mxu0  ;;  %7790 = vmatprep.mubr.msk.bf16.mxu0 %vm3162_vm0, %v9970_v32 }
 0x198   :  { %v9988_v25 = vld [vmem:[%s13505_s0 + $0x64c] ss:$16 sps:$4 sm:$0xff]  }
 0x199   :  { %v4774_v30 = vadd.f32 %v11293_v37, %v3717_v24  ;;  %3928 = vmatmul.mubr.bf16.gmra.mrb[172].mxu1 %v9951_v17  ;;  %v5697_v33 = vmax.f32 %v4771_v23, 0.0  ;;  %v9957_v37 = vld [vmem:[%s13505_s0 + $0x580] ss:$16 sps:$4 sm:$0xff]   ;;  %v11383_v43 = vpop.f32.mrb[80].mxu0 }
 0x19a   :  { %3935 = vmatprep.mubr.bf16.mxu1 %v9954_v21  ;;  %v4804_v46 = vpop.f32.mrb[81].mxu0  ;;  %v9986_v21 = vld [vmem:[%s13505_s0 + $0x628] ss:$16 sps:$4 sm:$0xff]  }
 0x19b   :  { %v5698_v34 = vmax.f32 %v4774_v30, 0.0  ;;  %v11389_v50 = vpop.f32.mrb[82].mxu0 }
 0x19c   :  { %v3721_v36 = vpop.f32.mrb[68].mxu1 }
 0x19d   :  { %v8466_v38 = vpack.c.bf16 %v5698_v34, %v5697_v33  ;;  %v3722_v35 = vadd.f32 %v10967_v26, %v3721_v36  ;;  %v3723_v39 = vpop.f32.mrb[69].mxu1  ;;  %v9978_v36 = vld [vmem:[%s13505_s0 + $0x604] ss:$16 sps:$4 sm:$0xff]  }
 0x19e   :  { %v3724_v40 = vpop.f32.mrb[70].mxu1  ;;  %5017 = vmatmul.mubr.bf16.gmra.mrb[188].mxu0 %v9974_v47 }
 0x19f   :  { %9038 = vst [vmem:[%s13507_s3 + $0x80] sm:$0xff] %v8466_v38   ;;  %v4779_v44 = vadd.f32 %v11311_v48, %v3722_v35  ;;  %v3725_v41 = vadd.f32 %v10967_v26, %v3724_v40  ;;  %v3726_v45 = vpop.f32.mrb[71].mxu1  ;;  %v4807_v48 = vpop.f32.mrb[83].mxu0  ;;  %7791 = vmatprep.mubr.msk.bf16.mxu0 %vm3162_vm0, %v9976_v51 }
 0x1a0   :  { %v9994_v45 = vld [vmem:[%s13505_s0 + $0x66c] ss:$16 sps:$4 sm:$0xff]  }
 0x1a1   :  { %v4782_v49 = vadd.f32 %v11317_v56, %v3725_v41  ;;  %3936 = vmatmul.mubr.bf16.gmra.mrb[176].mxu1 %v9957_v37  ;;  %v5699_v52 = vmax.f32 %v4779_v44, 0.0  ;;  %v9963_v56 = vld [vmem:[%s13505_s0 + $0x5a0] ss:$16 sps:$4 sm:$0xff]   ;;  %v11407_v62 = vpop.f32.mrb[84].mxu0 }
 0x1a2   :  { %3943 = vmatprep.mubr.bf16.mxu1 %v9960_v42  ;;  %v4812_v1 = vpop.f32.mrb[85].mxu0  ;;  %v9992_v42 = vld [vmem:[%s13505_s0 + $0x648] ss:$16 sps:$4 sm:$0xff]  }
 0x1a3   :  { %v5700_v53 = vmax.f32 %v4782_v49, 0.0  ;;  %v11413_v5 = vpop.f32.mrb[86].mxu0 }
 0x1a4   :  { %v3729_v55 = vpop.f32.mrb[72].mxu1 }
 0x1a5   :  { %v8471_v57 = vpack.c.bf16 %v5700_v53, %v5699_v52  ;;  %v3730_v54 = vadd.f32 %v10967_v26, %v3729_v55  ;;  %v3731_v58 = vpop.f32.mrb[73].mxu1  ;;  %v9984_v55 = vld [vmem:[%s13505_s0 + $0x624] ss:$16 sps:$4 sm:$0xff]  }
 0x1a6   :  { %v3732_v59 = vpop.f32.mrb[74].mxu1  ;;  %5025 = vmatmul.mubr.bf16.gmra.mrb[192].mxu0 %v9980_v2 }
 0x1a7   :  { %9039 = vst [vmem:[%s13507_s3 + $0x88] sm:$0xff] %v8471_v57   ;;  %v4787_v63 = vadd.f32 %v11335_v3, %v3730_v54  ;;  %v3733_v60 = vadd.f32 %v10967_v26, %v3732_v59  ;;  %v3734_v0 = vpop.f32.mrb[75].mxu1  ;;  %v4815_v3 = vpop.f32.mrb[87].mxu0  ;;  %7792 = vmatprep.mubr.msk.bf16.mxu0 %vm3162_vm0, %v9982_v6 }
 0x1a8   :  { %v10000_v0 = vld [vmem:[%s13505_s0 + $0x68c] ss:$16 sps:$4 sm:$0xff]  }
 0x1a9   :  { %v4790_v4 = vadd.f32 %v11341_v11, %v3733_v60  ;;  %3944 = vmatmul.mubr.bf16.gmra.mrb[180].mxu1 %v9963_v56  ;;  %v5701_v7 = vmax.f32 %v4787_v63, 0.0  ;;  %v9969_v11 = vld [vmem:[%s13505_s0 + $0x5c0] ss:$16 sps:$4 sm:$0xff]   ;;  %v11431_v17 = vpop.f32.mrb[88].mxu0 }
 0x1aa   :  { %3951 = vmatprep.mubr.bf16.mxu1 %v9966_v61  ;;  %v4820_v20 = vpop.f32.mrb[89].mxu0  ;;  %v9998_v61 = vld [vmem:[%s13505_s0 + $0x668] ss:$16 sps:$4 sm:$0xff]  }
 0x1ab   :  { %v5702_v8 = vmax.f32 %v4790_v4, 0.0  ;;  %v11437_v24 = vpop.f32.mrb[90].mxu0 }
 0x1ac   :  { %v3737_v10 = vpop.f32.mrb[76].mxu1 }
 0x1ad   :  { %v8476_v12 = vpack.c.bf16 %v5702_v8, %v5701_v7  ;;  %v3738_v9 = vadd.f32 %v10967_v26, %v3737_v10  ;;  %v3739_v13 = vpop.f32.mrb[77].mxu1  ;;  %v9990_v10 = vld [vmem:[%s13505_s0 + $0x644] ss:$16 sps:$4 sm:$0xff]  }
 0x1ae   :  { %v3740_v14 = vpop.f32.mrb[78].mxu1  ;;  %5033 = vmatmul.mubr.bf16.gmra.mrb[196].mxu0 %v9986_v21 }
 0x1af   :  { %9040 = vst [vmem:[%s13507_s3 + $0x90] sm:$0xff] %v8476_v12   ;;  %v4795_v18 = vadd.f32 %v11359_v22, %v3738_v9  ;;  %v3741_v15 = vadd.f32 %v10967_v26, %v3740_v14  ;;  %v3742_v19 = vpop.f32.mrb[79].mxu1  ;;  %v4823_v22 = vpop.f32.mrb[91].mxu0  ;;  %7793 = vmatprep.mubr.msk.bf16.mxu0 %vm3162_vm0, %v9988_v25 }
 0x1b0   :  { %v10006_v19 = vld [vmem:[%s13505_s0 + $0x6ac] ss:$16 sps:$4 sm:$0xff]  }
 0x1b1   :  { %v4798_v23 = vadd.f32 %v11365_v31, %v3741_v15  ;;  %3952 = vmatmul.mubr.bf16.gmra.mrb[184].mxu1 %v9969_v11  ;;  %v5703_v27 = vmax.f32 %v4795_v18, 0.0  ;;  %v9975_v31 = vld [vmem:[%s13505_s0 + $0x5e0] ss:$16 sps:$4 sm:$0xff]   ;;  %v11455_v37 = vpop.f32.mrb[92].mxu0 }
 0x1b2   :  { %3959 = vmatprep.mubr.bf16.mxu1 %v9972_v16  ;;  %v4828_v40 = vpop.f32.mrb[93].mxu0  ;;  %v10004_v16 = vld [vmem:[%s13505_s0 + $0x688] ss:$16 sps:$4 sm:$0xff]  }
 0x1b3   :  { %v5704_v28 = vmax.f32 %v4798_v23, 0.0  ;;  %v11461_v41 = vpop.f32.mrb[94].mxu0 }
 0x1b4   :  { %v3745_v30 = vpop.f32.mrb[80].mxu1 }
 0x1b5   :  { %v8481_v32 = vpack.c.bf16 %v5704_v28, %v5703_v27  ;;  %v3746_v29 = vadd.f32 %v10967_v26, %v3745_v30  ;;  %v3747_v33 = vpop.f32.mrb[81].mxu1  ;;  %v9996_v30 = vld [vmem:[%s13505_s0 + $0x664] ss:$16 sps:$4 sm:$0xff]  }
 0x1b6   :  { %v3748_v34 = vpop.f32.mrb[82].mxu1  ;;  %5041 = vmatmul.mubr.bf16.gmra.mrb[200].mxu0 %v9992_v42 }
 0x1b7   :  { %9041 = vst [vmem:[%s13507_s3 + $0x98] sm:$0xff] %v8481_v32   ;;  %v4803_v38 = vadd.f32 %v11383_v43, %v3746_v29  ;;  %v3749_v35 = vadd.f32 %v10967_v26, %v3748_v34  ;;  %v3750_v39 = vpop.f32.mrb[83].mxu1  ;;  %v4831_v43 = vpop.f32.mrb[95].mxu0  ;;  %7794 = vmatprep.mubr.msk.bf16.mxu0 %vm3162_vm0, %v9994_v45 }
 0x1b8   :  { %v10012_v39 = vld [vmem:[%s13505_s0 + $0x6cc] ss:$16 sps:$4 sm:$0xff]  }
 0x1b9   :  { %v4806_v44 = vadd.f32 %v11389_v50, %v3749_v35  ;;  %3960 = vmatmul.mubr.bf16.gmra.mrb[188].mxu1 %v9975_v31  ;;  %v5705_v46 = vmax.f32 %v4803_v38, 0.0  ;;  %v9981_v50 = vld [vmem:[%s13505_s0 + $0x600] ss:$16 sps:$4 sm:$0xff]   ;;  %v11484_v56 = vpop.f32.mrb[96].mxu0 }
 0x1ba   :  { %3967 = vmatprep.mubr.bf16.mxu1 %v9978_v36  ;;  %v4836_v59 = vpop.f32.mrb[97].mxu0  ;;  %v10010_v36 = vld [vmem:[%s13505_s0 + $0x6a8] ss:$16 sps:$4 sm:$0xff]  }
 0x1bb   :  { %v5706_v47 = vmax.f32 %v4806_v44, 0.0  ;;  %v11490_v60 = vpop.f32.mrb[98].mxu0 }
 0x1bc   :  { %v3753_v49 = vpop.f32.mrb[84].mxu1 }
 0x1bd   :  { %v8486_v51 = vpack.c.bf16 %v5706_v47, %v5705_v46  ;;  %v3754_v48 = vadd.f32 %v10967_v26, %v3753_v49  ;;  %v3755_v52 = vpop.f32.mrb[85].mxu1  ;;  %v11481_v26 = vld [vmem:[%s13506_s2] ss:$0 sm:$0xff]  ;;  %v10002_v49 = vld [vmem:[%s13505_s0 + $0x684] ss:$16 sps:$4 sm:$0xff]  }
 0x1be   :  { %v3756_v53 = vpop.f32.mrb[86].mxu1  ;;  %5049 = vmatmul.mubr.bf16.gmra.mrb[204].mxu0 %v9998_v61 }
 0x1bf   :  { %9042 = vst [vmem:[%s13507_s3 + $0xa0] sm:$0xff] %v8486_v51   ;;  %v4811_v57 = vadd.f32 %v11407_v62, %v3754_v48  ;;  %v3757_v54 = vadd.f32 %v11481_v26, %v3756_v53  ;;  %v3758_v58 = vpop.f32.mrb[87].mxu1  ;;  %v4839_v62 = vpop.f32.mrb[99].mxu0  ;;  %7795 = vmatprep.mubr.msk.bf16.mxu0 %vm3162_vm0, %v10000_v0 }
 0x1c0   :  { %v10018_v58 = vld [vmem:[%s13505_s0 + $0x6ec] ss:$16 sps:$4 sm:$0xff]  }
 0x1c1   :  { %v4814_v63 = vadd.f32 %v11413_v5, %v3757_v54  ;;  %3968 = vmatmul.mubr.bf16.gmra.mrb[192].mxu1 %v9981_v50  ;;  %v5707_v1 = vmax.f32 %v4811_v57, 0.0  ;;  %v9987_v5 = vld [vmem:[%s13505_s0 + $0x620] ss:$16 sps:$4 sm:$0xff]   ;;  %v11508_v11 = vpop.f32.mrb[100].mxu0 }
 0x1c2   :  { %3975 = vmatprep.mubr.bf16.mxu1 %v9984_v55  ;;  %v4844_v14 = vpop.f32.mrb[101].mxu0  ;;  %v10016_v55 = vld [vmem:[%s13505_s0 + $0x6c8] ss:$16 sps:$4 sm:$0xff]  }
 0x1c3   :  { %v5708_v2 = vmax.f32 %v4814_v63, 0.0  ;;  %v11514_v15 = vpop.f32.mrb[102].mxu0 }
 0x1c4   :  { %v3761_v4 = vpop.f32.mrb[88].mxu1 }
 0x1c5   :  { %v8491_v6 = vpack.c.bf16 %v5708_v2, %v5707_v1  ;;  %v3762_v3 = vadd.f32 %v11481_v26, %v3761_v4  ;;  %v3763_v7 = vpop.f32.mrb[89].mxu1  ;;  %v10008_v4 = vld [vmem:[%s13505_s0 + $0x6a4] ss:$16 sps:$4 sm:$0xff]  }
 0x1c6   :  { %v3764_v8 = vpop.f32.mrb[90].mxu1  ;;  %5057 = vmatmul.mubr.bf16.gmra.mrb[208].mxu0 %v10004_v16 }
 0x1c7   :  { %9043 = vst [vmem:[%s13507_s3 + $0xa8] sm:$0xff] %v8491_v6   ;;  %v4819_v12 = vadd.f32 %v11431_v17, %v3762_v3  ;;  %v3765_v9 = vadd.f32 %v11481_v26, %v3764_v8  ;;  %v3766_v13 = vpop.f32.mrb[91].mxu1  ;;  %v4847_v17 = vpop.f32.mrb[103].mxu0  ;;  %7796 = vmatprep.mubr.msk.bf16.mxu0 %vm3162_vm0, %v10006_v19 }
 0x1c8   :  { %v10024_v13 = vld [vmem:[%s13505_s0 + $0x70c] ss:$16 sps:$4 sm:$0xff]  }
 0x1c9   :  { %v4822_v18 = vadd.f32 %v11437_v24, %v3765_v9  ;;  %3976 = vmatmul.mubr.bf16.gmra.mrb[196].mxu1 %v9987_v5  ;;  %v5709_v20 = vmax.f32 %v4819_v12, 0.0  ;;  %v9993_v24 = vld [vmem:[%s13505_s0 + $0x640] ss:$16 sps:$4 sm:$0xff]   ;;  %v11532_v31 = vpop.f32.mrb[104].mxu0 }
 0x1ca   :  { %3983 = vmatprep.mubr.bf16.mxu1 %v9990_v10  ;;  %v4852_v34 = vpop.f32.mrb[105].mxu0  ;;  %v10022_v10 = vld [vmem:[%s13505_s0 + $0x6e8] ss:$16 sps:$4 sm:$0xff]  }
 0x1cb   :  { %v5710_v21 = vmax.f32 %v4822_v18, 0.0  ;;  %v11538_v35 = vpop.f32.mrb[106].mxu0 }
 0x1cc   :  { %v3769_v23 = vpop.f32.mrb[92].mxu1 }
 0x1cd   :  { %v8496_v25 = vpack.c.bf16 %v5710_v21, %v5709_v20  ;;  %v3770_v22 = vadd.f32 %v11481_v26, %v3769_v23  ;;  %v3771_v27 = vpop.f32.mrb[93].mxu1  ;;  %v10014_v23 = vld [vmem:[%s13505_s0 + $0x6c4] ss:$16 sps:$4 sm:$0xff]  }
 0x1ce   :  { %v3772_v28 = vpop.f32.mrb[94].mxu1  ;;  %5065 = vmatmul.mubr.bf16.gmra.mrb[212].mxu0 %v10010_v36 }
 0x1cf   :  { %9044 = vst [vmem:[%s13507_s3 + $0xb0] sm:$0xff] %v8496_v25   ;;  %v4827_v32 = vadd.f32 %v11455_v37, %v3770_v22  ;;  %v3773_v29 = vadd.f32 %v11481_v26, %v3772_v28  ;;  %v3774_v33 = vpop.f32.mrb[95].mxu1  ;;  %v4855_v37 = vpop.f32.mrb[107].mxu0  ;;  %7797 = vmatprep.mubr.msk.bf16.mxu0 %vm3162_vm0, %v10012_v39 }
 0x1d0   :  { %v10030_v33 = vld [vmem:[%s13505_s0 + $0x72c] ss:$16 sps:$4 sm:$0xff]  }
 0x1d1   :  { %v4830_v38 = vadd.f32 %v11461_v41, %v3773_v29  ;;  %3984 = vmatmul.mubr.bf16.gmra.mrb[200].mxu1 %v9993_v24  ;;  %v5711_v40 = vmax.f32 %v4827_v32, 0.0  ;;  %v9999_v41 = vld [vmem:[%s13505_s0 + $0x660] ss:$16 sps:$4 sm:$0xff]   ;;  %v11556_v50 = vpop.f32.mrb[108].mxu0 }
 0x1d2   :  { %3991 = vmatprep.mubr.bf16.mxu1 %v9996_v30  ;;  %v4860_v53 = vpop.f32.mrb[109].mxu0  ;;  %v10028_v30 = vld [vmem:[%s13505_s0 + $0x708] ss:$16 sps:$4 sm:$0xff]  }
 0x1d3   :  { %v5712_v42 = vmax.f32 %v4830_v38, 0.0  ;;  %v11562_v54 = vpop.f32.mrb[110].mxu0 }
 0x1d4   :  { %v3777_v44 = vpop.f32.mrb[96].mxu1 }
 0x1d5   :  { %v8501_v45 = vpack.c.bf16 %v5712_v42, %v5711_v40  ;;  %v3778_v43 = vadd.f32 %v11481_v26, %v3777_v44  ;;  %v3779_v46 = vpop.f32.mrb[97].mxu1  ;;  %v10020_v44 = vld [vmem:[%s13505_s0 + $0x6e4] ss:$16 sps:$4 sm:$0xff]  }
 0x1d6   :  { %v3780_v47 = vpop.f32.mrb[98].mxu1  ;;  %5073 = vmatmul.mubr.bf16.gmra.mrb[216].mxu0 %v10016_v55 }
 0x1d7   :  { %9045 = vst [vmem:[%s13507_s3 + $0xb8] sm:$0xff] %v8501_v45   ;;  %v4835_v51 = vadd.f32 %v11484_v56, %v3778_v43  ;;  %v3781_v48 = vadd.f32 %v11481_v26, %v3780_v47  ;;  %v3782_v52 = vpop.f32.mrb[99].mxu1  ;;  %v4863_v56 = vpop.f32.mrb[111].mxu0  ;;  %7798 = vmatprep.mubr.msk.bf16.mxu0 %vm3162_vm0, %v10018_v58 }
 0x1d8   :  { %v10036_v52 = vld [vmem:[%s13505_s0 + $0x74c] ss:$16 sps:$4 sm:$0xff]  }
 0x1d9   :  { %v4838_v57 = vadd.f32 %v11490_v60, %v3781_v48  ;;  %3992 = vmatmul.mubr.bf16.gmra.mrb[204].mxu1 %v9999_v41  ;;  %v5713_v59 = vmax.f32 %v4835_v51, 0.0  ;;  %v10005_v60 = vld [vmem:[%s13505_s0 + $0x680] ss:$16 sps:$4 sm:$0xff]   ;;  %v11580_v5 = vpop.f32.mrb[112].mxu0 }
 0x1da   :  { %3999 = vmatprep.mubr.bf16.mxu1 %v10002_v49  ;;  %v4868_v8 = vpop.f32.mrb[113].mxu0  ;;  %v10034_v49 = vld [vmem:[%s13505_s0 + $0x728] ss:$16 sps:$4 sm:$0xff]  }
 0x1db   :  { %v5714_v61 = vmax.f32 %v4838_v57, 0.0  ;;  %v11586_v9 = vpop.f32.mrb[114].mxu0 }
 0x1dc   :  { %v3785_v63 = vpop.f32.mrb[100].mxu1 }
 0x1dd   :  { %v8506_v0 = vpack.c.bf16 %v5714_v61, %v5713_v59  ;;  %v3786_v62 = vadd.f32 %v11481_v26, %v3785_v63  ;;  %v3787_v1 = vpop.f32.mrb[101].mxu1  ;;  %v10026_v63 = vld [vmem:[%s13505_s0 + $0x704] ss:$16 sps:$4 sm:$0xff]  }
 0x1de   :  { %v3788_v2 = vpop.f32.mrb[102].mxu1  ;;  %5081 = vmatmul.mubr.bf16.gmra.mrb[220].mxu0 %v10022_v10 }
 0x1df   :  { %9046 = vst [vmem:[%s13507_s3 + $0xc0] sm:$0xff] %v8506_v0   ;;  %v4843_v6 = vadd.f32 %v11508_v11, %v3786_v62  ;;  %v3789_v3 = vadd.f32 %v11481_v26, %v3788_v2  ;;  %v3790_v7 = vpop.f32.mrb[103].mxu1  ;;  %v4871_v11 = vpop.f32.mrb[115].mxu0  ;;  %7799 = vmatprep.mubr.msk.bf16.mxu0 %vm3162_vm0, %v10024_v13 }
 0x1e0   :  { %v10042_v7 = vld [vmem:[%s13505_s0 + $0x76c] ss:$16 sps:$4 sm:$0xff]  }
 0x1e1   :  { %v4846_v12 = vadd.f32 %v11514_v15, %v3789_v3  ;;  %4000 = vmatmul.mubr.bf16.gmra.mrb[208].mxu1 %v10005_v60  ;;  %v5715_v14 = vmax.f32 %v4843_v6, 0.0  ;;  %v10011_v15 = vld [vmem:[%s13505_s0 + $0x6a0] ss:$16 sps:$4 sm:$0xff]   ;;  %v11604_v24 = vpop.f32.mrb[116].mxu0 }
 0x1e2   :  { %4007 = vmatprep.mubr.bf16.mxu1 %v10008_v4  ;;  %v4876_v28 = vpop.f32.mrb[117].mxu0  ;;  %v10040_v4 = vld [vmem:[%s13505_s0 + $0x748] ss:$16 sps:$4 sm:$0xff]  }
 0x1e3   :  { %v5716_v16 = vmax.f32 %v4846_v12, 0.0  ;;  %v11610_v29 = vpop.f32.mrb[118].mxu0 }
 0x1e4   :  { %v3793_v18 = vpop.f32.mrb[104].mxu1 }
 0x1e5   :  { %v8511_v19 = vpack.c.bf16 %v5716_v16, %v5715_v14  ;;  %v3794_v17 = vadd.f32 %v11481_v26, %v3793_v18  ;;  %v3795_v20 = vpop.f32.mrb[105].mxu1  ;;  %v10032_v18 = vld [vmem:[%s13505_s0 + $0x724] ss:$16 sps:$4 sm:$0xff]  }
 0x1e6   :  { %v3796_v21 = vpop.f32.mrb[106].mxu1  ;;  %5089 = vmatmul.mubr.bf16.gmra.mrb[224].mxu0 %v10028_v30 }
 0x1e7   :  { %9047 = vst [vmem:[%s13507_s3 + $0xc8] sm:$0xff] %v8511_v19   ;;  %v4851_v25 = vadd.f32 %v11532_v31, %v3794_v17  ;;  %v3797_v22 = vadd.f32 %v11481_v26, %v3796_v21  ;;  %v3798_v27 = vpop.f32.mrb[107].mxu1  ;;  %v4879_v31 = vpop.f32.mrb[119].mxu0  ;;  %7800 = vmatprep.mubr.msk.bf16.mxu0 %vm3162_vm0, %v10030_v33 }
 0x1e8   :  { %v10048_v27 = vld [vmem:[%s13505_s0 + $0x78c] ss:$16 sps:$4 sm:$0xff]  }
 0x1e9   :  { %v4854_v32 = vadd.f32 %v11538_v35, %v3797_v22  ;;  %4008 = vmatmul.mubr.bf16.gmra.mrb[212].mxu1 %v10011_v15  ;;  %v5717_v34 = vmax.f32 %v4851_v25, 0.0  ;;  %v10017_v35 = vld [vmem:[%s13505_s0 + $0x6c0] ss:$16 sps:$4 sm:$0xff]   ;;  %v11628_v41 = vpop.f32.mrb[120].mxu0 }
 0x1ea   :  { %4015 = vmatprep.mubr.bf16.mxu1 %v10014_v23  ;;  %v4884_v47 = vpop.f32.mrb[121].mxu0  ;;  %v10046_v23 = vld [vmem:[%s13505_s0 + $0x768] ss:$16 sps:$4 sm:$0xff]  }
 0x1eb   :  { %v5718_v36 = vmax.f32 %v4854_v32, 0.0  ;;  %v11634_v48 = vpop.f32.mrb[122].mxu0 }
 0x1ec   :  { %v3801_v38 = vpop.f32.mrb[108].mxu1 }
 0x1ed   :  { %v8516_v39 = vpack.c.bf16 %v5718_v36, %v5717_v34  ;;  %v3802_v37 = vadd.f32 %v11481_v26, %v3801_v38  ;;  %v3803_v40 = vpop.f32.mrb[109].mxu1  ;;  %v10038_v38 = vld [vmem:[%s13505_s0 + $0x744] ss:$16 sps:$4 sm:$0xff]  }
 0x1ee   :  { %v3804_v42 = vpop.f32.mrb[110].mxu1  ;;  %5097 = vmatmul.mubr.bf16.gmra.mrb[228].mxu0 %v10034_v49 }
 0x1ef   :  { %9048 = vst [vmem:[%s13507_s3 + $0xd0] sm:$0xff] %v8516_v39   ;;  %v4859_v45 = vadd.f32 %v11556_v50, %v3802_v37  ;;  %v3805_v43 = vadd.f32 %v11481_v26, %v3804_v42  ;;  %v3806_v46 = vpop.f32.mrb[111].mxu1  ;;  %v4887_v50 = vpop.f32.mrb[123].mxu0  ;;  %7801 = vmatprep.mubr.msk.bf16.mxu0 %vm3162_vm0, %v10036_v52 }
 0x1f0   :  { %v10054_v46 = vld [vmem:[%s13505_s0 + $0x7ac] ss:$16 sps:$4 sm:$0xff]  }
 0x1f1   :  { %v4862_v51 = vadd.f32 %v11562_v54, %v3805_v43  ;;  %4016 = vmatmul.mubr.bf16.gmra.mrb[216].mxu1 %v10017_v35  ;;  %v5719_v53 = vmax.f32 %v4859_v45, 0.0  ;;  %v10023_v54 = vld [vmem:[%s13505_s0 + $0x6e0] ss:$16 sps:$4 sm:$0xff]   ;;  %v11652_v60 = vpop.f32.mrb[124].mxu0 }
 0x1f2   :  { %4023 = vmatprep.mubr.bf16.mxu1 %v10020_v44  ;;  %v4892_v2 = vpop.f32.mrb[125].mxu0  ;;  %v10052_v44 = vld [vmem:[%s13505_s0 + $0x788] ss:$16 sps:$4 sm:$0xff]  }
 0x1f3   :  { %v5720_v55 = vmax.f32 %v4862_v51, 0.0  ;;  %v11658_v3 = vpop.f32.mrb[126].mxu0 }
 0x1f4   :  { %v3809_v57 = vpop.f32.mrb[112].mxu1 }
 0x1f5   :  { %v8521_v58 = vpack.c.bf16 %v5720_v55, %v5719_v53  ;;  %v3810_v56 = vadd.f32 %v11481_v26, %v3809_v57  ;;  %v3811_v59 = vpop.f32.mrb[113].mxu1  ;;  %v10044_v57 = vld [vmem:[%s13505_s0 + $0x764] ss:$16 sps:$4 sm:$0xff]  }
 0x1f6   :  { %v3812_v61 = vpop.f32.mrb[114].mxu1  ;;  %5105 = vmatmul.mubr.bf16.gmra.mrb[232].mxu0 %v10040_v4 }
 0x1f7   :  { %9049 = vst [vmem:[%s13507_s3 + $0xd8] sm:$0xff] %v8521_v58   ;;  %v4867_v0 = vadd.f32 %v11580_v5, %v3810_v56  ;;  %v3813_v62 = vadd.f32 %v11481_v26, %v3812_v61  ;;  %v3814_v1 = vpop.f32.mrb[115].mxu1  ;;  %v4895_v5 = vpop.f32.mrb[127].mxu0  ;;  %7802 = vmatprep.mubr.msk.bf16.mxu0 %vm3162_vm0, %v10042_v7 }
 0x1f8   :  { %v10060_v1 = vld [vmem:[%s13505_s0 + $0x7cc] ss:$16 sps:$4 sm:$0xff]  }
 0x1f9   :  { %v4870_v6 = vadd.f32 %v11586_v9, %v3813_v62  ;;  %4024 = vmatmul.mubr.bf16.gmra.mrb[220].mxu1 %v10023_v54  ;;  %v5721_v8 = vmax.f32 %v4867_v0, 0.0  ;;  %v10029_v9 = vld [vmem:[%s13505_s0 + $0x700] ss:$16 sps:$4 sm:$0xff]   ;;  %v11676_v15 = vpop.f32.mrb[128].mxu0 }
 0x1fa   :  { %4031 = vmatprep.mubr.bf16.mxu1 %v10026_v63  ;;  %v4900_v21 = vpop.f32.mrb[129].mxu0  ;;  %v10058_v63 = vld [vmem:[%s13505_s0 + $0x7a8] ss:$16 sps:$4 sm:$0xff]  }
 0x1fb   :  { %v5722_v10 = vmax.f32 %v4870_v6, 0.0  ;;  %v11682_v22 = vpop.f32.mrb[130].mxu0 }
 0x1fc   :  { %v3817_v12 = vpop.f32.mrb[116].mxu1 }
 0x1fd   :  { %v8526_v13 = vpack.c.bf16 %v5722_v10, %v5721_v8  ;;  %v3818_v11 = vadd.f32 %v11481_v26, %v3817_v12  ;;  %v3819_v14 = vpop.f32.mrb[117].mxu1  ;;  %v10050_v12 = vld [vmem:[%s13505_s0 + $0x784] ss:$16 sps:$4 sm:$0xff]  }
 0x1fe   :  { %v3820_v16 = vpop.f32.mrb[118].mxu1  ;;  %5113 = vmatmul.mubr.bf16.gmra.mrb[236].mxu0 %v10046_v23 }
 0x1ff   :  { %9050 = vst [vmem:[%s13507_s3 + $0xe0] sm:$0xff] %v8526_v13   ;;  %v4875_v19 = vadd.f32 %v11604_v24, %v3818_v11  ;;  %v3821_v17 = vadd.f32 %v11481_v26, %v3820_v16  ;;  %v3822_v20 = vpop.f32.mrb[119].mxu1  ;;  %v4903_v24 = vpop.f32.mrb[131].mxu0  ;;  %7803 = vmatprep.mubr.msk.bf16.mxu0 %vm3162_vm0, %v10048_v27 }
 0x200   :  { %v10066_v20 = vld [vmem:[%s13505_s0 + $0x7ec] ss:$16 sps:$4 sm:$0xff]  }
 0x201   :  { %v4878_v25 = vadd.f32 %v11610_v29, %v3821_v17  ;;  %4032 = vmatmul.mubr.bf16.gmra.mrb[224].mxu1 %v10029_v9  ;;  %v5723_v28 = vmax.f32 %v4875_v19, 0.0  ;;  %v10035_v29 = vld [vmem:[%s13505_s0 + $0x720] ss:$16 sps:$4 sm:$0xff]   ;;  %v11700_v35 = vpop.f32.mrb[132].mxu0 }
 0x202   :  { %4039 = vmatprep.mubr.bf16.mxu1 %v10032_v18  ;;  %v4908_v42 = vpop.f32.mrb[133].mxu0  ;;  %v10064_v18 = vld [vmem:[%s13505_s0 + $0x7c8] ss:$16 sps:$4 sm:$0xff]  }
 0x203   :  { %v5724_v30 = vmax.f32 %v4878_v25, 0.0  ;;  %v11706_v43 = vpop.f32.mrb[134].mxu0 }
 0x204   :  { %v3825_v32 = vpop.f32.mrb[120].mxu1 }
 0x205   :  { %v8531_v33 = vpack.c.bf16 %v5724_v30, %v5723_v28  ;;  %v3826_v31 = vadd.f32 %v11481_v26, %v3825_v32  ;;  %v3827_v34 = vpop.f32.mrb[121].mxu1  ;;  %v10056_v32 = vld [vmem:[%s13505_s0 + $0x7a4] ss:$16 sps:$4 sm:$0xff]  }
 0x206   :  { %v3828_v36 = vpop.f32.mrb[122].mxu1  ;;  %5121 = vmatmul.mubr.bf16.gmra.mrb[240].mxu0 %v10052_v44 }
 0x207   :  { %9051 = vst [vmem:[%s13507_s3 + $0xe8] sm:$0xff] %v8531_v33   ;;  %v4883_v39 = vadd.f32 %v11628_v41, %v3826_v31  ;;  %v3829_v37 = vadd.f32 %v11481_v26, %v3828_v36  ;;  %v3830_v40 = vpop.f32.mrb[123].mxu1  ;;  %v4911_v41 = vpop.f32.mrb[135].mxu0  ;;  %7804 = vmatprep.mubr.msk.bf16.mxu0 %vm3162_vm0, %v10054_v46 }
 0x208   :  { %v10074_v40 = vld [vmem:[%s13505_s0 + $0x80c] ss:$16 sps:$4 sm:$0xff]  }
 0x209   :  { %v4886_v45 = vadd.f32 %v11634_v48, %v3829_v37  ;;  %4040 = vmatmul.mubr.bf16.gmra.mrb[228].mxu1 %v10035_v29  ;;  %v5725_v47 = vmax.f32 %v4883_v39, 0.0  ;;  %v10041_v48 = vld [vmem:[%s13505_s0 + $0x740] ss:$16 sps:$4 sm:$0xff]   ;;  %v11724_v54 = vpop.f32.mrb[136].mxu0 }
 0x20a   :  { %4047 = vmatprep.mubr.bf16.mxu1 %v10038_v38  ;;  %v4916_v61 = vpop.f32.mrb[137].mxu0  ;;  %v10070_v38 = vld [vmem:[%s13505_s0 + $0x7e8] ss:$16 sps:$4 sm:$0xff]  }
 0x20b   :  { %v5726_v49 = vmax.f32 %v4886_v45, 0.0  ;;  %v11730_v62 = vpop.f32.mrb[138].mxu0 }
 0x20c   :  { %v3833_v51 = vpop.f32.mrb[124].mxu1 }
 0x20d   :  { %v8536_v52 = vpack.c.bf16 %v5726_v49, %v5725_v47  ;;  %v3834_v50 = vadd.f32 %v11481_v26, %v3833_v51  ;;  %v3835_v53 = vpop.f32.mrb[125].mxu1  ;;  %v10062_v51 = vld [vmem:[%s13505_s0 + $0x7c4] ss:$16 sps:$4 sm:$0xff]  }
 0x20e   :  { %v3836_v55 = vpop.f32.mrb[126].mxu1  ;;  %5129 = vmatmul.mubr.bf16.gmra.mrb[244].mxu0 %v10058_v63 }
 0x20f   :  { %9052 = vst [vmem:[%s13507_s3 + $0xf0] sm:$0xff] %v8536_v52   ;;  %v4891_v58 = vadd.f32 %v11652_v60, %v3834_v50  ;;  %v3837_v56 = vadd.f32 %v11481_v26, %v3836_v55  ;;  %v3838_v59 = vpop.f32.mrb[127].mxu1  ;;  %v4919_v60 = vpop.f32.mrb[139].mxu0  ;;  %7805 = vmatprep.mubr.msk.bf16.mxu0 %vm3162_vm0, %v10060_v1 }
 0x210   :  { %v10080_v59 = vld [vmem:[%s13505_s0 + $0x82c] ss:$16 sps:$4 sm:$0xff]  }
 0x211   :  { %v4894_v0 = vadd.f32 %v11658_v3, %v3837_v56  ;;  %4048 = vmatmul.mubr.bf16.gmra.mrb[232].mxu1 %v10041_v48  ;;  %v5727_v2 = vmax.f32 %v4891_v58, 0.0  ;;  %v10047_v3 = vld [vmem:[%s13505_s0 + $0x760] ss:$16 sps:$4 sm:$0xff]   ;;  %v11748_v9 = vpop.f32.mrb[140].mxu0 }
 0x212   :  { %4055 = vmatprep.mubr.bf16.mxu1 %v10044_v57  ;;  %v4924_v16 = vpop.f32.mrb[141].mxu0  ;;  %v10072_v57 = vld [vmem:[%s13505_s0 + $0x808] ss:$16 sps:$4 sm:$0xff]  }
 0x213   :  { %v5728_v4 = vmax.f32 %v4894_v0, 0.0  ;;  %v11754_v17 = vpop.f32.mrb[142].mxu0 }
 0x214   :  { %v3841_v6 = vpop.f32.mrb[128].mxu1 }
 0x215   :  { %v8541_v7 = vpack.c.bf16 %v5728_v4, %v5727_v2  ;;  %v3842_v5 = vadd.f32 %v11481_v26, %v3841_v6  ;;  %v3843_v8 = vpop.f32.mrb[129].mxu1  ;;  %v10068_v6 = vld [vmem:[%s13505_s0 + $0x7e4] ss:$16 sps:$4 sm:$0xff]  }
 0x216   :  { %v3844_v10 = vpop.f32.mrb[130].mxu1  ;;  %5137 = vmatmul.mubr.bf16.gmra.mrb[248].mxu0 %v10064_v18 }
 0x217   :  { %9053 = vst [vmem:[%s13507_s3 + $0xf8] sm:$0xff] %v8541_v7   ;;  %v4899_v13 = vadd.f32 %v11676_v15, %v3842_v5  ;;  %v3845_v11 = vadd.f32 %v11481_v26, %v3844_v10  ;;  %v3846_v14 = vpop.f32.mrb[131].mxu1  ;;  %v4927_v15 = vpop.f32.mrb[143].mxu0  ;;  %7806 = vmatprep.mubr.msk.bf16.mxu0 %vm3162_vm0, %v10066_v20 }
 0x218   :  { %v10086_v14 = vld [vmem:[%s13505_s0 + $0x84c] ss:$16 sps:$4 sm:$0xff]  }
 0x219   :  { %v4902_v19 = vadd.f32 %v11682_v22, %v3845_v11  ;;  %4056 = vmatmul.mubr.bf16.gmra.mrb[236].mxu1 %v10047_v3  ;;  %v5729_v21 = vmax.f32 %v4899_v13, 0.0  ;;  %v10053_v22 = vld [vmem:[%s13505_s0 + $0x780] ss:$16 sps:$4 sm:$0xff]   ;;  %v11772_v29 = vpop.f32.mrb[144].mxu0 }
 0x21a   :  { %4063 = vmatprep.mubr.bf16.mxu1 %v10050_v12  ;;  %v4932_v36 = vpop.f32.mrb[145].mxu0  ;;  %v10078_v12 = vld [vmem:[%s13505_s0 + $0x828] ss:$16 sps:$4 sm:$0xff]  }
 0x21b   :  { %v5730_v23 = vmax.f32 %v4902_v19, 0.0  ;;  %v11778_v37 = vpop.f32.mrb[146].mxu0 }
 0x21c   :  { %v3849_v25 = vpop.f32.mrb[132].mxu1 }
 0x21d   :  { %v8546_v27 = vpack.c.bf16 %v5730_v23, %v5729_v21  ;;  %v3850_v24 = vadd.f32 %v11481_v26, %v3849_v25  ;;  %v3851_v28 = vpop.f32.mrb[133].mxu1  ;;  %v10077_v25 = vld [vmem:[%s13505_s0 + $0x804] ss:$16 sps:$4 sm:$0xff]  }
 0x21e   :  { %v3852_v30 = vpop.f32.mrb[134].mxu1  ;;  %5145 = vmatmul.mubr.bf16.gmra.mrb[252].mxu0 %v10070_v38 }
 0x21f   :  { %9054 = vst [vmem:[%s13507_s3 + $0x100] sm:$0xff] %v8546_v27   ;;  %v4907_v33 = vadd.f32 %v11700_v35, %v3850_v24  ;;  %v3853_v31 = vadd.f32 %v11481_v26, %v3852_v30  ;;  %v3854_v34 = vpop.f32.mrb[135].mxu1  ;;  %v4935_v35 = vpop.f32.mrb[147].mxu0  ;;  %7807 = vmatprep.mubr.msk.bf16.mxu0 %vm3162_vm0, %v10074_v40 }
 0x220   :  { %v10092_v34 = vld [vmem:[%s13505_s0 + $0x86c] ss:$16 sps:$4 sm:$0xff]  }
 0x221   :  { %v4910_v39 = vadd.f32 %v11706_v43, %v3853_v31  ;;  %4064 = vmatmul.mubr.bf16.gmra.mrb[240].mxu1 %v10053_v22  ;;  %v5731_v42 = vmax.f32 %v4907_v33, 0.0  ;;  %v10059_v43 = vld [vmem:[%s13505_s0 + $0x7a0] ss:$16 sps:$4 sm:$0xff]   ;;  %v11796_v48 = vpop.f32.mrb[148].mxu0 }
 0x222   :  { %4071 = vmatprep.mubr.bf16.mxu1 %v10056_v32  ;;  %v4940_v55 = vpop.f32.mrb[149].mxu0  ;;  %v10084_v32 = vld [vmem:[%s13505_s0 + $0x848] ss:$16 sps:$4 sm:$0xff]  }
 0x223   :  { %v5732_v44 = vmax.f32 %v4910_v39, 0.0  ;;  %v11802_v56 = vpop.f32.mrb[150].mxu0 }
 0x224   :  { %v3857_v45 = vpop.f32.mrb[136].mxu1 }
 0x225   :  { %v8551_v46 = vpack.c.bf16 %v5732_v44, %v5731_v42  ;;  %v3858_v41 = vadd.f32 %v11481_v26, %v3857_v45  ;;  %v3859_v47 = vpop.f32.mrb[137].mxu1  ;;  %v10083_v45 = vld [vmem:[%s13505_s0 + $0x824] ss:$16 sps:$4 sm:$0xff]  }
 0x226   :  { %v3860_v49 = vpop.f32.mrb[138].mxu1  ;;  %5153 = vmatmul.mubr.bf16.gmra.mrb[0].mxu0 %v10072_v57 }
 0x227   :  { %9055 = vst [vmem:[%s13507_s3 + $0x108] sm:$0xff] %v8551_v46   ;;  %v4915_v52 = vadd.f32 %v11724_v54, %v3858_v41  ;;  %v3861_v50 = vadd.f32 %v11481_v26, %v3860_v49  ;;  %v3862_v53 = vpop.f32.mrb[139].mxu1  ;;  %v4943_v54 = vpop.f32.mrb[151].mxu0  ;;  %7808 = vmatprep.mubr.msk.bf16.mxu0 %vm3162_vm0, %v10080_v59 }
 0x228   :  { %v10098_v53 = vld [vmem:[%s13505_s0 + $0x88c] ss:$16 sps:$4 sm:$0xff]  }
 0x229   :  { %v4918_v58 = vadd.f32 %v11730_v62, %v3861_v50  ;;  %4072 = vmatmul.mubr.bf16.gmra.mrb[244].mxu1 %v10059_v43  ;;  %v5733_v61 = vmax.f32 %v4915_v52, 0.0  ;;  %v10065_v62 = vld [vmem:[%s13505_s0 + $0x7c0] ss:$16 sps:$4 sm:$0xff]   ;;  %v11820_v3 = vpop.f32.mrb[152].mxu0 }
 0x22a   :  { %4079 = vmatprep.mubr.bf16.mxu1 %v10062_v51  ;;  %v4948_v10 = vpop.f32.mrb[153].mxu0  ;;  %v10090_v51 = vld [vmem:[%s13505_s0 + $0x868] ss:$16 sps:$4 sm:$0xff]  }
 0x22b   :  { %v5734_v63 = vmax.f32 %v4918_v58, 0.0  ;;  %v11826_v11 = vpop.f32.mrb[154].mxu0 }
 0x22c   :  { %v3865_v0 = vpop.f32.mrb[140].mxu1 }
 0x22d   :  { %v8556_v1 = vpack.c.bf16 %v5734_v63, %v5733_v61  ;;  %v3866_v60 = vadd.f32 %v11481_v26, %v3865_v0  ;;  %v3867_v2 = vpop.f32.mrb[141].mxu1  ;;  %v10089_v0 = vld [vmem:[%s13505_s0 + $0x844] ss:$16 sps:$4 sm:$0xff]  }
 0x22e   :  { %v3868_v4 = vpop.f32.mrb[142].mxu1  ;;  %5161 = vmatmul.mubr.bf16.gmra.mrb[4].mxu0 %v10078_v12 }
 0x22f   :  { %9056 = vst [vmem:[%s13507_s3 + $0x110] sm:$0xff] %v8556_v1   ;;  %v4923_v7 = vadd.f32 %v11748_v9, %v3866_v60  ;;  %v3869_v5 = vadd.f32 %v11481_v26, %v3868_v4  ;;  %v3870_v8 = vpop.f32.mrb[143].mxu1  ;;  %v4951_v9 = vpop.f32.mrb[155].mxu0  ;;  %7809 = vmatprep.mubr.msk.bf16.mxu0 %vm3162_vm0, %v10086_v14 }
 0x230   :  { %v10104_v8 = vld [vmem:[%s13505_s0 + $0x8ac] ss:$16 sps:$4 sm:$0xff]  }
 0x231   :  { %v4926_v13 = vadd.f32 %v11754_v17, %v3869_v5  ;;  %4080 = vmatmul.mubr.bf16.gmra.mrb[248].mxu1 %v10065_v62  ;;  %v5735_v16 = vmax.f32 %v4923_v7, 0.0  ;;  %v10071_v17 = vld [vmem:[%s13505_s0 + $0x7e0] ss:$16 sps:$4 sm:$0xff]   ;;  %v11844_v22 = vpop.f32.mrb[156].mxu0 }
 0x232   :  { %4087 = vmatprep.mubr.bf16.mxu1 %v10068_v6  ;;  %v4956_v30 = vpop.f32.mrb[157].mxu0  ;;  %v10096_v6 = vld [vmem:[%s13505_s0 + $0x888] ss:$16 sps:$4 sm:$0xff]  }
 0x233   :  { %v5736_v18 = vmax.f32 %v4926_v13, 0.0  ;;  %v11850_v31 = vpop.f32.mrb[158].mxu0 }
 0x234   :  { %v3873_v19 = vpop.f32.mrb[144].mxu1 }
 0x235   :  { %v8561_v20 = vpack.c.bf16 %v5736_v18, %v5735_v16  ;;  %v3874_v15 = vadd.f32 %v11481_v26, %v3873_v19  ;;  %v3875_v21 = vpop.f32.mrb[145].mxu1  ;;  %v10095_v19 = vld [vmem:[%s13505_s0 + $0x864] ss:$16 sps:$4 sm:$0xff]  }
 0x236   :  { %v3876_v23 = vpop.f32.mrb[146].mxu1  ;;  %5169 = vmatmul.mubr.bf16.gmra.mrb[8].mxu0 %v10084_v32 }
 0x237   :  { %9057 = vst [vmem:[%s13507_s3 + $0x118] sm:$0xff] %v8561_v20   ;;  %v4931_v27 = vadd.f32 %v11772_v29, %v3874_v15  ;;  %v3877_v24 = vadd.f32 %v11481_v26, %v3876_v23  ;;  %v3878_v28 = vpop.f32.mrb[147].mxu1  ;;  %v4959_v29 = vpop.f32.mrb[159].mxu0  ;;  %7810 = vmatprep.mubr.msk.bf16.mxu0 %vm3162_vm0, %v10092_v34 }
 0x238   :  { %v10110_v28 = vld [vmem:[%s13505_s0 + $0x8cc] ss:$16 sps:$4 sm:$0xff]  }
 0x239   :  { %v4934_v33 = vadd.f32 %v11778_v37, %v3877_v24  ;;  %4088 = vmatmul.mubr.bf16.gmra.mrb[252].mxu1 %v10071_v17  ;;  %v5737_v36 = vmax.f32 %v4931_v27, 0.0  ;;  %v10075_v37 = vld [vmem:[%s13505_s0 + $0x800] ss:$16 sps:$4 sm:$0xff]   ;;  %v11868_v43 = vpop.f32.mrb[160].mxu0 }
 0x23a   :  { %4095 = vmatprep.mubr.bf16.mxu1 %v10077_v25  ;;  %v4964_v49 = vpop.f32.mrb[161].mxu0  ;;  %v10102_v25 = vld [vmem:[%s13505_s0 + $0x8a8] ss:$16 sps:$4 sm:$0xff]  }
 0x23b   :  { %v5738_v38 = vmax.f32 %v4934_v33, 0.0  ;;  %v11874_v50 = vpop.f32.mrb[162].mxu0 }
 0x23c   :  { %v3881_v39 = vpop.f32.mrb[148].mxu1 }
 0x23d   :  { %v8566_v40 = vpack.c.bf16 %v5738_v38, %v5737_v36  ;;  %v3882_v35 = vadd.f32 %v11481_v26, %v3881_v39  ;;  %v3883_v42 = vpop.f32.mrb[149].mxu1  ;;  %v10101_v39 = vld [vmem:[%s13505_s0 + $0x884] ss:$16 sps:$4 sm:$0xff]  }
 0x23e   :  { %v3884_v44 = vpop.f32.mrb[150].mxu1  ;;  %5177 = vmatmul.mubr.bf16.gmra.mrb[12].mxu0 %v10090_v51 }
 0x23f   :  { %9058 = vst [vmem:[%s13507_s3 + $0x120] sm:$0xff] %v8566_v40   ;;  %v4939_v46 = vadd.f32 %v11796_v48, %v3882_v35  ;;  %v3885_v41 = vadd.f32 %v11481_v26, %v3884_v44  ;;  %v3886_v47 = vpop.f32.mrb[151].mxu1  ;;  %v4967_v48 = vpop.f32.mrb[163].mxu0  ;;  %7811 = vmatprep.mubr.msk.bf16.mxu0 %vm3162_vm0, %v10098_v53 }
 0x240   :  { %v10116_v47 = vld [vmem:[%s13505_s0 + $0x8ec] ss:$16 sps:$4 sm:$0xff]  }
 0x241   :  { %v4942_v52 = vadd.f32 %v11802_v56, %v3885_v41  ;;  %4096 = vmatmul.mubr.bf16.gmra.mrb[148].mxu1 %v10075_v37  ;;  %v5739_v55 = vmax.f32 %v4939_v46, 0.0  ;;  %v10081_v56 = vld [vmem:[%s13505_s0 + $0x820] ss:$16 sps:$4 sm:$0xff]   ;;  %v11892_v62 = vpop.f32.mrb[164].mxu0 }
 0x242   :  { %4103 = vmatprep.mubr.bf16.mxu1 %v10083_v45  ;;  %v4972_v4 = vpop.f32.mrb[165].mxu0  ;;  %v10108_v45 = vld [vmem:[%s13505_s0 + $0x8c8] ss:$16 sps:$4 sm:$0xff]  }
 0x243   :  { %v5740_v57 = vmax.f32 %v4942_v52, 0.0  ;;  %v11898_v5 = vpop.f32.mrb[166].mxu0 }
 0x244   :  { %v3889_v58 = vpop.f32.mrb[152].mxu1 }
 0x245   :  { %v8571_v59 = vpack.c.bf16 %v5740_v57, %v5739_v55  ;;  %v3890_v54 = vadd.f32 %v11481_v26, %v3889_v58  ;;  %v3891_v61 = vpop.f32.mrb[153].mxu1  ;;  %v10107_v58 = vld [vmem:[%s13505_s0 + $0x8a4] ss:$16 sps:$4 sm:$0xff]  }
 0x246   :  { %v3892_v63 = vpop.f32.mrb[154].mxu1  ;;  %5185 = vmatmul.mubr.bf16.gmra.mrb[16].mxu0 %v10096_v6 }
 0x247   :  { %9059 = vst [vmem:[%s13507_s3 + $0x128] sm:$0xff] %v8571_v59   ;;  %v4947_v1 = vadd.f32 %v11820_v3, %v3890_v54  ;;  %v3893_v60 = vadd.f32 %v11481_v26, %v3892_v63  ;;  %v3894_v2 = vpop.f32.mrb[155].mxu1  ;;  %v4975_v3 = vpop.f32.mrb[167].mxu0  ;;  %7812 = vmatprep.mubr.msk.bf16.mxu0 %vm3162_vm0, %v10104_v8 }
 0x248   :  { %v10122_v2 = vld [vmem:[%s13505_s0 + $0x90c] ss:$16 sps:$4 sm:$0xff]  }
 0x249   :  { %v4950_v7 = vadd.f32 %v11826_v11, %v3893_v60  ;;  %4104 = vmatmul.mubr.bf16.gmra.mrb[152].mxu1 %v10081_v56  ;;  %v5741_v10 = vmax.f32 %v4947_v1, 0.0  ;;  %v10087_v11 = vld [vmem:[%s13505_s0 + $0x840] ss:$16 sps:$4 sm:$0xff]   ;;  %v11916_v17 = vpop.f32.mrb[168].mxu0 }
 0x24a   :  { %4111 = vmatprep.mubr.bf16.mxu1 %v10089_v0  ;;  %v4980_v23 = vpop.f32.mrb[169].mxu0  ;;  %v10114_v0 = vld [vmem:[%s13505_s0 + $0x8e8] ss:$16 sps:$4 sm:$0xff]  }
 0x24b   :  { %v5742_v12 = vmax.f32 %v4950_v7, 0.0  ;;  %v11922_v24 = vpop.f32.mrb[170].mxu0 }
 0x24c   :  { %v3897_v13 = vpop.f32.mrb[156].mxu1 }
 0x24d   :  { %v8576_v14 = vpack.c.bf16 %v5742_v12, %v5741_v10  ;;  %v3898_v9 = vadd.f32 %v11481_v26, %v3897_v13  ;;  %v3899_v16 = vpop.f32.mrb[157].mxu1  ;;  %v10113_v13 = vld [vmem:[%s13505_s0 + $0x8c4] ss:$16 sps:$4 sm:$0xff]  }
 0x24e   :  { %v3900_v18 = vpop.f32.mrb[158].mxu1  ;;  %5193 = vmatmul.mubr.bf16.gmra.mrb[20].mxu0 %v10102_v25 }
 0x24f   :  { %9060 = vst [vmem:[%s13507_s3 + $0x130] sm:$0xff] %v8576_v14   ;;  %v4955_v20 = vadd.f32 %v11844_v22, %v3898_v9  ;;  %v3901_v15 = vadd.f32 %v11481_v26, %v3900_v18  ;;  %v3902_v21 = vpop.f32.mrb[159].mxu1  ;;  %v4983_v22 = vpop.f32.mrb[171].mxu0  ;;  %7813 = vmatprep.mubr.msk.bf16.mxu0 %vm3162_vm0, %v10110_v28  ;;  %v12002_v28 = vld [vmem:[%s13506_s2] ss:$0 sm:$0xff] }
 0x250   :  { %v10128_v21 = vld [vmem:[%s13505_s0 + $0x92c] ss:$16 sps:$4 sm:$0xff]  }
 0x251   :  { %v4958_v27 = vadd.f32 %v11850_v31, %v3901_v15  ;;  %4112 = vmatmul.mubr.bf16.gmra.mrb[156].mxu1 %v10087_v11  ;;  %v5743_v30 = vmax.f32 %v4955_v20, 0.0  ;;  %v10093_v31 = vld [vmem:[%s13505_s0 + $0x860] ss:$16 sps:$4 sm:$0xff]   ;;  %v11940_v37 = vpop.f32.mrb[172].mxu0 }
 0x252   :  { %4119 = vmatprep.mubr.bf16.mxu1 %v10095_v19  ;;  %v4988_v44 = vpop.f32.mrb[173].mxu0  ;;  %v10120_v19 = vld [vmem:[%s13505_s0 + $0x908] ss:$16 sps:$4 sm:$0xff]  }
 0x253   :  { %v5744_v32 = vmax.f32 %v4958_v27, 0.0  ;;  %v11946_v41 = vpop.f32.mrb[174].mxu0 }
 0x254   :  { %v3905_v33 = vpop.f32.mrb[160].mxu1 }
 0x255   :  { %v8581_v34 = vpack.c.bf16 %v5744_v32, %v5743_v30  ;;  %v3906_v29 = vadd.f32 %v11481_v26, %v3905_v33  ;;  %v3907_v36 = vpop.f32.mrb[161].mxu1  ;;  %v10111_v30 = vld [vmem:[%s13505_s0 + $0x8c0] ss:$16 sps:$4 sm:$0xff]   ;;  %v10119_v33 = vld [vmem:[%s13505_s0 + $0x8e4] ss:$16 sps:$4 sm:$0xff]  }
 0x256   :  { %v3908_v38 = vpop.f32.mrb[162].mxu1  ;;  %5201 = vmatmul.mubr.bf16.gmra.mrb[24].mxu0 %v10108_v45 }
 0x257   :  { %9061 = vst [vmem:[%s13507_s3 + $0x138] sm:$0xff] %v8581_v34   ;;  %v4963_v40 = vadd.f32 %v11868_v43, %v3906_v29  ;;  %v3909_v35 = vadd.f32 %v11481_v26, %v3908_v38  ;;  %v3910_v42 = vpop.f32.mrb[163].mxu1  ;;  %v4991_v43 = vpop.f32.mrb[175].mxu0  ;;  %7814 = vmatprep.mubr.msk.bf16.mxu0 %vm3162_vm0, %v10116_v47 }
 0x258   :  { %v10134_v42 = vld [vmem:[%s13505_s0 + $0x94c] ss:$16 sps:$4 sm:$0xff]  }
 0x259   :  { %v4966_v46 = vadd.f32 %v11874_v50, %v3909_v35  ;;  %4120 = vmatmul.mubr.bf16.gmra.mrb[160].mxu1 %v10093_v31  ;;  %v5745_v49 = vmax.f32 %v4963_v40, 0.0  ;;  %v10099_v50 = vld [vmem:[%s13505_s0 + $0x880] ss:$16 sps:$4 sm:$0xff]   ;;  %v11964_v56 = vpop.f32.mrb[176].mxu0 }
 0x25a   :  { %4127 = vmatprep.mubr.bf16.mxu1 %v10101_v39  ;;  %v4996_v63 = vpop.f32.mrb[177].mxu0  ;;  %v10126_v39 = vld [vmem:[%s13505_s0 + $0x928] ss:$16 sps:$4 sm:$0xff]  }
 0x25b   :  { %v5746_v51 = vmax.f32 %v4966_v46, 0.0  ;;  %v11970_v60 = vpop.f32.mrb[178].mxu0 }
 0x25c   :  { %v3913_v52 = vpop.f32.mrb[164].mxu1 }
 0x25d   :  { %v8586_v53 = vpack.c.bf16 %v5746_v51, %v5745_v49  ;;  %v3914_v48 = vadd.f32 %v11481_v26, %v3913_v52  ;;  %v3915_v55 = vpop.f32.mrb[165].mxu1  ;;  %v10125_v52 = vld [vmem:[%s13505_s0 + $0x904] ss:$16 sps:$4 sm:$0xff]  }
 0x25e   :  { %v3916_v57 = vpop.f32.mrb[166].mxu1  ;;  %5209 = vmatmul.mubr.bf16.gmra.mrb[28].mxu0 %v10114_v0 }
 0x25f   :  { %9062 = vst [vmem:[%s13507_s3 + $0x140] sm:$0xff] %v8586_v53   ;;  %v4971_v59 = vadd.f32 %v11892_v62, %v3914_v48  ;;  %v3917_v54 = vadd.f32 %v11481_v26, %v3916_v57  ;;  %v3918_v61 = vpop.f32.mrb[167].mxu1  ;;  %v4999_v62 = vpop.f32.mrb[179].mxu0  ;;  %7815 = vmatprep.mubr.msk.bf16.mxu0 %vm3162_vm0, %v10122_v2 }
 0x260   :  { %v10140_v61 = vld [vmem:[%s13505_s0 + $0x96c] ss:$16 sps:$4 sm:$0xff]  }
 0x261   :  { %v4974_v1 = vadd.f32 %v11898_v5, %v3917_v54  ;;  %4128 = vmatmul.mubr.bf16.gmra.mrb[164].mxu1 %v10099_v50  ;;  %v5747_v4 = vmax.f32 %v4971_v59, 0.0  ;;  %v10105_v5 = vld [vmem:[%s13505_s0 + $0x8a0] ss:$16 sps:$4 sm:$0xff]   ;;  %v11988_v11 = vpop.f32.mrb[180].mxu0 }
 0x262   :  { %4135 = vmatprep.mubr.bf16.mxu1 %v10107_v58  ;;  %v5004_v18 = vpop.f32.mrb[181].mxu0  ;;  %v10132_v58 = vld [vmem:[%s13505_s0 + $0x948] ss:$16 sps:$4 sm:$0xff]  }
 0x263   :  { %v5748_v6 = vmax.f32 %v4974_v1, 0.0  ;;  %v11994_v15 = vpop.f32.mrb[182].mxu0 }
 0x264   :  { %v3921_v7 = vpop.f32.mrb[168].mxu1 }
 0x265   :  { %v8591_v8 = vpack.c.bf16 %v5748_v6, %v5747_v4  ;;  %v3922_v3 = vadd.f32 %v11481_v26, %v3921_v7  ;;  %v3923_v10 = vpop.f32.mrb[169].mxu1  ;;  %v10131_v7 = vld [vmem:[%s13505_s0 + $0x924] ss:$16 sps:$4 sm:$0xff]  }
 0x266   :  { %v3924_v12 = vpop.f32.mrb[170].mxu1  ;;  %5217 = vmatmul.mubr.bf16.gmra.mrb[32].mxu0 %v10120_v19 }
 0x267   :  { %9063 = vst [vmem:[%s13507_s3 + $0x148] sm:$0xff] %v8591_v8   ;;  %v4979_v14 = vadd.f32 %v11916_v17, %v3922_v3  ;;  %v3925_v9 = vadd.f32 %v11481_v26, %v3924_v12  ;;  %v3926_v16 = vpop.f32.mrb[171].mxu1  ;;  %v5007_v17 = vpop.f32.mrb[183].mxu0  ;;  %7816 = vmatprep.mubr.msk.bf16.mxu0 %vm3162_vm0, %v10128_v21 }
 0x268   :  { %v10146_v16 = vld [vmem:[%s13505_s0 + $0x98c] ss:$16 sps:$4 sm:$0xff]  }
 0x269   :  { %v4982_v20 = vadd.f32 %v11922_v24, %v3925_v9  ;;  %4136 = vmatmul.mubr.bf16.gmra.mrb[168].mxu1 %v10105_v5  ;;  %v5749_v26 = vmax.f32 %v4979_v14, 0.0  ;;  %v12017_v31 = vpop.f32.mrb[184].mxu0 }
 0x26a   :  { %4143 = vmatprep.mubr.bf16.mxu1 %v10113_v13  ;;  %v5012_v38 = vpop.f32.mrb[185].mxu0  ;;  %v10138_v13 = vld [vmem:[%s13505_s0 + $0x968] ss:$16 sps:$4 sm:$0xff]  }
 0x26b   :  { %v5750_v23 = vmax.f32 %v4982_v20, 0.0  ;;  %v12023_v35 = vpop.f32.mrb[186].mxu0 }
 0x26c   :  { %v3929_v25 = vpop.f32.mrb[172].mxu1 }
 0x26d   :  { %v8596_v27 = vpack.c.bf16 %v5750_v23, %v5749_v26  ;;  %v3930_v24 = vadd.f32 %v12002_v28, %v3929_v25  ;;  %v3931_v22 = vpop.f32.mrb[173].mxu1  ;;  %v10137_v25 = vld [vmem:[%s13505_s0 + $0x944] ss:$16 sps:$4 sm:$0xff]  }
 0x26e   :  { %v3932_v32 = vpop.f32.mrb[174].mxu1  ;;  %5225 = vmatmul.mubr.bf16.gmra.mrb[36].mxu0 %v10126_v39 }
 0x26f   :  { %9064 = vst [vmem:[%s13507_s3 + $0x150] sm:$0xff] %v8596_v27   ;;  %v4987_v34 = vadd.f32 %v11940_v37, %v3930_v24  ;;  %v3933_v29 = vadd.f32 %v12002_v28, %v3932_v32  ;;  %v3934_v36 = vpop.f32.mrb[175].mxu1  ;;  %v5015_v37 = vpop.f32.mrb[187].mxu0  ;;  %7817 = vmatprep.mubr.msk.bf16.mxu0 %vm3162_vm0, %v10134_v42 }
 0x270   :  { %v10152_v36 = vld [vmem:[%s13505_s0 + $0x9ac] ss:$16 sps:$4 sm:$0xff]  }
 0x271   :  { %v4990_v40 = vadd.f32 %v11946_v41, %v3933_v29  ;;  %4144 = vmatmul.mubr.bf16.gmra.mrb[172].mxu1 %v10111_v30  ;;  %v5751_v44 = vmax.f32 %v4987_v34, 0.0  ;;  %v10117_v41 = vld [vmem:[%s13505_s0 + $0x8e0] ss:$16 sps:$4 sm:$0xff]   ;;  %v12041_v50 = vpop.f32.mrb[188].mxu0 }
 0x272   :  { %4151 = vmatprep.mubr.bf16.mxu1 %v10119_v33  ;;  %v5020_v57 = vpop.f32.mrb[189].mxu0  ;;  %v10144_v33 = vld [vmem:[%s13505_s0 + $0x988] ss:$16 sps:$4 sm:$0xff]  }
 0x273   :  { %v5752_v45 = vmax.f32 %v4990_v40, 0.0  ;;  %v12047_v54 = vpop.f32.mrb[190].mxu0 }
 0x274   :  { %v3937_v46 = vpop.f32.mrb[176].mxu1 }
 0x275   :  { %v8601_v47 = vpack.c.bf16 %v5752_v45, %v5751_v44  ;;  %v3938_v43 = vadd.f32 %v12002_v28, %v3937_v46  ;;  %v3939_v49 = vpop.f32.mrb[177].mxu1  ;;  %v10143_v46 = vld [vmem:[%s13505_s0 + $0x964] ss:$16 sps:$4 sm:$0xff]  }
 0x276   :  { %v3940_v51 = vpop.f32.mrb[178].mxu1  ;;  %5233 = vmatmul.mubr.bf16.gmra.mrb[40].mxu0 %v10132_v58 }
 0x277   :  { %9065 = vst [vmem:[%s13507_s3 + $0x158] sm:$0xff] %v8601_v47   ;;  %v4995_v53 = vadd.f32 %v11964_v56, %v3938_v43  ;;  %v3941_v48 = vadd.f32 %v12002_v28, %v3940_v51  ;;  %v3942_v55 = vpop.f32.mrb[179].mxu1  ;;  %v5023_v56 = vpop.f32.mrb[191].mxu0  ;;  %7818 = vmatprep.mubr.msk.bf16.mxu0 %vm3162_vm0, %v10140_v61 }
 0x278   :  { %v10158_v55 = vld [vmem:[%s13505_s0 + $0x9cc] ss:$16 sps:$4 sm:$0xff]  }
 0x279   :  { %v4998_v59 = vadd.f32 %v11970_v60, %v3941_v48  ;;  %4152 = vmatmul.mubr.bf16.gmra.mrb[176].mxu1 %v10117_v41  ;;  %v5753_v63 = vmax.f32 %v4995_v53, 0.0  ;;  %v10123_v60 = vld [vmem:[%s13505_s0 + $0x900] ss:$16 sps:$4 sm:$0xff]   ;;  %v12065_v5 = vpop.f32.mrb[192].mxu0 }
 0x27a   :  { %4159 = vmatprep.mubr.bf16.mxu1 %v10125_v52  ;;  %v5028_v12 = vpop.f32.mrb[193].mxu0  ;;  %v10150_v52 = vld [vmem:[%s13505_s0 + $0x9a8] ss:$16 sps:$4 sm:$0xff]  }
 0x27b   :  { %v5754_v0 = vmax.f32 %v4998_v59, 0.0  ;;  %v12071_v9 = vpop.f32.mrb[194].mxu0 }
 0x27c   :  { %v3945_v1 = vpop.f32.mrb[180].mxu1 }
 0x27d   :  { %v8606_v2 = vpack.c.bf16 %v5754_v0, %v5753_v63  ;;  %v3946_v62 = vadd.f32 %v12002_v28, %v3945_v1  ;;  %v3947_v4 = vpop.f32.mrb[181].mxu1  ;;  %v10149_v1 = vld [vmem:[%s13505_s0 + $0x984] ss:$16 sps:$4 sm:$0xff]  }
 0x27e   :  { %v3948_v6 = vpop.f32.mrb[182].mxu1  ;;  %5241 = vmatmul.mubr.bf16.gmra.mrb[44].mxu0 %v10138_v13 }
 0x27f   :  { %9066 = vst [vmem:[%s13507_s3 + $0x160] sm:$0xff] %v8606_v2   ;;  %v5003_v8 = vadd.f32 %v11988_v11, %v3946_v62  ;;  %v3949_v3 = vadd.f32 %v12002_v28, %v3948_v6  ;;  %v3950_v10 = vpop.f32.mrb[183].mxu1  ;;  %v5031_v11 = vpop.f32.mrb[195].mxu0  ;;  %7819 = vmatprep.mubr.msk.bf16.mxu0 %vm3162_vm0, %v10146_v16 }
 0x280   :  { %v10164_v10 = vld [vmem:[%s13505_s0 + $0x9ec] ss:$16 sps:$4 sm:$0xff]  }
 0x281   :  { %v5006_v14 = vadd.f32 %v11994_v15, %v3949_v3  ;;  %4160 = vmatmul.mubr.bf16.gmra.mrb[180].mxu1 %v10123_v60  ;;  %v5755_v18 = vmax.f32 %v5003_v8, 0.0  ;;  %v10129_v15 = vld [vmem:[%s13505_s0 + $0x920] ss:$16 sps:$4 sm:$0xff]   ;;  %v12089_v30 = vpop.f32.mrb[196].mxu0 }
 0x282   :  { %4167 = vmatprep.mubr.bf16.mxu1 %v10131_v7  ;;  %v5036_v32 = vpop.f32.mrb[197].mxu0  ;;  %v10156_v7 = vld [vmem:[%s13505_s0 + $0x9c8] ss:$16 sps:$4 sm:$0xff]  }
 0x283   :  { %v5756_v19 = vmax.f32 %v5006_v14, 0.0  ;;  %v12095_v29 = vpop.f32.mrb[198].mxu0 }
 0x284   :  { %v3953_v20 = vpop.f32.mrb[184].mxu1 }
 0x285   :  { %v8611_v21 = vpack.c.bf16 %v5756_v19, %v5755_v18  ;;  %v3954_v17 = vadd.f32 %v12002_v28, %v3953_v20  ;;  %v3955_v26 = vpop.f32.mrb[185].mxu1  ;;  %v10155_v20 = vld [vmem:[%s13505_s0 + $0x9a4] ss:$16 sps:$4 sm:$0xff]  }
 0x286   :  { %v3956_v23 = vpop.f32.mrb[186].mxu1  ;;  %5249 = vmatmul.mubr.bf16.gmra.mrb[48].mxu0 %v10144_v33 }
 0x287   :  { %9067 = vst [vmem:[%s13507_s3 + $0x168] sm:$0xff] %v8611_v21   ;;  %v5011_v27 = vadd.f32 %v12017_v31, %v3954_v17  ;;  %v3957_v24 = vadd.f32 %v12002_v28, %v3956_v23  ;;  %v3958_v22 = vpop.f32.mrb[187].mxu1  ;;  %v5039_v31 = vpop.f32.mrb[199].mxu0  ;;  %7820 = vmatprep.mubr.msk.bf16.mxu0 %vm3162_vm0, %v10152_v36 }
 0x288   :  { %v10170_v22 = vld [vmem:[%s13505_s0 + $0xa0c] ss:$16 sps:$4 sm:$0xff]  }
 0x289   :  { %v5014_v34 = vadd.f32 %v12023_v35, %v3957_v24  ;;  %4168 = vmatmul.mubr.bf16.gmra.mrb[184].mxu1 %v10129_v15  ;;  %v5757_v38 = vmax.f32 %v5011_v27, 0.0  ;;  %v10135_v35 = vld [vmem:[%s13505_s0 + $0x940] ss:$16 sps:$4 sm:$0xff]   ;;  %v12113_v41 = vpop.f32.mrb[200].mxu0 }
 0x28a   :  { %4175 = vmatprep.mubr.bf16.mxu1 %v10137_v25  ;;  %v5044_v51 = vpop.f32.mrb[201].mxu0  ;;  %v10162_v25 = vld [vmem:[%s13505_s0 + $0x9e8] ss:$16 sps:$4 sm:$0xff]  }
 0x28b   :  { %v5758_v39 = vmax.f32 %v5014_v34, 0.0  ;;  %v12119_v48 = vpop.f32.mrb[202].mxu0 }
 0x28c   :  { %v3961_v40 = vpop.f32.mrb[188].mxu1 }
 0x28d   :  { %v8616_v42 = vpack.c.bf16 %v5758_v39, %v5757_v38  ;;  %v3962_v37 = vadd.f32 %v12002_v28, %v3961_v40  ;;  %v3963_v44 = vpop.f32.mrb[189].mxu1  ;;  %v10161_v40 = vld [vmem:[%s13505_s0 + $0x9c4] ss:$16 sps:$4 sm:$0xff]  }
 0x28e   :  { %v3964_v45 = vpop.f32.mrb[190].mxu1  ;;  %5257 = vmatmul.mubr.bf16.gmra.mrb[52].mxu0 %v10150_v52 }
 0x28f   :  { %9068 = vst [vmem:[%s13507_s3 + $0x170] sm:$0xff] %v8616_v42   ;;  %v5019_v47 = vadd.f32 %v12041_v50, %v3962_v37  ;;  %v3965_v43 = vadd.f32 %v12002_v28, %v3964_v45  ;;  %v3966_v49 = vpop.f32.mrb[191].mxu1  ;;  %v5047_v50 = vpop.f32.mrb[203].mxu0  ;;  %7821 = vmatprep.mubr.msk.bf16.mxu0 %vm3162_vm0, %v10158_v55 }
 0x290   :  { %v10176_v49 = vld [vmem:[%s13505_s0 + $0xa2c] ss:$16 sps:$4 sm:$0xff]  }
 0x291   :  { %v5022_v53 = vadd.f32 %v12047_v54, %v3965_v43  ;;  %4176 = vmatmul.mubr.bf16.gmra.mrb[188].mxu1 %v10135_v35  ;;  %v5759_v57 = vmax.f32 %v5019_v47, 0.0  ;;  %v10141_v54 = vld [vmem:[%s13505_s0 + $0x960] ss:$16 sps:$4 sm:$0xff]   ;;  %v12137_v60 = vpop.f32.mrb[204].mxu0 }
 0x292   :  { %4183 = vmatprep.mubr.bf16.mxu1 %v10143_v46  ;;  %v5052_v6 = vpop.f32.mrb[205].mxu0  ;;  %v10168_v46 = vld [vmem:[%s13505_s0 + $0xa08] ss:$16 sps:$4 sm:$0xff]  }
 0x293   :  { %v5760_v58 = vmax.f32 %v5022_v53, 0.0  ;;  %v12143_v3 = vpop.f32.mrb[206].mxu0 }
 0x294   :  { %v3969_v59 = vpop.f32.mrb[192].mxu1 }
 0x295   :  { %v8621_v61 = vpack.c.bf16 %v5760_v58, %v5759_v57  ;;  %v3970_v56 = vadd.f32 %v12002_v28, %v3969_v59  ;;  %v3971_v63 = vpop.f32.mrb[193].mxu1  ;;  %v10167_v59 = vld [vmem:[%s13505_s0 + $0x9e4] ss:$16 sps:$4 sm:$0xff]  }
 0x296   :  { %v3972_v0 = vpop.f32.mrb[194].mxu1  ;;  %5265 = vmatmul.mubr.bf16.gmra.mrb[56].mxu0 %v10156_v7 }
 0x297   :  { %9069 = vst [vmem:[%s13507_s3 + $0x178] sm:$0xff] %v8621_v61   ;;  %v5027_v2 = vadd.f32 %v12065_v5, %v3970_v56  ;;  %v3973_v62 = vadd.f32 %v12002_v28, %v3972_v0  ;;  %v3974_v4 = vpop.f32.mrb[195].mxu1  ;;  %v5055_v5 = vpop.f32.mrb[207].mxu0  ;;  %7822 = vmatprep.mubr.msk.bf16.mxu0 %vm3162_vm0, %v10164_v10 }
 0x298   :  { %v10182_v4 = vld [vmem:[%s13505_s0 + $0xa4c] ss:$16 sps:$4 sm:$0xff]  }
 0x299   :  { %v5030_v8 = vadd.f32 %v12071_v9, %v3973_v62  ;;  %4184 = vmatmul.mubr.bf16.gmra.mrb[192].mxu1 %v10141_v54  ;;  %v5761_v12 = vmax.f32 %v5027_v2, 0.0  ;;  %v10147_v9 = vld [vmem:[%s13505_s0 + $0x980] ss:$16 sps:$4 sm:$0xff]   ;;  %v12161_v15 = vpop.f32.mrb[208].mxu0 }
 0x29a   :  { %4191 = vmatprep.mubr.bf16.mxu1 %v10149_v1  ;;  %v5060_v23 = vpop.f32.mrb[209].mxu0  ;;  %v10174_v1 = vld [vmem:[%s13505_s0 + $0xa28] ss:$16 sps:$4 sm:$0xff]  }
 0x29b   :  { %v5762_v13 = vmax.f32 %v5030_v8, 0.0  ;;  %v12167_v24 = vpop.f32.mrb[210].mxu0 }
 0x29c   :  { %v3977_v14 = vpop.f32.mrb[196].mxu1 }
 0x29d   :  { %v8626_v16 = vpack.c.bf16 %v5762_v13, %v5761_v12  ;;  %v3978_v11 = vadd.f32 %v12002_v28, %v3977_v14  ;;  %v3979_v18 = vpop.f32.mrb[197].mxu1  ;;  %v10173_v14 = vld [vmem:[%s13505_s0 + $0xa04] ss:$16 sps:$4 sm:$0xff]  }
 0x29e   :  { %v3980_v19 = vpop.f32.mrb[198].mxu1  ;;  %5273 = vmatmul.mubr.bf16.gmra.mrb[60].mxu0 %v10162_v25 }
 0x29f   :  { %9070 = vst [vmem:[%s13507_s3 + $0x180] sm:$0xff] %v8626_v16   ;;  %v5035_v21 = vadd.f32 %v12089_v30, %v3978_v11  ;;  %v3981_v17 = vadd.f32 %v12002_v28, %v3980_v19  ;;  %v3982_v26 = vpop.f32.mrb[199].mxu1  ;;  %v5063_v30 = vpop.f32.mrb[211].mxu0  ;;  %7823 = vmatprep.mubr.msk.bf16.mxu0 %vm3162_vm0, %v10170_v22 }
 0x2a0   :  { %v10188_v26 = vld [vmem:[%s13505_s0 + $0xa6c] ss:$16 sps:$4 sm:$0xff]  }
 0x2a1   :  { %v5038_v27 = vadd.f32 %v12095_v29, %v3981_v17  ;;  %4192 = vmatmul.mubr.bf16.gmra.mrb[196].mxu1 %v10147_v9  ;;  %v5763_v32 = vmax.f32 %v5035_v21, 0.0  ;;  %v10153_v29 = vld [vmem:[%s13505_s0 + $0x9a0] ss:$16 sps:$4 sm:$0xff]   ;;  %v12185_v35 = vpop.f32.mrb[212].mxu0 }
 0x2a2   :  { %4199 = vmatprep.mubr.bf16.mxu1 %v10155_v20  ;;  %v5068_v45 = vpop.f32.mrb[213].mxu0  ;;  %v10180_v20 = vld [vmem:[%s13505_s0 + $0xa48] ss:$16 sps:$4 sm:$0xff]  }
 0x2a3   :  { %v5764_v33 = vmax.f32 %v5038_v27, 0.0  ;;  %v12191_v43 = vpop.f32.mrb[214].mxu0 }
 0x2a4   :  { %v3985_v34 = vpop.f32.mrb[200].mxu1 }
 0x2a5   :  { %v8631_v36 = vpack.c.bf16 %v5764_v33, %v5763_v32  ;;  %v3986_v31 = vadd.f32 %v12002_v28, %v3985_v34  ;;  %v3987_v38 = vpop.f32.mrb[201].mxu1  ;;  %v10179_v34 = vld [vmem:[%s13505_s0 + $0xa24] ss:$16 sps:$4 sm:$0xff]  }
 0x2a6   :  { %v3988_v39 = vpop.f32.mrb[202].mxu1  ;;  %5281 = vmatmul.mubr.bf16.gmra.mrb[64].mxu0 %v10168_v46 }
 0x2a7   :  { %9071 = vst [vmem:[%s13507_s3 + $0x188] sm:$0xff] %v8631_v36   ;;  %v5043_v42 = vadd.f32 %v12113_v41, %v3986_v31  ;;  %v3989_v37 = vadd.f32 %v12002_v28, %v3988_v39  ;;  %v3990_v44 = vpop.f32.mrb[203].mxu1  ;;  %v5071_v41 = vpop.f32.mrb[215].mxu0  ;;  %7824 = vmatprep.mubr.msk.bf16.mxu0 %vm3162_vm0, %v10176_v49 }
 0x2a8   :  { %v10194_v44 = vld [vmem:[%s13505_s0 + $0xa8c] ss:$16 sps:$4 sm:$0xff]  }
 0x2a9   :  { %v5046_v47 = vadd.f32 %v12119_v48, %v3989_v37  ;;  %4200 = vmatmul.mubr.bf16.gmra.mrb[200].mxu1 %v10153_v29  ;;  %v5765_v51 = vmax.f32 %v5043_v42, 0.0  ;;  %v10159_v48 = vld [vmem:[%s13505_s0 + $0x9c0] ss:$16 sps:$4 sm:$0xff]   ;;  %v12209_v54 = vpop.f32.mrb[216].mxu0 }
 0x2aa   :  { %4207 = vmatprep.mubr.bf16.mxu1 %v10161_v40  ;;  %v5076_v0 = vpop.f32.mrb[217].mxu0  ;;  %v10186_v40 = vld [vmem:[%s13505_s0 + $0xa68] ss:$16 sps:$4 sm:$0xff]  }
 0x2ab   :  { %v5766_v52 = vmax.f32 %v5046_v47, 0.0  ;;  %v12215_v62 = vpop.f32.mrb[218].mxu0 }
 0x2ac   :  { %v3993_v53 = vpop.f32.mrb[204].mxu1 }
 0x2ad   :  { %v8636_v55 = vpack.c.bf16 %v5766_v52, %v5765_v51  ;;  %v3994_v50 = vadd.f32 %v12002_v28, %v3993_v53  ;;  %v3995_v57 = vpop.f32.mrb[205].mxu1  ;;  %v10185_v53 = vld [vmem:[%s13505_s0 + $0xa44] ss:$16 sps:$4 sm:$0xff]  }
 0x2ae   :  { %v3996_v58 = vpop.f32.mrb[206].mxu1  ;;  %5289 = vmatmul.mubr.bf16.gmra.mrb[68].mxu0 %v10174_v1 }
 0x2af   :  { %9072 = vst [vmem:[%s13507_s3 + $0x190] sm:$0xff] %v8636_v55   ;;  %v5051_v61 = vadd.f32 %v12137_v60, %v3994_v50  ;;  %v3997_v56 = vadd.f32 %v12002_v28, %v3996_v58  ;;  %v3998_v63 = vpop.f32.mrb[207].mxu1  ;;  %v5079_v60 = vpop.f32.mrb[219].mxu0  ;;  %7825 = vmatprep.mubr.msk.bf16.mxu0 %vm3162_vm0, %v10182_v4 }
 0x2b0   :  { %v10200_v63 = vld [vmem:[%s13505_s0 + $0xaac] ss:$16 sps:$4 sm:$0xff]  }
 0x2b1   :  { %v5054_v2 = vadd.f32 %v12143_v3, %v3997_v56  ;;  %4208 = vmatmul.mubr.bf16.gmra.mrb[204].mxu1 %v10159_v48  ;;  %v5767_v6 = vmax.f32 %v5051_v61, 0.0  ;;  %v10165_v3 = vld [vmem:[%s13505_s0 + $0x9e0] ss:$16 sps:$4 sm:$0xff]   ;;  %v12233_v9 = vpop.f32.mrb[220].mxu0 }
 0x2b2   :  { %4215 = vmatprep.mubr.bf16.mxu1 %v10167_v59  ;;  %v5084_v19 = vpop.f32.mrb[221].mxu0  ;;  %v10192_v59 = vld [vmem:[%s13505_s0 + $0xa88] ss:$16 sps:$4 sm:$0xff]  }
 0x2b3   :  { %v5768_v7 = vmax.f32 %v5054_v2, 0.0  ;;  %v12239_v17 = vpop.f32.mrb[222].mxu0 }
 0x2b4   :  { %v4001_v8 = vpop.f32.mrb[208].mxu1 }
 0x2b5   :  { %v8641_v10 = vpack.c.bf16 %v5768_v7, %v5767_v6  ;;  %v4002_v5 = vadd.f32 %v12002_v28, %v4001_v8  ;;  %v4003_v12 = vpop.f32.mrb[209].mxu1  ;;  %v10191_v8 = vld [vmem:[%s13505_s0 + $0xa64] ss:$16 sps:$4 sm:$0xff]  }
 0x2b6   :  { %v4004_v13 = vpop.f32.mrb[210].mxu1  ;;  %5297 = vmatmul.mubr.bf16.gmra.mrb[72].mxu0 %v10180_v20 }
 0x2b7   :  { %9073 = vst [vmem:[%s13507_s3 + $0x198] sm:$0xff] %v8641_v10   ;;  %v5059_v16 = vadd.f32 %v12161_v15, %v4002_v5  ;;  %v4005_v11 = vadd.f32 %v12002_v28, %v4004_v13  ;;  %v4006_v18 = vpop.f32.mrb[211].mxu1  ;;  %v5087_v15 = vpop.f32.mrb[223].mxu0  ;;  %7826 = vmatprep.mubr.msk.bf16.mxu0 %vm3162_vm0, %v10188_v26 }
 0x2b8   :  { %v10206_v18 = vld [vmem:[%s13505_s0 + $0xacc] ss:$16 sps:$4 sm:$0xff]  }
 0x2b9   :  { %v5062_v21 = vadd.f32 %v12167_v24, %v4005_v11  ;;  %4216 = vmatmul.mubr.bf16.gmra.mrb[208].mxu1 %v10165_v3  ;;  %v5769_v23 = vmax.f32 %v5059_v16, 0.0  ;;  %v10171_v24 = vld [vmem:[%s13505_s0 + $0xa00] ss:$16 sps:$4 sm:$0xff]   ;;  %v12257_v29 = vpop.f32.mrb[224].mxu0 }
 0x2ba   :  { %4223 = vmatprep.mubr.bf16.mxu1 %v10173_v14  ;;  %v5092_v39 = vpop.f32.mrb[225].mxu0  ;;  %v10198_v14 = vld [vmem:[%s13505_s0 + $0xaa8] ss:$16 sps:$4 sm:$0xff]  }
 0x2bb   :  { %v5770_v25 = vmax.f32 %v5062_v21, 0.0  ;;  %v12263_v37 = vpop.f32.mrb[226].mxu0 }
 0x2bc   :  { %v4009_v27 = vpop.f32.mrb[212].mxu1 }
 0x2bd   :  { %v8646_v22 = vpack.c.bf16 %v5770_v25, %v5769_v23  ;;  %v4010_v30 = vadd.f32 %v12002_v28, %v4009_v27  ;;  %v4011_v32 = vpop.f32.mrb[213].mxu1  ;;  %v10197_v27 = vld [vmem:[%s13505_s0 + $0xa84] ss:$16 sps:$4 sm:$0xff]  }
 0x2be   :  { %v4012_v33 = vpop.f32.mrb[214].mxu1  ;;  %5305 = vmatmul.mubr.bf16.gmra.mrb[76].mxu0 %v10186_v40 }
 0x2bf   :  { %9074 = vst [vmem:[%s13507_s3 + $0x1a0] sm:$0xff] %v8646_v22   ;;  %v5067_v36 = vadd.f32 %v12185_v35, %v4010_v30  ;;  %v4013_v31 = vadd.f32 %v12002_v28, %v4012_v33  ;;  %v4014_v38 = vpop.f32.mrb[215].mxu1  ;;  %v5095_v35 = vpop.f32.mrb[227].mxu0  ;;  %7827 = vmatprep.mubr.msk.bf16.mxu0 %vm3162_vm0, %v10194_v44 }
 0x2c0   :  { %v10212_v38 = vld [vmem:[%s13505_s0 + $0xaec] ss:$16 sps:$4 sm:$0xff]  }
 0x2c1   :  { %v5070_v42 = vadd.f32 %v12191_v43, %v4013_v31  ;;  %4224 = vmatmul.mubr.bf16.gmra.mrb[212].mxu1 %v10171_v24  ;;  %v5771_v45 = vmax.f32 %v5067_v36, 0.0  ;;  %v10177_v43 = vld [vmem:[%s13505_s0 + $0xa20] ss:$16 sps:$4 sm:$0xff]   ;;  %v12281_v48 = vpop.f32.mrb[228].mxu0 }
 0x2c2   :  { %4231 = vmatprep.mubr.bf16.mxu1 %v10179_v34  ;;  %v5100_v58 = vpop.f32.mrb[229].mxu0  ;;  %v10204_v34 = vld [vmem:[%s13505_s0 + $0xac8] ss:$16 sps:$4 sm:$0xff]  }
 0x2c3   :  { %v5772_v46 = vmax.f32 %v5070_v42, 0.0  ;;  %v12287_v56 = vpop.f32.mrb[230].mxu0 }
 0x2c4   :  { %v4017_v47 = vpop.f32.mrb[216].mxu1 }
 0x2c5   :  { %v8651_v49 = vpack.c.bf16 %v5772_v46, %v5771_v45  ;;  %v4018_v41 = vadd.f32 %v12002_v28, %v4017_v47  ;;  %v4019_v51 = vpop.f32.mrb[217].mxu1  ;;  %v10203_v47 = vld [vmem:[%s13505_s0 + $0xaa4] ss:$16 sps:$4 sm:$0xff]  }
 0x2c6   :  { %v4020_v52 = vpop.f32.mrb[218].mxu1  ;;  %5313 = vmatmul.mubr.bf16.gmra.mrb[80].mxu0 %v10192_v59 }
 0x2c7   :  { %9075 = vst [vmem:[%s13507_s3 + $0x1a8] sm:$0xff] %v8651_v49   ;;  %v5075_v55 = vadd.f32 %v12209_v54, %v4018_v41  ;;  %v4021_v50 = vadd.f32 %v12002_v28, %v4020_v52  ;;  %v4022_v57 = vpop.f32.mrb[219].mxu1  ;;  %v5103_v54 = vpop.f32.mrb[231].mxu0  ;;  %7828 = vmatprep.mubr.msk.bf16.mxu0 %vm3162_vm0, %v10200_v63 }
 0x2c8   :  { %v10218_v57 = vld [vmem:[%s13505_s0 + $0xb0c] ss:$16 sps:$4 sm:$0xff]  }
 0x2c9   :  { %v5078_v61 = vadd.f32 %v12215_v62, %v4021_v50  ;;  %4232 = vmatmul.mubr.bf16.gmra.mrb[216].mxu1 %v10177_v43  ;;  %v5773_v0 = vmax.f32 %v5075_v55, 0.0  ;;  %v10183_v62 = vld [vmem:[%s13505_s0 + $0xa40] ss:$16 sps:$4 sm:$0xff]   ;;  %v12305_v3 = vpop.f32.mrb[232].mxu0 }
 0x2ca   :  { %4239 = vmatprep.mubr.bf16.mxu1 %v10185_v53  ;;  %v5108_v13 = vpop.f32.mrb[233].mxu0  ;;  %v10210_v53 = vld [vmem:[%s13505_s0 + $0xae8] ss:$16 sps:$4 sm:$0xff]  }
 0x2cb   :  { %v5774_v1 = vmax.f32 %v5078_v61, 0.0  ;;  %v12311_v11 = vpop.f32.mrb[234].mxu0 }
 0x2cc   :  { %v4025_v2 = vpop.f32.mrb[220].mxu1 }
 0x2cd   :  { %v8656_v4 = vpack.c.bf16 %v5774_v1, %v5773_v0  ;;  %v4026_v60 = vadd.f32 %v12002_v28, %v4025_v2  ;;  %v4027_v6 = vpop.f32.mrb[221].mxu1  ;;  %v10209_v2 = vld [vmem:[%s13505_s0 + $0xac4] ss:$16 sps:$4 sm:$0xff]  }
 0x2ce   :  { %v4028_v7 = vpop.f32.mrb[222].mxu1  ;;  %5321 = vmatmul.mubr.bf16.gmra.mrb[84].mxu0 %v10198_v14 }
 0x2cf   :  { %9076 = vst [vmem:[%s13507_s3 + $0x1b0] sm:$0xff] %v8656_v4   ;;  %v5083_v10 = vadd.f32 %v12233_v9, %v4026_v60  ;;  %v4029_v5 = vadd.f32 %v12002_v28, %v4028_v7  ;;  %v4030_v12 = vpop.f32.mrb[223].mxu1  ;;  %v5111_v9 = vpop.f32.mrb[235].mxu0  ;;  %7829 = vmatprep.mubr.msk.bf16.mxu0 %vm3162_vm0, %v10206_v18 }
 0x2d0   :  { %v10224_v12 = vld [vmem:[%s13505_s0 + $0xb2c] ss:$16 sps:$4 sm:$0xff]  }
 0x2d1   :  { %v5086_v16 = vadd.f32 %v12239_v17, %v4029_v5  ;;  %4240 = vmatmul.mubr.bf16.gmra.mrb[220].mxu1 %v10183_v62  ;;  %v5775_v19 = vmax.f32 %v5083_v10, 0.0  ;;  %v10189_v17 = vld [vmem:[%s13505_s0 + $0xa60] ss:$16 sps:$4 sm:$0xff]   ;;  %v12329_v24 = vpop.f32.mrb[236].mxu0 }
 0x2d2   :  { %4247 = vmatprep.mubr.bf16.mxu1 %v10191_v8  ;;  %v5116_v33 = vpop.f32.mrb[237].mxu0  ;;  %v10216_v8 = vld [vmem:[%s13505_s0 + $0xb08] ss:$16 sps:$4 sm:$0xff]  }
 0x2d3   :  { %v5776_v20 = vmax.f32 %v5086_v16, 0.0  ;;  %v12335_v31 = vpop.f32.mrb[238].mxu0 }
 0x2d4   :  { %v4033_v21 = vpop.f32.mrb[224].mxu1 }
 0x2d5   :  { %v8661_v26 = vpack.c.bf16 %v5776_v20, %v5775_v19  ;;  %v4034_v15 = vadd.f32 %v12002_v28, %v4033_v21  ;;  %v4035_v23 = vpop.f32.mrb[225].mxu1  ;;  %v10215_v21 = vld [vmem:[%s13505_s0 + $0xae4] ss:$16 sps:$4 sm:$0xff]  }
 0x2d6   :  { %v4036_v25 = vpop.f32.mrb[226].mxu1  ;;  %5329 = vmatmul.mubr.bf16.gmra.mrb[88].mxu0 %v10204_v34 }
 0x2d7   :  { %9077 = vst [vmem:[%s13507_s3 + $0x1b8] sm:$0xff] %v8661_v26   ;;  %v5091_v22 = vadd.f32 %v12257_v29, %v4034_v15  ;;  %v4037_v30 = vadd.f32 %v12002_v28, %v4036_v25  ;;  %v4038_v32 = vpop.f32.mrb[227].mxu1  ;;  %v5119_v29 = vpop.f32.mrb[239].mxu0  ;;  %7830 = vmatprep.mubr.msk.bf16.mxu0 %vm3162_vm0, %v10212_v38 }
 0x2d8   :  { %v10230_v32 = vld [vmem:[%s13505_s0 + $0xb4c] ss:$16 sps:$4 sm:$0xff]  }
 0x2d9   :  { %v5094_v36 = vadd.f32 %v12263_v37, %v4037_v30  ;;  %4248 = vmatmul.mubr.bf16.gmra.mrb[224].mxu1 %v10189_v17  ;;  %v5777_v39 = vmax.f32 %v5091_v22, 0.0  ;;  %v10195_v37 = vld [vmem:[%s13505_s0 + $0xa80] ss:$16 sps:$4 sm:$0xff]   ;;  %v12353_v43 = vpop.f32.mrb[240].mxu0 }
 0x2da   :  { %4255 = vmatprep.mubr.bf16.mxu1 %v10197_v27  ;;  %v5124_v52 = vpop.f32.mrb[241].mxu0  ;;  %v10222_v27 = vld [vmem:[%s13505_s0 + $0xb28] ss:$16 sps:$4 sm:$0xff]  }
 0x2db   :  { %v5778_v40 = vmax.f32 %v5094_v36, 0.0  ;;  %v12359_v50 = vpop.f32.mrb[242].mxu0 }
 0x2dc   :  { %v4041_v42 = vpop.f32.mrb[228].mxu1 }
 0x2dd   :  { %v8666_v44 = vpack.c.bf16 %v5778_v40, %v5777_v39  ;;  %v4042_v35 = vadd.f32 %v12002_v28, %v4041_v42  ;;  %v4043_v45 = vpop.f32.mrb[229].mxu1  ;;  %v10221_v42 = vld [vmem:[%s13505_s0 + $0xb04] ss:$16 sps:$4 sm:$0xff]  }
 0x2de   :  { %v4044_v46 = vpop.f32.mrb[230].mxu1  ;;  %5337 = vmatmul.mubr.bf16.gmra.mrb[92].mxu0 %v10210_v53 }
 0x2df   :  { %9078 = vst [vmem:[%s13507_s3 + $0x1c0] sm:$0xff] %v8666_v44   ;;  %v5099_v49 = vadd.f32 %v12281_v48, %v4042_v35  ;;  %v4045_v41 = vadd.f32 %v12002_v28, %v4044_v46  ;;  %v4046_v51 = vpop.f32.mrb[231].mxu1  ;;  %v5127_v48 = vpop.f32.mrb[243].mxu0  ;;  %7831 = vmatprep.mubr.msk.bf16.mxu0 %vm3162_vm0, %v10218_v57 }
 0x2e0   :  { %v10236_v51 = vld [vmem:[%s13505_s0 + $0xb6c] ss:$16 sps:$4 sm:$0xff]  }
 0x2e1   :  { %v5102_v55 = vadd.f32 %v12287_v56, %v4045_v41  ;;  %4256 = vmatmul.mubr.bf16.gmra.mrb[228].mxu1 %v10195_v37  ;;  %v5779_v58 = vmax.f32 %v5099_v49, 0.0  ;;  %v10201_v56 = vld [vmem:[%s13505_s0 + $0xaa0] ss:$16 sps:$4 sm:$0xff]   ;;  %v12377_v62 = vpop.f32.mrb[244].mxu0 }
 0x2e2   :  { %4263 = vmatprep.mubr.bf16.mxu1 %v10203_v47  ;;  %v5132_v7 = vpop.f32.mrb[245].mxu0  ;;  %v10228_v47 = vld [vmem:[%s13505_s0 + $0xb48] ss:$16 sps:$4 sm:$0xff]  }
 0x2e3   :  { %v5780_v59 = vmax.f32 %v5102_v55, 0.0  ;;  %v12383_v5 = vpop.f32.mrb[246].mxu0 }
 0x2e4   :  { %v4049_v61 = vpop.f32.mrb[232].mxu1 }
 0x2e5   :  { %v8671_v63 = vpack.c.bf16 %v5780_v59, %v5779_v58  ;;  %v4050_v54 = vadd.f32 %v12002_v28, %v4049_v61  ;;  %v4051_v0 = vpop.f32.mrb[233].mxu1  ;;  %v10227_v61 = vld [vmem:[%s13505_s0 + $0xb24] ss:$16 sps:$4 sm:$0xff]  }
 0x2e6   :  { %v4052_v1 = vpop.f32.mrb[234].mxu1  ;;  %5345 = vmatmul.mubr.bf16.gmra.mrb[96].mxu0 %v10216_v8 }
 0x2e7   :  { %9079 = vst [vmem:[%s13507_s3 + $0x1c8] sm:$0xff] %v8671_v63   ;;  %v5107_v4 = vadd.f32 %v12305_v3, %v4050_v54  ;;  %v4053_v60 = vadd.f32 %v12002_v28, %v4052_v1  ;;  %v4054_v6 = vpop.f32.mrb[235].mxu1  ;;  %v5135_v3 = vpop.f32.mrb[247].mxu0  ;;  %7832 = vmatprep.mubr.msk.bf16.mxu0 %vm3162_vm0, %v10224_v12 }
 0x2e8   :  { %v10242_v6 = vld [vmem:[%s13505_s0 + $0xb8c] ss:$16 sps:$4 sm:$0xff]  }
 0x2e9   :  { %v5110_v10 = vadd.f32 %v12311_v11, %v4053_v60  ;;  %4264 = vmatmul.mubr.bf16.gmra.mrb[232].mxu1 %v10201_v56  ;;  %v5781_v13 = vmax.f32 %v5107_v4, 0.0  ;;  %v10207_v11 = vld [vmem:[%s13505_s0 + $0xac0] ss:$16 sps:$4 sm:$0xff]   ;;  %v12401_v17 = vpop.f32.mrb[248].mxu0 }
 0x2ea   :  { %4271 = vmatprep.mubr.bf16.mxu1 %v10209_v2  ;;  %v5140_v25 = vpop.f32.mrb[249].mxu0  ;;  %v10234_v2 = vld [vmem:[%s13505_s0 + $0xb68] ss:$16 sps:$4 sm:$0xff]  }
 0x2eb   :  { %v5782_v14 = vmax.f32 %v5110_v10, 0.0  ;;  %v12407_v30 = vpop.f32.mrb[250].mxu0 }
 0x2ec   :  { %v4057_v16 = vpop.f32.mrb[236].mxu1 }
 0x2ed   :  { %v8676_v18 = vpack.c.bf16 %v5782_v14, %v5781_v13  ;;  %v4058_v9 = vadd.f32 %v12002_v28, %v4057_v16  ;;  %v4059_v19 = vpop.f32.mrb[237].mxu1  ;;  %v10233_v16 = vld [vmem:[%s13505_s0 + $0xb44] ss:$16 sps:$4 sm:$0xff]  }
 0x2ee   :  { %v4060_v20 = vpop.f32.mrb[238].mxu1  ;;  %5353 = vmatmul.mubr.bf16.gmra.mrb[100].mxu0 %v10222_v27 }
 0x2ef   :  { %9080 = vst [vmem:[%s13507_s3 + $0x1d0] sm:$0xff] %v8676_v18   ;;  %v5115_v26 = vadd.f32 %v12329_v24, %v4058_v9  ;;  %v4061_v15 = vadd.f32 %v12002_v28, %v4060_v20  ;;  %v4062_v23 = vpop.f32.mrb[239].mxu1  ;;  %v5143_v24 = vpop.f32.mrb[251].mxu0  ;;  %7833 = vmatprep.mubr.msk.bf16.mxu0 %vm3162_vm0, %v10230_v32 }
 0x2f0   :  { %v10248_v23 = vld [vmem:[%s13505_s0 + $0xbac] ss:$16 sps:$4 sm:$0xff]  }
 0x2f1   :  { %v5118_v22 = vadd.f32 %v12335_v31, %v4061_v15  ;;  %4272 = vmatmul.mubr.bf16.gmra.mrb[236].mxu1 %v10207_v11  ;;  %v5783_v33 = vmax.f32 %v5115_v26, 0.0  ;;  %v10213_v31 = vld [vmem:[%s13505_s0 + $0xae0] ss:$16 sps:$4 sm:$0xff]   ;;  %v12425_v37 = vpop.f32.mrb[252].mxu0 }
 0x2f2   :  { %4279 = vmatprep.mubr.bf16.mxu1 %v10215_v21  ;;  %v5148_v46 = vpop.f32.mrb[253].mxu0  ;;  %v10240_v21 = vld [vmem:[%s13505_s0 + $0xb88] ss:$16 sps:$4 sm:$0xff]  }
 0x2f3   :  { %v5784_v34 = vmax.f32 %v5118_v22, 0.0  ;;  %v12431_v41 = vpop.f32.mrb[254].mxu0 }
 0x2f4   :  { %v4065_v36 = vpop.f32.mrb[240].mxu1 }
 0x2f5   :  { %v8681_v38 = vpack.c.bf16 %v5784_v34, %v5783_v33  ;;  %v4066_v29 = vadd.f32 %v12002_v28, %v4065_v36  ;;  %v4067_v39 = vpop.f32.mrb[241].mxu1  ;;  %v10239_v36 = vld [vmem:[%s13505_s0 + $0xb64] ss:$16 sps:$4 sm:$0xff]  }
 0x2f6   :  { %v4068_v40 = vpop.f32.mrb[242].mxu1  ;;  %5361 = vmatmul.mubr.bf16.gmra.mrb[104].mxu0 %v10228_v47 }
 0x2f7   :  { %9081 = vst [vmem:[%s13507_s3 + $0x1d8] sm:$0xff] %v8681_v38   ;;  %v5123_v44 = vadd.f32 %v12353_v43, %v4066_v29  ;;  %v4069_v35 = vadd.f32 %v12002_v28, %v4068_v40  ;;  %v4070_v45 = vpop.f32.mrb[243].mxu1  ;;  %v5151_v43 = vpop.f32.mrb[255].mxu0  ;;  %7834 = vmatprep.mubr.msk.bf16.mxu0 %vm3162_vm0, %v10236_v51 }
 0x2f8   :  { %v10254_v45 = vld [vmem:[%s13505_s0 + $0xbcc] ss:$16 sps:$4 sm:$0xff]  }
 0x2f9   :  { %v5126_v49 = vadd.f32 %v12359_v50, %v4069_v35  ;;  %4280 = vmatmul.mubr.bf16.gmra.mrb[240].mxu1 %v10213_v31  ;;  %v5785_v52 = vmax.f32 %v5123_v44, 0.0  ;;  %v10219_v50 = vld [vmem:[%s13505_s0 + $0xb00] ss:$16 sps:$4 sm:$0xff]   ;;  %v12449_v56 = vpop.f32.mrb[0].mxu0 }
 0x2fa   :  { %4287 = vmatprep.mubr.bf16.mxu1 %v10221_v42  ;;  %v5156_v1 = vpop.f32.mrb[1].mxu0  ;;  %v10246_v42 = vld [vmem:[%s13505_s0 + $0xba8] ss:$16 sps:$4 sm:$0xff]  }
 0x2fb   :  { %v5786_v53 = vmax.f32 %v5126_v49, 0.0  ;;  %v12455_v60 = vpop.f32.mrb[2].mxu0 }
 0x2fc   :  { %v4073_v55 = vpop.f32.mrb[244].mxu1 }
 0x2fd   :  { %v8686_v57 = vpack.c.bf16 %v5786_v53, %v5785_v52  ;;  %v4074_v48 = vadd.f32 %v12002_v28, %v4073_v55  ;;  %v4075_v58 = vpop.f32.mrb[245].mxu1  ;;  %v10245_v55 = vld [vmem:[%s13505_s0 + $0xb84] ss:$16 sps:$4 sm:$0xff]  }
 0x2fe   :  { %v4076_v59 = vpop.f32.mrb[246].mxu1  ;;  %5369 = vmatmul.mubr.bf16.gmra.mrb[108].mxu0 %v10234_v2 }
 0x2ff   :  { %9082 = vst [vmem:[%s13507_s3 + $0x1e0] sm:$0xff] %v8686_v57   ;;  %v5131_v63 = vadd.f32 %v12377_v62, %v4074_v48  ;;  %v4077_v54 = vadd.f32 %v12002_v28, %v4076_v59  ;;  %v4078_v0 = vpop.f32.mrb[247].mxu1  ;;  %v5159_v62 = vpop.f32.mrb[3].mxu0  ;;  %7835 = vmatprep.mubr.msk.bf16.mxu0 %vm3162_vm0, %v10242_v6 }
 0x300   :  { %v10260_v0 = vld [vmem:[%s13505_s0 + $0xbec] ss:$16 sps:$4 sm:$0xff]  }
 0x301   :  { %v5134_v4 = vadd.f32 %v12383_v5, %v4077_v54  ;;  %4288 = vmatmul.mubr.bf16.gmra.mrb[244].mxu1 %v10219_v50  ;;  %v5787_v7 = vmax.f32 %v5131_v63, 0.0  ;;  %v10225_v5 = vld [vmem:[%s13505_s0 + $0xb20] ss:$16 sps:$4 sm:$0xff]   ;;  %v12473_v11 = vpop.f32.mrb[4].mxu0 }
 0x302   :  { %4295 = vmatprep.mubr.bf16.mxu1 %v10227_v61  ;;  %v5164_v20 = vpop.f32.mrb[5].mxu0  ;;  %v10252_v61 = vld [vmem:[%s13505_s0 + $0xbc8] ss:$16 sps:$4 sm:$0xff]  }
 0x303   :  { %v5788_v8 = vmax.f32 %v5134_v4, 0.0  ;;  %v12479_v15 = vpop.f32.mrb[6].mxu0 }
 0x304   :  { %v4081_v10 = vpop.f32.mrb[248].mxu1 }
 0x305   :  { %v8691_v12 = vpack.c.bf16 %v5788_v8, %v5787_v7  ;;  %v4082_v3 = vadd.f32 %v12002_v28, %v4081_v10  ;;  %v4083_v13 = vpop.f32.mrb[249].mxu1  ;;  %v10251_v10 = vld [vmem:[%s13505_s0 + $0xba4] ss:$16 sps:$4 sm:$0xff]  }
 0x306   :  { %v4084_v14 = vpop.f32.mrb[250].mxu1  ;;  %5377 = vmatmul.mubr.bf16.gmra.mrb[112].mxu0 %v10240_v21 }
 0x307   :  { %9083 = vst [vmem:[%s13507_s3 + $0x1e8] sm:$0xff] %v8691_v12   ;;  %v5139_v18 = vadd.f32 %v12401_v17, %v4082_v3  ;;  %v4085_v9 = vadd.f32 %v12002_v28, %v4084_v14  ;;  %v4086_v19 = vpop.f32.mrb[251].mxu1  ;;  %v5167_v17 = vpop.f32.mrb[7].mxu0  ;;  %7836 = vmatprep.mubr.msk.bf16.mxu0 %vm3162_vm0, %v10248_v23 }
 0x308   :  { %v10266_v19 = vld [vmem:[%s13505_s0 + $0xc0c] ss:$16 sps:$4 sm:$0xff]  }
 0x309   :  { %v5142_v26 = vadd.f32 %v12407_v30, %v4085_v9  ;;  %4296 = vmatmul.mubr.bf16.gmra.mrb[248].mxu1 %v10225_v5  ;;  %v5789_v25 = vmax.f32 %v5139_v18, 0.0  ;;  %v10231_v30 = vld [vmem:[%s13505_s0 + $0xb40] ss:$16 sps:$4 sm:$0xff]   ;;  %v12497_v31 = vpop.f32.mrb[8].mxu0 }
 0x30a   :  { %4303 = vmatprep.mubr.bf16.mxu1 %v10233_v16  ;;  %v5172_v40 = vpop.f32.mrb[9].mxu0  ;;  %v10258_v16 = vld [vmem:[%s13505_s0 + $0xbe8] ss:$16 sps:$4 sm:$0xff]  }
 0x30b   :  { %v5790_v27 = vmax.f32 %v5142_v26, 0.0  ;;  %v12503_v35 = vpop.f32.mrb[10].mxu0 }
 0x30c   :  { %v4089_v22 = vpop.f32.mrb[252].mxu1 }
 0x30d   :  { %v8696_v32 = vpack.c.bf16 %v5790_v27, %v5789_v25  ;;  %v4090_v24 = vadd.f32 %v12002_v28, %v4089_v22  ;;  %v4091_v33 = vpop.f32.mrb[253].mxu1  ;;  %v10257_v22 = vld [vmem:[%s13505_s0 + $0xbc4] ss:$16 sps:$4 sm:$0xff]  }
 0x30e   :  { %v4092_v34 = vpop.f32.mrb[254].mxu1  ;;  %5385 = vmatmul.mubr.bf16.gmra.mrb[116].mxu0 %v10246_v42 }
 0x30f   :  { %9084 = vst [vmem:[%s13507_s3 + $0x1f0] sm:$0xff] %v8696_v32   ;;  %v5147_v38 = vadd.f32 %v12425_v37, %v4090_v24  ;;  %v4093_v29 = vadd.f32 %v12002_v28, %v4092_v34  ;;  %v4094_v39 = vpop.f32.mrb[255].mxu1  ;;  %v5175_v37 = vpop.f32.mrb[11].mxu0  ;;  %7837 = vmatprep.mubr.msk.bf16.mxu0 %vm3162_vm0, %v10254_v45 }
 0x310   :  { %v10272_v39 = vld [vmem:[%s13505_s0 + $0xc2c] ss:$16 sps:$4 sm:$0xff]  }
 0x311   :  { %v5150_v44 = vadd.f32 %v12431_v41, %v4093_v29  ;;  %4304 = vmatmul.mubr.bf16.gmra.mrb[252].mxu1 %v10231_v30  ;;  %v5791_v46 = vmax.f32 %v5147_v38, 0.0  ;;  %v10237_v41 = vld [vmem:[%s13505_s0 + $0xb60] ss:$16 sps:$4 sm:$0xff]   ;;  %v12526_v50 = vpop.f32.mrb[12].mxu0 }
 0x312   :  { %4311 = vmatprep.mubr.bf16.mxu1 %v10239_v36  ;;  %v5180_v59 = vpop.f32.mrb[13].mxu0  ;;  %v10264_v36 = vld [vmem:[%s13505_s0 + $0xc08] ss:$16 sps:$4 sm:$0xff]  }
 0x313   :  { %v5792_v47 = vmax.f32 %v5150_v44, 0.0  ;;  %v12532_v54 = vpop.f32.mrb[14].mxu0 }
 0x314   :  { %v4097_v49 = vpop.f32.mrb[148].mxu1 }
 0x315   :  { %v8701_v51 = vpack.c.bf16 %v5792_v47, %v5791_v46  ;;  %v4098_v43 = vadd.f32 %v12002_v28, %v4097_v49  ;;  %v4099_v52 = vpop.f32.mrb[149].mxu1  ;;  %v12523_v28 = vld [vmem:[%s13506_s2] ss:$0 sm:$0xff]  ;;  %v10263_v49 = vld [vmem:[%s13505_s0 + $0xbe4] ss:$16 sps:$4 sm:$0xff]  }
 0x316   :  { %v4100_v53 = vpop.f32.mrb[150].mxu1  ;;  %5393 = vmatmul.mubr.bf16.gmra.mrb[120].mxu0 %v10252_v61 }
 0x317   :  { %9085 = vst [vmem:[%s13507_s3 + $0x1f8] sm:$0xff] %v8701_v51   ;;  %v5155_v57 = vadd.f32 %v12449_v56, %v4098_v43  ;;  %v4101_v48 = vadd.f32 %v12523_v28, %v4100_v53  ;;  %v4102_v58 = vpop.f32.mrb[151].mxu1  ;;  %v5183_v56 = vpop.f32.mrb[15].mxu0  ;;  %7838 = vmatprep.mubr.msk.bf16.mxu0 %vm3162_vm0, %v10260_v0 }
 0x318   :  { %v10278_v58 = vld [vmem:[%s13505_s0 + $0xc4c] ss:$16 sps:$4 sm:$0xff]  }
 0x319   :  { %v5158_v63 = vadd.f32 %v12455_v60, %v4101_v48  ;;  %4312 = vmatmul.mubr.bf16.gmra.mrb[148].mxu1 %v10237_v41  ;;  %v5793_v1 = vmax.f32 %v5155_v57, 0.0  ;;  %v10243_v60 = vld [vmem:[%s13505_s0 + $0xb80] ss:$16 sps:$4 sm:$0xff]   ;;  %v12550_v5 = vpop.f32.mrb[16].mxu0 }
 0x31a   :  { %4319 = vmatprep.mubr.bf16.mxu1 %v10245_v55  ;;  %v5188_v14 = vpop.f32.mrb[17].mxu0  ;;  %v10270_v55 = vld [vmem:[%s13505_s0 + $0xc28] ss:$16 sps:$4 sm:$0xff]  }
 0x31b   :  { %v5794_v2 = vmax.f32 %v5158_v63, 0.0  ;;  %v12556_v9 = vpop.f32.mrb[18].mxu0 }
 0x31c   :  { %v4105_v4 = vpop.f32.mrb[152].mxu1 }
 0x31d   :  { %v8706_v6 = vpack.c.bf16 %v5794_v2, %v5793_v1  ;;  %v4106_v62 = vadd.f32 %v12523_v28, %v4105_v4  ;;  %v4107_v7 = vpop.f32.mrb[153].mxu1  ;;  %v10269_v4 = vld [vmem:[%s13505_s0 + $0xc04] ss:$16 sps:$4 sm:$0xff]  }
 0x31e   :  { %v4108_v8 = vpop.f32.mrb[154].mxu1  ;;  %5401 = vmatmul.mubr.bf16.gmra.mrb[124].mxu0 %v10258_v16 }
 0x31f   :  { %9086 = vst [vmem:[%s13507_s3 + $0x200] sm:$0xff] %v8706_v6   ;;  %v5163_v12 = vadd.f32 %v12473_v11, %v4106_v62  ;;  %v4109_v3 = vadd.f32 %v12523_v28, %v4108_v8  ;;  %v4110_v13 = vpop.f32.mrb[155].mxu1  ;;  %v5191_v11 = vpop.f32.mrb[19].mxu0  ;;  %7839 = vmatprep.mubr.msk.bf16.mxu0 %vm3162_vm0, %v10266_v19 }
 0x320   :  { %v10284_v13 = vld [vmem:[%s13505_s0 + $0xc6c] ss:$16 sps:$4 sm:$0xff]  }
 0x321   :  { %v5166_v18 = vadd.f32 %v12479_v15, %v4109_v3  ;;  %4320 = vmatmul.mubr.bf16.gmra.mrb[152].mxu1 %v10243_v60  ;;  %v5795_v20 = vmax.f32 %v5163_v12, 0.0  ;;  %v10249_v15 = vld [vmem:[%s13505_s0 + $0xba0] ss:$16 sps:$4 sm:$0xff]   ;;  %v12574_v30 = vpop.f32.mrb[20].mxu0 }
 0x322   :  { %4327 = vmatprep.mubr.bf16.mxu1 %v10251_v10  ;;  %v5196_v34 = vpop.f32.mrb[21].mxu0  ;;  %v10276_v10 = vld [vmem:[%s13505_s0 + $0xc48] ss:$16 sps:$4 sm:$0xff]  }
 0x323   :  { %v5796_v21 = vmax.f32 %v5166_v18, 0.0  ;;  %v12580_v29 = vpop.f32.mrb[22].mxu0 }
 0x324   :  { %v4113_v26 = vpop.f32.mrb[156].mxu1 }
 0x325   :  { %v8711_v23 = vpack.c.bf16 %v5796_v21, %v5795_v20  ;;  %v4114_v17 = vadd.f32 %v12523_v28, %v4113_v26  ;;  %v4115_v25 = vpop.f32.mrb[157].mxu1  ;;  %v10275_v26 = vld [vmem:[%s13505_s0 + $0xc24] ss:$16 sps:$4 sm:$0xff]  }
 0x326   :  { %v4116_v27 = vpop.f32.mrb[158].mxu1  ;;  %5409 = vmatmul.mubr.bf16.gmra.mrb[128].mxu0 %v10264_v36 }
 0x327   :  { %9087 = vst [vmem:[%s13507_s3 + $0x208] sm:$0xff] %v8711_v23   ;;  %v5171_v32 = vadd.f32 %v12497_v31, %v4114_v17  ;;  %v4117_v24 = vadd.f32 %v12523_v28, %v4116_v27  ;;  %v4118_v33 = vpop.f32.mrb[159].mxu1  ;;  %v5199_v31 = vpop.f32.mrb[23].mxu0  ;;  %7840 = vmatprep.mubr.msk.bf16.mxu0 %vm3162_vm0, %v10272_v39 }
 0x328   :  { %v10290_v33 = vld [vmem:[%s13505_s0 + $0xc8c] ss:$16 sps:$4 sm:$0xff]  }
 0x329   :  { %v5174_v38 = vadd.f32 %v12503_v35, %v4117_v24  ;;  %4328 = vmatmul.mubr.bf16.gmra.mrb[156].mxu1 %v10249_v15  ;;  %v5797_v40 = vmax.f32 %v5171_v32, 0.0  ;;  %v10255_v35 = vld [vmem:[%s13505_s0 + $0xbc0] ss:$16 sps:$4 sm:$0xff]   ;;  %v12598_v41 = vpop.f32.mrb[24].mxu0 }
 0x32a   :  { %4335 = vmatprep.mubr.bf16.mxu1 %v10257_v22  ;;  %v5204_v53 = vpop.f32.mrb[25].mxu0  ;;  %v10282_v22 = vld [vmem:[%s13505_s0 + $0xc68] ss:$16 sps:$4 sm:$0xff]  }
 0x32b   :  { %v5798_v42 = vmax.f32 %v5174_v38, 0.0  ;;  %v12604_v48 = vpop.f32.mrb[26].mxu0 }
 0x32c   :  { %v4121_v44 = vpop.f32.mrb[160].mxu1 }
 0x32d   :  { %v8716_v45 = vpack.c.bf16 %v5798_v42, %v5797_v40  ;;  %v4122_v37 = vadd.f32 %v12523_v28, %v4121_v44  ;;  %v4123_v46 = vpop.f32.mrb[161].mxu1  ;;  %v10281_v44 = vld [vmem:[%s13505_s0 + $0xc44] ss:$16 sps:$4 sm:$0xff]  }
 0x32e   :  { %v4124_v47 = vpop.f32.mrb[162].mxu1  ;;  %5417 = vmatmul.mubr.bf16.gmra.mrb[132].mxu0 %v10270_v55 }
 0x32f   :  { %9088 = vst [vmem:[%s13507_s3 + $0x210] sm:$0xff] %v8716_v45   ;;  %v5179_v51 = vadd.f32 %v12526_v50, %v4122_v37  ;;  %v4125_v43 = vadd.f32 %v12523_v28, %v4124_v47  ;;  %v4126_v52 = vpop.f32.mrb[163].mxu1  ;;  %v5207_v50 = vpop.f32.mrb[27].mxu0  ;;  %7841 = vmatprep.mubr.msk.bf16.mxu0 %vm3162_vm0, %v10278_v58 }
 0x330   :  { %v10296_v52 = vld [vmem:[%s13505_s0 + $0xcac] ss:$16 sps:$4 sm:$0xff]  }
 0x331   :  { %v5182_v57 = vadd.f32 %v12532_v54, %v4125_v43  ;;  %4336 = vmatmul.mubr.bf16.gmra.mrb[160].mxu1 %v10255_v35  ;;  %v5799_v59 = vmax.f32 %v5179_v51, 0.0  ;;  %v10261_v54 = vld [vmem:[%s13505_s0 + $0xbe0] ss:$16 sps:$4 sm:$0xff]   ;;  %v12622_v60 = vpop.f32.mrb[28].mxu0 }
 0x332   :  { %4343 = vmatprep.mubr.bf16.mxu1 %v10263_v49  ;;  %v5212_v8 = vpop.f32.mrb[29].mxu0  ;;  %v10288_v49 = vld [vmem:[%s13505_s0 + $0xc88] ss:$16 sps:$4 sm:$0xff]  }
 0x333   :  { %v5800_v61 = vmax.f32 %v5182_v57, 0.0  ;;  %v12628_v3 = vpop.f32.mrb[30].mxu0 }
 0x334   :  { %v4129_v63 = vpop.f32.mrb[164].mxu1 }
 0x335   :  { %v8721_v0 = vpack.c.bf16 %v5800_v61, %v5799_v59  ;;  %v4130_v56 = vadd.f32 %v12523_v28, %v4129_v63  ;;  %v4131_v1 = vpop.f32.mrb[165].mxu1  ;;  %v10287_v63 = vld [vmem:[%s13505_s0 + $0xc64] ss:$16 sps:$4 sm:$0xff]  }
 0x336   :  { %v4132_v2 = vpop.f32.mrb[166].mxu1  ;;  %5425 = vmatmul.mubr.bf16.gmra.mrb[136].mxu0 %v10276_v10 }
 0x337   :  { %9089 = vst [vmem:[%s13507_s3 + $0x218] sm:$0xff] %v8721_v0   ;;  %v5187_v6 = vadd.f32 %v12550_v5, %v4130_v56  ;;  %v4133_v62 = vadd.f32 %v12523_v28, %v4132_v2  ;;  %v4134_v7 = vpop.f32.mrb[167].mxu1  ;;  %v5215_v5 = vpop.f32.mrb[31].mxu0  ;;  %7842 = vmatprep.mubr.msk.bf16.mxu0 %vm3162_vm0, %v10284_v13 }
 0x338   :  { %v10302_v7 = vld [vmem:[%s13505_s0 + $0xccc] ss:$16 sps:$4 sm:$0xff]  }
 0x339   :  { %v5190_v12 = vadd.f32 %v12556_v9, %v4133_v62  ;;  %4344 = vmatmul.mubr.bf16.gmra.mrb[164].mxu1 %v10261_v54  ;;  %v5801_v14 = vmax.f32 %v5187_v6, 0.0  ;;  %v10267_v9 = vld [vmem:[%s13505_s0 + $0xc00] ss:$16 sps:$4 sm:$0xff]   ;;  %v12646_v15 = vpop.f32.mrb[32].mxu0 }
 0x33a   :  { %4351 = vmatprep.mubr.bf16.mxu1 %v10269_v4  ;;  %v5220_v27 = vpop.f32.mrb[33].mxu0  ;;  %v10294_v4 = vld [vmem:[%s13505_s0 + $0xca8] ss:$16 sps:$4 sm:$0xff]  }
 0x33b   :  { %v5802_v16 = vmax.f32 %v5190_v12, 0.0  ;;  %v12652_v24 = vpop.f32.mrb[34].mxu0 }
 0x33c   :  { %v4137_v18 = vpop.f32.mrb[168].mxu1 }
 0x33d   :  { %v8726_v19 = vpack.c.bf16 %v5802_v16, %v5801_v14  ;;  %v4138_v11 = vadd.f32 %v12523_v28, %v4137_v18  ;;  %v4139_v20 = vpop.f32.mrb[169].mxu1  ;;  %v10293_v18 = vld [vmem:[%s13505_s0 + $0xc84] ss:$16 sps:$4 sm:$0xff]  }
 0x33e   :  { %v4140_v21 = vpop.f32.mrb[170].mxu1  ;;  %5433 = vmatmul.mubr.bf16.gmra.mrb[140].mxu0 %v10282_v22 }
 0x33f   :  { %9090 = vst [vmem:[%s13507_s3 + $0x220] sm:$0xff] %v8726_v19   ;;  %v5195_v23 = vadd.f32 %v12574_v30, %v4138_v11  ;;  %v4141_v17 = vadd.f32 %v12523_v28, %v4140_v21  ;;  %v4142_v25 = vpop.f32.mrb[171].mxu1  ;;  %v5223_v30 = vpop.f32.mrb[35].mxu0  ;;  %7843 = vmatprep.mubr.msk.bf16.mxu0 %vm3162_vm0, %v10290_v33 }
 0x340   :  { %v10308_v25 = vld [vmem:[%s13505_s0 + $0xcec] ss:$16 sps:$4 sm:$0xff]  }
 0x341   :  { %v5198_v32 = vadd.f32 %v12580_v29, %v4141_v17  ;;  %4352 = vmatmul.mubr.bf16.gmra.mrb[168].mxu1 %v10267_v9  ;;  %v5803_v34 = vmax.f32 %v5195_v23, 0.0  ;;  %v10273_v29 = vld [vmem:[%s13505_s0 + $0xc20] ss:$16 sps:$4 sm:$0xff]   ;;  %v12670_v35 = vpop.f32.mrb[36].mxu0 }
 0x342   :  { %4359 = vmatprep.mubr.bf16.mxu1 %v10275_v26  ;;  %v5228_v47 = vpop.f32.mrb[37].mxu0  ;;  %v10300_v26 = vld [vmem:[%s13505_s0 + $0xcc8] ss:$16 sps:$4 sm:$0xff]  }
 0x343   :  { %v5804_v36 = vmax.f32 %v5198_v32, 0.0  ;;  %v12676_v43 = vpop.f32.mrb[38].mxu0 }
 0x344   :  { %v4145_v38 = vpop.f32.mrb[172].mxu1 }
 0x345   :  { %v8731_v39 = vpack.c.bf16 %v5804_v36, %v5803_v34  ;;  %v4146_v31 = vadd.f32 %v12523_v28, %v4145_v38  ;;  %v4147_v40 = vpop.f32.mrb[173].mxu1  ;;  %v10299_v38 = vld [vmem:[%s13505_s0 + $0xca4] ss:$16 sps:$4 sm:$0xff]  }
 0x346   :  { %v4148_v42 = vpop.f32.mrb[174].mxu1  ;;  %5441 = vmatmul.mubr.bf16.gmra.mrb[144].mxu0 %v10288_v49 }
 0x347   :  { %9091 = vst [vmem:[%s13507_s3 + $0x228] sm:$0xff] %v8731_v39   ;;  %v5203_v45 = vadd.f32 %v12598_v41, %v4146_v31  ;;  %v4149_v37 = vadd.f32 %v12523_v28, %v4148_v42  ;;  %v4150_v46 = vpop.f32.mrb[175].mxu1  ;;  %v5231_v41 = vpop.f32.mrb[39].mxu0  ;;  %7844 = vmatprep.mubr.msk.bf16.mxu0 %vm3162_vm0, %v10296_v52 }
 0x348   :  { %v10314_v46 = vld [vmem:[%s13505_s0 + $0xd0c] ss:$16 sps:$4 sm:$0xff]  }
 0x349   :  { %v5206_v51 = vadd.f32 %v12604_v48, %v4149_v37  ;;  %4360 = vmatmul.mubr.bf16.gmra.mrb[172].mxu1 %v10273_v29  ;;  %v5805_v53 = vmax.f32 %v5203_v45, 0.0  ;;  %v10279_v48 = vld [vmem:[%s13505_s0 + $0xc40] ss:$16 sps:$4 sm:$0xff]   ;;  %v12694_v54 = vpop.f32.mrb[40].mxu0 }
 0x34a   :  { %4367 = vmatprep.mubr.bf16.mxu1 %v10281_v44  ;;  %v5236_v2 = vpop.f32.mrb[41].mxu0  ;;  %v10306_v44 = vld [vmem:[%s13505_s0 + $0xce8] ss:$16 sps:$4 sm:$0xff]  }
 0x34b   :  { %v5806_v55 = vmax.f32 %v5206_v51, 0.0  ;;  %v12700_v62 = vpop.f32.mrb[42].mxu0 }
 0x34c   :  { %v4153_v57 = vpop.f32.mrb[176].mxu1 }
 0x34d   :  { %v8736_v58 = vpack.c.bf16 %v5806_v55, %v5805_v53  ;;  %v4154_v50 = vadd.f32 %v12523_v28, %v4153_v57  ;;  %v4155_v59 = vpop.f32.mrb[177].mxu1  ;;  %v10305_v57 = vld [vmem:[%s13505_s0 + $0xcc4] ss:$16 sps:$4 sm:$0xff]  }
 0x34e   :  { %v4156_v61 = vpop.f32.mrb[178].mxu1  ;;  %5449 = vmatmul.mubr.bf16.gmra.mrb[148].mxu0 %v10294_v4 }
 0x34f   :  { %9092 = vst [vmem:[%s13507_s3 + $0x230] sm:$0xff] %v8736_v58   ;;  %v5211_v0 = vadd.f32 %v12622_v60, %v4154_v50  ;;  %v4157_v56 = vadd.f32 %v12523_v28, %v4156_v61  ;;  %v4158_v1 = vpop.f32.mrb[179].mxu1  ;;  %v5239_v60 = vpop.f32.mrb[43].mxu0  ;;  %7845 = vmatprep.mubr.msk.bf16.mxu0 %vm3162_vm0, %v10302_v7 }
 0x350   :  { %v10320_v1 = vld [vmem:[%s13505_s0 + $0xd2c] ss:$16 sps:$4 sm:$0xff]  }
 0x351   :  { %v5214_v6 = vadd.f32 %v12628_v3, %v4157_v56  ;;  %4368 = vmatmul.mubr.bf16.gmra.mrb[176].mxu1 %v10279_v48  ;;  %v5807_v8 = vmax.f32 %v5211_v0, 0.0  ;;  %v10285_v3 = vld [vmem:[%s13505_s0 + $0xc60] ss:$16 sps:$4 sm:$0xff]   ;;  %v12718_v9 = vpop.f32.mrb[44].mxu0 }
 0x352   :  { %4375 = vmatprep.mubr.bf16.mxu1 %v10287_v63  ;;  %v5244_v21 = vpop.f32.mrb[45].mxu0  ;;  %v10312_v63 = vld [vmem:[%s13505_s0 + $0xd08] ss:$16 sps:$4 sm:$0xff]  }
 0x353   :  { %v5808_v10 = vmax.f32 %v5214_v6, 0.0  ;;  %v12724_v17 = vpop.f32.mrb[46].mxu0 }
 0x354   :  { %v4161_v12 = vpop.f32.mrb[180].mxu1 }
 0x355   :  { %v8741_v13 = vpack.c.bf16 %v5808_v10, %v5807_v8  ;;  %v4162_v5 = vadd.f32 %v12523_v28, %v4161_v12  ;;  %v4163_v14 = vpop.f32.mrb[181].mxu1  ;;  %v10311_v12 = vld [vmem:[%s13505_s0 + $0xce4] ss:$16 sps:$4 sm:$0xff]  }
 0x356   :  { %v4164_v16 = vpop.f32.mrb[182].mxu1  ;;  %5457 = vmatmul.mubr.bf16.gmra.mrb[152].mxu0 %v10300_v26 }
 0x357   :  { %9093 = vst [vmem:[%s13507_s3 + $0x238] sm:$0xff] %v8741_v13   ;;  %v5219_v19 = vadd.f32 %v12646_v15, %v4162_v5  ;;  %v4165_v11 = vadd.f32 %v12523_v28, %v4164_v16  ;;  %v4166_v20 = vpop.f32.mrb[183].mxu1  ;;  %v5247_v15 = vpop.f32.mrb[47].mxu0  ;;  %7846 = vmatprep.mubr.msk.bf16.mxu0 %vm3162_vm0, %v10308_v25 }
 0x358   :  { %v10326_v20 = vld [vmem:[%s13505_s0 + $0xd4c] ss:$16 sps:$4 sm:$0xff]  }
 0x359   :  { %v5222_v23 = vadd.f32 %v12652_v24, %v4165_v11  ;;  %4376 = vmatmul.mubr.bf16.gmra.mrb[180].mxu1 %v10285_v3  ;;  %v5809_v27 = vmax.f32 %v5219_v19, 0.0  ;;  %v10291_v24 = vld [vmem:[%s13505_s0 + $0xc80] ss:$16 sps:$4 sm:$0xff]   ;;  %v12742_v29 = vpop.f32.mrb[48].mxu0 }
 0x35a   :  { %4383 = vmatprep.mubr.bf16.mxu1 %v10293_v18  ;;  %v5252_v42 = vpop.f32.mrb[49].mxu0  ;;  %v10318_v18 = vld [vmem:[%s13505_s0 + $0xd28] ss:$16 sps:$4 sm:$0xff]  }
 0x35b   :  { %v5810_v22 = vmax.f32 %v5222_v23, 0.0  ;;  %v12748_v37 = vpop.f32.mrb[50].mxu0 }
 0x35c   :  { %v4169_v32 = vpop.f32.mrb[184].mxu1 }
 0x35d   :  { %v8746_v33 = vpack.c.bf16 %v5810_v22, %v5809_v27  ;;  %v4170_v30 = vadd.f32 %v12523_v28, %v4169_v32  ;;  %v4171_v34 = vpop.f32.mrb[185].mxu1  ;;  %v10317_v32 = vld [vmem:[%s13505_s0 + $0xd04] ss:$16 sps:$4 sm:$0xff]  }
 0x35e   :  { %v4172_v36 = vpop.f32.mrb[186].mxu1  ;;  %5465 = vmatmul.mubr.bf16.gmra.mrb[156].mxu0 %v10306_v44 }
 0x35f   :  { %9094 = vst [vmem:[%s13507_s3 + $0x240] sm:$0xff] %v8746_v33   ;;  %v5227_v39 = vadd.f32 %v12670_v35, %v4170_v30  ;;  %v4173_v31 = vadd.f32 %v12523_v28, %v4172_v36  ;;  %v4174_v40 = vpop.f32.mrb[187].mxu1  ;;  %v5255_v35 = vpop.f32.mrb[51].mxu0  ;;  %7847 = vmatprep.mubr.msk.bf16.mxu0 %vm3162_vm0, %v10314_v46 }
 0x360   :  { %v10332_v40 = vld [vmem:[%s13505_s0 + $0xd6c] ss:$16 sps:$4 sm:$0xff]  }
 0x361   :  { %v5230_v45 = vadd.f32 %v12676_v43, %v4173_v31  ;;  %4384 = vmatmul.mubr.bf16.gmra.mrb[184].mxu1 %v10291_v24  ;;  %v5811_v47 = vmax.f32 %v5227_v39, 0.0  ;;  %v10297_v43 = vld [vmem:[%s13505_s0 + $0xca0] ss:$16 sps:$4 sm:$0xff]   ;;  %v12766_v48 = vpop.f32.mrb[52].mxu0 }
 0x362   :  { %4391 = vmatprep.mubr.bf16.mxu1 %v10299_v38  ;;  %v5260_v61 = vpop.f32.mrb[53].mxu0  ;;  %v10324_v38 = vld [vmem:[%s13505_s0 + $0xd48] ss:$16 sps:$4 sm:$0xff]  }
 0x363   :  { %v5812_v49 = vmax.f32 %v5230_v45, 0.0  ;;  %v12772_v56 = vpop.f32.mrb[54].mxu0 }
 0x364   :  { %v4177_v51 = vpop.f32.mrb[188].mxu1 }
 0x365   :  { %v8751_v52 = vpack.c.bf16 %v5812_v49, %v5811_v47  ;;  %v4178_v41 = vadd.f32 %v12523_v28, %v4177_v51  ;;  %v4179_v53 = vpop.f32.mrb[189].mxu1  ;;  %v10323_v51 = vld [vmem:[%s13505_s0 + $0xd24] ss:$16 sps:$4 sm:$0xff]  }
 0x366   :  { %v4180_v55 = vpop.f32.mrb[190].mxu1  ;;  %5473 = vmatmul.mubr.bf16.gmra.mrb[160].mxu0 %v10312_v63 }
 0x367   :  { %9095 = vst [vmem:[%s13507_s3 + $0x248] sm:$0xff] %v8751_v52   ;;  %v5235_v58 = vadd.f32 %v12694_v54, %v4178_v41  ;;  %v4181_v50 = vadd.f32 %v12523_v28, %v4180_v55  ;;  %v4182_v59 = vpop.f32.mrb[191].mxu1  ;;  %v5263_v54 = vpop.f32.mrb[55].mxu0  ;;  %7848 = vmatprep.mubr.msk.bf16.mxu0 %vm3162_vm0, %v10320_v1 }
 0x368   :  { %v10338_v59 = vld [vmem:[%s13505_s0 + $0xd8c] ss:$16 sps:$4 sm:$0xff]  }
 0x369   :  { %v5238_v0 = vadd.f32 %v12700_v62, %v4181_v50  ;;  %4392 = vmatmul.mubr.bf16.gmra.mrb[188].mxu1 %v10297_v43  ;;  %v5813_v2 = vmax.f32 %v5235_v58, 0.0  ;;  %v10303_v62 = vld [vmem:[%s13505_s0 + $0xcc0] ss:$16 sps:$4 sm:$0xff]   ;;  %v12790_v3 = vpop.f32.mrb[56].mxu0 }
 0x36a   :  { %4399 = vmatprep.mubr.bf16.mxu1 %v10305_v57  ;;  %v5268_v16 = vpop.f32.mrb[57].mxu0  ;;  %v10330_v57 = vld [vmem:[%s13505_s0 + $0xd68] ss:$16 sps:$4 sm:$0xff]  }
 0x36b   :  { %v5814_v4 = vmax.f32 %v5238_v0, 0.0  ;;  %v12796_v11 = vpop.f32.mrb[58].mxu0 }
 0x36c   :  { %v4185_v6 = vpop.f32.mrb[192].mxu1 }
 0x36d   :  { %v8756_v7 = vpack.c.bf16 %v5814_v4, %v5813_v2  ;;  %v4186_v60 = vadd.f32 %v12523_v28, %v4185_v6  ;;  %v4187_v8 = vpop.f32.mrb[193].mxu1  ;;  %v10329_v6 = vld [vmem:[%s13505_s0 + $0xd44] ss:$16 sps:$4 sm:$0xff]  }
 0x36e   :  { %v4188_v10 = vpop.f32.mrb[194].mxu1  ;;  %5481 = vmatmul.mubr.bf16.gmra.mrb[164].mxu0 %v10318_v18 }
 0x36f   :  { %9096 = vst [vmem:[%s13507_s3 + $0x250] sm:$0xff] %v8756_v7   ;;  %v5243_v13 = vadd.f32 %v12718_v9, %v4186_v60  ;;  %v4189_v5 = vadd.f32 %v12523_v28, %v4188_v10  ;;  %v4190_v14 = vpop.f32.mrb[195].mxu1  ;;  %v5271_v9 = vpop.f32.mrb[59].mxu0  ;;  %7849 = vmatprep.mubr.msk.bf16.mxu0 %vm3162_vm0, %v10326_v20 }
 0x370   :  { %v10344_v14 = vld [vmem:[%s13505_s0 + $0xdac] ss:$16 sps:$4 sm:$0xff]  }
 0x371   :  { %v5246_v19 = vadd.f32 %v12724_v17, %v4189_v5  ;;  %4400 = vmatmul.mubr.bf16.gmra.mrb[192].mxu1 %v10303_v62  ;;  %v5815_v21 = vmax.f32 %v5243_v13, 0.0  ;;  %v10309_v17 = vld [vmem:[%s13505_s0 + $0xce0] ss:$16 sps:$4 sm:$0xff]   ;;  %v12814_v24 = vpop.f32.mrb[60].mxu0 }
 0x372   :  { %4407 = vmatprep.mubr.bf16.mxu1 %v10311_v12  ;;  %v5276_v36 = vpop.f32.mrb[61].mxu0  ;;  %v10336_v12 = vld [vmem:[%s13505_s0 + $0xd88] ss:$16 sps:$4 sm:$0xff]  }
 0x373   :  { %v5816_v26 = vmax.f32 %v5246_v19, 0.0  ;;  %v12820_v31 = vpop.f32.mrb[62].mxu0 }
 0x374   :  { %v4193_v23 = vpop.f32.mrb[196].mxu1 }
 0x375   :  { %v8761_v25 = vpack.c.bf16 %v5816_v26, %v5815_v21  ;;  %v4194_v15 = vadd.f32 %v12523_v28, %v4193_v23  ;;  %v4195_v27 = vpop.f32.mrb[197].mxu1  ;;  %v10335_v23 = vld [vmem:[%s13505_s0 + $0xd64] ss:$16 sps:$4 sm:$0xff]  }
 0x376   :  { %v4196_v22 = vpop.f32.mrb[198].mxu1  ;;  %5489 = vmatmul.mubr.bf16.gmra.mrb[168].mxu0 %v10324_v38 }
 0x377   :  { %9097 = vst [vmem:[%s13507_s3 + $0x258] sm:$0xff] %v8761_v25   ;;  %v5251_v33 = vadd.f32 %v12742_v29, %v4194_v15  ;;  %v4197_v30 = vadd.f32 %v12523_v28, %v4196_v22  ;;  %v4198_v34 = vpop.f32.mrb[199].mxu1  ;;  %v5279_v29 = vpop.f32.mrb[63].mxu0  ;;  %7850 = vmatprep.mubr.msk.bf16.mxu0 %vm3162_vm0, %v10332_v40 }
 0x378   :  { %v10350_v34 = vld [vmem:[%s13505_s0 + $0xdcc] ss:$16 sps:$4 sm:$0xff]  }
 0x379   :  { %v5254_v39 = vadd.f32 %v12748_v37, %v4197_v30  ;;  %4408 = vmatmul.mubr.bf16.gmra.mrb[196].mxu1 %v10309_v17  ;;  %v5817_v42 = vmax.f32 %v5251_v33, 0.0  ;;  %v10315_v37 = vld [vmem:[%s13505_s0 + $0xd00] ss:$16 sps:$4 sm:$0xff]   ;;  %v12838_v43 = vpop.f32.mrb[64].mxu0 }
 0x37a   :  { %4415 = vmatprep.mubr.bf16.mxu1 %v10317_v32  ;;  %v5284_v55 = vpop.f32.mrb[65].mxu0  ;;  %v10342_v32 = vld [vmem:[%s13505_s0 + $0xda8] ss:$16 sps:$4 sm:$0xff]  }
 0x37b   :  { %v5818_v44 = vmax.f32 %v5254_v39, 0.0  ;;  %v12844_v50 = vpop.f32.mrb[66].mxu0 }
 0x37c   :  { %v4201_v45 = vpop.f32.mrb[200].mxu1 }
 0x37d   :  { %v8766_v46 = vpack.c.bf16 %v5818_v44, %v5817_v42  ;;  %v4202_v35 = vadd.f32 %v12523_v28, %v4201_v45  ;;  %v4203_v47 = vpop.f32.mrb[201].mxu1  ;;  %v10341_v45 = vld [vmem:[%s13505_s0 + $0xd84] ss:$16 sps:$4 sm:$0xff]  }
 0x37e   :  { %v4204_v49 = vpop.f32.mrb[202].mxu1  ;;  %5497 = vmatmul.mubr.bf16.gmra.mrb[172].mxu0 %v10330_v57 }
 0x37f   :  { %9098 = vst [vmem:[%s13507_s3 + $0x260] sm:$0xff] %v8766_v46   ;;  %v5259_v52 = vadd.f32 %v12766_v48, %v4202_v35  ;;  %v4205_v41 = vadd.f32 %v12523_v28, %v4204_v49  ;;  %v4206_v53 = vpop.f32.mrb[203].mxu1  ;;  %v5287_v48 = vpop.f32.mrb[67].mxu0  ;;  %7851 = vmatprep.mubr.msk.bf16.mxu0 %vm3162_vm0, %v10338_v59 }
 0x380   :  { %v10356_v53 = vld [vmem:[%s13505_s0 + $0xdec] ss:$16 sps:$4 sm:$0xff]  }
 0x381   :  { %v5262_v58 = vadd.f32 %v12772_v56, %v4205_v41  ;;  %4416 = vmatmul.mubr.bf16.gmra.mrb[200].mxu1 %v10315_v37  ;;  %v5819_v61 = vmax.f32 %v5259_v52, 0.0  ;;  %v10321_v56 = vld [vmem:[%s13505_s0 + $0xd20] ss:$16 sps:$4 sm:$0xff]   ;;  %v12862_v62 = vpop.f32.mrb[68].mxu0 }
 0x382   :  { %4423 = vmatprep.mubr.bf16.mxu1 %v10323_v51  ;;  %v5292_v10 = vpop.f32.mrb[69].mxu0  ;;  %v10348_v51 = vld [vmem:[%s13505_s0 + $0xdc8] ss:$16 sps:$4 sm:$0xff]  }
 0x383   :  { %v5820_v63 = vmax.f32 %v5262_v58, 0.0  ;;  %v12868_v5 = vpop.f32.mrb[70].mxu0 }
 0x384   :  { %v4209_v0 = vpop.f32.mrb[204].mxu1 }
 0x385   :  { %v8771_v1 = vpack.c.bf16 %v5820_v63, %v5819_v61  ;;  %v4210_v54 = vadd.f32 %v12523_v28, %v4209_v0  ;;  %v4211_v2 = vpop.f32.mrb[205].mxu1  ;;  %v10347_v0 = vld [vmem:[%s13505_s0 + $0xda4] ss:$16 sps:$4 sm:$0xff]  }
 0x386   :  { %v4212_v4 = vpop.f32.mrb[206].mxu1  ;;  %5505 = vmatmul.mubr.bf16.gmra.mrb[176].mxu0 %v10336_v12 }
 0x387   :  { %9099 = vst [vmem:[%s13507_s3 + $0x268] sm:$0xff] %v8771_v1   ;;  %v5267_v7 = vadd.f32 %v12790_v3, %v4210_v54  ;;  %v4213_v60 = vadd.f32 %v12523_v28, %v4212_v4  ;;  %v4214_v8 = vpop.f32.mrb[207].mxu1  ;;  %v5295_v3 = vpop.f32.mrb[71].mxu0  ;;  %7852 = vmatprep.mubr.msk.bf16.mxu0 %vm3162_vm0, %v10344_v14 }
 0x388   :  { %v10362_v8 = vld [vmem:[%s13505_s0 + $0xe0c] ss:$16 sps:$4 sm:$0xff]  }
 0x389   :  { %v5270_v13 = vadd.f32 %v12796_v11, %v4213_v60  ;;  %4424 = vmatmul.mubr.bf16.gmra.mrb[204].mxu1 %v10321_v56  ;;  %v5821_v16 = vmax.f32 %v5267_v7, 0.0  ;;  %v10327_v11 = vld [vmem:[%s13505_s0 + $0xd40] ss:$16 sps:$4 sm:$0xff]   ;;  %v12886_v17 = vpop.f32.mrb[72].mxu0 }
 0x38a   :  { %4431 = vmatprep.mubr.bf16.mxu1 %v10329_v6  ;;  %v5300_v22 = vpop.f32.mrb[73].mxu0  ;;  %v10354_v6 = vld [vmem:[%s13505_s0 + $0xde8] ss:$16 sps:$4 sm:$0xff]  }
 0x38b   :  { %v5822_v18 = vmax.f32 %v5270_v13, 0.0  ;;  %v12892_v30 = vpop.f32.mrb[74].mxu0 }
 0x38c   :  { %v4217_v19 = vpop.f32.mrb[208].mxu1 }
 0x38d   :  { %v8776_v20 = vpack.c.bf16 %v5822_v18, %v5821_v16  ;;  %v4218_v9 = vadd.f32 %v12523_v28, %v4217_v19  ;;  %v4219_v21 = vpop.f32.mrb[209].mxu1  ;;  %v10353_v19 = vld [vmem:[%s13505_s0 + $0xdc4] ss:$16 sps:$4 sm:$0xff]  }
 0x38e   :  { %v4220_v26 = vpop.f32.mrb[210].mxu1  ;;  %5513 = vmatmul.mubr.bf16.gmra.mrb[180].mxu0 %v10342_v32 }
 0x38f   :  { %9100 = vst [vmem:[%s13507_s3 + $0x270] sm:$0xff] %v8776_v20   ;;  %v5275_v25 = vadd.f32 %v12814_v24, %v4218_v9  ;;  %v4221_v15 = vadd.f32 %v12523_v28, %v4220_v26  ;;  %v4222_v27 = vpop.f32.mrb[211].mxu1  ;;  %v5303_v24 = vpop.f32.mrb[75].mxu0  ;;  %7853 = vmatprep.mubr.msk.bf16.mxu0 %vm3162_vm0, %v10350_v34 }
 0x390   :  { %v10368_v27 = vld [vmem:[%s13505_s0 + $0xe2c] ss:$16 sps:$4 sm:$0xff]  }
 0x391   :  { %v5278_v33 = vadd.f32 %v12820_v31, %v4221_v15  ;;  %4432 = vmatmul.mubr.bf16.gmra.mrb[208].mxu1 %v10327_v11  ;;  %v5823_v36 = vmax.f32 %v5275_v25, 0.0  ;;  %v10333_v31 = vld [vmem:[%s13505_s0 + $0xd60] ss:$16 sps:$4 sm:$0xff]   ;;  %v12910_v37 = vpop.f32.mrb[76].mxu0 }
 0x392   :  { %4439 = vmatprep.mubr.bf16.mxu1 %v10335_v23  ;;  %v5308_v49 = vpop.f32.mrb[77].mxu0  ;;  %v10360_v23 = vld [vmem:[%s13505_s0 + $0xe08] ss:$16 sps:$4 sm:$0xff]  }
 0x393   :  { %v5824_v38 = vmax.f32 %v5278_v33, 0.0  ;;  %v12916_v41 = vpop.f32.mrb[78].mxu0 }
 0x394   :  { %v4225_v39 = vpop.f32.mrb[212].mxu1 }
 0x395   :  { %v8781_v40 = vpack.c.bf16 %v5824_v38, %v5823_v36  ;;  %v4226_v29 = vadd.f32 %v12523_v28, %v4225_v39  ;;  %v4227_v42 = vpop.f32.mrb[213].mxu1  ;;  %v10359_v39 = vld [vmem:[%s13505_s0 + $0xde4] ss:$16 sps:$4 sm:$0xff]  }
 0x396   :  { %v4228_v44 = vpop.f32.mrb[214].mxu1  ;;  %5521 = vmatmul.mubr.bf16.gmra.mrb[184].mxu0 %v10348_v51 }
 0x397   :  { %9101 = vst [vmem:[%s13507_s3 + $0x278] sm:$0xff] %v8781_v40   ;;  %v5283_v46 = vadd.f32 %v12838_v43, %v4226_v29  ;;  %v4229_v35 = vadd.f32 %v12523_v28, %v4228_v44  ;;  %v4230_v47 = vpop.f32.mrb[215].mxu1  ;;  %v5311_v43 = vpop.f32.mrb[79].mxu0  ;;  %7854 = vmatprep.mubr.msk.bf16.mxu0 %vm3162_vm0, %v10356_v53 }
 0x398   :  { %v10374_v47 = vld [vmem:[%s13505_s0 + $0xe4c] ss:$16 sps:$4 sm:$0xff]  }
 0x399   :  { %v5286_v52 = vadd.f32 %v12844_v50, %v4229_v35  ;;  %4440 = vmatmul.mubr.bf16.gmra.mrb[212].mxu1 %v10333_v31  ;;  %v5825_v55 = vmax.f32 %v5283_v46, 0.0  ;;  %v10339_v50 = vld [vmem:[%s13505_s0 + $0xd80] ss:$16 sps:$4 sm:$0xff]   ;;  %v12934_v56 = vpop.f32.mrb[80].mxu0 }
 0x39a   :  { %4447 = vmatprep.mubr.bf16.mxu1 %v10341_v45  ;;  %v5316_v4 = vpop.f32.mrb[81].mxu0  ;;  %v10366_v45 = vld [vmem:[%s13505_s0 + $0xe28] ss:$16 sps:$4 sm:$0xff]  }
 0x39b   :  { %v5826_v57 = vmax.f32 %v5286_v52, 0.0  ;;  %v12940_v60 = vpop.f32.mrb[82].mxu0 }
 0x39c   :  { %v4233_v58 = vpop.f32.mrb[216].mxu1 }
 0x39d   :  { %v8786_v59 = vpack.c.bf16 %v5826_v57, %v5825_v55  ;;  %v4234_v48 = vadd.f32 %v12523_v28, %v4233_v58  ;;  %v4235_v61 = vpop.f32.mrb[217].mxu1  ;;  %v10365_v58 = vld [vmem:[%s13505_s0 + $0xe04] ss:$16 sps:$4 sm:$0xff]  }
 0x39e   :  { %v4236_v63 = vpop.f32.mrb[218].mxu1  ;;  %5529 = vmatmul.mubr.bf16.gmra.mrb[188].mxu0 %v10354_v6 }
 0x39f   :  { %9102 = vst [vmem:[%s13507_s3 + $0x280] sm:$0xff] %v8786_v59   ;;  %v5291_v1 = vadd.f32 %v12862_v62, %v4234_v48  ;;  %v4237_v54 = vadd.f32 %v12523_v28, %v4236_v63  ;;  %v4238_v2 = vpop.f32.mrb[219].mxu1  ;;  %v5319_v62 = vpop.f32.mrb[83].mxu0  ;;  %7855 = vmatprep.mubr.msk.bf16.mxu0 %vm3162_vm0, %v10362_v8 }
 0x3a0   :  { %v10380_v2 = vld [vmem:[%s13505_s0 + $0xe6c] ss:$16 sps:$4 sm:$0xff]  }
 0x3a1   :  { %v5294_v7 = vadd.f32 %v12868_v5, %v4237_v54  ;;  %4448 = vmatmul.mubr.bf16.gmra.mrb[216].mxu1 %v10339_v50  ;;  %v5827_v10 = vmax.f32 %v5291_v1, 0.0  ;;  %v10345_v5 = vld [vmem:[%s13505_s0 + $0xda0] ss:$16 sps:$4 sm:$0xff]   ;;  %v12958_v11 = vpop.f32.mrb[84].mxu0 }
 0x3a2   :  { %4455 = vmatprep.mubr.bf16.mxu1 %v10347_v0  ;;  %v5324_v26 = vpop.f32.mrb[85].mxu0  ;;  %v10372_v0 = vld [vmem:[%s13505_s0 + $0xe48] ss:$16 sps:$4 sm:$0xff]  }
 0x3a3   :  { %v5828_v12 = vmax.f32 %v5294_v7, 0.0  ;;  %v12964_v15 = vpop.f32.mrb[86].mxu0 }
 0x3a4   :  { %v4241_v13 = vpop.f32.mrb[220].mxu1 }
 0x3a5   :  { %v8791_v14 = vpack.c.bf16 %v5828_v12, %v5827_v10  ;;  %v4242_v3 = vadd.f32 %v12523_v28, %v4241_v13  ;;  %v4243_v16 = vpop.f32.mrb[221].mxu1  ;;  %v10371_v13 = vld [vmem:[%s13505_s0 + $0xe24] ss:$16 sps:$4 sm:$0xff]  }
 0x3a6   :  { %v4244_v18 = vpop.f32.mrb[222].mxu1  ;;  %5537 = vmatmul.mubr.bf16.gmra.mrb[192].mxu0 %v10360_v23 }
 0x3a7   :  { %9103 = vst [vmem:[%s13507_s3 + $0x288] sm:$0xff] %v8791_v14   ;;  %v5299_v20 = vadd.f32 %v12886_v17, %v4242_v3  ;;  %v4245_v9 = vadd.f32 %v12523_v28, %v4244_v18  ;;  %v4246_v21 = vpop.f32.mrb[223].mxu1  ;;  %v5327_v17 = vpop.f32.mrb[87].mxu0  ;;  %7856 = vmatprep.mubr.msk.bf16.mxu0 %vm3162_vm0, %v10368_v27  ;;  %v13044_v27 = vld [vmem:[%s13506_s2] ss:$0 sm:$0xff] }
 0x3a8   :  { %v10386_v21 = vld [vmem:[%s13505_s0 + $0xe8c] ss:$16 sps:$4 sm:$0xff]  }
 0x3a9   :  { %v5302_v25 = vadd.f32 %v12892_v30, %v4245_v9  ;;  %4456 = vmatmul.mubr.bf16.gmra.mrb[220].mxu1 %v10345_v5  ;;  %v5829_v22 = vmax.f32 %v5299_v20, 0.0  ;;  %v10351_v30 = vld [vmem:[%s13505_s0 + $0xdc0] ss:$16 sps:$4 sm:$0xff]   ;;  %v12982_v31 = vpop.f32.mrb[88].mxu0 }
 0x3aa   :  { %4463 = vmatprep.mubr.bf16.mxu1 %v10353_v19  ;;  %v5332_v44 = vpop.f32.mrb[89].mxu0  ;;  %v10378_v19 = vld [vmem:[%s13505_s0 + $0xe68] ss:$16 sps:$4 sm:$0xff]  }
 0x3ab   :  { %v5830_v32 = vmax.f32 %v5302_v25, 0.0  ;;  %v12988_v35 = vpop.f32.mrb[90].mxu0 }
 0x3ac   :  { %v4249_v33 = vpop.f32.mrb[224].mxu1 }
 0x3ad   :  { %v8796_v34 = vpack.c.bf16 %v5830_v32, %v5829_v22  ;;  %v4250_v24 = vadd.f32 %v12523_v28, %v4249_v33  ;;  %v4251_v36 = vpop.f32.mrb[225].mxu1  ;;  %v10369_v22 = vld [vmem:[%s13505_s0 + $0xe20] ss:$16 sps:$4 sm:$0xff]   ;;  %v10377_v33 = vld [vmem:[%s13505_s0 + $0xe44] ss:$16 sps:$4 sm:$0xff]  }
 0x3ae   :  { %v4252_v38 = vpop.f32.mrb[226].mxu1  ;;  %5545 = vmatmul.mubr.bf16.gmra.mrb[196].mxu0 %v10366_v45 }
 0x3af   :  { %9104 = vst [vmem:[%s13507_s3 + $0x290] sm:$0xff] %v8796_v34   ;;  %v5307_v40 = vadd.f32 %v12910_v37, %v4250_v24  ;;  %v4253_v29 = vadd.f32 %v12523_v28, %v4252_v38  ;;  %v4254_v42 = vpop.f32.mrb[227].mxu1  ;;  %v5335_v37 = vpop.f32.mrb[91].mxu0  ;;  %7857 = vmatprep.mubr.msk.bf16.mxu0 %vm3162_vm0, %v10374_v47 }
 0x3b0   :  { %v10392_v42 = vld [vmem:[%s13505_s0 + $0xeac] ss:$16 sps:$4 sm:$0xff]  }
 0x3b1   :  { %v5310_v46 = vadd.f32 %v12916_v41, %v4253_v29  ;;  %4464 = vmatmul.mubr.bf16.gmra.mrb[224].mxu1 %v10351_v30  ;;  %v5831_v49 = vmax.f32 %v5307_v40, 0.0  ;;  %v10357_v41 = vld [vmem:[%s13505_s0 + $0xde0] ss:$16 sps:$4 sm:$0xff]   ;;  %v13006_v50 = vpop.f32.mrb[92].mxu0 }
 0x3b2   :  { %4471 = vmatprep.mubr.bf16.mxu1 %v10359_v39  ;;  %v5340_v63 = vpop.f32.mrb[93].mxu0  ;;  %v10384_v39 = vld [vmem:[%s13505_s0 + $0xe88] ss:$16 sps:$4 sm:$0xff]  }
 0x3b3   :  { %v5832_v51 = vmax.f32 %v5310_v46, 0.0  ;;  %v13012_v54 = vpop.f32.mrb[94].mxu0 }
 0x3b4   :  { %v4257_v52 = vpop.f32.mrb[228].mxu1 }
 0x3b5   :  { %v8801_v53 = vpack.c.bf16 %v5832_v51, %v5831_v49  ;;  %v4258_v43 = vadd.f32 %v12523_v28, %v4257_v52  ;;  %v4259_v55 = vpop.f32.mrb[229].mxu1  ;;  %v10383_v52 = vld [vmem:[%s13505_s0 + $0xe64] ss:$16 sps:$4 sm:$0xff]  }
 0x3b6   :  { %v4260_v57 = vpop.f32.mrb[230].mxu1  ;;  %5553 = vmatmul.mubr.bf16.gmra.mrb[200].mxu0 %v10372_v0 }
 0x3b7   :  { %9105 = vst [vmem:[%s13507_s3 + $0x298] sm:$0xff] %v8801_v53   ;;  %v5315_v59 = vadd.f32 %v12934_v56, %v4258_v43  ;;  %v4261_v48 = vadd.f32 %v12523_v28, %v4260_v57  ;;  %v4262_v61 = vpop.f32.mrb[231].mxu1  ;;  %v5343_v56 = vpop.f32.mrb[95].mxu0  ;;  %7858 = vmatprep.mubr.msk.bf16.mxu0 %vm3162_vm0, %v10380_v2 }
 0x3b8   :  { %v10398_v61 = vld [vmem:[%s13505_s0 + $0xecc] ss:$16 sps:$4 sm:$0xff]  }
 0x3b9   :  { %v5318_v1 = vadd.f32 %v12940_v60, %v4261_v48  ;;  %4472 = vmatmul.mubr.bf16.gmra.mrb[228].mxu1 %v10357_v41  ;;  %v5833_v4 = vmax.f32 %v5315_v59, 0.0  ;;  %v10363_v60 = vld [vmem:[%s13505_s0 + $0xe00] ss:$16 sps:$4 sm:$0xff]   ;;  %v13030_v5 = vpop.f32.mrb[96].mxu0 }
 0x3ba   :  { %4479 = vmatprep.mubr.bf16.mxu1 %v10365_v58  ;;  %v5348_v18 = vpop.f32.mrb[97].mxu0  ;;  %v10390_v58 = vld [vmem:[%s13505_s0 + $0xea8] ss:$16 sps:$4 sm:$0xff]  }
 0x3bb   :  { %v5834_v6 = vmax.f32 %v5318_v1, 0.0  ;;  %v13036_v9 = vpop.f32.mrb[98].mxu0 }
 0x3bc   :  { %v4265_v7 = vpop.f32.mrb[232].mxu1 }
 0x3bd   :  { %v8806_v8 = vpack.c.bf16 %v5834_v6, %v5833_v4  ;;  %v4266_v62 = vadd.f32 %v12523_v28, %v4265_v7  ;;  %v4267_v10 = vpop.f32.mrb[233].mxu1  ;;  %v10389_v7 = vld [vmem:[%s13505_s0 + $0xe84] ss:$16 sps:$4 sm:$0xff]  }
 0x3be   :  { %v4268_v12 = vpop.f32.mrb[234].mxu1  ;;  %5561 = vmatmul.mubr.bf16.gmra.mrb[204].mxu0 %v10378_v19 }
 0x3bf   :  { %9106 = vst [vmem:[%s13507_s3 + $0x2a0] sm:$0xff] %v8806_v8   ;;  %v5323_v14 = vadd.f32 %v12958_v11, %v4266_v62  ;;  %v4269_v3 = vadd.f32 %v12523_v28, %v4268_v12  ;;  %v4270_v16 = vpop.f32.mrb[235].mxu1  ;;  %v5351_v11 = vpop.f32.mrb[99].mxu0  ;;  %7859 = vmatprep.mubr.msk.bf16.mxu0 %vm3162_vm0, %v10386_v21 }
 0x3c0   :  { %v10404_v16 = vld [vmem:[%s13505_s0 + $0xeec] ss:$16 sps:$4 sm:$0xff]  }
 0x3c1   :  { %v5326_v20 = vadd.f32 %v12964_v15, %v4269_v3  ;;  %4480 = vmatmul.mubr.bf16.gmra.mrb[232].mxu1 %v10363_v60  ;;  %v5835_v28 = vmax.f32 %v5323_v14, 0.0  ;;  %v13059_v30 = vpop.f32.mrb[100].mxu0 }
 0x3c2   :  { %4487 = vmatprep.mubr.bf16.mxu1 %v10371_v13  ;;  %v5356_v38 = vpop.f32.mrb[101].mxu0  ;;  %v10396_v13 = vld [vmem:[%s13505_s0 + $0xec8] ss:$16 sps:$4 sm:$0xff]  }
 0x3c3   :  { %v5836_v26 = vmax.f32 %v5326_v20, 0.0  ;;  %v13065_v29 = vpop.f32.mrb[102].mxu0 }
 0x3c4   :  { %v4273_v23 = vpop.f32.mrb[236].mxu1 }
 0x3c5   :  { %v8811_v25 = vpack.c.bf16 %v5836_v26, %v5835_v28  ;;  %v4274_v15 = vadd.f32 %v13044_v27, %v4273_v23  ;;  %v4275_v17 = vpop.f32.mrb[237].mxu1  ;;  %v10395_v23 = vld [vmem:[%s13505_s0 + $0xea4] ss:$16 sps:$4 sm:$0xff]  }
 0x3c6   :  { %v4276_v32 = vpop.f32.mrb[238].mxu1  ;;  %5569 = vmatmul.mubr.bf16.gmra.mrb[208].mxu0 %v10384_v39 }
 0x3c7   :  { %9107 = vst [vmem:[%s13507_s3 + $0x2a8] sm:$0xff] %v8811_v25   ;;  %v5331_v34 = vadd.f32 %v12982_v31, %v4274_v15  ;;  %v4277_v24 = vadd.f32 %v13044_v27, %v4276_v32  ;;  %v4278_v36 = vpop.f32.mrb[239].mxu1  ;;  %v5359_v31 = vpop.f32.mrb[103].mxu0  ;;  %7860 = vmatprep.mubr.msk.bf16.mxu0 %vm3162_vm0, %v10392_v42 }
 0x3c8   :  { %v10410_v36 = vld [vmem:[%s13505_s0 + $0xf0c] ss:$16 sps:$4 sm:$0xff]  }
 0x3c9   :  { %v5334_v40 = vadd.f32 %v12988_v35, %v4277_v24  ;;  %4488 = vmatmul.mubr.bf16.gmra.mrb[236].mxu1 %v10369_v22  ;;  %v5837_v44 = vmax.f32 %v5331_v34, 0.0  ;;  %v10375_v35 = vld [vmem:[%s13505_s0 + $0xe40] ss:$16 sps:$4 sm:$0xff]   ;;  %v13083_v41 = vpop.f32.mrb[104].mxu0 }
 0x3ca   :  { %4495 = vmatprep.mubr.bf16.mxu1 %v10377_v33  ;;  %v5364_v57 = vpop.f32.mrb[105].mxu0  ;;  %v10402_v33 = vld [vmem:[%s13505_s0 + $0xee8] ss:$16 sps:$4 sm:$0xff]  }
 0x3cb   :  { %v5838_v45 = vmax.f32 %v5334_v40, 0.0  ;;  %v13089_v48 = vpop.f32.mrb[106].mxu0 }
 0x3cc   :  { %v4281_v46 = vpop.f32.mrb[240].mxu1 }
 0x3cd   :  { %v8816_v47 = vpack.c.bf16 %v5838_v45, %v5837_v44  ;;  %v4282_v37 = vadd.f32 %v13044_v27, %v4281_v46  ;;  %v4283_v49 = vpop.f32.mrb[241].mxu1  ;;  %v10401_v46 = vld [vmem:[%s13505_s0 + $0xec4] ss:$16 sps:$4 sm:$0xff]  }
 0x3ce   :  { %v4284_v51 = vpop.f32.mrb[242].mxu1  ;;  %5577 = vmatmul.mubr.bf16.gmra.mrb[212].mxu0 %v10390_v58 }
 0x3cf   :  { %9108 = vst [vmem:[%s13507_s3 + $0x2b0] sm:$0xff] %v8816_v47   ;;  %v5339_v53 = vadd.f32 %v13006_v50, %v4282_v37  ;;  %v4285_v43 = vadd.f32 %v13044_v27, %v4284_v51  ;;  %v4286_v55 = vpop.f32.mrb[243].mxu1  ;;  %v5367_v50 = vpop.f32.mrb[107].mxu0  ;;  %7861 = vmatprep.mubr.msk.bf16.mxu0 %vm3162_vm0, %v10398_v61 }
 0x3d0   :  { %v10416_v55 = vld [vmem:[%s13505_s0 + $0xf2c] ss:$16 sps:$4 sm:$0xff]  }
 0x3d1   :  { %v5342_v59 = vadd.f32 %v13012_v54, %v4285_v43  ;;  %4496 = vmatmul.mubr.bf16.gmra.mrb[240].mxu1 %v10375_v35  ;;  %v5839_v63 = vmax.f32 %v5339_v53, 0.0  ;;  %v10381_v54 = vld [vmem:[%s13505_s0 + $0xe60] ss:$16 sps:$4 sm:$0xff]   ;;  %v13107_v60 = vpop.f32.mrb[108].mxu0 }
 0x3d2   :  { %4503 = vmatprep.mubr.bf16.mxu1 %v10383_v52  ;;  %v5372_v12 = vpop.f32.mrb[109].mxu0  ;;  %v10408_v52 = vld [vmem:[%s13505_s0 + $0xf08] ss:$16 sps:$4 sm:$0xff]  }
 0x3d3   :  { %v5840_v0 = vmax.f32 %v5342_v59, 0.0  ;;  %v13113_v3 = vpop.f32.mrb[110].mxu0 }
 0x3d4   :  { %v4289_v1 = vpop.f32.mrb[244].mxu1 }
 0x3d5   :  { %v8821_v2 = vpack.c.bf16 %v5840_v0, %v5839_v63  ;;  %v4290_v56 = vadd.f32 %v13044_v27, %v4289_v1  ;;  %v4291_v4 = vpop.f32.mrb[245].mxu1  ;;  %v10407_v1 = vld [vmem:[%s13505_s0 + $0xee4] ss:$16 sps:$4 sm:$0xff]  }
 0x3d6   :  { %v4292_v6 = vpop.f32.mrb[246].mxu1  ;;  %5585 = vmatmul.mubr.bf16.gmra.mrb[216].mxu0 %v10396_v13 }
 0x3d7   :  { %9109 = vst [vmem:[%s13507_s3 + $0x2b8] sm:$0xff] %v8821_v2   ;;  %v5347_v8 = vadd.f32 %v13030_v5, %v4290_v56  ;;  %v4293_v62 = vadd.f32 %v13044_v27, %v4292_v6  ;;  %v4294_v10 = vpop.f32.mrb[247].mxu1  ;;  %v5375_v5 = vpop.f32.mrb[111].mxu0  ;;  %7862 = vmatprep.mubr.msk.bf16.mxu0 %vm3162_vm0, %v10404_v16 }
 0x3d8   :  { %v10422_v10 = vld [vmem:[%s13505_s0 + $0xf4c] ss:$16 sps:$4 sm:$0xff]  }
 0x3d9   :  { %v5350_v14 = vadd.f32 %v13036_v9, %v4293_v62  ;;  %4504 = vmatmul.mubr.bf16.gmra.mrb[244].mxu1 %v10381_v54  ;;  %v5841_v18 = vmax.f32 %v5347_v8, 0.0  ;;  %v10387_v9 = vld [vmem:[%s13505_s0 + $0xe80] ss:$16 sps:$4 sm:$0xff]   ;;  %v13131_v22 = vpop.f32.mrb[112].mxu0 }
 0x3da   :  { %4511 = vmatprep.mubr.bf16.mxu1 %v10389_v7  ;;  %v5380_v32 = vpop.f32.mrb[113].mxu0  ;;  %v10414_v7 = vld [vmem:[%s13505_s0 + $0xf28] ss:$16 sps:$4 sm:$0xff]  }
 0x3db   :  { %v5842_v19 = vmax.f32 %v5350_v14, 0.0  ;;  %v13137_v24 = vpop.f32.mrb[114].mxu0 }
 0x3dc   :  { %v4297_v20 = vpop.f32.mrb[248].mxu1 }
 0x3dd   :  { %v8826_v21 = vpack.c.bf16 %v5842_v19, %v5841_v18  ;;  %v4298_v11 = vadd.f32 %v13044_v27, %v4297_v20  ;;  %v4299_v28 = vpop.f32.mrb[249].mxu1  ;;  %v10413_v20 = vld [vmem:[%s13505_s0 + $0xf04] ss:$16 sps:$4 sm:$0xff]  }
 0x3de   :  { %v4300_v26 = vpop.f32.mrb[250].mxu1  ;;  %5593 = vmatmul.mubr.bf16.gmra.mrb[220].mxu0 %v10402_v33 }
 0x3df   :  { %9110 = vst [vmem:[%s13507_s3 + $0x2c0] sm:$0xff] %v8826_v21   ;;  %v5355_v25 = vadd.f32 %v13059_v30, %v4298_v11  ;;  %v4301_v15 = vadd.f32 %v13044_v27, %v4300_v26  ;;  %v4302_v17 = vpop.f32.mrb[251].mxu1  ;;  %v5383_v30 = vpop.f32.mrb[115].mxu0  ;;  %7863 = vmatprep.mubr.msk.bf16.mxu0 %vm3162_vm0, %v10410_v36 }
 0x3e0   :  { %v10428_v17 = vld [vmem:[%s13505_s0 + $0xf6c] ss:$16 sps:$4 sm:$0xff]  }
 0x3e1   :  { %v5358_v34 = vadd.f32 %v13065_v29, %v4301_v15  ;;  %4512 = vmatmul.mubr.bf16.gmra.mrb[248].mxu1 %v10387_v9  ;;  %v5843_v38 = vmax.f32 %v5355_v25, 0.0  ;;  %v10393_v29 = vld [vmem:[%s13505_s0 + $0xea0] ss:$16 sps:$4 sm:$0xff]   ;;  %v13155_v35 = vpop.f32.mrb[116].mxu0 }
 0x3e2   :  { %4519 = vmatprep.mubr.bf16.mxu1 %v10395_v23  ;;  %v5388_v51 = vpop.f32.mrb[117].mxu0  ;;  %v10420_v23 = vld [vmem:[%s13505_s0 + $0xf48] ss:$16 sps:$4 sm:$0xff]  }
 0x3e3   :  { %v5844_v39 = vmax.f32 %v5358_v34, 0.0  ;;  %v13161_v43 = vpop.f32.mrb[118].mxu0 }
 0x3e4   :  { %v4305_v40 = vpop.f32.mrb[252].mxu1 }
 0x3e5   :  { %v8831_v42 = vpack.c.bf16 %v5844_v39, %v5843_v38  ;;  %v4306_v31 = vadd.f32 %v13044_v27, %v4305_v40  ;;  %v4307_v44 = vpop.f32.mrb[253].mxu1  ;;  %v10419_v40 = vld [vmem:[%s13505_s0 + $0xf24] ss:$16 sps:$4 sm:$0xff]  }
 0x3e6   :  { %v4308_v45 = vpop.f32.mrb[254].mxu1  ;;  %5601 = vmatmul.mubr.bf16.gmra.mrb[224].mxu0 %v10408_v52 }
 0x3e7   :  { %9111 = vst [vmem:[%s13507_s3 + $0x2c8] sm:$0xff] %v8831_v42   ;;  %v5363_v47 = vadd.f32 %v13083_v41, %v4306_v31  ;;  %v4309_v37 = vadd.f32 %v13044_v27, %v4308_v45  ;;  %v4310_v49 = vpop.f32.mrb[255].mxu1  ;;  %v5391_v41 = vpop.f32.mrb[119].mxu0  ;;  %7864 = vmatprep.mubr.msk.bf16.mxu0 %vm3162_vm0, %v10416_v55 }
 0x3e8   :  { %v10434_v49 = vld [vmem:[%s13505_s0 + $0xf8c] ss:$16 sps:$4 sm:$0xff]  }
 0x3e9   :  { %v5366_v53 = vadd.f32 %v13089_v48, %v4309_v37  ;;  %4520 = vmatmul.mubr.bf16.gmra.mrb[252].mxu1 %v10393_v29  ;;  %v5845_v57 = vmax.f32 %v5363_v47, 0.0  ;;  %v10399_v48 = vld [vmem:[%s13505_s0 + $0xec0] ss:$16 sps:$4 sm:$0xff]   ;;  %v13179_v54 = vpop.f32.mrb[120].mxu0 }
 0x3ea   :  { %4527 = vmatprep.mubr.bf16.mxu1 %v10401_v46  ;;  %v5396_v6 = vpop.f32.mrb[121].mxu0  ;;  %v10426_v46 = vld [vmem:[%s13505_s0 + $0xf68] ss:$16 sps:$4 sm:$0xff]  }
 0x3eb   :  { %v5846_v58 = vmax.f32 %v5366_v53, 0.0  ;;  %v13185_v62 = vpop.f32.mrb[122].mxu0 }
 0x3ec   :  { %v4313_v59 = vpop.f32.mrb[148].mxu1 }
 0x3ed   :  { %v8836_v61 = vpack.c.bf16 %v5846_v58, %v5845_v57  ;;  %v4314_v50 = vadd.f32 %v13044_v27, %v4313_v59  ;;  %v4315_v63 = vpop.f32.mrb[149].mxu1  ;;  %v10425_v59 = vld [vmem:[%s13505_s0 + $0xf44] ss:$16 sps:$4 sm:$0xff]  }
 0x3ee   :  { %v4316_v0 = vpop.f32.mrb[150].mxu1  ;;  %5609 = vmatmul.mubr.bf16.gmra.mrb[228].mxu0 %v10414_v7 }
 0x3ef   :  { %9112 = vst [vmem:[%s13507_s3 + $0x2d0] sm:$0xff] %v8836_v61   ;;  %v5371_v2 = vadd.f32 %v13107_v60, %v4314_v50  ;;  %v4317_v56 = vadd.f32 %v13044_v27, %v4316_v0  ;;  %v4318_v4 = vpop.f32.mrb[151].mxu1  ;;  %v5399_v60 = vpop.f32.mrb[123].mxu0  ;;  %7865 = vmatprep.mubr.msk.bf16.mxu0 %vm3162_vm0, %v10422_v10 }
 0x3f0   :  { %v10440_v4 = vld [vmem:[%s13505_s0 + $0xfac] ss:$16 sps:$4 sm:$0xff]  }
 0x3f1   :  { %v5374_v8 = vadd.f32 %v13113_v3, %v4317_v56  ;;  %4528 = vmatmul.mubr.bf16.gmra.mrb[148].mxu1 %v10399_v48  ;;  %v5847_v12 = vmax.f32 %v5371_v2, 0.0  ;;  %v10405_v3 = vld [vmem:[%s13505_s0 + $0xee0] ss:$16 sps:$4 sm:$0xff]   ;;  %v13203_v9 = vpop.f32.mrb[124].mxu0 }
 0x3f2   :  { %4535 = vmatprep.mubr.bf16.mxu1 %v10407_v1  ;;  %v5404_v26 = vpop.f32.mrb[125].mxu0  ;;  %v10432_v1 = vld [vmem:[%s13505_s0 + $0xf88] ss:$16 sps:$4 sm:$0xff]  }
 0x3f3   :  { %v5848_v13 = vmax.f32 %v5374_v8, 0.0  ;;  %v13209_v15 = vpop.f32.mrb[126].mxu0 }
 0x3f4   :  { %v4321_v14 = vpop.f32.mrb[152].mxu1 }
 0x3f5   :  { %v8841_v16 = vpack.c.bf16 %v5848_v13, %v5847_v12  ;;  %v4322_v5 = vadd.f32 %v13044_v27, %v4321_v14  ;;  %v4323_v18 = vpop.f32.mrb[153].mxu1  ;;  %v10431_v14 = vld [vmem:[%s13505_s0 + $0xf64] ss:$16 sps:$4 sm:$0xff]  }
 0x3f6   :  { %v4324_v19 = vpop.f32.mrb[154].mxu1  ;;  %5617 = vmatmul.mubr.bf16.gmra.mrb[232].mxu0 %v10420_v23 }
 0x3f7   :  { %9113 = vst [vmem:[%s13507_s3 + $0x2d8] sm:$0xff] %v8841_v16   ;;  %v5379_v21 = vadd.f32 %v13131_v22, %v4322_v5  ;;  %v4325_v11 = vadd.f32 %v13044_v27, %v4324_v19  ;;  %v4326_v28 = vpop.f32.mrb[155].mxu1  ;;  %v5407_v22 = vpop.f32.mrb[127].mxu0  ;;  %7866 = vmatprep.mubr.msk.bf16.mxu0 %vm3162_vm0, %v10428_v17 }
 0x3f8   :  { %v10446_v28 = vld [vmem:[%s13505_s0 + $0xfcc] ss:$16 sps:$4 sm:$0xff]  }
 0x3f9   :  { %v5382_v25 = vadd.f32 %v13137_v24, %v4325_v11  ;;  %4536 = vmatmul.mubr.bf16.gmra.mrb[152].mxu1 %v10405_v3  ;;  %v5849_v32 = vmax.f32 %v5379_v21, 0.0  ;;  %v10411_v24 = vld [vmem:[%s13505_s0 + $0xf00] ss:$16 sps:$4 sm:$0xff]   ;;  %v13227_v29 = vpop.f32.mrb[128].mxu0 }
 0x3fa   :  { %4543 = vmatprep.mubr.bf16.mxu1 %v10413_v20  ;;  %v5412_v45 = vpop.f32.mrb[129].mxu0  ;;  %v10438_v20 = vld [vmem:[%s13505_s0 + $0xfa8] ss:$16 sps:$4 sm:$0xff]  }
 0x3fb   :  { %v5850_v33 = vmax.f32 %v5382_v25, 0.0  ;;  %v13233_v37 = vpop.f32.mrb[130].mxu0 }
 0x3fc   :  { %v4329_v34 = vpop.f32.mrb[156].mxu1 }
 0x3fd   :  { %v8846_v36 = vpack.c.bf16 %v5850_v33, %v5849_v32  ;;  %v4330_v30 = vadd.f32 %v13044_v27, %v4329_v34  ;;  %v4331_v38 = vpop.f32.mrb[157].mxu1  ;;  %v10437_v34 = vld [vmem:[%s13505_s0 + $0xf84] ss:$16 sps:$4 sm:$0xff]  }
 0x3fe   :  { %v4332_v39 = vpop.f32.mrb[158].mxu1  ;;  %5625 = vmatmul.mubr.bf16.gmra.mrb[236].mxu0 %v10426_v46 }
 0x3ff   :  { %9114 = vst [vmem:[%s13507_s3 + $0x2e0] sm:$0xff] %v8846_v36   ;;  %v5387_v42 = vadd.f32 %v13155_v35, %v4330_v30  ;;  %v4333_v31 = vadd.f32 %v13044_v27, %v4332_v39  ;;  %v4334_v44 = vpop.f32.mrb[159].mxu1  ;;  %v5415_v35 = vpop.f32.mrb[131].mxu0  ;;  %7867 = vmatprep.mubr.msk.bf16.mxu0 %vm3162_vm0, %v10434_v49 }
 0x400   :  { %v10452_v44 = vld [vmem:[%s13505_s0 + $0xfec] ss:$16 sps:$4 sm:$0xff]  }
 0x401   :  { %v5390_v47 = vadd.f32 %v13161_v43, %v4333_v31  ;;  %4544 = vmatmul.mubr.bf16.gmra.mrb[156].mxu1 %v10411_v24  ;;  %v5851_v51 = vmax.f32 %v5387_v42, 0.0  ;;  %v10417_v43 = vld [vmem:[%s13505_s0 + $0xf20] ss:$16 sps:$4 sm:$0xff]   ;;  %v13251_v48 = vpop.f32.mrb[132].mxu0 }
 0x402   :  { %4551 = vmatprep.mubr.bf16.mxu1 %v10419_v40  ;;  %v5420_v0 = vpop.f32.mrb[133].mxu0  ;;  %v10444_v40 = vld [vmem:[%s13505_s0 + $0xfc8] ss:$16 sps:$4 sm:$0xff]  }
 0x403   :  { %v5852_v52 = vmax.f32 %v5390_v47, 0.0  ;;  %v13257_v56 = vpop.f32.mrb[134].mxu0 }
 0x404   :  { %v4337_v53 = vpop.f32.mrb[160].mxu1 }
 0x405   :  { %v8851_v55 = vpack.c.bf16 %v5852_v52, %v5851_v51  ;;  %v4338_v41 = vadd.f32 %v13044_v27, %v4337_v53  ;;  %v4339_v57 = vpop.f32.mrb[161].mxu1  ;;  %v10443_v53 = vld [vmem:[%s13505_s0 + $0xfa4] ss:$16 sps:$4 sm:$0xff]  }
 0x406   :  { %v4340_v58 = vpop.f32.mrb[162].mxu1  ;;  %5633 = vmatmul.mubr.bf16.gmra.mrb[240].mxu0 %v10432_v1 }
 0x407   :  { %9115 = vst [vmem:[%s13507_s3 + $0x2e8] sm:$0xff] %v8851_v55   ;;  %v5395_v61 = vadd.f32 %v13179_v54, %v4338_v41  ;;  %v4341_v50 = vadd.f32 %v13044_v27, %v4340_v58  ;;  %v4342_v63 = vpop.f32.mrb[163].mxu1  ;;  %v5423_v54 = vpop.f32.mrb[135].mxu0  ;;  %7868 = vmatprep.mubr.msk.bf16.mxu0 %vm3162_vm0, %v10440_v4 }
 0x409   :  { %v5398_v2 = vadd.f32 %v13185_v62, %v4341_v50  ;;  %4552 = vmatmul.mubr.bf16.gmra.mrb[160].mxu1 %v10417_v43  ;;  %v5853_v6 = vmax.f32 %v5395_v61, 0.0  ;;  %v10423_v62 = vld [vmem:[%s13505_s0 + $0xf40] ss:$16 sps:$4 sm:$0xff]   ;;  %v13275_v3 = vpop.f32.mrb[136].mxu0 }
 0x40a   :  { %4559 = vmatprep.mubr.bf16.mxu1 %v10425_v59  ;;  %v5428_v19 = vpop.f32.mrb[137].mxu0  ;;  %v10450_v59 = vld [vmem:[%s13505_s0 + $0xfe8] ss:$16 sps:$4 sm:$0xff]  }
 0x40b   :  { %v5854_v7 = vmax.f32 %v5398_v2, 0.0  ;;  %v13281_v11 = vpop.f32.mrb[138].mxu0 }
 0x40c   :  { %v4345_v8 = vpop.f32.mrb[164].mxu1 }
 0x40d   :  { %v8856_v10 = vpack.c.bf16 %v5854_v7, %v5853_v6  ;;  %v4346_v60 = vadd.f32 %v13044_v27, %v4345_v8  ;;  %v4347_v12 = vpop.f32.mrb[165].mxu1  ;;  %v10441_v6 = vld [vmem:[%s13505_s0 + $0xfa0] ss:$16 sps:$4 sm:$0xff]  }
 0x40e   :  { %v4348_v13 = vpop.f32.mrb[166].mxu1  ;;  %5641 = vmatmul.mubr.bf16.gmra.mrb[244].mxu0 %v10438_v20 }
 0x40f   :  { %9116 = vst [vmem:[%s13507_s3 + $0x2f0] sm:$0xff] %v8856_v10   ;;  %v5403_v16 = vadd.f32 %v13203_v9, %v4346_v60  ;;  %v4349_v5 = vadd.f32 %v13044_v27, %v4348_v13  ;;  %v4350_v18 = vpop.f32.mrb[167].mxu1  ;;  %v5431_v9 = vpop.f32.mrb[139].mxu0  ;;  %7869 = vmatprep.mubr.msk.bf16.mxu0 %vm3162_vm0, %v10446_v28 }
 0x411   :  { %v5406_v21 = vadd.f32 %v13209_v15, %v4349_v5  ;;  %4560 = vmatmul.mubr.bf16.gmra.mrb[164].mxu1 %v10423_v62  ;;  %v5855_v26 = vmax.f32 %v5403_v16, 0.0  ;;  %v10429_v15 = vld [vmem:[%s13505_s0 + $0xf60] ss:$16 sps:$4 sm:$0xff]   ;;  %v13299_v24 = vpop.f32.mrb[140].mxu0 }
 0x412   :  { %4567 = vmatprep.mubr.bf16.mxu1 %v10431_v14  ;;  %v5436_v39 = vpop.f32.mrb[141].mxu0 }
 0x413   :  { %v5856_v23 = vmax.f32 %v5406_v21, 0.0  ;;  %v13305_v31 = vpop.f32.mrb[142].mxu0 }
 0x414   :  { %v4353_v25 = vpop.f32.mrb[168].mxu1 }
 0x415   :  { %v8861_v17 = vpack.c.bf16 %v5856_v23, %v5855_v26  ;;  %v4354_v22 = vadd.f32 %v13044_v27, %v4353_v25  ;;  %v4355_v32 = vpop.f32.mrb[169].mxu1 }
 0x416   :  { %v4356_v33 = vpop.f32.mrb[170].mxu1  ;;  %5649 = vmatmul.mubr.bf16.gmra.mrb[248].mxu0 %v10444_v40 }
 0x417   :  { %9117 = vst [vmem:[%s13507_s3 + $0x2f8] sm:$0xff] %v8861_v17   ;;  %v5411_v36 = vadd.f32 %v13227_v29, %v4354_v22  ;;  %v4357_v30 = vadd.f32 %v13044_v27, %v4356_v33  ;;  %v4358_v38 = vpop.f32.mrb[171].mxu1  ;;  %v5439_v29 = vpop.f32.mrb[143].mxu0  ;;  %7870 = vmatprep.mubr.msk.bf16.mxu0 %vm3162_vm0, %v10452_v44 }
 0x419   :  { %v5414_v42 = vadd.f32 %v13233_v37, %v4357_v30  ;;  %4568 = vmatmul.mubr.bf16.gmra.mrb[168].mxu1 %v10429_v15  ;;  %v5857_v45 = vmax.f32 %v5411_v36, 0.0  ;;  %v10435_v37 = vld [vmem:[%s13505_s0 + $0xf80] ss:$16 sps:$4 sm:$0xff]   ;;  %v5442_v43 = vpop.f32.mrb[144].mxu0 }
 0x41a   :  { %4575 = vmatprep.mubr.bf16.mxu1 %v10437_v34  ;;  %v5444_v58 = vpop.f32.mrb[145].mxu0 }
 0x41b   :  { %v5858_v46 = vmax.f32 %v5414_v42, 0.0  ;;  %v5445_v50 = vpop.f32.mrb[146].mxu0 }
 0x41c   :  { %v4361_v47 = vpop.f32.mrb[172].mxu1  ;;  %v5447_v63 = vpop.f32.mrb[147].mxu0 }
 0x41d   :  { %v8866_v49 = vpack.c.bf16 %v5858_v46, %v5857_v45  ;;  %v4362_v35 = vadd.f32 %v13044_v27, %v4361_v47  ;;  %v4363_v51 = vpop.f32.mrb[173].mxu1 }
 0x41e   :  { %v4364_v52 = vpop.f32.mrb[174].mxu1  ;;  %5657 = vmatmul.mubr.bf16.gmra.mrb[252].mxu0 %v10450_v59 }
 0x41f   :  { %9118 = vst [vmem:[%s13507_s3 + $0x300] sm:$0xff] %v8866_v49   ;;  %v5419_v55 = vadd.f32 %v13251_v48, %v4362_v35  ;;  %v4365_v41 = vadd.f32 %v13044_v27, %v4364_v52  ;;  %v4366_v57 = vpop.f32.mrb[175].mxu1 }
 0x421   :  { %v5422_v61 = vadd.f32 %v13257_v56, %v4365_v41  ;;  %4576 = vmatmul.mubr.bf16.gmra.mrb[172].mxu1 %v10435_v37  ;;  %v5859_v0 = vmax.f32 %v5419_v55, 0.0  ;;  %v10449_v56 = vld [vmem:[%s13505_s0 + $0xfc4] ss:$16 sps:$4 sm:$0xff]   ;;  %v5450_v12 = vpop.f32.mrb[148].mxu0 }
 0x422   :  { %4583 = vmatprep.mubr.bf16.mxu1 %v10443_v53  ;;  %v5452_v62 = vpop.f32.mrb[149].mxu0 }
 0x423   :  { %v5860_v1 = vmax.f32 %v5422_v61, 0.0  ;;  %v5453_v14 = vpop.f32.mrb[150].mxu0 }
 0x424   :  { %v4369_v2 = vpop.f32.mrb[176].mxu1  ;;  %v5455_v16 = vpop.f32.mrb[151].mxu0 }
 0x425   :  { %v8871_v48 = vpack.c.bf16 %v5860_v1, %v5859_v0  ;;  %v4370_v4 = vadd.f32 %v13044_v27, %v4369_v2  ;;  %v4371_v54 = vpop.f32.mrb[177].mxu1 }
 0x426   :  { %v4372_v7 = vpop.f32.mrb[178].mxu1 }
 0x427   :  { %9119 = vst [vmem:[%s13507_s3 + $0x308] sm:$0xff] %v8871_v48   ;;  %v5427_v8 = vadd.f32 %v13275_v3, %v4370_v4  ;;  %v4373_v10 = vadd.f32 %v13044_v27, %v4372_v7  ;;  %v4374_v60 = vpop.f32.mrb[179].mxu1  ;;  %v10447_v3 = vld [vmem:[%s13505_s0 + $0xfc0] ss:$16 sps:$4 sm:$0xff]  }
 0x429   :  { %v5430_v13 = vadd.f32 %v13281_v11, %v4373_v10  ;;  %4584 = vmatmul.mubr.bf16.gmra.mrb[176].mxu1 %v10441_v6  ;;  %v5861_v5 = vmax.f32 %v5427_v8, 0.0  ;;  %v10455_v11 = vld [vmem:[%s13505_s0 + $0xfe4] ss:$16 sps:$4 sm:$0xff]   ;;  %v5458_v17 = vpop.f32.mrb[152].mxu0 }
 0x42a   :  { %4591 = vmatprep.mubr.bf16.mxu1 %v10449_v56  ;;  %v5460_v22 = vpop.f32.mrb[153].mxu0 }
 0x42b   :  { %v5862_v18 = vmax.f32 %v5430_v13, 0.0  ;;  %v5461_v15 = vpop.f32.mrb[154].mxu0 }
 0x42c   :  { %v4377_v19 = vpop.f32.mrb[180].mxu1  ;;  %v5463_v33 = vpop.f32.mrb[155].mxu0 }
 0x42d   :  { %v8876_v20 = vpack.c.bf16 %v5862_v18, %v5861_v5  ;;  %v4378_v21 = vadd.f32 %v13044_v27, %v4377_v19  ;;  %v4379_v28 = vpop.f32.mrb[181].mxu1 }
 0x42e   :  { %v4380_v9 = vpop.f32.mrb[182].mxu1 }
 0x42f   :  { %9120 = vst [vmem:[%s13507_s3 + $0x310] sm:$0xff] %v8876_v20   ;;  %v5435_v26 = vadd.f32 %v13299_v24, %v4378_v21  ;;  %v4381_v23 = vadd.f32 %v13044_v27, %v4380_v9  ;;  %v4382_v25 = vpop.f32.mrb[183].mxu1  ;;  %v10453_v24 = vld [vmem:[%s13505_s0 + $0xfe0] ss:$16 sps:$4 sm:$0xff]  }
 0x431   :  { %v5438_v32 = vadd.f32 %v13305_v31, %v4381_v23  ;;  %4592 = vmatmul.mubr.bf16.gmra.mrb[180].mxu1 %v10447_v3  ;;  %v5863_v34 = vmax.f32 %v5435_v26, 0.0  ;;  %v5466_v45 = vpop.f32.mrb[156].mxu0 }
 0x432   :  { %4599 = vmatprep.mubr.bf16.mxu1 %v10455_v11  ;;  %v5468_v46 = vpop.f32.mrb[157].mxu0 }
 0x433   :  { %v5864_v36 = vmax.f32 %v5438_v32, 0.0  ;;  %v5469_v49 = vpop.f32.mrb[158].mxu0 }
 0x434   :  { %v4385_v30 = vpop.f32.mrb[184].mxu1  ;;  %v5471_v35 = vpop.f32.mrb[159].mxu0 }
 0x435   :  { %v8881_v38 = vpack.c.bf16 %v5864_v36, %v5863_v34  ;;  %v4386_v39 = vadd.f32 %v13044_v27, %v4385_v30  ;;  %v4387_v40 = vpop.f32.mrb[185].mxu1 }
 0x436   :  { %v4388_v42 = vpop.f32.mrb[186].mxu1 }
 0x437   :  { %9121 = vst [vmem:[%s13507_s3 + $0x318] sm:$0xff] %v8881_v38   ;;  %v5443_v31 = vadd.f32 %v5442_v43, %v4386_v39  ;;  %v4389_v44 = vadd.f32 %v13044_v27, %v4388_v42  ;;  %v4390_v29 = vpop.f32.mrb[187].mxu1 }
 0x439   :  { %v5446_v47 = vadd.f32 %v5445_v50, %v4389_v44  ;;  %4600 = vmatmul.mubr.bf16.gmra.mrb[184].mxu1 %v10453_v24  ;;  %v5865_v51 = vmax.f32 %v5443_v31, 0.0  ;;  %v5474_v61 = vpop.f32.mrb[160].mxu0 }
 0x43a   :  { %v5476_v50 = vpop.f32.mrb[161].mxu0 }
 0x43b   :  { %v5866_v37 = vmax.f32 %v5446_v47, 0.0  ;;  %v5477_v0 = vpop.f32.mrb[162].mxu0 }
 0x43c   :  { %v4393_v52 = vpop.f32.mrb[188].mxu1  ;;  %v5479_v1 = vpop.f32.mrb[163].mxu0 }
 0x43d   :  { %v8886_v53 = vpack.c.bf16 %v5866_v37, %v5865_v51  ;;  %v4394_v55 = vadd.f32 %v13044_v27, %v4393_v52  ;;  %v4395_v41 = vpop.f32.mrb[189].mxu1 }
 0x43e   :  { %v4396_v57 = vpop.f32.mrb[190].mxu1 }
 0x43f   :  { %9122 = vst [vmem:[%s13507_s3 + $0x320] sm:$0xff] %v8886_v53   ;;  %v5451_v43 = vadd.f32 %v5450_v12, %v4394_v55  ;;  %v4397_v58 = vadd.f32 %v13044_v27, %v4396_v57  ;;  %v4398_v59 = vpop.f32.mrb[191].mxu1 }
 0x441   :  { %v5454_v63 = vadd.f32 %v5453_v14, %v4397_v58  ;;  %v5867_v2 = vmax.f32 %v5451_v43, 0.0  ;;  %v5482_v12 = vpop.f32.mrb[164].mxu0 }
 0x442   :  { %v5484_v62 = vpop.f32.mrb[165].mxu0 }
 0x443   :  { %v5868_v48 = vmax.f32 %v5454_v63, 0.0  ;;  %v5485_v14 = vpop.f32.mrb[166].mxu0 }
 0x444   :  { %v4401_v4 = vpop.f32.mrb[192].mxu1  ;;  %v5487_v16 = vpop.f32.mrb[167].mxu0 }
 0x445   :  { %v8891_v54 = vpack.c.bf16 %v5868_v48, %v5867_v2  ;;  %v4402_v6 = vadd.f32 %v13044_v27, %v4401_v4  ;;  %v4403_v7 = vpop.f32.mrb[193].mxu1 }
 0x446   :  { %v4404_v56 = vpop.f32.mrb[194].mxu1 }
 0x447   :  { %9123 = vst [vmem:[%s13507_s3 + $0x328] sm:$0xff] %v8891_v54   ;;  %v5459_v8 = vadd.f32 %v5458_v17, %v4402_v6  ;;  %v4405_v10 = vadd.f32 %v13044_v27, %v4404_v56  ;;  %v4406_v60 = vpop.f32.mrb[195].mxu1 }
 0x449   :  { %v5462_v13 = vadd.f32 %v5461_v15, %v4405_v10  ;;  %v5869_v5 = vmax.f32 %v5459_v8, 0.0  ;;  %v5490_v23 = vpop.f32.mrb[168].mxu0 }
 0x44a   :  { %v5492_v25 = vpop.f32.mrb[169].mxu0 }
 0x44b   :  { %v5870_v18 = vmax.f32 %v5462_v13, 0.0  ;;  %v5493_v22 = vpop.f32.mrb[170].mxu0 }
 0x44c   :  { %v4409_v19 = vpop.f32.mrb[196].mxu1  ;;  %v5495_v32 = vpop.f32.mrb[171].mxu0 }
 0x44d   :  { %v8896_v20 = vpack.c.bf16 %v5870_v18, %v5869_v5  ;;  %v4410_v21 = vadd.f32 %v13044_v27, %v4409_v19  ;;  %v4411_v28 = vpop.f32.mrb[197].mxu1 }
 0x44e   :  { %v4412_v3 = vpop.f32.mrb[198].mxu1 }
 0x44f   :  { %9124 = vst [vmem:[%s13507_s3 + $0x330] sm:$0xff] %v8896_v20   ;;  %v5467_v9 = vadd.f32 %v5466_v45, %v4410_v21  ;;  %v4413_v11 = vadd.f32 %v13044_v27, %v4412_v3  ;;  %v4414_v26 = vpop.f32.mrb[199].mxu1 }
 0x451   :  { %v5470_v17 = vadd.f32 %v5469_v49, %v4413_v11  ;;  %v5871_v15 = vmax.f32 %v5467_v9, 0.0  ;;  %v5498_v31 = vpop.f32.mrb[172].mxu0 }
 0x452   :  { %v5500_v44 = vpop.f32.mrb[173].mxu0 }
 0x453   :  { %v5872_v33 = vmax.f32 %v5470_v17, 0.0  ;;  %v5501_v45 = vpop.f32.mrb[174].mxu0 }
 0x454   :  { %v4417_v34 = vpop.f32.mrb[200].mxu1  ;;  %v5503_v46 = vpop.f32.mrb[175].mxu0 }
 0x455   :  { %v8901_v36 = vpack.c.bf16 %v5872_v33, %v5871_v15  ;;  %v4418_v30 = vadd.f32 %v13044_v27, %v4417_v34  ;;  %v4419_v38 = vpop.f32.mrb[201].mxu1 }
 0x456   :  { %v4420_v39 = vpop.f32.mrb[202].mxu1 }
 0x457   :  { %9125 = vst [vmem:[%s13507_s3 + $0x338] sm:$0xff] %v8901_v36   ;;  %v5475_v40 = vadd.f32 %v5474_v61, %v4418_v30  ;;  %v4421_v24 = vadd.f32 %v13044_v27, %v4420_v39  ;;  %v4422_v42 = vpop.f32.mrb[203].mxu1 }
 0x459   :  { %v5478_v29 = vadd.f32 %v5477_v0, %v4421_v24  ;;  %v5873_v47 = vmax.f32 %v5475_v40, 0.0  ;;  %v5506_v43 = vpop.f32.mrb[176].mxu0 }
 0x45a   :  { %v5508_v58 = vpop.f32.mrb[177].mxu0 }
 0x45b   :  { %v5874_v49 = vmax.f32 %v5478_v29, 0.0  ;;  %v5509_v61 = vpop.f32.mrb[178].mxu0 }
 0x45c   :  { %v4425_v35 = vpop.f32.mrb[204].mxu1  ;;  %v5511_v50 = vpop.f32.mrb[179].mxu0 }
 0x45d   :  { %v8906_v51 = vpack.c.bf16 %v5874_v49, %v5873_v47  ;;  %v4426_v37 = vadd.f32 %v13044_v27, %v4425_v35  ;;  %v4427_v52 = vpop.f32.mrb[205].mxu1 }
 0x45e   :  { %v4428_v53 = vpop.f32.mrb[206].mxu1 }
 0x45f   :  { %9126 = vst [vmem:[%s13507_s3 + $0x340] sm:$0xff] %v8906_v51   ;;  %v5483_v55 = vadd.f32 %v5482_v12, %v4426_v37  ;;  %v4429_v41 = vadd.f32 %v13044_v27, %v4428_v53  ;;  %v4430_v57 = vpop.f32.mrb[207].mxu1 }
 0x461   :  { %v5486_v59 = vadd.f32 %v5485_v14, %v4429_v41  ;;  %v5875_v63 = vmax.f32 %v5483_v55, 0.0  ;;  %v5514_v8 = vpop.f32.mrb[180].mxu0 }
 0x462   :  { %v5516_v10 = vpop.f32.mrb[181].mxu0 }
 0x463   :  { %v5876_v0 = vmax.f32 %v5486_v59, 0.0  ;;  %v5517_v12 = vpop.f32.mrb[182].mxu0 }
 0x464   :  { %v4433_v1 = vpop.f32.mrb[208].mxu1  ;;  %v5519_v62 = vpop.f32.mrb[183].mxu0 }
 0x465   :  { %v8911_v2 = vpack.c.bf16 %v5876_v0, %v5875_v63  ;;  %v4434_v48 = vadd.f32 %v13044_v27, %v4433_v1  ;;  %v4435_v4 = vpop.f32.mrb[209].mxu1 }
 0x466   :  { %v4436_v54 = vpop.f32.mrb[210].mxu1 }
 0x467   :  { %9127 = vst [vmem:[%s13507_s3 + $0x348] sm:$0xff] %v8911_v2   ;;  %v5491_v6 = vadd.f32 %v5490_v23, %v4434_v48  ;;  %v4437_v7 = vadd.f32 %v13044_v27, %v4436_v54  ;;  %v4438_v56 = vpop.f32.mrb[211].mxu1 }
 0x469   :  { %v5494_v60 = vadd.f32 %v5493_v22, %v4437_v7  ;;  %v5877_v13 = vmax.f32 %v5491_v6, 0.0  ;;  %v5522_v9 = vpop.f32.mrb[184].mxu0 }
 0x46a   :  { %v5524_v11 = vpop.f32.mrb[185].mxu0 }
 0x46b   :  { %v5878_v14 = vmax.f32 %v5494_v60, 0.0  ;;  %v5525_v23 = vpop.f32.mrb[186].mxu0 }
 0x46c   :  { %v4441_v16 = vpop.f32.mrb[212].mxu1  ;;  %v5527_v25 = vpop.f32.mrb[187].mxu0 }
 0x46d   :  { %v8916_v5 = vpack.c.bf16 %v5878_v14, %v5877_v13  ;;  %v4442_v18 = vadd.f32 %v13044_v27, %v4441_v16  ;;  %v4443_v19 = vpop.f32.mrb[213].mxu1 }
 0x46e   :  { %v4444_v20 = vpop.f32.mrb[214].mxu1 }
 0x46f   :  { %9128 = vst [vmem:[%s13507_s3 + $0x350] sm:$0xff] %v8916_v5   ;;  %v5499_v21 = vadd.f32 %v5498_v31, %v4442_v18  ;;  %v4445_v28 = vadd.f32 %v13044_v27, %v4444_v20  ;;  %v4446_v3 = vpop.f32.mrb[215].mxu1 }
 0x471   :  { %v5502_v26 = vadd.f32 %v5501_v45, %v4445_v28  ;;  %v5879_v17 = vmax.f32 %v5499_v21, 0.0  ;;  %v5530_v40 = vpop.f32.mrb[188].mxu0 }
 0x472   :  { %v5532_v24 = vpop.f32.mrb[189].mxu0 }
 0x473   :  { %v5880_v22 = vmax.f32 %v5502_v26, 0.0  ;;  %v5533_v31 = vpop.f32.mrb[190].mxu0 }
 0x474   :  { %v4449_v32 = vpop.f32.mrb[216].mxu1  ;;  %v5535_v44 = vpop.f32.mrb[191].mxu0 }
 0x475   :  { %v8921_v15 = vpack.c.bf16 %v5880_v22, %v5879_v17  ;;  %v4450_v33 = vadd.f32 %v13044_v27, %v4449_v32  ;;  %v4451_v34 = vpop.f32.mrb[217].mxu1  ;;  %v13419_v22 = vld [vmem:[%s13506_s2] ss:$0 sm:$0xff] }
 0x476   :  { %v4452_v36 = vpop.f32.mrb[218].mxu1 }
 0x477   :  { %9129 = vst [vmem:[%s13507_s3 + $0x358] sm:$0xff] %v8921_v15   ;;  %v5507_v30 = vadd.f32 %v5506_v43, %v4450_v33  ;;  %v4453_v38 = vadd.f32 %v13044_v27, %v4452_v36  ;;  %v4454_v39 = vpop.f32.mrb[219].mxu1 }
 0x479   :  { %v5510_v42 = vadd.f32 %v5509_v61, %v4453_v38  ;;  %v5881_v29 = vmax.f32 %v5507_v30, 0.0  ;;  %v5538_v55 = vpop.f32.mrb[192].mxu0 }
 0x47a   :  { %v5540_v41 = vpop.f32.mrb[193].mxu0 }
 0x47b   :  { %v5882_v45 = vmax.f32 %v5510_v42, 0.0  ;;  %v5541_v43 = vpop.f32.mrb[194].mxu0 }
 0x47c   :  { %v4457_v46 = vpop.f32.mrb[220].mxu1  ;;  %v5543_v58 = vpop.f32.mrb[195].mxu0 }
 0x47d   :  { %v8926_v47 = vpack.c.bf16 %v5882_v45, %v5881_v29  ;;  %v4458_v49 = vadd.f32 %v13044_v27, %v4457_v46  ;;  %v4459_v35 = vpop.f32.mrb[221].mxu1 }
 0x47e   :  { %v4460_v51 = vpop.f32.mrb[222].mxu1 }
 0x47f   :  { %9130 = vst [vmem:[%s13507_s3 + $0x360] sm:$0xff] %v8926_v47   ;;  %v5515_v37 = vadd.f32 %v5514_v8, %v4458_v49  ;;  %v4461_v52 = vadd.f32 %v13044_v27, %v4460_v51  ;;  %v4462_v53 = vpop.f32.mrb[223].mxu1 }
 0x481   :  { %v5518_v57 = vadd.f32 %v5517_v12, %v4461_v52  ;;  %v5883_v59 = vmax.f32 %v5515_v37, 0.0  ;;  %v5546_v6 = vpop.f32.mrb[196].mxu0 }
 0x482   :  { %v5548_v7 = vpop.f32.mrb[197].mxu0 }
 0x483   :  { %v5884_v61 = vmax.f32 %v5518_v57, 0.0  ;;  %v5549_v8 = vpop.f32.mrb[198].mxu0 }
 0x484   :  { %v4465_v50 = vpop.f32.mrb[224].mxu1  ;;  %v5551_v10 = vpop.f32.mrb[199].mxu0 }
 0x485   :  { %v8931_v63 = vpack.c.bf16 %v5884_v61, %v5883_v59  ;;  %v4466_v0 = vadd.f32 %v13044_v27, %v4465_v50  ;;  %v4467_v1 = vpop.f32.mrb[225].mxu1 }
 0x486   :  { %v4468_v2 = vpop.f32.mrb[226].mxu1 }
 0x487   :  { %9131 = vst [vmem:[%s13507_s3 + $0x368] sm:$0xff] %v8931_v63   ;;  %v5523_v48 = vadd.f32 %v5522_v9, %v4466_v0  ;;  %v4469_v4 = vadd.f32 %v13044_v27, %v4468_v2  ;;  %v4470_v54 = vpop.f32.mrb[227].mxu1 }
 0x489   :  { %v5526_v56 = vadd.f32 %v5525_v23, %v4469_v4  ;;  %v5885_v60 = vmax.f32 %v5523_v48, 0.0  ;;  %v5554_v21 = vpop.f32.mrb[200].mxu0 }
 0x48a   :  { %v5556_v28 = vpop.f32.mrb[201].mxu0 }
 0x48b   :  { %v5886_v12 = vmax.f32 %v5526_v56, 0.0  ;;  %v5557_v9 = vpop.f32.mrb[202].mxu0 }
 0x48c   :  { %v4473_v62 = vpop.f32.mrb[228].mxu1  ;;  %v5559_v11 = vpop.f32.mrb[203].mxu0 }
 0x48d   :  { %v8936_v13 = vpack.c.bf16 %v5886_v12, %v5885_v60  ;;  %v4474_v14 = vadd.f32 %v13044_v27, %v4473_v62  ;;  %v4475_v16 = vpop.f32.mrb[229].mxu1 }
 0x48e   :  { %v4476_v5 = vpop.f32.mrb[230].mxu1 }
 0x48f   :  { %9132 = vst [vmem:[%s13507_s3 + $0x370] sm:$0xff] %v8936_v13   ;;  %v5531_v18 = vadd.f32 %v5530_v40, %v4474_v14  ;;  %v4477_v19 = vadd.f32 %v13044_v27, %v4476_v5  ;;  %v4478_v20 = vpop.f32.mrb[231].mxu1 }
 0x491   :  { %v5534_v3 = vadd.f32 %v5533_v31, %v4477_v19  ;;  %v5887_v26 = vmax.f32 %v5531_v18, 0.0  ;;  %v5562_v30 = vpop.f32.mrb[204].mxu0 }
 0x492   :  { %v5564_v38 = vpop.f32.mrb[205].mxu0 }
 0x493   :  { %v5888_v23 = vmax.f32 %v5534_v3, 0.0  ;;  %v5565_v40 = vpop.f32.mrb[206].mxu0 }
 0x494   :  { %v4481_v25 = vpop.f32.mrb[232].mxu1  ;;  %v5567_v24 = vpop.f32.mrb[207].mxu0 }
 0x495   :  { %v8941_v17 = vpack.c.bf16 %v5888_v23, %v5887_v26  ;;  %v4482_v32 = vadd.f32 %v13419_v22, %v4481_v25  ;;  %v4483_v15 = vpop.f32.mrb[233].mxu1 }
 0x496   :  { %v4484_v33 = vpop.f32.mrb[234].mxu1 }
 0x497   :  { %9133 = vst [vmem:[%s13507_s3 + $0x378] sm:$0xff] %v8941_v17   ;;  %v5539_v27 = vadd.f32 %v5538_v55, %v4482_v32  ;;  %v4485_v34 = vadd.f32 %v13419_v22, %v4484_v33  ;;  %v4486_v36 = vpop.f32.mrb[235].mxu1 }
 0x499   :  { %v5542_v39 = vadd.f32 %v5541_v43, %v4485_v34  ;;  %v5889_v42 = vmax.f32 %v5539_v27, 0.0  ;;  %v5570_v37 = vpop.f32.mrb[208].mxu0 }
 0x49a   :  { %v5572_v52 = vpop.f32.mrb[209].mxu0 }
 0x49b   :  { %v5890_v31 = vmax.f32 %v5542_v39, 0.0  ;;  %v5573_v55 = vpop.f32.mrb[210].mxu0 }
 0x49c   :  { %v4489_v44 = vpop.f32.mrb[236].mxu1  ;;  %v5575_v41 = vpop.f32.mrb[211].mxu0 }
 0x49d   :  { %v8946_v29 = vpack.c.bf16 %v5890_v31, %v5889_v42  ;;  %v4490_v45 = vadd.f32 %v13419_v22, %v4489_v44  ;;  %v4491_v46 = vpop.f32.mrb[237].mxu1 }
 0x49e   :  { %v4492_v47 = vpop.f32.mrb[238].mxu1 }
 0x49f   :  { %9134 = vst [vmem:[%s13507_s3 + $0x380] sm:$0xff] %v8946_v29   ;;  %v5547_v49 = vadd.f32 %v5546_v6, %v4490_v45  ;;  %v4493_v35 = vadd.f32 %v13419_v22, %v4492_v47  ;;  %v4494_v51 = vpop.f32.mrb[239].mxu1 }
 0x4a1   :  { %v5550_v53 = vadd.f32 %v5549_v8, %v4493_v35  ;;  %v5891_v57 = vmax.f32 %v5547_v49, 0.0  ;;  %v5578_v48 = vpop.f32.mrb[212].mxu0 }
 0x4a2   :  { %v5580_v4 = vpop.f32.mrb[213].mxu0 }
 0x4a3   :  { %v5892_v43 = vmax.f32 %v5550_v53, 0.0  ;;  %v5581_v6 = vpop.f32.mrb[214].mxu0 }
 0x4a4   :  { %v4497_v58 = vpop.f32.mrb[240].mxu1  ;;  %v5583_v7 = vpop.f32.mrb[215].mxu0 }
 0x4a5   :  { %v8951_v59 = vpack.c.bf16 %v5892_v43, %v5891_v57  ;;  %v4498_v61 = vadd.f32 %v13419_v22, %v4497_v58  ;;  %v4499_v50 = vpop.f32.mrb[241].mxu1 }
 0x4a6   :  { %v4500_v63 = vpop.f32.mrb[242].mxu1 }
 0x4a7   :  { %9135 = vst [vmem:[%s13507_s3 + $0x388] sm:$0xff] %v8951_v59   ;;  %v5555_v0 = vadd.f32 %v5554_v21, %v4498_v61  ;;  %v4501_v1 = vadd.f32 %v13419_v22, %v4500_v63  ;;  %v4502_v2 = vpop.f32.mrb[243].mxu1 }
 0x4a9   :  { %v5558_v54 = vadd.f32 %v5557_v9, %v4501_v1  ;;  %v5893_v56 = vmax.f32 %v5555_v0, 0.0  ;;  %v5586_v18 = vpop.f32.mrb[216].mxu0 }
 0x4aa   :  { %v5588_v19 = vpop.f32.mrb[217].mxu0 }
 0x4ab   :  { %v5894_v8 = vmax.f32 %v5558_v54, 0.0  ;;  %v5589_v21 = vpop.f32.mrb[218].mxu0 }
 0x4ac   :  { %v4505_v10 = vpop.f32.mrb[244].mxu1  ;;  %v5591_v28 = vpop.f32.mrb[219].mxu0 }
 0x4ad   :  { %v8956_v60 = vpack.c.bf16 %v5894_v8, %v5893_v56  ;;  %v4506_v12 = vadd.f32 %v13419_v22, %v4505_v10  ;;  %v4507_v62 = vpop.f32.mrb[245].mxu1 }
 0x4ae   :  { %v4508_v13 = vpop.f32.mrb[246].mxu1 }
 0x4af   :  { %9136 = vst [vmem:[%s13507_s3 + $0x390] sm:$0xff] %v8956_v60   ;;  %v5563_v14 = vadd.f32 %v5562_v30, %v4506_v12  ;;  %v4509_v16 = vadd.f32 %v13419_v22, %v4508_v13  ;;  %v4510_v5 = vpop.f32.mrb[247].mxu1 }
 0x4b1   :  { %v5566_v20 = vadd.f32 %v5565_v40, %v4509_v16  ;;  %v5895_v3 = vmax.f32 %v5563_v14, 0.0  ;;  %v5594_v27 = vpop.f32.mrb[220].mxu0 }
 0x4b2   :  { %v5596_v34 = vpop.f32.mrb[221].mxu0 }
 0x4b3   :  { %v5896_v9 = vmax.f32 %v5566_v20, 0.0  ;;  %v5597_v30 = vpop.f32.mrb[222].mxu0 }
 0x4b4   :  { %v4513_v11 = vpop.f32.mrb[248].mxu1  ;;  %v5599_v38 = vpop.f32.mrb[223].mxu0 }
 0x4b5   :  { %v8961_v26 = vpack.c.bf16 %v5896_v9, %v5895_v3  ;;  %v4514_v23 = vadd.f32 %v13419_v22, %v4513_v11  ;;  %v4515_v25 = vpop.f32.mrb[249].mxu1 }
 0x4b6   :  { %v4516_v17 = vpop.f32.mrb[250].mxu1 }
 0x4b7   :  { %9137 = vst [vmem:[%s13507_s3 + $0x398] sm:$0xff] %v8961_v26   ;;  %v5571_v32 = vadd.f32 %v5570_v37, %v4514_v23  ;;  %v4517_v15 = vadd.f32 %v13419_v22, %v4516_v17  ;;  %v4518_v33 = vpop.f32.mrb[251].mxu1 }
 0x4b9   :  { %v5574_v36 = vadd.f32 %v5573_v55, %v4517_v15  ;;  %v5897_v39 = vmax.f32 %v5571_v32, 0.0  ;;  %v5602_v49 = vpop.f32.mrb[224].mxu0 }
 0x4ba   :  { %v5604_v35 = vpop.f32.mrb[225].mxu0 }
 0x4bb   :  { %v5898_v40 = vmax.f32 %v5574_v36, 0.0  ;;  %v5605_v37 = vpop.f32.mrb[226].mxu0 }
 0x4bc   :  { %v4521_v24 = vpop.f32.mrb[252].mxu1  ;;  %v5607_v52 = vpop.f32.mrb[227].mxu0 }
 0x4bd   :  { %v8966_v42 = vpack.c.bf16 %v5898_v40, %v5897_v39  ;;  %v4522_v31 = vadd.f32 %v13419_v22, %v4521_v24  ;;  %v4523_v44 = vpop.f32.mrb[253].mxu1 }
 0x4be   :  { %v4524_v29 = vpop.f32.mrb[254].mxu1 }
 0x4bf   :  { %9138 = vst [vmem:[%s13507_s3 + $0x3a0] sm:$0xff] %v8966_v42   ;;  %v5579_v45 = vadd.f32 %v5578_v48, %v4522_v31  ;;  %v4525_v46 = vadd.f32 %v13419_v22, %v4524_v29  ;;  %v4526_v47 = vpop.f32.mrb[255].mxu1 }
 0x4c1   :  { %v5582_v51 = vadd.f32 %v5581_v6, %v4525_v46  ;;  %v5899_v53 = vmax.f32 %v5579_v45, 0.0  ;;  %v5610_v0 = vpop.f32.mrb[228].mxu0 }
 0x4c2   :  { %v5612_v1 = vpop.f32.mrb[229].mxu0 }
 0x4c3   :  { %v5900_v55 = vmax.f32 %v5582_v51, 0.0  ;;  %v5613_v48 = vpop.f32.mrb[230].mxu0 }
 0x4c4   :  { %v4529_v41 = vpop.f32.mrb[148].mxu1  ;;  %v5615_v4 = vpop.f32.mrb[231].mxu0 }
 0x4c5   :  { %v8971_v57 = vpack.c.bf16 %v5900_v55, %v5899_v53  ;;  %v4530_v43 = vadd.f32 %v13419_v22, %v4529_v41  ;;  %v4531_v58 = vpop.f32.mrb[149].mxu1 }
 0x4c6   :  { %v4532_v59 = vpop.f32.mrb[150].mxu1 }
 0x4c7   :  { %9139 = vst [vmem:[%s13507_s3 + $0x3a8] sm:$0xff] %v8971_v57   ;;  %v5587_v61 = vadd.f32 %v5586_v18, %v4530_v43  ;;  %v4533_v50 = vadd.f32 %v13419_v22, %v4532_v59  ;;  %v4534_v63 = vpop.f32.mrb[151].mxu1 }
 0x4c9   :  { %v5590_v2 = vadd.f32 %v5589_v21, %v4533_v50  ;;  %v5901_v54 = vmax.f32 %v5587_v61, 0.0  ;;  %v5618_v14 = vpop.f32.mrb[232].mxu0 }
 0x4ca   :  { %v5620_v16 = vpop.f32.mrb[233].mxu0 }
 0x4cb   :  { %v5902_v6 = vmax.f32 %v5590_v2, 0.0  ;;  %v5621_v18 = vpop.f32.mrb[234].mxu0 }
 0x4cc   :  { %v4537_v7 = vpop.f32.mrb[152].mxu1  ;;  %v5623_v19 = vpop.f32.mrb[235].mxu0 }
 0x4cd   :  { %v8976_v56 = vpack.c.bf16 %v5902_v6, %v5901_v54  ;;  %v4538_v8 = vadd.f32 %v13419_v22, %v4537_v7  ;;  %v4539_v10 = vpop.f32.mrb[153].mxu1 }
 0x4ce   :  { %v4540_v60 = vpop.f32.mrb[154].mxu1 }
 0x4cf   :  { %9140 = vst [vmem:[%s13507_s3 + $0x3b0] sm:$0xff] %v8976_v56   ;;  %v5595_v12 = vadd.f32 %v5594_v27, %v4538_v8  ;;  %v4541_v62 = vadd.f32 %v13419_v22, %v4540_v60  ;;  %v4542_v13 = vpop.f32.mrb[155].mxu1 }
 0x4d1   :  { %v5598_v5 = vadd.f32 %v5597_v30, %v4541_v62  ;;  %v5903_v20 = vmax.f32 %v5595_v12, 0.0  ;;  %v5626_v32 = vpop.f32.mrb[236].mxu0 }
 0x4d2   :  { %v5628_v15 = vpop.f32.mrb[237].mxu0 }
 0x4d3   :  { %v5904_v21 = vmax.f32 %v5598_v5, 0.0  ;;  %v5629_v27 = vpop.f32.mrb[238].mxu0 }
 0x4d4   :  { %v4545_v28 = vpop.f32.mrb[156].mxu1  ;;  %v5631_v34 = vpop.f32.mrb[239].mxu0 }
 0x4d5   :  { %v8981_v3 = vpack.c.bf16 %v5904_v21, %v5903_v20  ;;  %v4546_v9 = vadd.f32 %v13419_v22, %v4545_v28  ;;  %v4547_v11 = vpop.f32.mrb[157].mxu1 }
 0x4d6   :  { %v4548_v26 = vpop.f32.mrb[158].mxu1 }
 0x4d7   :  { %9141 = vst [vmem:[%s13507_s3 + $0x3b8] sm:$0xff] %v8981_v3   ;;  %v5603_v23 = vadd.f32 %v5602_v49, %v4546_v9  ;;  %v4549_v25 = vadd.f32 %v13419_v22, %v4548_v26  ;;  %v4550_v17 = vpop.f32.mrb[159].mxu1 }
 0x4d9   :  { %v5606_v33 = vadd.f32 %v5605_v37, %v4549_v25  ;;  %v5905_v36 = vmax.f32 %v5603_v23, 0.0  ;;  %v5634_v45 = vpop.f32.mrb[240].mxu0 }
 0x4da   :  { %v5636_v46 = vpop.f32.mrb[241].mxu0 }
 0x4db   :  { %v5906_v30 = vmax.f32 %v5606_v33, 0.0  ;;  %v5637_v49 = vpop.f32.mrb[242].mxu0 }
 0x4dc   :  { %v4553_v38 = vpop.f32.mrb[160].mxu1  ;;  %v5639_v35 = vpop.f32.mrb[243].mxu0 }
 0x4dd   :  { %v8986_v39 = vpack.c.bf16 %v5906_v30, %v5905_v36  ;;  %v4554_v40 = vadd.f32 %v13419_v22, %v4553_v38  ;;  %v4555_v24 = vpop.f32.mrb[161].mxu1 }
 0x4de   :  { %v4556_v42 = vpop.f32.mrb[162].mxu1 }
 0x4df   :  { %9142 = vst [vmem:[%s13507_s3 + $0x3c0] sm:$0xff] %v8986_v39   ;;  %v5611_v31 = vadd.f32 %v5610_v0, %v4554_v40  ;;  %v4557_v44 = vadd.f32 %v13419_v22, %v4556_v42  ;;  %v4558_v29 = vpop.f32.mrb[163].mxu1 }
 0x4e1   :  { %v5614_v47 = vadd.f32 %v5613_v48, %v4557_v44  ;;  %v5907_v51 = vmax.f32 %v5611_v31, 0.0  ;;  %v5642_v61 = vpop.f32.mrb[244].mxu0 }
 0x4e2   :  { %v5644_v50 = vpop.f32.mrb[245].mxu0 }
 0x4e3   :  { %v5908_v37 = vmax.f32 %v5614_v47, 0.0  ;;  %v5645_v0 = vpop.f32.mrb[246].mxu0 }
 0x4e4   :  { %v4561_v52 = vpop.f32.mrb[164].mxu1  ;;  %v5647_v1 = vpop.f32.mrb[247].mxu0 }
 0x4e5   :  { %v8991_v53 = vpack.c.bf16 %v5908_v37, %v5907_v51  ;;  %v4562_v55 = vadd.f32 %v13419_v22, %v4561_v52  ;;  %v4563_v41 = vpop.f32.mrb[165].mxu1 }
 0x4e6   :  { %v4564_v57 = vpop.f32.mrb[166].mxu1 }
 0x4e7   :  { %9143 = vst [vmem:[%s13507_s3 + $0x3c8] sm:$0xff] %v8991_v53   ;;  %v5619_v43 = vadd.f32 %v5618_v14, %v4562_v55  ;;  %v4565_v58 = vadd.f32 %v13419_v22, %v4564_v57  ;;  %v4566_v59 = vpop.f32.mrb[167].mxu1 }
 0x4e9   :  { %v5622_v63 = vadd.f32 %v5621_v18, %v4565_v58  ;;  %v5909_v2 = vmax.f32 %v5619_v43, 0.0  ;;  %v5650_v12 = vpop.f32.mrb[248].mxu0 }
 0x4ea   :  { %v5652_v62 = vpop.f32.mrb[249].mxu0 }
 0x4eb   :  { %v5910_v48 = vmax.f32 %v5622_v63, 0.0  ;;  %v5653_v14 = vpop.f32.mrb[250].mxu0 }
 0x4ec   :  { %v4569_v4 = vpop.f32.mrb[168].mxu1  ;;  %v5655_v16 = vpop.f32.mrb[251].mxu0 }
 0x4ed   :  { %v8996_v54 = vpack.c.bf16 %v5910_v48, %v5909_v2  ;;  %v4570_v6 = vadd.f32 %v13419_v22, %v4569_v4  ;;  %v4571_v7 = vpop.f32.mrb[169].mxu1 }
 0x4ee   :  { %v4572_v56 = vpop.f32.mrb[170].mxu1 }
 0x4ef   :  { %9144 = vst [vmem:[%s13507_s3 + $0x3d0] sm:$0xff] %v8996_v54   ;;  %v5627_v8 = vadd.f32 %v5626_v32, %v4570_v6  ;;  %v4573_v10 = vadd.f32 %v13419_v22, %v4572_v56  ;;  %v4574_v60 = vpop.f32.mrb[171].mxu1 }
 0x4f1   :  { %v5630_v13 = vadd.f32 %v5629_v27, %v4573_v10  ;;  %v5911_v5 = vmax.f32 %v5627_v8, 0.0  ;;  %v5658_v23 = vpop.f32.mrb[252].mxu0 }
 0x4f2   :  { %v5660_v25 = vpop.f32.mrb[253].mxu0 }
 0x4f3   :  { %v5912_v18 = vmax.f32 %v5630_v13, 0.0  ;;  %v5661_v32 = vpop.f32.mrb[254].mxu0 }
 0x4f4   :  { %v4577_v19 = vpop.f32.mrb[172].mxu1  ;;  %v5663_v15 = vpop.f32.mrb[255].mxu0 }
 0x4f5   :  { %v9001_v20 = vpack.c.bf16 %v5912_v18, %v5911_v5  ;;  %v4578_v21 = vadd.f32 %v13419_v22, %v4577_v19  ;;  %v4579_v28 = vpop.f32.mrb[173].mxu1 }
 0x4f6   :  { %v4580_v3 = vpop.f32.mrb[174].mxu1 }
 0x4f7   :  { %9145 = vst [vmem:[%s13507_s3 + $0x3d8] sm:$0xff] %v9001_v20   ;;  %v5635_v9 = vadd.f32 %v5634_v45, %v4578_v21  ;;  %v4581_v11 = vadd.f32 %v13419_v22, %v4580_v3  ;;  %v4582_v26 = vpop.f32.mrb[175].mxu1 }
 0x4f9   :  { %v5638_v17 = vadd.f32 %v5637_v49, %v4581_v11  ;;  %v5913_v33 = vmax.f32 %v5635_v9, 0.0 }
 0x4fb   :  { %v5914_v27 = vmax.f32 %v5638_v17, 0.0 }
 0x4fc   :  { %v4585_v34 = vpop.f32.mrb[176].mxu1 }
 0x4fd   :  { %v9006_v36 = vpack.c.bf16 %v5914_v27, %v5913_v33  ;;  %v4586_v30 = vadd.f32 %v13419_v22, %v4585_v34  ;;  %v4587_v38 = vpop.f32.mrb[177].mxu1 }
 0x4fe   :  { %v4588_v39 = vpop.f32.mrb[178].mxu1 }
 0x4ff   :  { %9146 = vst [vmem:[%s13507_s3 + $0x3e0] sm:$0xff] %v9006_v36   ;;  %v5643_v40 = vadd.f32 %v5642_v61, %v4586_v30  ;;  %v4589_v24 = vadd.f32 %v13419_v22, %v4588_v39  ;;  %v4590_v42 = vpop.f32.mrb[179].mxu1 }
 0x501   :  { %v5646_v31 = vadd.f32 %v5645_v0, %v4589_v24  ;;  %v5915_v44 = vmax.f32 %v5643_v40, 0.0 }
 0x503   :  { %v5916_v29 = vmax.f32 %v5646_v31, 0.0 }
 0x504   :  { %v4593_v45 = vpop.f32.mrb[180].mxu1 }
 0x505   :  { %v9011_v46 = vpack.c.bf16 %v5916_v29, %v5915_v44  ;;  %v4594_v47 = vadd.f32 %v13419_v22, %v4593_v45  ;;  %v4595_v49 = vpop.f32.mrb[181].mxu1 }
 0x506   :  { %v4596_v35 = vpop.f32.mrb[182].mxu1 }
 0x507   :  { %9147 = vst [vmem:[%s13507_s3 + $0x3e8] sm:$0xff] %v9011_v46   ;;  %v5651_v51 = vadd.f32 %v5650_v12, %v4594_v47  ;;  %v4597_v37 = vadd.f32 %v13419_v22, %v4596_v35  ;;  %v4598_v52 = vpop.f32.mrb[183].mxu1 }
 0x509   :  { %v5654_v53 = vadd.f32 %v5653_v14, %v4597_v37  ;;  %v5917_v55 = vmax.f32 %v5651_v51, 0.0 }
 0x50b   :  { %v5918_v41 = vmax.f32 %v5654_v53, 0.0 }
 0x50c   :  { %v4601_v57 = vpop.f32.mrb[184].mxu1 }
 0x50d   :  { %v9016_v43 = vpack.c.bf16 %v5918_v41, %v5917_v55  ;;  %v4602_v58 = vadd.f32 %v13419_v22, %v4601_v57  ;;  %v4603_v59 = vpop.f32.mrb[185].mxu1 }
 0x50e   :  { %v4604_v61 = vpop.f32.mrb[186].mxu1 }
 0x50f   :  { %9148 = vst [vmem:[%s13507_s3 + $0x3f0] sm:$0xff] %v9016_v43   ;;  %v5659_v50 = vadd.f32 %v5658_v23, %v4602_v58  ;;  %v4605_v63 = vadd.f32 %v13419_v22, %v4604_v61  ;;  %v4606_v0 = vpop.f32.mrb[187].mxu1 }
 0x511   :  { %v5662_v1 = vadd.f32 %v5661_v32, %v4605_v63  ;;  %v5919_v2 = vmax.f32 %v5659_v50, 0.0 }
 0x513   :  { %v5920_v48 = vmax.f32 %v5662_v1, 0.0 }
 0x515   :  { %v9021_v4 = vpack.c.bf16 %v5920_v48, %v5919_v2 }
 0x517   :  { %9149 = vst [vmem:[%s13507_s3 + $0x3f8] sm:$0xff] %v9021_v4  }

// kernel: rl_forward.9
= control target key start
LH: loop header
LB: loop body
LE: loop exit
PB: predicated region body
PF: predicated region fallthrough
CT: control target
= control target key end

     0   :  { %s9381_s21 = smov 0   ;;  %s10175_s0 = inlined_call_operand.vmem [shape: bf16[2,16,9216], index: 0, kind: input, shape index: {}]   ;;  %s10176_s1 = inlined_call_operand.vmem [shape: bf16[2,9216,128], index: 1, kind: input, shape index: {}]   ;;  %s10177_s2 = inlined_call_operand.vmem [shape: f32[2,1,128], index: 2, kind: input, shape index: {}]   ;;  %s10178_s3 = inlined_call_operand.vmem [shape: bf16[2,128,128], index: 3, kind: input, shape index: {}]   ;;  %s10179_s4 = inlined_call_operand.vmem [shape: f32[2,1,128], index: 4, kind: input, shape index: {}]   ;;  %s10180_s5 = inlined_call_operand.vmem [shape: bf16[2,128,128], index: 5, kind: input, shape index: {}]   ;;  %s10181_s6 = inlined_call_operand.vmem [shape: f32[2,16,128], index: 6, kind: output, shape index: {}]  }
   0x1 LB: > { %s7198_s22 = sadd.s32 4294967295, %s9342_s21   ;;  %p7202_p0 = scmp.ge.s32.totalorder %s9342_s21, 1  ;;  %s9342_s21 = sphi %s9381_s21, %s16_s21  }
   0x2   : > { %p258_p1 = scmp.lt.s32.totalorder %s9342_s21, 3 }
   0x4   : > { %p259_p2 = pnand %p7202_p0, %p258_p1 }
   0x5   : > { %p309_p3 = scmp.lt.s32.totalorder (!%p259_p2), %s7198_s22, 1  ;;  %vm9345_vm0 = vmmov (!%p259_p2), 0  }
   0x6   : > { %262 = sbr.rel (%p259_p2) target bundleno = 1256 (0x4e8), region = 44 }
   0xd   : > { %s10183_s22 = smov (!%p309_p3, %s7198_s22), 1 }
   0xe   : > { %s8733_s23 = smul.u32 4608, %s10183_s22  ;;  %s321_s9 = scalar_lea.vmem %s10177_s2, %s10183_s22 }
   0xf   : > { %s8732_s27 = smul.u32 576, %s10183_s22  ;;  %s7879_s10 = sshll.u32 %s10183_s22, 6 }
  0x10   : > { %s9395_s26 = scalar_lea.vmem %s10176_s1, %s8733_s23  ;;  %s10122_s13 = scalar_lea.vmem %s10178_s3, %s7879_s10 }
  0x11   : > { %v8744_v0 = vld [vmem:[%s9395_s26 + $0x40] sm:$0xff]   ;;  %v8748_v4 = vld [vmem:[%s9395_s26 + $0x48] sm:$0xff]   ;;  %v8752_v8 = vld [vmem:[%s9395_s26 + $0x50] sm:$0xff]   ;;  %s9431_s30 = scalar_lea.vmem %s10175_s0, %s8732_s27  ;;  %s10147_s16 = scalar_lea.vmem %s10180_s5, %s7879_s10 }
  0x12   : > { %v8745_v1 = vld [vmem:[%s9395_s26 + $0xc0] sm:$0xff]   ;;  %7882 = vmatprep.subr.bf16.mxu0 %v8744_v0  ;;  %v8749_v5 = vld [vmem:[%s9395_s26 + $0xc8] sm:$0xff]   ;;  %v8753_v9 = vld [vmem:[%s9395_s26 + $0xd0] sm:$0xff]   ;;  %s329_s19 = scalar_lea.vmem %s10179_s4, %s10183_s22  ;;  %s7881_s20 = sshll.u32 %s10183_s22, 4 }
  0x13   : > { %v8746_v2 = vld [vmem:[%s9395_s26] sm:$0xff]   ;;  %7904 = vmatprep.subr.bf16.mxu1 %v8745_v1  ;;  %v8750_v6 = vld [vmem:[%s9395_s26 + $0x8] sm:$0xff]   ;;  %v8754_v10 = vld [vmem:[%s9395_s26 + $0x10] sm:$0xff]   ;;  %s339_s25 = scalar_lea.vmem %s10181_s6, %s7881_s20 }
  0x14   : > { %v8747_v3 = vld [vmem:[%s9395_s26 + $0x80] sm:$0xff]   ;;  %7883 = vmatpush3.bf16.msra.mxu0 %v8746_v2  ;;  %v8751_v7 = vld [vmem:[%s9395_s26 + $0x88] sm:$0xff]   ;;  %v8755_v11 = vld [vmem:[%s9395_s26 + $0x90] sm:$0xff]  }
  0x15   : > { %7905 = vmatpush3.bf16.msra.mxu1 %v8747_v3  ;;  %7884 = vmatprep.subr.bf16.mxu0 %v8748_v4  ;;  %v8756_v12 = vld [vmem:[%s9395_s26 + $0x58] sm:$0xff]   ;;  %v8760_v16 = vld [vmem:[%s9395_s26 + $0x60] sm:$0xff]   ;;  %v8764_v20 = vld [vmem:[%s9395_s26 + $0x68] sm:$0xff]  }
  0x16   : > { %7906 = vmatprep.subr.bf16.mxu1 %v8749_v5  ;;  %v8757_v13 = vld [vmem:[%s9395_s26 + $0xd8] sm:$0xff]   ;;  %v8761_v17 = vld [vmem:[%s9395_s26 + $0xe0] sm:$0xff]   ;;  %v8765_v21 = vld [vmem:[%s9395_s26 + $0xe8] sm:$0xff]  }
  0x17   : > { %v8758_v14 = vld [vmem:[%s9395_s26 + $0x18] sm:$0xff]   ;;  %v8762_v18 = vld [vmem:[%s9395_s26 + $0x20] sm:$0xff]   ;;  %v8766_v22 = vld [vmem:[%s9395_s26 + $0x28] sm:$0xff]  }
  0x18   : > { %7885 = vmatpush3.bf16.msra.mxu0 %v8750_v6  ;;  %v8759_v15 = vld [vmem:[%s9395_s26 + $0x98] sm:$0xff]   ;;  %v8763_v19 = vld [vmem:[%s9395_s26 + $0xa0] sm:$0xff]   ;;  %v8767_v23 = vld [vmem:[%s9395_s26 + $0xa8] sm:$0xff]  }
  0x19   : > { %7907 = vmatpush3.bf16.msra.mxu1 %v8751_v7  ;;  %7886 = vmatprep.subr.bf16.mxu0 %v8752_v8  ;;  %v8768_v24 = vld [vmem:[%s9395_s26 + $0x70] sm:$0xff]   ;;  %v8772_v28 = vld [vmem:[%s9395_s26 + $0x78] sm:$0xff]   ;;  %v341_v32 = vld [vmem:[%s9431_s30] sm:$0xff] }
  0x1a   : > { %7908 = vmatprep.subr.bf16.mxu1 %v8753_v9  ;;  %v8769_v25 = vld [vmem:[%s9395_s26 + $0xf0] sm:$0xff]   ;;  %v8773_v29 = vld [vmem:[%s9395_s26 + $0xf8] sm:$0xff]   ;;  %v377_v33 = vld [vmem:[%s9431_s30 + $0x120] sm:$0xff] }
  0x1b   : > { %v8770_v26 = vld [vmem:[%s9395_s26 + $0x30] sm:$0xff]   ;;  %v8774_v30 = vld [vmem:[%s9395_s26 + $0x38] sm:$0xff]   ;;  %v342_v34 = vld [vmem:[%s9431_s30 + $0x8] sm:$0xff]  ;;  %v7212_v35 = vcombine.low %v341_v32, %v377_v33  ;;  %v7213_v36 = vcombine.high %v341_v32, %v377_v33 }
  0x1c   : > { %7887 = vmatpush3.bf16.msra.mxu0 %v8754_v10  ;;  %v8771_v27 = vld [vmem:[%s9395_s26 + $0xb0] sm:$0xff]   ;;  %v8775_v31 = vld [vmem:[%s9395_s26 + $0xb8] sm:$0xff]   ;;  %v378_v37 = vld [vmem:[%s9431_s30 + $0x128] sm:$0xff] }
  0x1d   : > { %7909 = vmatpush3.bf16.msra.mxu1 %v8755_v11  ;;  %7888 = vmatprep.subr.bf16.mxu0 %v8756_v12  ;;  %v7214_v38 = vcombine.low %v342_v34, %v378_v37  ;;  %v7215_v39 = vcombine.high %v342_v34, %v378_v37  ;;  %v8776_v40 = vld [vmem:[%s9395_s26 + $0x140] sm:$0xff]   ;;  %v8780_v44 = vld [vmem:[%s9395_s26 + $0x148] sm:$0xff]   ;;  %v8784_v48 = vld [vmem:[%s9395_s26 + $0x150] sm:$0xff]  }
  0x1e   : > { %7910 = vmatprep.subr.bf16.mxu1 %v8757_v13  ;;  %5420 = vmatprep.mubr.bf16.mxu0 %v7213_v36  ;;  %v8777_v41 = vld [vmem:[%s9395_s26 + $0x1c0] sm:$0xff]   ;;  %v8781_v45 = vld [vmem:[%s9395_s26 + $0x1c8] sm:$0xff]   ;;  %v8785_v49 = vld [vmem:[%s9395_s26 + $0x1d0] sm:$0xff]  }
  0x1f   : > { %5461 = vmatprep.mubr.bf16.mxu1 %v7215_v39  ;;  %v8778_v42 = vld [vmem:[%s9395_s26 + $0x100] sm:$0xff]   ;;  %v8782_v46 = vld [vmem:[%s9395_s26 + $0x108] sm:$0xff]   ;;  %v8786_v50 = vld [vmem:[%s9395_s26 + $0x110] sm:$0xff]  }
  0x20   : > { %7889 = vmatpush3.bf16.msra.mxu0 %v8758_v14  ;;  %v8779_v43 = vld [vmem:[%s9395_s26 + $0x180] sm:$0xff]   ;;  %v8783_v47 = vld [vmem:[%s9395_s26 + $0x188] sm:$0xff]   ;;  %v8787_v51 = vld [vmem:[%s9395_s26 + $0x190] sm:$0xff]  }
  0x21   : > { %7911 = vmatpush3.bf16.msra.mxu1 %v8759_v15  ;;  %7890 = vmatprep.subr.bf16.mxu0 %v8760_v16  ;;  %v8788_v52 = vld [vmem:[%s9395_s26 + $0x158] sm:$0xff]   ;;  %v8792_v56 = vld [vmem:[%s9395_s26 + $0x160] sm:$0xff]   ;;  %v8796_v60 = vld [vmem:[%s9395_s26 + $0x168] sm:$0xff]  }
  0x22   : > { %7912 = vmatprep.subr.bf16.mxu1 %v8761_v17  ;;  %v8789_v53 = vld [vmem:[%s9395_s26 + $0x1d8] sm:$0xff]   ;;  %v8793_v57 = vld [vmem:[%s9395_s26 + $0x1e0] sm:$0xff]   ;;  %v8797_v61 = vld [vmem:[%s9395_s26 + $0x1e8] sm:$0xff]  }
  0x23   : > { %v8790_v54 = vld [vmem:[%s9395_s26 + $0x118] sm:$0xff]   ;;  %v8794_v58 = vld [vmem:[%s9395_s26 + $0x120] sm:$0xff]   ;;  %v8798_v62 = vld [vmem:[%s9395_s26 + $0x128] sm:$0xff]  }
  0x24   : > { %7891 = vmatpush3.bf16.msra.mxu0 %v8762_v18  ;;  %v8791_v55 = vld [vmem:[%s9395_s26 + $0x198] sm:$0xff]   ;;  %v8795_v59 = vld [vmem:[%s9395_s26 + $0x1a0] sm:$0xff]   ;;  %v8799_v63 = vld [vmem:[%s9395_s26 + $0x1a8] sm:$0xff]  }
  0x25   : > { %7913 = vmatpush3.bf16.msra.mxu1 %v8763_v19  ;;  %7892 = vmatprep.subr.bf16.mxu0 %v8764_v20  ;;  %v8800_v0 = vld [vmem:[%s9395_s26 + $0x170] sm:$0xff]   ;;  %v8804_v4 = vld [vmem:[%s9395_s26 + $0x178] sm:$0xff]   ;;  %v8808_v16 = vld [vmem:[%s9395_s26 + $0x240] sm:$0xff]  }
  0x26   : > { %7914 = vmatprep.subr.bf16.mxu1 %v8765_v21  ;;  %v8801_v1 = vld [vmem:[%s9395_s26 + $0x1f0] sm:$0xff]   ;;  %v8805_v5 = vld [vmem:[%s9395_s26 + $0x1f8] sm:$0xff]   ;;  %v8809_v17 = vld [vmem:[%s9395_s26 + $0x2c0] sm:$0xff]  }
  0x27   : > { %v8802_v2 = vld [vmem:[%s9395_s26 + $0x130] sm:$0xff]   ;;  %v8806_v6 = vld [vmem:[%s9395_s26 + $0x138] sm:$0xff]   ;;  %v8810_v18 = vld [vmem:[%s9395_s26 + $0x200] sm:$0xff]  }
  0x28   : > { %7893 = vmatpush3.bf16.msra.mxu0 %v8766_v22  ;;  %v8803_v3 = vld [vmem:[%s9395_s26 + $0x1b0] sm:$0xff]   ;;  %v8807_v7 = vld [vmem:[%s9395_s26 + $0x1b8] sm:$0xff]   ;;  %v8811_v19 = vld [vmem:[%s9395_s26 + $0x280] sm:$0xff]  }
  0x29   : > { %7915 = vmatpush3.bf16.msra.mxu1 %v8767_v23  ;;  %7894 = vmatprep.subr.bf16.mxu0 %v8768_v24  ;;  %v343_v8 = vld [vmem:[%s9431_s30 + $0x10] sm:$0xff]  ;;  %v344_v12 = vld [vmem:[%s9431_s30 + $0x18] sm:$0xff]  ;;  %v8812_v20 = vld [vmem:[%s9395_s26 + $0x248] sm:$0xff]  }
  0x2a   : > { %7916 = vmatprep.subr.bf16.mxu1 %v8769_v25  ;;  %v379_v9 = vld [vmem:[%s9431_s30 + $0x130] sm:$0xff]  ;;  %v380_v13 = vld [vmem:[%s9431_s30 + $0x138] sm:$0xff]  ;;  %v8813_v21 = vld [vmem:[%s9395_s26 + $0x2c8] sm:$0xff]  }
  0x2b   : > { %v7216_v10 = vcombine.low %v343_v8, %v379_v9  ;;  %v7217_v11 = vcombine.high %v343_v8, %v379_v9  ;;  %v7218_v14 = vcombine.low %v344_v12, %v380_v13  ;;  %v7219_v15 = vcombine.high %v344_v12, %v380_v13  ;;  %v8814_v22 = vld [vmem:[%s9395_s26 + $0x208] sm:$0xff]   ;;  %v8816_v24 = vld [vmem:[%s9395_s26 + $0x250] sm:$0xff]   ;;  %v8824_v32 = vld [vmem:[%s9395_s26 + $0x260] sm:$0xff]  }
  0x2c   : > { %7895 = vmatpush3.bf16.msra.mxu0 %v8770_v26  ;;  %v8815_v23 = vld [vmem:[%s9395_s26 + $0x288] sm:$0xff]   ;;  %v8817_v25 = vld [vmem:[%s9395_s26 + $0x2d0] sm:$0xff]   ;;  %v8825_v33 = vld [vmem:[%s9395_s26 + $0x2e0] sm:$0xff]  }
  0x2d   : > { %7917 = vmatpush3.bf16.msra.mxu1 %v8771_v27  ;;  %7896 = vmatprep.subr.bf16.mxu0 %v8772_v28  ;;  %v8818_v26 = vld [vmem:[%s9395_s26 + $0x210] sm:$0xff]   ;;  %v8820_v28 = vld [vmem:[%s9395_s26 + $0x258] sm:$0xff]   ;;  %v8826_v34 = vld [vmem:[%s9395_s26 + $0x220] sm:$0xff]  }
  0x2e   : > { %7918 = vmatprep.subr.bf16.mxu1 %v8773_v29  ;;  %v8819_v27 = vld [vmem:[%s9395_s26 + $0x290] sm:$0xff]   ;;  %v8821_v29 = vld [vmem:[%s9395_s26 + $0x2d8] sm:$0xff]   ;;  %v8828_v36 = vld [vmem:[%s9395_s26 + $0x268] sm:$0xff]  }
  0x2f   : > { %v8829_v37 = vld [vmem:[%s9395_s26 + $0x2e8] sm:$0xff]   ;;  %v8856_v8 = vld [vmem:[%s9395_s26 + $0x360] sm:$0xff]  }
  0x30   : > { %7897 = vmatpush3.bf16.msra.mxu0 %v8774_v30  ;;  %v8822_v30 = vld [vmem:[%s9395_s26 + $0x218] sm:$0xff]   ;;  %v8831_v39 = vld [vmem:[%s9395_s26 + $0x2a8] sm:$0xff]   ;;  %v8857_v9 = vld [vmem:[%s9395_s26 + $0x3e0] sm:$0xff]  }
  0x31   : > { %7919 = vmatpush3.bf16.msra.mxu1 %v8775_v31  ;;  %7926 = vmatprep.subr.bf16.mxu0 %v8776_v40  ;;  %v8823_v31 = vld [vmem:[%s9395_s26 + $0x298] sm:$0xff]   ;;  %v8832_v40 = vld [vmem:[%s9395_s26 + $0x270] sm:$0xff]   ;;  %v8860_v12 = vld [vmem:[%s9395_s26 + $0x368] sm:$0xff]  }
  0x32   : > { %7948 = vmatprep.subr.bf16.mxu1 %v8777_v41  ;;  %v8833_v41 = vld [vmem:[%s9395_s26 + $0x2f0] sm:$0xff]   ;;  %v8861_v13 = vld [vmem:[%s9395_s26 + $0x3e8] sm:$0xff]  }
  0x33   : > { %5421 = vmatmul.mubr.bf16.vlgmr.msra.gmra.mrb[0].mxu0 %v7212_v35  ;;  %v8827_v35 = vld [vmem:[%s9395_s26 + $0x2a0] sm:$0xff]  }
  0x34   : > { %5462 = vmatmul.mubr.bf16.vlgmr.msra.gmra.mrb[0].mxu1 %v7214_v38  ;;  %7927 = vmatpush3.bf16.msra.mxu0 %v8778_v42  ;;  %v8830_v38 = vld [vmem:[%s9395_s26 + $0x228] sm:$0xff]   ;;  %v8834_v42 = vld [vmem:[%s9395_s26 + $0x230] sm:$0xff]  }
  0x35   : > { %7949 = vmatpush3.bf16.msra.mxu1 %v8779_v43  ;;  %7928 = vmatprep.subr.bf16.mxu0 %v8780_v44  ;;  %v8835_v43 = vld [vmem:[%s9395_s26 + $0x2b0] sm:$0xff]   ;;  %v8836_v44 = vld [vmem:[%s9395_s26 + $0x278] sm:$0xff]  }
  0x36   : > { %7950 = vmatprep.subr.bf16.mxu1 %v8781_v45  ;;  %5502 = vmatprep.mubr.bf16.mxu0 %v7217_v11  ;;  %v8837_v45 = vld [vmem:[%s9395_s26 + $0x2f8] sm:$0xff]   ;;  %v8859_v11 = vld [vmem:[%s9395_s26 + $0x3a0] sm:$0xff]  }
  0x37   : > { %5543 = vmatprep.mubr.bf16.mxu1 %v7219_v15  ;;  %v8863_v15 = vld [vmem:[%s9395_s26 + $0x3a8] sm:$0xff]  }
  0x38   : > { %7929 = vmatpush3.bf16.msra.mxu0 %v8782_v46  ;;  %v8838_v46 = vld [vmem:[%s9395_s26 + $0x238] sm:$0xff]  }
  0x39   : > { %7951 = vmatpush3.bf16.msra.mxu1 %v8783_v47  ;;  %7930 = vmatprep.subr.bf16.mxu0 %v8784_v48  ;;  %v8839_v47 = vld [vmem:[%s9395_s26 + $0x2b8] sm:$0xff]   ;;  %v345_v48 = vld [vmem:[%s9431_s30 + $0x20] sm:$0xff] }
  0x3a   : > { %7952 = vmatprep.subr.bf16.mxu1 %v8785_v49  ;;  %v381_v49 = vld [vmem:[%s9431_s30 + $0x140] sm:$0xff] }
  0x3c   : > { %7931 = vmatpush3.bf16.msra.mxu0 %v8786_v50  ;;  %v346_v50 = vld [vmem:[%s9431_s30 + $0x28] sm:$0xff] }
  0x3d   : > { %7953 = vmatpush3.bf16.msra.mxu1 %v8787_v51  ;;  %7932 = vmatprep.subr.bf16.mxu0 %v8788_v52  ;;  %v382_v51 = vld [vmem:[%s9431_s30 + $0x148] sm:$0xff]  ;;  %v7220_v52 = vcombine.low %v345_v48, %v381_v49 }
  0x3e   : > { %7954 = vmatprep.subr.bf16.mxu1 %v8789_v53  ;;  %v7221_v53 = vcombine.high %v345_v48, %v381_v49  ;;  %v8888_v48 = vld [vmem:[%s9395_s26 + $0x460] sm:$0xff]  }
  0x3f   : > { %v8889_v49 = vld [vmem:[%s9395_s26 + $0x4e0] sm:$0xff]  }
  0x40   : > { %7933 = vmatpush3.bf16.msra.mxu0 %v8790_v54  ;;  %v7222_v54 = vcombine.low %v346_v50, %v382_v51 }
  0x41   : > { %7955 = vmatpush3.bf16.msra.mxu1 %v8791_v55  ;;  %7934 = vmatprep.subr.bf16.mxu0 %v8792_v56  ;;  %v7223_v55 = vcombine.high %v346_v50, %v382_v51  ;;  %v8840_v56 = vld [vmem:[%s9395_s26 + $0x340] sm:$0xff]  }
  0x42   : > { %7956 = vmatprep.subr.bf16.mxu1 %v8793_v57  ;;  %v8841_v57 = vld [vmem:[%s9395_s26 + $0x3c0] sm:$0xff]  }
  0x43   : > { %v8890_v50 = vld [vmem:[%s9395_s26 + $0x420] sm:$0xff]  }
  0x44   : > { %7935 = vmatpush3.bf16.msra.mxu0 %v8794_v58  ;;  %v8842_v58 = vld [vmem:[%s9395_s26 + $0x300] sm:$0xff]  }
  0x45   : > { %7957 = vmatpush3.bf16.msra.mxu1 %v8795_v59  ;;  %7936 = vmatprep.subr.bf16.mxu0 %v8796_v60  ;;  %v8843_v59 = vld [vmem:[%s9395_s26 + $0x380] sm:$0xff]   ;;  %v8844_v60 = vld [vmem:[%s9395_s26 + $0x348] sm:$0xff]  }
  0x46   : > { %7958 = vmatprep.subr.bf16.mxu1 %v8797_v61  ;;  %v8845_v61 = vld [vmem:[%s9395_s26 + $0x3c8] sm:$0xff]   ;;  %v8891_v51 = vld [vmem:[%s9395_s26 + $0x4a0] sm:$0xff]  }
  0x48   : > { %7937 = vmatpush3.bf16.msra.mxu0 %v8798_v62  ;;  %v8846_v62 = vld [vmem:[%s9395_s26 + $0x308] sm:$0xff]  }
  0x49   : > { %7959 = vmatpush3.bf16.msra.mxu1 %v8799_v63  ;;  %7938 = vmatprep.subr.bf16.mxu0 %v8800_v0  ;;  %v8847_v63 = vld [vmem:[%s9395_s26 + $0x388] sm:$0xff]   ;;  %v8848_v0 = vld [vmem:[%s9395_s26 + $0x350] sm:$0xff]  }
  0x4a   : > { %7960 = vmatprep.subr.bf16.mxu1 %v8801_v1  ;;  %v8849_v1 = vld [vmem:[%s9395_s26 + $0x3d0] sm:$0xff]  }
  0x4c   : > { %7939 = vmatpush3.bf16.msra.mxu0 %v8802_v2  ;;  %v8850_v2 = vld [vmem:[%s9395_s26 + $0x310] sm:$0xff]  }
  0x4d   : > { %7961 = vmatpush3.bf16.msra.mxu1 %v8803_v3  ;;  %7940 = vmatprep.subr.bf16.mxu0 %v8804_v4  ;;  %v8851_v3 = vld [vmem:[%s9395_s26 + $0x390] sm:$0xff]   ;;  %v8852_v4 = vld [vmem:[%s9395_s26 + $0x358] sm:$0xff]  }
  0x4e   : > { %7962 = vmatprep.subr.bf16.mxu1 %v8805_v5  ;;  %v8853_v5 = vld [vmem:[%s9395_s26 + $0x3d8] sm:$0xff]  }
  0x50   : > { %7941 = vmatpush3.bf16.msra.mxu0 %v8806_v6  ;;  %v8854_v6 = vld [vmem:[%s9395_s26 + $0x318] sm:$0xff]  }
  0x51   : > { %7963 = vmatpush3.bf16.msra.mxu1 %v8807_v7  ;;  %7970 = vmatprep.subr.bf16.mxu0 %v8808_v16  ;;  %v8855_v7 = vld [vmem:[%s9395_s26 + $0x398] sm:$0xff]   ;;  %v8864_v16 = vld [vmem:[%s9395_s26 + $0x370] sm:$0xff]  }
  0x52   : > { %7992 = vmatprep.subr.bf16.mxu1 %v8809_v17  ;;  %v8865_v17 = vld [vmem:[%s9395_s26 + $0x3f0] sm:$0xff]  }
  0x53   : > { %5503 = vmatmul.mubr.bf16.vlgmr.msra.gmra.mrb[4].mxu0 %v7216_v10  ;;  %v8858_v10 = vld [vmem:[%s9395_s26 + $0x320] sm:$0xff]  }
  0x54   : > { %5544 = vmatmul.mubr.bf16.vlgmr.msra.gmra.mrb[4].mxu1 %v7218_v14  ;;  %7971 = vmatpush3.bf16.msra.mxu0 %v8810_v18  ;;  %v8862_v14 = vld [vmem:[%s9395_s26 + $0x328] sm:$0xff]   ;;  %v8866_v18 = vld [vmem:[%s9395_s26 + $0x330] sm:$0xff]  }
  0x55   : > { %7993 = vmatpush3.bf16.msra.mxu1 %v8811_v19  ;;  %7972 = vmatprep.subr.bf16.mxu0 %v8812_v20  ;;  %v8867_v19 = vld [vmem:[%s9395_s26 + $0x3b0] sm:$0xff]   ;;  %v8868_v20 = vld [vmem:[%s9395_s26 + $0x378] sm:$0xff]  }
  0x56   : > { %7994 = vmatprep.subr.bf16.mxu1 %v8813_v21  ;;  %5584 = vmatprep.mubr.bf16.mxu0 %v7221_v53  ;;  %v8869_v21 = vld [vmem:[%s9395_s26 + $0x3f8] sm:$0xff]   ;;  %v8893_v53 = vld [vmem:[%s9395_s26 + $0x4e8] sm:$0xff]  }
  0x57   : > { %5625 = vmatprep.mubr.bf16.mxu1 %v7223_v55  ;;  %v8895_v55 = vld [vmem:[%s9395_s26 + $0x4a8] sm:$0xff]  }
  0x58   : > { %7973 = vmatpush3.bf16.msra.mxu0 %v8814_v22  ;;  %v8870_v22 = vld [vmem:[%s9395_s26 + $0x338] sm:$0xff]  }
  0x59   : > { %7995 = vmatpush3.bf16.msra.mxu1 %v8815_v23  ;;  %7974 = vmatprep.subr.bf16.mxu0 %v8816_v24  ;;  %v8871_v23 = vld [vmem:[%s9395_s26 + $0x3b8] sm:$0xff]   ;;  %v347_v24 = vld [vmem:[%s9431_s30 + $0x30] sm:$0xff] }
  0x5a   : > { %7996 = vmatprep.subr.bf16.mxu1 %v8817_v25  ;;  %v383_v25 = vld [vmem:[%s9431_s30 + $0x150] sm:$0xff] }
  0x5c   : > { %7975 = vmatpush3.bf16.msra.mxu0 %v8818_v26  ;;  %v348_v26 = vld [vmem:[%s9431_s30 + $0x38] sm:$0xff] }
  0x5d   : > { %7997 = vmatpush3.bf16.msra.mxu1 %v8819_v27  ;;  %7976 = vmatprep.subr.bf16.mxu0 %v8820_v28  ;;  %v7224_v27 = vcombine.low %v347_v24, %v383_v25  ;;  %v7225_v28 = vcombine.high %v347_v24, %v383_v25  ;;  %v8920_v24 = vld [vmem:[%s9395_s26 + $0x560] sm:$0xff]  }
  0x5e   : > { %7998 = vmatprep.subr.bf16.mxu1 %v8821_v29  ;;  %v384_v29 = vld [vmem:[%s9431_s30 + $0x158] sm:$0xff]  ;;  %v8921_v25 = vld [vmem:[%s9395_s26 + $0x5e0] sm:$0xff]  }
  0x60   : > { %7977 = vmatpush3.bf16.msra.mxu0 %v8822_v30  ;;  %v7226_v30 = vcombine.low %v348_v26, %v384_v29 }
  0x61   : > { %7999 = vmatpush3.bf16.msra.mxu1 %v8823_v31  ;;  %7978 = vmatprep.subr.bf16.mxu0 %v8824_v32  ;;  %v7227_v31 = vcombine.high %v348_v26, %v384_v29  ;;  %v8872_v32 = vld [vmem:[%s9395_s26 + $0x440] sm:$0xff]   ;;  %v8925_v29 = vld [vmem:[%s9395_s26 + $0x5e8] sm:$0xff]  }
  0x62   : > { %8000 = vmatprep.subr.bf16.mxu1 %v8825_v33  ;;  %v8873_v33 = vld [vmem:[%s9395_s26 + $0x4c0] sm:$0xff]  }
  0x63   : > { %v8922_v26 = vld [vmem:[%s9395_s26 + $0x520] sm:$0xff]  }
  0x64   : > { %7979 = vmatpush3.bf16.msra.mxu0 %v8826_v34  ;;  %v8874_v34 = vld [vmem:[%s9395_s26 + $0x400] sm:$0xff]  }
  0x65   : > { %8001 = vmatpush3.bf16.msra.mxu1 %v8827_v35  ;;  %7980 = vmatprep.subr.bf16.mxu0 %v8828_v36  ;;  %v8875_v35 = vld [vmem:[%s9395_s26 + $0x480] sm:$0xff]   ;;  %v8876_v36 = vld [vmem:[%s9395_s26 + $0x448] sm:$0xff]  }
  0x66   : > { %8002 = vmatprep.subr.bf16.mxu1 %v8829_v37  ;;  %v8877_v37 = vld [vmem:[%s9395_s26 + $0x4c8] sm:$0xff]  }
  0x68   : > { %7981 = vmatpush3.bf16.msra.mxu0 %v8830_v38  ;;  %v8878_v38 = vld [vmem:[%s9395_s26 + $0x408] sm:$0xff]  }
  0x69   : > { %8003 = vmatpush3.bf16.msra.mxu1 %v8831_v39  ;;  %7982 = vmatprep.subr.bf16.mxu0 %v8832_v40  ;;  %v8879_v39 = vld [vmem:[%s9395_s26 + $0x488] sm:$0xff]   ;;  %v8880_v40 = vld [vmem:[%s9395_s26 + $0x450] sm:$0xff]  }
  0x6a   : > { %8004 = vmatprep.subr.bf16.mxu1 %v8833_v41  ;;  %v8881_v41 = vld [vmem:[%s9395_s26 + $0x4d0] sm:$0xff]  }
  0x6c   : > { %7983 = vmatpush3.bf16.msra.mxu0 %v8834_v42  ;;  %v8882_v42 = vld [vmem:[%s9395_s26 + $0x410] sm:$0xff]  }
  0x6d   : > { %8005 = vmatpush3.bf16.msra.mxu1 %v8835_v43  ;;  %7984 = vmatprep.subr.bf16.mxu0 %v8836_v44  ;;  %v8883_v43 = vld [vmem:[%s9395_s26 + $0x490] sm:$0xff]   ;;  %v8884_v44 = vld [vmem:[%s9395_s26 + $0x458] sm:$0xff]  }
  0x6e   : > { %8006 = vmatprep.subr.bf16.mxu1 %v8837_v45  ;;  %v8885_v45 = vld [vmem:[%s9395_s26 + $0x4d8] sm:$0xff]  }
  0x70   : > { %7985 = vmatpush3.bf16.msra.mxu0 %v8838_v46  ;;  %v8886_v46 = vld [vmem:[%s9395_s26 + $0x418] sm:$0xff]  }
  0x71   : > { %8007 = vmatpush3.bf16.msra.mxu1 %v8839_v47  ;;  %8014 = vmatprep.subr.bf16.mxu0 %v8840_v56  ;;  %v8887_v47 = vld [vmem:[%s9395_s26 + $0x498] sm:$0xff]   ;;  %v8896_v56 = vld [vmem:[%s9395_s26 + $0x470] sm:$0xff]  }
  0x72   : > { %8036 = vmatprep.subr.bf16.mxu1 %v8841_v57  ;;  %v8897_v57 = vld [vmem:[%s9395_s26 + $0x4f0] sm:$0xff]  }
  0x73   : > { %5585 = vmatmul.mubr.bf16.vlgmr.msra.gmra.mrb[8].mxu0 %v7220_v52  ;;  %v8892_v52 = vld [vmem:[%s9395_s26 + $0x468] sm:$0xff]  }
  0x74   : > { %5626 = vmatmul.mubr.bf16.vlgmr.msra.gmra.mrb[8].mxu1 %v7222_v54  ;;  %8015 = vmatpush3.bf16.msra.mxu0 %v8842_v58  ;;  %v8894_v54 = vld [vmem:[%s9395_s26 + $0x428] sm:$0xff]   ;;  %v8898_v58 = vld [vmem:[%s9395_s26 + $0x430] sm:$0xff]  }
  0x75   : > { %8037 = vmatpush3.bf16.msra.mxu1 %v8843_v59  ;;  %8016 = vmatprep.subr.bf16.mxu0 %v8844_v60  ;;  %v8899_v59 = vld [vmem:[%s9395_s26 + $0x4b0] sm:$0xff]   ;;  %v8900_v60 = vld [vmem:[%s9395_s26 + $0x478] sm:$0xff]  }
  0x76   : > { %8038 = vmatprep.subr.bf16.mxu1 %v8845_v61  ;;  %5666 = vmatprep.mubr.bf16.mxu0 %v7225_v28  ;;  %v8901_v61 = vld [vmem:[%s9395_s26 + $0x4f8] sm:$0xff]   ;;  %v8924_v28 = vld [vmem:[%s9395_s26 + $0x568] sm:$0xff]  }
  0x77   : > { %5707 = vmatprep.mubr.bf16.mxu1 %v7227_v31  ;;  %v8927_v31 = vld [vmem:[%s9395_s26 + $0x5a8] sm:$0xff]  }
  0x78   : > { %8017 = vmatpush3.bf16.msra.mxu0 %v8846_v62  ;;  %v8902_v62 = vld [vmem:[%s9395_s26 + $0x438] sm:$0xff]  }
  0x79   : > { %8039 = vmatpush3.bf16.msra.mxu1 %v8847_v63  ;;  %8018 = vmatprep.subr.bf16.mxu0 %v8848_v0  ;;  %v8903_v63 = vld [vmem:[%s9395_s26 + $0x4b8] sm:$0xff]   ;;  %v349_v0 = vld [vmem:[%s9431_s30 + $0x40] sm:$0xff] }
  0x7a   : > { %8040 = vmatprep.subr.bf16.mxu1 %v8849_v1  ;;  %v385_v1 = vld [vmem:[%s9431_s30 + $0x160] sm:$0xff] }
  0x7c   : > { %8019 = vmatpush3.bf16.msra.mxu0 %v8850_v2  ;;  %v7228_v2 = vcombine.low %v349_v0, %v385_v1 }
  0x7d   : > { %8041 = vmatpush3.bf16.msra.mxu1 %v8851_v3  ;;  %8020 = vmatprep.subr.bf16.mxu0 %v8852_v4  ;;  %v7229_v3 = vcombine.high %v349_v0, %v385_v1  ;;  %v350_v4 = vld [vmem:[%s9431_s30 + $0x48] sm:$0xff]  ;;  %v8952_v0 = vld [vmem:[%s9395_s26 + $0x660] sm:$0xff]  }
  0x7e   : > { %8042 = vmatprep.subr.bf16.mxu1 %v8853_v5  ;;  %v386_v5 = vld [vmem:[%s9431_s30 + $0x168] sm:$0xff]  ;;  %v8953_v1 = vld [vmem:[%s9395_s26 + $0x6e0] sm:$0xff]  }
  0x80   : > { %8021 = vmatpush3.bf16.msra.mxu0 %v8854_v6  ;;  %v7230_v6 = vcombine.low %v350_v4, %v386_v5 }
  0x81   : > { %8043 = vmatpush3.bf16.msra.mxu1 %v8855_v7  ;;  %8022 = vmatprep.subr.bf16.mxu0 %v8856_v8  ;;  %v7231_v7 = vcombine.high %v350_v4, %v386_v5  ;;  %v8904_v8 = vld [vmem:[%s9395_s26 + $0x540] sm:$0xff]   ;;  %v8956_v4 = vld [vmem:[%s9395_s26 + $0x668] sm:$0xff]  }
  0x82   : > { %8044 = vmatprep.subr.bf16.mxu1 %v8857_v9  ;;  %v8905_v9 = vld [vmem:[%s9395_s26 + $0x5c0] sm:$0xff]   ;;  %v8957_v5 = vld [vmem:[%s9395_s26 + $0x6e8] sm:$0xff]  }
  0x84   : > { %8023 = vmatpush3.bf16.msra.mxu0 %v8858_v10  ;;  %v8906_v10 = vld [vmem:[%s9395_s26 + $0x500] sm:$0xff]  }
  0x85   : > { %8045 = vmatpush3.bf16.msra.mxu1 %v8859_v11  ;;  %8024 = vmatprep.subr.bf16.mxu0 %v8860_v12  ;;  %v8907_v11 = vld [vmem:[%s9395_s26 + $0x580] sm:$0xff]   ;;  %v8908_v12 = vld [vmem:[%s9395_s26 + $0x548] sm:$0xff]  }
  0x86   : > { %8046 = vmatprep.subr.bf16.mxu1 %v8861_v13  ;;  %v8909_v13 = vld [vmem:[%s9395_s26 + $0x5c8] sm:$0xff]  }
  0x88   : > { %8025 = vmatpush3.bf16.msra.mxu0 %v8862_v14  ;;  %v8910_v14 = vld [vmem:[%s9395_s26 + $0x508] sm:$0xff]  }
  0x89   : > { %8047 = vmatpush3.bf16.msra.mxu1 %v8863_v15  ;;  %8026 = vmatprep.subr.bf16.mxu0 %v8864_v16  ;;  %v8911_v15 = vld [vmem:[%s9395_s26 + $0x588] sm:$0xff]   ;;  %v8912_v16 = vld [vmem:[%s9395_s26 + $0x550] sm:$0xff]  }
  0x8a   : > { %8048 = vmatprep.subr.bf16.mxu1 %v8865_v17  ;;  %v8913_v17 = vld [vmem:[%s9395_s26 + $0x5d0] sm:$0xff]  }
  0x8c   : > { %8027 = vmatpush3.bf16.msra.mxu0 %v8866_v18  ;;  %v8914_v18 = vld [vmem:[%s9395_s26 + $0x510] sm:$0xff]  }
  0x8d   : > { %8049 = vmatpush3.bf16.msra.mxu1 %v8867_v19  ;;  %8028 = vmatprep.subr.bf16.mxu0 %v8868_v20  ;;  %v8915_v19 = vld [vmem:[%s9395_s26 + $0x590] sm:$0xff]   ;;  %v8916_v20 = vld [vmem:[%s9395_s26 + $0x558] sm:$0xff]  }
  0x8e   : > { %8050 = vmatprep.subr.bf16.mxu1 %v8869_v21  ;;  %v8917_v21 = vld [vmem:[%s9395_s26 + $0x5d8] sm:$0xff]  }
  0x90   : > { %8029 = vmatpush3.bf16.msra.mxu0 %v8870_v22  ;;  %v8918_v22 = vld [vmem:[%s9395_s26 + $0x518] sm:$0xff]  }
  0x91   : > { %8051 = vmatpush3.bf16.msra.mxu1 %v8871_v23  ;;  %8058 = vmatprep.subr.bf16.mxu0 %v8872_v32  ;;  %v8919_v23 = vld [vmem:[%s9395_s26 + $0x598] sm:$0xff]   ;;  %v8928_v32 = vld [vmem:[%s9395_s26 + $0x570] sm:$0xff]  }
  0x92   : > { %8080 = vmatprep.subr.bf16.mxu1 %v8873_v33  ;;  %v8929_v33 = vld [vmem:[%s9395_s26 + $0x5f0] sm:$0xff]  }
  0x93   : > { %5667 = vmatmul.mubr.bf16.vlgmr.msra.gmra.mrb[12].mxu0 %v7224_v27  ;;  %v8923_v27 = vld [vmem:[%s9395_s26 + $0x5a0] sm:$0xff]  }
  0x94   : > { %5708 = vmatmul.mubr.bf16.vlgmr.msra.gmra.mrb[12].mxu1 %v7226_v30  ;;  %8059 = vmatpush3.bf16.msra.mxu0 %v8874_v34  ;;  %v8926_v30 = vld [vmem:[%s9395_s26 + $0x528] sm:$0xff]   ;;  %v8930_v34 = vld [vmem:[%s9395_s26 + $0x530] sm:$0xff]  }
  0x95   : > { %8081 = vmatpush3.bf16.msra.mxu1 %v8875_v35  ;;  %8060 = vmatprep.subr.bf16.mxu0 %v8876_v36  ;;  %v8931_v35 = vld [vmem:[%s9395_s26 + $0x5b0] sm:$0xff]   ;;  %v8932_v36 = vld [vmem:[%s9395_s26 + $0x578] sm:$0xff]  }
  0x96   : > { %8082 = vmatprep.subr.bf16.mxu1 %v8877_v37  ;;  %5748 = vmatprep.mubr.bf16.mxu0 %v7229_v3  ;;  %v8933_v37 = vld [vmem:[%s9395_s26 + $0x5f8] sm:$0xff]   ;;  %v8955_v3 = vld [vmem:[%s9395_s26 + $0x6a0] sm:$0xff]  }
  0x97   : > { %5789 = vmatprep.mubr.bf16.mxu1 %v7231_v7  ;;  %v8959_v7 = vld [vmem:[%s9395_s26 + $0x6a8] sm:$0xff]  }
  0x98   : > { %8061 = vmatpush3.bf16.msra.mxu0 %v8878_v38  ;;  %v8934_v38 = vld [vmem:[%s9395_s26 + $0x538] sm:$0xff]  }
  0x99   : > { %8083 = vmatpush3.bf16.msra.mxu1 %v8879_v39  ;;  %8062 = vmatprep.subr.bf16.mxu0 %v8880_v40  ;;  %v8935_v39 = vld [vmem:[%s9395_s26 + $0x5b8] sm:$0xff]   ;;  %v351_v40 = vld [vmem:[%s9431_s30 + $0x50] sm:$0xff] }
  0x9a   : > { %8084 = vmatprep.subr.bf16.mxu1 %v8881_v41  ;;  %v387_v41 = vld [vmem:[%s9431_s30 + $0x170] sm:$0xff] }
  0x9c   : > { %8063 = vmatpush3.bf16.msra.mxu0 %v8882_v42  ;;  %v352_v42 = vld [vmem:[%s9431_s30 + $0x58] sm:$0xff] }
  0x9d   : > { %8085 = vmatpush3.bf16.msra.mxu1 %v8883_v43  ;;  %8064 = vmatprep.subr.bf16.mxu0 %v8884_v44  ;;  %v388_v43 = vld [vmem:[%s9431_s30 + $0x178] sm:$0xff]  ;;  %v7232_v44 = vcombine.low %v351_v40, %v387_v41 }
  0x9e   : > { %8086 = vmatprep.subr.bf16.mxu1 %v8885_v45  ;;  %v7233_v45 = vcombine.high %v351_v40, %v387_v41  ;;  %v8983_v41 = vld [vmem:[%s9395_s26 + $0x798] sm:$0xff]  }
  0xa0   : > { %8065 = vmatpush3.bf16.msra.mxu0 %v8886_v46  ;;  %v7234_v46 = vcombine.low %v352_v42, %v388_v43 }
  0xa1   : > { %8087 = vmatpush3.bf16.msra.mxu1 %v8887_v47  ;;  %8066 = vmatprep.subr.bf16.mxu0 %v8888_v48  ;;  %v7235_v47 = vcombine.high %v352_v42, %v388_v43  ;;  %v8936_v48 = vld [vmem:[%s9395_s26 + $0x640] sm:$0xff]  }
  0xa2   : > { %8088 = vmatprep.subr.bf16.mxu1 %v8889_v49  ;;  %v8937_v49 = vld [vmem:[%s9395_s26 + $0x6c0] sm:$0xff]  }
  0xa3   : > { %v8984_v43 = vld [vmem:[%s9395_s26 + $0x760] sm:$0xff]  }
  0xa4   : > { %8067 = vmatpush3.bf16.msra.mxu0 %v8890_v50  ;;  %v8938_v50 = vld [vmem:[%s9395_s26 + $0x600] sm:$0xff]  }
  0xa5   : > { %8089 = vmatpush3.bf16.msra.mxu1 %v8891_v51  ;;  %8068 = vmatprep.subr.bf16.mxu0 %v8892_v52  ;;  %v8939_v51 = vld [vmem:[%s9395_s26 + $0x680] sm:$0xff]   ;;  %v8940_v52 = vld [vmem:[%s9395_s26 + $0x648] sm:$0xff]  }
  0xa6   : > { %8090 = vmatprep.subr.bf16.mxu1 %v8893_v53  ;;  %v8941_v53 = vld [vmem:[%s9395_s26 + $0x6c8] sm:$0xff]  }
  0xa8   : > { %8069 = vmatpush3.bf16.msra.mxu0 %v8894_v54  ;;  %v8942_v54 = vld [vmem:[%s9395_s26 + $0x608] sm:$0xff]  }
  0xa9   : > { %8091 = vmatpush3.bf16.msra.mxu1 %v8895_v55  ;;  %8070 = vmatprep.subr.bf16.mxu0 %v8896_v56  ;;  %v8943_v55 = vld [vmem:[%s9395_s26 + $0x688] sm:$0xff]   ;;  %v8944_v56 = vld [vmem:[%s9395_s26 + $0x650] sm:$0xff]  }
  0xaa   : > { %8092 = vmatprep.subr.bf16.mxu1 %v8897_v57  ;;  %v8945_v57 = vld [vmem:[%s9395_s26 + $0x6d0] sm:$0xff]  }
  0xac   : > { %8071 = vmatpush3.bf16.msra.mxu0 %v8898_v58  ;;  %v8946_v58 = vld [vmem:[%s9395_s26 + $0x610] sm:$0xff]  }
  0xad   : > { %8093 = vmatpush3.bf16.msra.mxu1 %v8899_v59  ;;  %8072 = vmatprep.subr.bf16.mxu0 %v8900_v60  ;;  %v8947_v59 = vld [vmem:[%s9395_s26 + $0x690] sm:$0xff]   ;;  %v8948_v60 = vld [vmem:[%s9395_s26 + $0x658] sm:$0xff]  }
  0xae   : > { %8094 = vmatprep.subr.bf16.mxu1 %v8901_v61  ;;  %v8949_v61 = vld [vmem:[%s9395_s26 + $0x6d8] sm:$0xff]  }
  0xb0   : > { %8073 = vmatpush3.bf16.msra.mxu0 %v8902_v62  ;;  %v8950_v62 = vld [vmem:[%s9395_s26 + $0x618] sm:$0xff]  }
  0xb1   : > { %8095 = vmatpush3.bf16.msra.mxu1 %v8903_v63  ;;  %8102 = vmatprep.subr.bf16.mxu0 %v8904_v8  ;;  %v8951_v63 = vld [vmem:[%s9395_s26 + $0x698] sm:$0xff]   ;;  %v8960_v8 = vld [vmem:[%s9395_s26 + $0x670] sm:$0xff]  }
  0xb2   : > { %8124 = vmatprep.subr.bf16.mxu1 %v8905_v9  ;;  %v8961_v9 = vld [vmem:[%s9395_s26 + $0x6f0] sm:$0xff]  }
  0xb3   : > { %5749 = vmatmul.mubr.bf16.vlgmr.msra.gmra.mrb[16].mxu0 %v7228_v2  ;;  %v8954_v2 = vld [vmem:[%s9395_s26 + $0x620] sm:$0xff]  }
  0xb4   : > { %5790 = vmatmul.mubr.bf16.vlgmr.msra.gmra.mrb[16].mxu1 %v7230_v6  ;;  %8103 = vmatpush3.bf16.msra.mxu0 %v8906_v10  ;;  %v8958_v6 = vld [vmem:[%s9395_s26 + $0x628] sm:$0xff]   ;;  %v8962_v10 = vld [vmem:[%s9395_s26 + $0x630] sm:$0xff]  }
  0xb5   : > { %8125 = vmatpush3.bf16.msra.mxu1 %v8907_v11  ;;  %8104 = vmatprep.subr.bf16.mxu0 %v8908_v12  ;;  %v8963_v11 = vld [vmem:[%s9395_s26 + $0x6b0] sm:$0xff]   ;;  %v8964_v12 = vld [vmem:[%s9395_s26 + $0x678] sm:$0xff]  }
  0xb6   : > { %8126 = vmatprep.subr.bf16.mxu1 %v8909_v13  ;;  %5830 = vmatprep.mubr.bf16.mxu0 %v7233_v45  ;;  %v8965_v13 = vld [vmem:[%s9395_s26 + $0x6f8] sm:$0xff]  }
  0xb7   : > { %5871 = vmatprep.mubr.bf16.mxu1 %v7235_v47 }
  0xb8   : > { %8105 = vmatpush3.bf16.msra.mxu0 %v8910_v14  ;;  %v8966_v14 = vld [vmem:[%s9395_s26 + $0x638] sm:$0xff]  }
  0xb9   : > { %8127 = vmatpush3.bf16.msra.mxu1 %v8911_v15  ;;  %8106 = vmatprep.subr.bf16.mxu0 %v8912_v16  ;;  %v8967_v15 = vld [vmem:[%s9395_s26 + $0x6b8] sm:$0xff]   ;;  %v353_v16 = vld [vmem:[%s9431_s30 + $0x60] sm:$0xff] }
  0xba   : > { %8128 = vmatprep.subr.bf16.mxu1 %v8913_v17  ;;  %v389_v17 = vld [vmem:[%s9431_s30 + $0x180] sm:$0xff] }
  0xbc   : > { %8107 = vmatpush3.bf16.msra.mxu0 %v8914_v18  ;;  %v354_v18 = vld [vmem:[%s9431_s30 + $0x68] sm:$0xff] }
  0xbd   : > { %8129 = vmatpush3.bf16.msra.mxu1 %v8915_v19  ;;  %8108 = vmatprep.subr.bf16.mxu0 %v8916_v20  ;;  %v7236_v19 = vcombine.low %v353_v16, %v389_v17  ;;  %v7237_v20 = vcombine.high %v353_v16, %v389_v17  ;;  %v9000_v17 = vld [vmem:[%s9395_s26 + $0x840] sm:$0xff]  }
  0xbe   : > { %8130 = vmatprep.subr.bf16.mxu1 %v8917_v21  ;;  %v390_v21 = vld [vmem:[%s9431_s30 + $0x188] sm:$0xff] }
  0xc0   : > { %8109 = vmatpush3.bf16.msra.mxu0 %v8918_v22  ;;  %v7238_v22 = vcombine.low %v354_v18, %v390_v21 }
  0xc1   : > { %8131 = vmatpush3.bf16.msra.mxu1 %v8919_v23  ;;  %8110 = vmatprep.subr.bf16.mxu0 %v8920_v24  ;;  %v7239_v23 = vcombine.high %v354_v18, %v390_v21  ;;  %v8968_v24 = vld [vmem:[%s9395_s26 + $0x740] sm:$0xff]   ;;  %v9004_v21 = vld [vmem:[%s9395_s26 + $0x848] sm:$0xff]  }
  0xc2   : > { %8132 = vmatprep.subr.bf16.mxu1 %v8921_v25  ;;  %v8969_v25 = vld [vmem:[%s9395_s26 + $0x7c0] sm:$0xff]  }
  0xc3   : > { %v9001_v18 = vld [vmem:[%s9395_s26 + $0x8c0] sm:$0xff]  }
  0xc4   : > { %8111 = vmatpush3.bf16.msra.mxu0 %v8922_v26  ;;  %v8970_v26 = vld [vmem:[%s9395_s26 + $0x700] sm:$0xff]  }
  0xc5   : > { %8133 = vmatpush3.bf16.msra.mxu1 %v8923_v27  ;;  %8112 = vmatprep.subr.bf16.mxu0 %v8924_v28  ;;  %v8971_v27 = vld [vmem:[%s9395_s26 + $0x780] sm:$0xff]   ;;  %v8972_v28 = vld [vmem:[%s9395_s26 + $0x748] sm:$0xff]  }
  0xc6   : > { %8134 = vmatprep.subr.bf16.mxu1 %v8925_v29  ;;  %v8973_v29 = vld [vmem:[%s9395_s26 + $0x7c8] sm:$0xff]  }
  0xc8   : > { %8113 = vmatpush3.bf16.msra.mxu0 %v8926_v30  ;;  %v8974_v30 = vld [vmem:[%s9395_s26 + $0x708] sm:$0xff]  }
  0xc9   : > { %8135 = vmatpush3.bf16.msra.mxu1 %v8927_v31  ;;  %8114 = vmatprep.subr.bf16.mxu0 %v8928_v32  ;;  %v8975_v31 = vld [vmem:[%s9395_s26 + $0x788] sm:$0xff]   ;;  %v8976_v32 = vld [vmem:[%s9395_s26 + $0x750] sm:$0xff]  }
  0xca   : > { %8136 = vmatprep.subr.bf16.mxu1 %v8929_v33  ;;  %v8977_v33 = vld [vmem:[%s9395_s26 + $0x7d0] sm:$0xff]  }
  0xcc   : > { %8115 = vmatpush3.bf16.msra.mxu0 %v8930_v34  ;;  %v8978_v34 = vld [vmem:[%s9395_s26 + $0x710] sm:$0xff]  }
  0xcd   : > { %8137 = vmatpush3.bf16.msra.mxu1 %v8931_v35  ;;  %8116 = vmatprep.subr.bf16.mxu0 %v8932_v36  ;;  %v8979_v35 = vld [vmem:[%s9395_s26 + $0x790] sm:$0xff]   ;;  %v8980_v36 = vld [vmem:[%s9395_s26 + $0x758] sm:$0xff]  }
  0xce   : > { %8138 = vmatprep.subr.bf16.mxu1 %v8933_v37  ;;  %v8981_v37 = vld [vmem:[%s9395_s26 + $0x7d8] sm:$0xff]  }
  0xd0   : > { %8117 = vmatpush3.bf16.msra.mxu0 %v8934_v38 }
  0xd1   : > { %8139 = vmatpush3.bf16.msra.mxu1 %v8935_v39  ;;  %8146 = vmatprep.subr.bf16.mxu0 %v8936_v48  ;;  %v8982_v39 = vld [vmem:[%s9395_s26 + $0x718] sm:$0xff]  }
  0xd2   : > { %8168 = vmatprep.subr.bf16.mxu1 %v8937_v49  ;;  %v8986_v49 = vld [vmem:[%s9395_s26 + $0x720] sm:$0xff]  }
  0xd3   : > { %5831 = vmatmul.mubr.bf16.vlgmr.msra.gmra.mrb[20].mxu0 %v7232_v44 }
  0xd4   : > { %5872 = vmatmul.mubr.bf16.vlgmr.msra.gmra.mrb[20].mxu1 %v7234_v46  ;;  %8147 = vmatpush3.bf16.msra.mxu0 %v8938_v50  ;;  %v8985_v46 = vld [vmem:[%s9395_s26 + $0x7e0] sm:$0xff]  }
  0xd5   : > { %8169 = vmatpush3.bf16.msra.mxu1 %v8939_v51  ;;  %8148 = vmatprep.subr.bf16.mxu0 %v8940_v52  ;;  %v8987_v51 = vld [vmem:[%s9395_s26 + $0x7a0] sm:$0xff]  }
  0xd6   : > { %8170 = vmatprep.subr.bf16.mxu1 %v8941_v53  ;;  %5912 = vmatprep.mubr.bf16.mxu0 %v7237_v20  ;;  %v7211_v52 = vld [vmem:[%s321_s9] ss:$0 sm:$0xff] }
  0xd7   : > { %5953 = vmatprep.mubr.bf16.mxu1 %v7239_v23  ;;  %v9003_v20 = vld [vmem:[%s9395_s26 + $0x880] sm:$0xff]   ;;  %v9006_v23 = vld [vmem:[%s9395_s26 + $0x808] sm:$0xff]  }
  0xd8   : > { %8149 = vmatpush3.bf16.msra.mxu0 %v8942_v54 }
  0xd9   : > { %8171 = vmatpush3.bf16.msra.mxu1 %v8943_v55  ;;  %8150 = vmatprep.subr.bf16.mxu0 %v8944_v56  ;;  %v8988_v55 = vld [vmem:[%s9395_s26 + $0x768] sm:$0xff]  }
  0xda   : > { %8172 = vmatprep.subr.bf16.mxu1 %v8945_v57 }
  0xdc   : > { %8151 = vmatpush3.bf16.msra.mxu0 %v8946_v58  ;;  %v8989_v58 = vld [vmem:[%s9395_s26 + $0x7e8] sm:$0xff]  }
  0xdd   : > { %8173 = vmatpush3.bf16.msra.mxu1 %v8947_v59  ;;  %8152 = vmatprep.subr.bf16.mxu0 %v8948_v60 }
  0xde   : > { %8174 = vmatprep.subr.bf16.mxu1 %v8949_v61  ;;  %v8990_v61 = vld [vmem:[%s9395_s26 + $0x728] sm:$0xff]  }
  0xe0   : > { %8153 = vmatpush3.bf16.msra.mxu0 %v8950_v62 }
  0xe1   : > { %8175 = vmatpush3.bf16.msra.mxu1 %v8951_v63  ;;  %8154 = vmatprep.subr.bf16.mxu0 %v8952_v0  ;;  %v8991_v63 = vld [vmem:[%s9395_s26 + $0x7a8] sm:$0xff]  }
  0xe2   : > { %8176 = vmatprep.subr.bf16.mxu1 %v8953_v1  ;;  %v8992_v1 = vld [vmem:[%s9395_s26 + $0x770] sm:$0xff]  }
  0xe4   : > { %8155 = vmatpush3.bf16.msra.mxu0 %v8954_v2  ;;  %v8993_v2 = vld [vmem:[%s9395_s26 + $0x7f0] sm:$0xff]  }
  0xe5   : > { %8177 = vmatpush3.bf16.msra.mxu1 %v8955_v3  ;;  %8156 = vmatprep.subr.bf16.mxu0 %v8956_v4  ;;  %v8994_v3 = vld [vmem:[%s9395_s26 + $0x730] sm:$0xff]  }
  0xe6   : > { %8178 = vmatprep.subr.bf16.mxu1 %v8957_v5  ;;  %v8995_v4 = vld [vmem:[%s9395_s26 + $0x7b0] sm:$0xff]   ;;  %v8996_v5 = vld [vmem:[%s9395_s26 + $0x778] sm:$0xff]  }
  0xe8   : > { %8157 = vmatpush3.bf16.msra.mxu0 %v8958_v6  ;;  %v8997_v6 = vld [vmem:[%s9395_s26 + $0x7f8] sm:$0xff]  }
  0xe9   : > { %8179 = vmatpush3.bf16.msra.mxu1 %v8959_v7  ;;  %8158 = vmatprep.subr.bf16.mxu0 %v8960_v8  ;;  %v8998_v7 = vld [vmem:[%s9395_s26 + $0x738] sm:$0xff]  }
  0xea   : > { %8180 = vmatprep.subr.bf16.mxu1 %v8961_v9  ;;  %v8999_v8 = vld [vmem:[%s9395_s26 + $0x7b8] sm:$0xff]   ;;  %v355_v9 = vld [vmem:[%s9431_s30 + $0x70] sm:$0xff] }
  0xec   : > { %8159 = vmatpush3.bf16.msra.mxu0 %v8962_v10  ;;  %v391_v10 = vld [vmem:[%s9431_s30 + $0x190] sm:$0xff] }
  0xed   : > { %8181 = vmatpush3.bf16.msra.mxu1 %v8963_v11  ;;  %8160 = vmatprep.subr.bf16.mxu0 %v8964_v12  ;;  %v356_v11 = vld [vmem:[%s9431_s30 + $0x78] sm:$0xff] }
  0xee   : > { %8182 = vmatprep.subr.bf16.mxu1 %v8965_v13  ;;  %v392_v12 = vld [vmem:[%s9431_s30 + $0x198] sm:$0xff]  ;;  %v7240_v13 = vcombine.low %v355_v9, %v391_v10 }
  0xef   : > { %v7243_v16 = vcombine.high %v356_v11, %v392_v12 }
  0xf0   : > { %8161 = vmatpush3.bf16.msra.mxu0 %v8966_v14  ;;  %v7241_v14 = vcombine.high %v355_v9, %v391_v10  ;;  %v9032_v9 = vld [vmem:[%s9395_s26 + $0x940] sm:$0xff]  }
  0xf1   : > { %8183 = vmatpush3.bf16.msra.mxu1 %v8967_v15  ;;  %8190 = vmatprep.subr.bf16.mxu0 %v8968_v24  ;;  %v7242_v15 = vcombine.low %v356_v11, %v392_v12  ;;  %v9007_v24 = vld [vmem:[%s9395_s26 + $0x888] sm:$0xff]   ;;  %v9033_v10 = vld [vmem:[%s9395_s26 + $0x9c0] sm:$0xff]  }
  0xf2   : > { %8212 = vmatprep.subr.bf16.mxu1 %v8969_v25  ;;  %v9008_v25 = vld [vmem:[%s9395_s26 + $0x850] sm:$0xff]   ;;  %v9034_v11 = vld [vmem:[%s9395_s26 + $0x900] sm:$0xff]  }
  0xf3   : > { %5913 = vmatmul.mubr.bf16.vlgmr.msra.gmra.mrb[24].mxu0 %v7236_v19  ;;  %v9002_v19 = vld [vmem:[%s9395_s26 + $0x800] sm:$0xff]  }
  0xf4   : > { %5954 = vmatmul.mubr.bf16.vlgmr.msra.gmra.mrb[24].mxu1 %v7238_v22  ;;  %8191 = vmatpush3.bf16.msra.mxu0 %v8970_v26  ;;  %v9005_v22 = vld [vmem:[%s9395_s26 + $0x8c8] sm:$0xff]   ;;  %v9009_v26 = vld [vmem:[%s9395_s26 + $0x8d0] sm:$0xff]   ;;  %v9035_v12 = vld [vmem:[%s9395_s26 + $0x980] sm:$0xff]  }
  0xf5   : > { %8213 = vmatpush3.bf16.msra.mxu1 %v8971_v27  ;;  %8192 = vmatprep.subr.bf16.mxu0 %v8972_v28  ;;  %v9010_v27 = vld [vmem:[%s9395_s26 + $0x810] sm:$0xff]  }
  0xf6   : > { %8214 = vmatprep.subr.bf16.mxu1 %v8973_v29  ;;  %5994 = vmatprep.mubr.bf16.mxu0 %v7241_v14  ;;  %v9011_v28 = vld [vmem:[%s9395_s26 + $0x890] sm:$0xff]   ;;  %v9012_v29 = vld [vmem:[%s9395_s26 + $0x858] sm:$0xff]   ;;  %v9037_v14 = vld [vmem:[%s9395_s26 + $0x9c8] sm:$0xff]  }
  0xf7   : > { %6035 = vmatprep.mubr.bf16.mxu1 %v7243_v16  ;;  %v9039_v16 = vld [vmem:[%s9395_s26 + $0x988] sm:$0xff]  }
  0xf8   : > { %8193 = vmatpush3.bf16.msra.mxu0 %v8974_v30  ;;  %v9013_v30 = vld [vmem:[%s9395_s26 + $0x8d8] sm:$0xff]  }
  0xf9   : > { %8215 = vmatpush3.bf16.msra.mxu1 %v8975_v31  ;;  %8194 = vmatprep.subr.bf16.mxu0 %v8976_v32  ;;  %v9014_v32 = vld [vmem:[%s9395_s26 + $0x818] sm:$0xff]  }
  0xfa   : > { %8216 = vmatprep.subr.bf16.mxu1 %v8977_v33 }
  0xfc   : > { %8195 = vmatpush3.bf16.msra.mxu0 %v8978_v34  ;;  %v9015_v34 = vld [vmem:[%s9395_s26 + $0x898] sm:$0xff]  }
  0xfd   : > { %8217 = vmatpush3.bf16.msra.mxu1 %v8979_v35  ;;  %8196 = vmatprep.subr.bf16.mxu0 %v8980_v36  ;;  %v9016_v36 = vld [vmem:[%s9395_s26 + $0x860] sm:$0xff]  }
  0xfe   : > { %8218 = vmatprep.subr.bf16.mxu1 %v8981_v37 }
 0x100   : > { %8197 = vmatpush3.bf16.msra.mxu0 %v8982_v39  ;;  %v9017_v39 = vld [vmem:[%s9395_s26 + $0x8e0] sm:$0xff]  }
 0x101   : > { %8219 = vmatpush3.bf16.msra.mxu1 %v8983_v41  ;;  %8198 = vmatprep.subr.bf16.mxu0 %v8984_v43 }
 0x102   : > { %8220 = vmatprep.subr.bf16.mxu1 %v8985_v46 }
 0x104   : > { %8199 = vmatpush3.bf16.msra.mxu0 %v8986_v49 }
 0x105   : > { %8221 = vmatpush3.bf16.msra.mxu1 %v8987_v51  ;;  %8200 = vmatprep.subr.bf16.mxu0 %v8988_v55  ;;  %v9021_v51 = vld [vmem:[%s9395_s26 + $0x8e8] sm:$0xff]  }
 0x106   : > { %v7898_v38 = vpop.f32.mrb[0].mxu0  ;;  %8222 = vmatprep.subr.bf16.mxu1 %v8989_v58  ;;  %v9023_v55 = vld [vmem:[%s9395_s26 + $0x8a8] sm:$0xff]   ;;  %v9025_v58 = vld [vmem:[%s9395_s26 + $0x8f0] sm:$0xff]  }
 0x107   : > { %v7920_v40 = vpop.f32.mrb[0].mxu1  ;;  %v7899_v42 = vpop.f32.mrb[1].mxu0 }
 0x108   : > { %v7900_v44 = vadd.f32 %v7899_v42, %v7898_v38  ;;  %v7921_v45 = vpop.f32.mrb[1].mxu1  ;;  %v7901_v48 = vpop.f32.mrb[2].mxu0  ;;  %8201 = vmatpush3.bf16.msra.mxu0 %v8990_v61  ;;  %v9018_v42 = vld [vmem:[%s9395_s26 + $0x820] sm:$0xff]   ;;  %v9028_v61 = vld [vmem:[%s9395_s26 + $0x878] sm:$0xff]  }
 0x109   : > { %v7922_v47 = vadd.f32 %v7921_v45, %v7920_v40  ;;  %v7923_v50 = vpop.f32.mrb[2].mxu1  ;;  %v7902_v53 = vpop.f32.mrb[3].mxu0  ;;  %8223 = vmatpush3.bf16.msra.mxu1 %v8991_v63  ;;  %8202 = vmatprep.subr.bf16.mxu0 %v8992_v1  ;;  %v9019_v45 = vld [vmem:[%s9395_s26 + $0x8a0] sm:$0xff]   ;;  %v9030_v63 = vld [vmem:[%s9395_s26 + $0x838] sm:$0xff]  }
 0x10a   : > { %v5423_v54 = vadd.f32 %v7900_v44, %v7211_v52  ;;  %v7903_v56 = vadd.f32 %v7902_v53, %v7901_v48  ;;  %v7924_v57 = vpop.f32.mrb[3].mxu1  ;;  %8224 = vmatprep.subr.bf16.mxu1 %v8993_v2  ;;  %v9020_v48 = vld [vmem:[%s9395_s26 + $0x868] sm:$0xff]   ;;  %v357_v1 = vld [vmem:[%s9431_s30 + $0x80] sm:$0xff] }
 0x10b   : > { %v7925_v59 = vadd.f32 %v7924_v57, %v7923_v50  ;;  %v9022_v53 = vld [vmem:[%s9395_s26 + $0x828] sm:$0xff]   ;;  %v9024_v57 = vld [vmem:[%s9395_s26 + $0x870] sm:$0xff]   ;;  %v393_v2 = vld [vmem:[%s9431_s30 + $0x1a0] sm:$0xff] }
 0x10c   : > { %v9681_v60 = vadd.f32 %v7922_v47, %v5423_v54  ;;  %v5426_v62 = vadd.f32 %v7903_v56, %v7211_v52  ;;  %8203 = vmatpush3.bf16.msra.mxu0 %v8994_v3  ;;  %v358_v3 = vld [vmem:[%s9431_s30 + $0x88] sm:$0xff] }
 0x10d   : > { %8225 = vmatpush3.bf16.msra.mxu1 %v8995_v4  ;;  %8204 = vmatprep.subr.bf16.mxu0 %v8996_v5  ;;  %v7244_v4 = vcombine.low %v357_v1, %v393_v2  ;;  %v7245_v5 = vcombine.high %v357_v1, %v393_v2  ;;  %v9064_v1 = vld [vmem:[%s9395_s26 + $0xa40] sm:$0xff]  }
 0x10e   : > { %v9685_v0 = vadd.f32 %v7925_v59, %v5426_v62  ;;  %8226 = vmatprep.subr.bf16.mxu1 %v8997_v6  ;;  %v9026_v59 = vld [vmem:[%s9395_s26 + $0x830] sm:$0xff]   ;;  %v9029_v62 = vld [vmem:[%s9395_s26 + $0x8f8] sm:$0xff]   ;;  %v394_v6 = vld [vmem:[%s9431_s30 + $0x1a8] sm:$0xff] }
 0x10f   : > { %v9065_v2 = vld [vmem:[%s9395_s26 + $0xac0] sm:$0xff]  }
 0x110   : > { %8205 = vmatpush3.bf16.msra.mxu0 %v8998_v7  ;;  %v7246_v7 = vcombine.low %v358_v3, %v394_v6 }
 0x111   : > { %8227 = vmatpush3.bf16.msra.mxu1 %v8999_v8  ;;  %8234 = vmatprep.subr.bf16.mxu0 %v9000_v17  ;;  %v7247_v8 = vcombine.high %v358_v3, %v394_v6  ;;  %v9040_v17 = vld [vmem:[%s9395_s26 + $0x950] sm:$0xff]   ;;  %v9066_v3 = vld [vmem:[%s9395_s26 + $0xa00] sm:$0xff]   ;;  %v9069_v6 = vld [vmem:[%s9395_s26 + $0xac8] sm:$0xff]  }
 0x112   : > { %8256 = vmatprep.subr.bf16.mxu1 %v9001_v18  ;;  %v9041_v18 = vld [vmem:[%s9395_s26 + $0x9d0] sm:$0xff]  }
 0x113   : > { %5995 = vmatmul.mubr.bf16.vlgmr.msra.gmra.mrb[28].mxu0 %v7240_v13  ;;  %v9036_v13 = vld [vmem:[%s9395_s26 + $0x948] sm:$0xff]  }
 0x114   : > { %6036 = vmatmul.mubr.bf16.vlgmr.msra.gmra.mrb[28].mxu1 %v7242_v15  ;;  %8235 = vmatpush3.bf16.msra.mxu0 %v9002_v19  ;;  %v9038_v15 = vld [vmem:[%s9395_s26 + $0x908] sm:$0xff]   ;;  %v9042_v19 = vld [vmem:[%s9395_s26 + $0x910] sm:$0xff]  }
 0x115   : > { %8257 = vmatpush3.bf16.msra.mxu1 %v9003_v20  ;;  %8236 = vmatprep.subr.bf16.mxu0 %v9004_v21  ;;  %v9043_v20 = vld [vmem:[%s9395_s26 + $0x990] sm:$0xff]   ;;  %v9044_v21 = vld [vmem:[%s9395_s26 + $0x958] sm:$0xff]  }
 0x116   : > { %8258 = vmatprep.subr.bf16.mxu1 %v9005_v22  ;;  %6076 = vmatprep.mubr.bf16.mxu0 %v7245_v5  ;;  %v9045_v22 = vld [vmem:[%s9395_s26 + $0x9d8] sm:$0xff]   ;;  %v9068_v5 = vld [vmem:[%s9395_s26 + $0xa48] sm:$0xff]  }
 0x117   : > { %6117 = vmatprep.mubr.bf16.mxu1 %v7247_v8  ;;  %v9071_v8 = vld [vmem:[%s9395_s26 + $0xa88] sm:$0xff]  }
 0x118   : > { %8237 = vmatpush3.bf16.msra.mxu0 %v9006_v23 }
 0x119   : > { %8259 = vmatpush3.bf16.msra.mxu1 %v9007_v24  ;;  %8238 = vmatprep.subr.bf16.mxu0 %v9008_v25  ;;  %v9046_v24 = vld [vmem:[%s9395_s26 + $0x918] sm:$0xff]  }
 0x11a   : > { %8260 = vmatprep.subr.bf16.mxu1 %v9009_v26  ;;  %v9047_v26 = vld [vmem:[%s9395_s26 + $0x998] sm:$0xff]  }
 0x11c   : > { %8239 = vmatpush3.bf16.msra.mxu0 %v9010_v27 }
 0x11d   : > { %8261 = vmatpush3.bf16.msra.mxu1 %v9011_v28  ;;  %8240 = vmatprep.subr.bf16.mxu0 %v9012_v29  ;;  %v9048_v28 = vld [vmem:[%s9395_s26 + $0x960] sm:$0xff]  }
 0x11e   : > { %8262 = vmatprep.subr.bf16.mxu1 %v9013_v30 }
 0x120   : > { %8241 = vmatpush3.bf16.msra.mxu0 %v9014_v32 }
 0x121   : > { %8263 = vmatpush3.bf16.msra.mxu1 %v9015_v34  ;;  %8242 = vmatprep.subr.bf16.mxu0 %v9016_v36  ;;  %v9050_v34 = vld [vmem:[%s9395_s26 + $0x920] sm:$0xff]  }
 0x122   : > { %8264 = vmatprep.subr.bf16.mxu1 %v9017_v39 }
 0x124   : > { %8243 = vmatpush3.bf16.msra.mxu0 %v9018_v42 }
 0x125   : > { %8265 = vmatpush3.bf16.msra.mxu1 %v9019_v45  ;;  %8244 = vmatprep.subr.bf16.mxu0 %v9020_v48  ;;  %v9054_v45 = vld [vmem:[%s9395_s26 + $0x928] sm:$0xff]  }
 0x126   : > { %v7942_v31 = vpop.f32.mrb[4].mxu0  ;;  %8266 = vmatprep.subr.bf16.mxu1 %v9021_v51  ;;  %v9058_v51 = vld [vmem:[%s9395_s26 + $0x930] sm:$0xff]  }
 0x127   : > { %v7964_v33 = vpop.f32.mrb[4].mxu1  ;;  %v7943_v35 = vpop.f32.mrb[5].mxu0 }
 0x128   : > { %v7944_v37 = vadd.f32 %v7943_v35, %v7942_v31  ;;  %v7965_v38 = vpop.f32.mrb[5].mxu1  ;;  %v7945_v41 = vpop.f32.mrb[6].mxu0  ;;  %8245 = vmatpush3.bf16.msra.mxu0 %v9022_v53  ;;  %v9049_v31 = vld [vmem:[%s9395_s26 + $0x9e0] sm:$0xff]   ;;  %v9060_v53 = vld [vmem:[%s9395_s26 + $0x978] sm:$0xff]  }
 0x129   : > { %v7966_v40 = vadd.f32 %v7965_v38, %v7964_v33  ;;  %v7967_v44 = vpop.f32.mrb[6].mxu1  ;;  %v7946_v46 = vpop.f32.mrb[7].mxu0  ;;  %8267 = vmatpush3.bf16.msra.mxu1 %v9023_v55  ;;  %8246 = vmatprep.subr.bf16.mxu0 %v9024_v57  ;;  %v9062_v55 = vld [vmem:[%s9395_s26 + $0x938] sm:$0xff]   ;;  %v359_v57 = vld [vmem:[%s9431_s30 + $0x90] sm:$0xff] }
 0x12a   : > { %v5505_v43 = vadd.f32 %v7944_v37, %v9681_v60  ;;  %v7947_v49 = vadd.f32 %v7946_v46, %v7945_v41  ;;  %v7968_v50 = vpop.f32.mrb[7].mxu1  ;;  %8268 = vmatprep.subr.bf16.mxu1 %v9025_v58  ;;  %v9027_v60 = vld [vmem:[%s9395_s26 + $0x8b0] sm:$0xff]   ;;  %v9051_v37 = vld [vmem:[%s9395_s26 + $0x9a0] sm:$0xff]  }
 0x12b   : > { %v7969_v52 = vadd.f32 %v7968_v50, %v7967_v44  ;;  %v9057_v50 = vld [vmem:[%s9395_s26 + $0x9f0] sm:$0xff]  }
 0x12c   : > { %v9720_v47 = vadd.f32 %v7966_v40, %v5505_v43  ;;  %v5508_v54 = vadd.f32 %v7947_v49, %v9685_v0  ;;  %8247 = vmatpush3.bf16.msra.mxu0 %v9026_v59  ;;  %v9031_v0 = vld [vmem:[%s9395_s26 + $0x8b8] sm:$0xff]   ;;  %v9052_v40 = vld [vmem:[%s9395_s26 + $0x968] sm:$0xff]   ;;  %v9056_v49 = vld [vmem:[%s9395_s26 + $0x970] sm:$0xff]  }
 0x12d   : > { %8269 = vmatpush3.bf16.msra.mxu1 %v9027_v60  ;;  %8248 = vmatprep.subr.bf16.mxu0 %v9028_v61  ;;  %v9053_v43 = vld [vmem:[%s9395_s26 + $0x9e8] sm:$0xff]   ;;  %v395_v58 = vld [vmem:[%s9431_s30 + $0x1b0] sm:$0xff]  ;;  %v360_v61 = vld [vmem:[%s9431_s30 + $0x98] sm:$0xff] }
 0x12e   : > { %v9727_v56 = vadd.f32 %v7969_v52, %v5508_v54  ;;  %8270 = vmatprep.subr.bf16.mxu1 %v9029_v62  ;;  %v9059_v52 = vld [vmem:[%s9395_s26 + $0x9b0] sm:$0xff]   ;;  %v9061_v54 = vld [vmem:[%s9395_s26 + $0x9f8] sm:$0xff]   ;;  %v7248_v59 = vcombine.low %v359_v57, %v395_v58  ;;  %v7249_v60 = vcombine.high %v359_v57, %v395_v58  ;;  %v9096_v57 = vld [vmem:[%s9395_s26 + $0xb40] sm:$0xff]  }
 0x12f   : > { %v396_v62 = vld [vmem:[%s9431_s30 + $0x1b8] sm:$0xff]  ;;  %v9097_v58 = vld [vmem:[%s9395_s26 + $0xbc0] sm:$0xff]  }
 0x130   : > { %8249 = vmatpush3.bf16.msra.mxu0 %v9030_v63  ;;  %v7250_v63 = vcombine.low %v360_v61, %v396_v62 }
 0x131   : > { %8271 = vmatpush3.bf16.msra.mxu1 %v9031_v0  ;;  %8278 = vmatprep.subr.bf16.mxu0 %v9032_v9  ;;  %v7251_v0 = vcombine.high %v360_v61, %v396_v62  ;;  %v9072_v9 = vld [vmem:[%s9395_s26 + $0xa50] sm:$0xff]   ;;  %v9100_v61 = vld [vmem:[%s9395_s26 + $0xb48] sm:$0xff]  }
 0x132   : > { %8300 = vmatprep.subr.bf16.mxu1 %v9033_v10  ;;  %v9073_v10 = vld [vmem:[%s9395_s26 + $0xad0] sm:$0xff]   ;;  %v9101_v62 = vld [vmem:[%s9395_s26 + $0xbc8] sm:$0xff]  }
 0x133   : > { %6077 = vmatmul.mubr.bf16.vlgmr.msra.gmra.mrb[32].mxu0 %v7244_v4  ;;  %v9067_v4 = vld [vmem:[%s9395_s26 + $0xa80] sm:$0xff]  }
 0x134   : > { %6118 = vmatmul.mubr.bf16.vlgmr.msra.gmra.mrb[32].mxu1 %v7246_v7  ;;  %8279 = vmatpush3.bf16.msra.mxu0 %v9034_v11  ;;  %v9070_v7 = vld [vmem:[%s9395_s26 + $0xa08] sm:$0xff]   ;;  %v9074_v11 = vld [vmem:[%s9395_s26 + $0xa10] sm:$0xff]  }
 0x135   : > { %8301 = vmatpush3.bf16.msra.mxu1 %v9035_v12  ;;  %8280 = vmatprep.subr.bf16.mxu0 %v9036_v13  ;;  %v9075_v12 = vld [vmem:[%s9395_s26 + $0xa90] sm:$0xff]   ;;  %v9076_v13 = vld [vmem:[%s9395_s26 + $0xa58] sm:$0xff]  }
 0x136   : > { %8302 = vmatprep.subr.bf16.mxu1 %v9037_v14  ;;  %6158 = vmatprep.mubr.bf16.mxu0 %v7249_v60  ;;  %v9077_v14 = vld [vmem:[%s9395_s26 + $0xad8] sm:$0xff]   ;;  %v9099_v60 = vld [vmem:[%s9395_s26 + $0xb80] sm:$0xff]  }
 0x137   : > { %6199 = vmatprep.mubr.bf16.mxu1 %v7251_v0  ;;  %v9103_v0 = vld [vmem:[%s9395_s26 + $0xb88] sm:$0xff]  }
 0x138   : > { %8281 = vmatpush3.bf16.msra.mxu0 %v9038_v15 }
 0x139   : > { %8303 = vmatpush3.bf16.msra.mxu1 %v9039_v16  ;;  %8282 = vmatprep.subr.bf16.mxu0 %v9040_v17  ;;  %v9078_v16 = vld [vmem:[%s9395_s26 + $0xa18] sm:$0xff]  }
 0x13a   : > { %8304 = vmatprep.subr.bf16.mxu1 %v9041_v18  ;;  %v9079_v18 = vld [vmem:[%s9395_s26 + $0xa98] sm:$0xff]  }
 0x13c   : > { %8283 = vmatpush3.bf16.msra.mxu0 %v9042_v19 }
 0x13d   : > { %8305 = vmatpush3.bf16.msra.mxu1 %v9043_v20  ;;  %8284 = vmatprep.subr.bf16.mxu0 %v9044_v21  ;;  %v9080_v20 = vld [vmem:[%s9395_s26 + $0xa60] sm:$0xff]  }
 0x13e   : > { %8306 = vmatprep.subr.bf16.mxu1 %v9045_v22 }
 0x140   : > { %8285 = vmatpush3.bf16.msra.mxu0 %v9046_v24 }
 0x141   : > { %8307 = vmatpush3.bf16.msra.mxu1 %v9047_v26  ;;  %8286 = vmatprep.subr.bf16.mxu0 %v9048_v28  ;;  %v9082_v26 = vld [vmem:[%s9395_s26 + $0xa20] sm:$0xff]  }
 0x142   : > { %8308 = vmatprep.subr.bf16.mxu1 %v9049_v31 }
 0x144   : > { %8287 = vmatpush3.bf16.msra.mxu0 %v9050_v34 }
 0x145   : > { %8309 = vmatpush3.bf16.msra.mxu1 %v9051_v37  ;;  %8288 = vmatprep.subr.bf16.mxu0 %v9052_v40  ;;  %v9086_v37 = vld [vmem:[%s9395_s26 + $0xa28] sm:$0xff]  }
 0x146   : > { %v7986_v23 = vpop.f32.mrb[8].mxu0  ;;  %8310 = vmatprep.subr.bf16.mxu1 %v9053_v43  ;;  %v9090_v43 = vld [vmem:[%s9395_s26 + $0xa30] sm:$0xff]  }
 0x147   : > { %v8008_v25 = vpop.f32.mrb[8].mxu1  ;;  %v7987_v27 = vpop.f32.mrb[9].mxu0 }
 0x148   : > { %v7988_v29 = vadd.f32 %v7987_v27, %v7986_v23  ;;  %v8009_v30 = vpop.f32.mrb[9].mxu1  ;;  %v7989_v33 = vpop.f32.mrb[10].mxu0  ;;  %8289 = vmatpush3.bf16.msra.mxu0 %v9054_v45  ;;  %v9081_v23 = vld [vmem:[%s9395_s26 + $0xae0] sm:$0xff]   ;;  %v9092_v45 = vld [vmem:[%s9395_s26 + $0xa78] sm:$0xff]  }
 0x149   : > { %v8010_v32 = vadd.f32 %v8009_v30, %v8008_v25  ;;  %v8011_v36 = vpop.f32.mrb[10].mxu1  ;;  %v7990_v38 = vpop.f32.mrb[11].mxu0  ;;  %8290 = vmatprep.subr.bf16.mxu0 %v9056_v49  ;;  %v361_v49 = vld [vmem:[%s9431_s30 + $0xa0] sm:$0xff] }
 0x14a   : > { %v5587_v35 = vadd.f32 %v7988_v29, %v9720_v47  ;;  %v7991_v41 = vadd.f32 %v7990_v38, %v7989_v33  ;;  %v8012_v42 = vpop.f32.mrb[11].mxu1  ;;  %v9055_v47 = vld [vmem:[%s9395_s26 + $0x9a8] sm:$0xff]   ;;  %v9083_v29 = vld [vmem:[%s9395_s26 + $0xaa0] sm:$0xff]  }
 0x14b   : > { %v8013_v44 = vadd.f32 %v8012_v42, %v8011_v36  ;;  %8311 = vmatpush3.bf16.msra.mxu1 %v9055_v47  ;;  %v9089_v42 = vld [vmem:[%s9395_s26 + $0xaf0] sm:$0xff]   ;;  %v9094_v47 = vld [vmem:[%s9395_s26 + $0xa38] sm:$0xff]  }
 0x14c   : > { %v9762_v39 = vadd.f32 %v8010_v32, %v5587_v35  ;;  %v5590_v46 = vadd.f32 %v7991_v41, %v9727_v56  ;;  %8312 = vmatprep.subr.bf16.mxu1 %v9057_v50  ;;  %8291 = vmatpush3.bf16.msra.mxu0 %v9058_v51  ;;  %v9063_v56 = vld [vmem:[%s9395_s26 + $0x9b8] sm:$0xff]   ;;  %v9084_v32 = vld [vmem:[%s9395_s26 + $0xa68] sm:$0xff]   ;;  %v9088_v41 = vld [vmem:[%s9395_s26 + $0xa70] sm:$0xff]  }
 0x14d   : > { %8292 = vmatprep.subr.bf16.mxu0 %v9060_v53  ;;  %v9085_v35 = vld [vmem:[%s9395_s26 + $0xae8] sm:$0xff]   ;;  %v397_v50 = vld [vmem:[%s9431_s30 + $0x1c0] sm:$0xff] }
 0x14e   : > { %v9769_v48 = vadd.f32 %v8013_v44, %v5590_v46  ;;  %v9091_v44 = vld [vmem:[%s9395_s26 + $0xab0] sm:$0xff]   ;;  %v9093_v46 = vld [vmem:[%s9395_s26 + $0xaf8] sm:$0xff]   ;;  %v362_v51 = vld [vmem:[%s9431_s30 + $0xa8] sm:$0xff]  ;;  %v7252_v53 = vcombine.low %v361_v49, %v397_v50 }
 0x14f   : > { %8313 = vmatpush3.bf16.msra.mxu1 %v9059_v52  ;;  %v398_v52 = vld [vmem:[%s9431_s30 + $0x1c8] sm:$0xff] }
 0x150   : > { %8314 = vmatprep.subr.bf16.mxu1 %v9061_v54  ;;  %8293 = vmatpush3.bf16.msra.mxu0 %v9062_v55  ;;  %v7253_v54 = vcombine.high %v361_v49, %v397_v50  ;;  %v7254_v55 = vcombine.low %v362_v51, %v398_v52  ;;  %v9128_v49 = vld [vmem:[%s9395_s26 + $0xc40] sm:$0xff]  }
 0x151   : > { %8322 = vmatprep.subr.bf16.mxu0 %v9064_v1  ;;  %v9104_v1 = vld [vmem:[%s9395_s26 + $0xb50] sm:$0xff]   ;;  %v9129_v50 = vld [vmem:[%s9395_s26 + $0xcc0] sm:$0xff]  }
 0x153   : > { %8315 = vmatpush3.bf16.msra.mxu1 %v9063_v56  ;;  %6159 = vmatmul.mubr.bf16.vlgmr.msra.gmra.mrb[36].mxu0 %v7248_v59  ;;  %v7255_v56 = vcombine.high %v362_v51, %v398_v52  ;;  %v9098_v59 = vld [vmem:[%s9395_s26 + $0xb00] sm:$0xff]  }
 0x154   : > { %8344 = vmatprep.subr.bf16.mxu1 %v9065_v2  ;;  %8323 = vmatpush3.bf16.msra.mxu0 %v9066_v3  ;;  %v9105_v2 = vld [vmem:[%s9395_s26 + $0xbd0] sm:$0xff]   ;;  %v9130_v51 = vld [vmem:[%s9395_s26 + $0xc00] sm:$0xff]  }
 0x155   : > { %8324 = vmatprep.subr.bf16.mxu0 %v9068_v5  ;;  %6240 = vmatprep.mubr.bf16.mxu0 %v7253_v54  ;;  %v9106_v3 = vld [vmem:[%s9395_s26 + $0xb10] sm:$0xff]   ;;  %v9108_v5 = vld [vmem:[%s9395_s26 + $0xb58] sm:$0xff]   ;;  %v9131_v52 = vld [vmem:[%s9395_s26 + $0xc80] sm:$0xff]  }
 0x156   : > { %6200 = vmatmul.mubr.bf16.vlgmr.msra.gmra.mrb[36].mxu1 %v7250_v63  ;;  %v9102_v63 = vld [vmem:[%s9395_s26 + $0xb08] sm:$0xff]  }
 0x157   : > { %8345 = vmatpush3.bf16.msra.mxu1 %v9067_v4  ;;  %6281 = vmatprep.mubr.bf16.mxu1 %v7255_v56  ;;  %v9107_v4 = vld [vmem:[%s9395_s26 + $0xb90] sm:$0xff]   ;;  %v9133_v54 = vld [vmem:[%s9395_s26 + $0xcc8] sm:$0xff]  }
 0x158   : > { %8346 = vmatprep.subr.bf16.mxu1 %v9069_v6  ;;  %8325 = vmatpush3.bf16.msra.mxu0 %v9070_v7  ;;  %v9109_v6 = vld [vmem:[%s9395_s26 + $0xbd8] sm:$0xff]   ;;  %v9135_v56 = vld [vmem:[%s9395_s26 + $0xc88] sm:$0xff]  }
 0x159   : > { %8326 = vmatprep.subr.bf16.mxu0 %v9072_v9 }
 0x15b   : > { %8347 = vmatpush3.bf16.msra.mxu1 %v9071_v8  ;;  %v9110_v8 = vld [vmem:[%s9395_s26 + $0xb18] sm:$0xff]  }
 0x15c   : > { %8348 = vmatprep.subr.bf16.mxu1 %v9073_v10  ;;  %8327 = vmatpush3.bf16.msra.mxu0 %v9074_v11  ;;  %v9111_v10 = vld [vmem:[%s9395_s26 + $0xb98] sm:$0xff]  }
 0x15d   : > { %8328 = vmatprep.subr.bf16.mxu0 %v9076_v13 }
 0x15f   : > { %8349 = vmatpush3.bf16.msra.mxu1 %v9075_v12  ;;  %v9112_v12 = vld [vmem:[%s9395_s26 + $0xb60] sm:$0xff]  }
 0x160   : > { %8350 = vmatprep.subr.bf16.mxu1 %v9077_v14  ;;  %8329 = vmatpush3.bf16.msra.mxu0 %v9078_v16 }
 0x161   : > { %8330 = vmatprep.subr.bf16.mxu0 %v9080_v20 }
 0x163   : > { %8351 = vmatpush3.bf16.msra.mxu1 %v9079_v18  ;;  %v9114_v18 = vld [vmem:[%s9395_s26 + $0xb20] sm:$0xff]  }
 0x164   : > { %8352 = vmatprep.subr.bf16.mxu1 %v9081_v23  ;;  %8331 = vmatpush3.bf16.msra.mxu0 %v9082_v26 }
 0x165   : > { %8332 = vmatprep.subr.bf16.mxu0 %v9084_v32 }
 0x166   : > { %v8030_v15 = vpop.f32.mrb[12].mxu0 }
 0x167   : > { %v8052_v17 = vpop.f32.mrb[12].mxu1  ;;  %v8031_v19 = vpop.f32.mrb[13].mxu0  ;;  %8353 = vmatpush3.bf16.msra.mxu1 %v9083_v29  ;;  %v9118_v29 = vld [vmem:[%s9395_s26 + $0xb28] sm:$0xff]  }
 0x168   : > { %v8032_v21 = vadd.f32 %v8031_v19, %v8030_v15  ;;  %v8053_v22 = vpop.f32.mrb[13].mxu1  ;;  %v8033_v25 = vpop.f32.mrb[14].mxu0  ;;  %8354 = vmatprep.subr.bf16.mxu1 %v9085_v35  ;;  %8333 = vmatpush3.bf16.msra.mxu0 %v9086_v37  ;;  %v9113_v15 = vld [vmem:[%s9395_s26 + $0xbe0] sm:$0xff]   ;;  %v9122_v35 = vld [vmem:[%s9395_s26 + $0xb30] sm:$0xff]   ;;  %v9124_v37 = vld [vmem:[%s9395_s26 + $0xb78] sm:$0xff]  }
 0x169   : > { %v8054_v24 = vadd.f32 %v8053_v22, %v8052_v17  ;;  %v8055_v28 = vpop.f32.mrb[14].mxu1  ;;  %v8034_v30 = vpop.f32.mrb[15].mxu0  ;;  %8334 = vmatprep.subr.bf16.mxu0 %v9088_v41  ;;  %v363_v41 = vld [vmem:[%s9431_s30 + $0xb0] sm:$0xff] }
 0x16a   : > { %v5669_v27 = vadd.f32 %v8032_v21, %v9762_v39  ;;  %v8035_v33 = vadd.f32 %v8034_v30, %v8033_v25  ;;  %v8056_v34 = vpop.f32.mrb[15].mxu1  ;;  %v9087_v39 = vld [vmem:[%s9395_s26 + $0xaa8] sm:$0xff]   ;;  %v9115_v21 = vld [vmem:[%s9395_s26 + $0xba0] sm:$0xff]  }
 0x16b   : > { %v8057_v36 = vadd.f32 %v8056_v34, %v8055_v28  ;;  %8355 = vmatpush3.bf16.msra.mxu1 %v9087_v39  ;;  %v9121_v34 = vld [vmem:[%s9395_s26 + $0xbf0] sm:$0xff]   ;;  %v9126_v39 = vld [vmem:[%s9395_s26 + $0xb38] sm:$0xff]  }
 0x16c   : > { %v9804_v31 = vadd.f32 %v8054_v24, %v5669_v27  ;;  %v5672_v38 = vadd.f32 %v8035_v33, %v9769_v48  ;;  %8356 = vmatprep.subr.bf16.mxu1 %v9089_v42  ;;  %8335 = vmatpush3.bf16.msra.mxu0 %v9090_v43  ;;  %v9095_v48 = vld [vmem:[%s9395_s26 + $0xab8] sm:$0xff]   ;;  %v9116_v24 = vld [vmem:[%s9395_s26 + $0xb68] sm:$0xff]   ;;  %v9120_v33 = vld [vmem:[%s9395_s26 + $0xb70] sm:$0xff]  }
 0x16d   : > { %8336 = vmatprep.subr.bf16.mxu0 %v9092_v45  ;;  %v9117_v27 = vld [vmem:[%s9395_s26 + $0xbe8] sm:$0xff]   ;;  %v399_v42 = vld [vmem:[%s9431_s30 + $0x1d0] sm:$0xff]  ;;  %v364_v43 = vld [vmem:[%s9431_s30 + $0xb8] sm:$0xff] }
 0x16e   : > { %v9811_v40 = vadd.f32 %v8057_v36, %v5672_v38  ;;  %v9123_v36 = vld [vmem:[%s9395_s26 + $0xbb0] sm:$0xff]   ;;  %v9125_v38 = vld [vmem:[%s9395_s26 + $0xbf8] sm:$0xff]   ;;  %v7257_v45 = vcombine.high %v363_v41, %v399_v42 }
 0x16f   : > { %8357 = vmatpush3.bf16.msra.mxu1 %v9091_v44  ;;  %v7256_v44 = vcombine.low %v363_v41, %v399_v42  ;;  %v9160_v41 = vld [vmem:[%s9395_s26 + $0xd40] sm:$0xff]  }
 0x170   : > { %8358 = vmatprep.subr.bf16.mxu1 %v9093_v46  ;;  %8337 = vmatpush3.bf16.msra.mxu0 %v9094_v47  ;;  %v400_v46 = vld [vmem:[%s9431_s30 + $0x1d8] sm:$0xff]  ;;  %v9161_v42 = vld [vmem:[%s9395_s26 + $0xdc0] sm:$0xff]  }
 0x171   : > { %8366 = vmatprep.subr.bf16.mxu0 %v9096_v57  ;;  %v7258_v47 = vcombine.low %v364_v43, %v400_v46  ;;  %v9136_v57 = vld [vmem:[%s9395_s26 + $0xc50] sm:$0xff]  }
 0x173   : > { %8359 = vmatpush3.bf16.msra.mxu1 %v9095_v48  ;;  %6241 = vmatmul.mubr.bf16.vlgmr.msra.gmra.mrb[40].mxu0 %v7252_v53  ;;  %v7259_v48 = vcombine.high %v364_v43, %v400_v46  ;;  %v9132_v53 = vld [vmem:[%s9395_s26 + $0xc48] sm:$0xff]   ;;  %v9162_v43 = vld [vmem:[%s9395_s26 + $0xd00] sm:$0xff]  }
 0x174   : > { %8388 = vmatprep.subr.bf16.mxu1 %v9097_v58  ;;  %8367 = vmatpush3.bf16.msra.mxu0 %v9098_v59  ;;  %v9137_v58 = vld [vmem:[%s9395_s26 + $0xcd0] sm:$0xff]   ;;  %v9165_v46 = vld [vmem:[%s9395_s26 + $0xdc8] sm:$0xff]  }
 0x175   : > { %8368 = vmatprep.subr.bf16.mxu0 %v9100_v61  ;;  %6322 = vmatprep.mubr.bf16.mxu0 %v7257_v45  ;;  %v9138_v59 = vld [vmem:[%s9395_s26 + $0xc10] sm:$0xff]   ;;  %v9140_v61 = vld [vmem:[%s9395_s26 + $0xc58] sm:$0xff]   ;;  %v9164_v45 = vld [vmem:[%s9395_s26 + $0xd48] sm:$0xff]  }
 0x176   : > { %6282 = vmatmul.mubr.bf16.vlgmr.msra.gmra.mrb[40].mxu1 %v7254_v55  ;;  %v9134_v55 = vld [vmem:[%s9395_s26 + $0xc08] sm:$0xff]  }
 0x177   : > { %8389 = vmatpush3.bf16.msra.mxu1 %v9099_v60  ;;  %6363 = vmatprep.mubr.bf16.mxu1 %v7259_v48  ;;  %v9139_v60 = vld [vmem:[%s9395_s26 + $0xc90] sm:$0xff]   ;;  %v9167_v48 = vld [vmem:[%s9395_s26 + $0xd88] sm:$0xff]  }
 0x178   : > { %8390 = vmatprep.subr.bf16.mxu1 %v9101_v62  ;;  %8369 = vmatpush3.bf16.msra.mxu0 %v9102_v63  ;;  %v9141_v62 = vld [vmem:[%s9395_s26 + $0xcd8] sm:$0xff]  }
 0x179   : > { %8370 = vmatprep.subr.bf16.mxu0 %v9104_v1 }
 0x17b   : > { %8391 = vmatpush3.bf16.msra.mxu1 %v9103_v0  ;;  %v9142_v0 = vld [vmem:[%s9395_s26 + $0xc18] sm:$0xff]  }
 0x17c   : > { %8392 = vmatprep.subr.bf16.mxu1 %v9105_v2  ;;  %8371 = vmatpush3.bf16.msra.mxu0 %v9106_v3  ;;  %v9143_v2 = vld [vmem:[%s9395_s26 + $0xc98] sm:$0xff]  }
 0x17d   : > { %8372 = vmatprep.subr.bf16.mxu0 %v9108_v5 }
 0x17f   : > { %8393 = vmatpush3.bf16.msra.mxu1 %v9107_v4  ;;  %v9144_v4 = vld [vmem:[%s9395_s26 + $0xc60] sm:$0xff]  }
 0x180   : > { %8394 = vmatprep.subr.bf16.mxu1 %v9109_v6  ;;  %8373 = vmatpush3.bf16.msra.mxu0 %v9110_v8 }
 0x181   : > { %8374 = vmatprep.subr.bf16.mxu0 %v9112_v12 }
 0x183   : > { %8395 = vmatpush3.bf16.msra.mxu1 %v9111_v10  ;;  %v9146_v10 = vld [vmem:[%s9395_s26 + $0xc20] sm:$0xff]  }
 0x184   : > { %8396 = vmatprep.subr.bf16.mxu1 %v9113_v15  ;;  %8375 = vmatpush3.bf16.msra.mxu0 %v9114_v18 }
 0x185   : > { %8376 = vmatprep.subr.bf16.mxu0 %v9116_v24 }
 0x186   : > { %v8074_v7 = vpop.f32.mrb[16].mxu0 }
 0x187   : > { %v8096_v9 = vpop.f32.mrb[16].mxu1  ;;  %v8075_v11 = vpop.f32.mrb[17].mxu0  ;;  %8397 = vmatpush3.bf16.msra.mxu1 %v9115_v21  ;;  %v9150_v21 = vld [vmem:[%s9395_s26 + $0xc28] sm:$0xff]  }
 0x188   : > { %v8076_v13 = vadd.f32 %v8075_v11, %v8074_v7  ;;  %v8097_v14 = vpop.f32.mrb[17].mxu1  ;;  %v8077_v17 = vpop.f32.mrb[18].mxu0  ;;  %8398 = vmatprep.subr.bf16.mxu1 %v9117_v27  ;;  %8377 = vmatpush3.bf16.msra.mxu0 %v9118_v29  ;;  %v9145_v7 = vld [vmem:[%s9395_s26 + $0xce0] sm:$0xff]   ;;  %v9154_v27 = vld [vmem:[%s9395_s26 + $0xc30] sm:$0xff]   ;;  %v9156_v29 = vld [vmem:[%s9395_s26 + $0xc78] sm:$0xff]  }
 0x189   : > { %v8098_v16 = vadd.f32 %v8097_v14, %v8096_v9  ;;  %v8099_v20 = vpop.f32.mrb[18].mxu1  ;;  %v8078_v22 = vpop.f32.mrb[19].mxu0  ;;  %8378 = vmatprep.subr.bf16.mxu0 %v9120_v33  ;;  %v365_v33 = vld [vmem:[%s9431_s30 + $0xc0] sm:$0xff] }
 0x18a   : > { %v5751_v19 = vadd.f32 %v8076_v13, %v9804_v31  ;;  %v8079_v25 = vadd.f32 %v8078_v22, %v8077_v17  ;;  %v8100_v26 = vpop.f32.mrb[19].mxu1  ;;  %v9119_v31 = vld [vmem:[%s9395_s26 + $0xba8] sm:$0xff]   ;;  %v9147_v13 = vld [vmem:[%s9395_s26 + $0xca0] sm:$0xff]  }
 0x18b   : > { %v8101_v28 = vadd.f32 %v8100_v26, %v8099_v20  ;;  %8399 = vmatpush3.bf16.msra.mxu1 %v9119_v31  ;;  %v9153_v26 = vld [vmem:[%s9395_s26 + $0xcf0] sm:$0xff]   ;;  %v9158_v31 = vld [vmem:[%s9395_s26 + $0xc38] sm:$0xff]  }
 0x18c   : > { %v9846_v23 = vadd.f32 %v8098_v16, %v5751_v19  ;;  %v5754_v30 = vadd.f32 %v8079_v25, %v9811_v40  ;;  %8400 = vmatprep.subr.bf16.mxu1 %v9121_v34  ;;  %8379 = vmatpush3.bf16.msra.mxu0 %v9122_v35  ;;  %v9127_v40 = vld [vmem:[%s9395_s26 + $0xbb8] sm:$0xff]   ;;  %v9148_v16 = vld [vmem:[%s9395_s26 + $0xc68] sm:$0xff]   ;;  %v9152_v25 = vld [vmem:[%s9395_s26 + $0xc70] sm:$0xff]  }
 0x18d   : > { %8380 = vmatprep.subr.bf16.mxu0 %v9124_v37  ;;  %v9149_v19 = vld [vmem:[%s9395_s26 + $0xce8] sm:$0xff]   ;;  %v401_v34 = vld [vmem:[%s9431_s30 + $0x1e0] sm:$0xff] }
 0x18e   : > { %v9853_v32 = vadd.f32 %v8101_v28, %v5754_v30  ;;  %v9155_v28 = vld [vmem:[%s9395_s26 + $0xcb0] sm:$0xff]   ;;  %v9157_v30 = vld [vmem:[%s9395_s26 + $0xcf8] sm:$0xff]   ;;  %v7260_v35 = vcombine.low %v365_v33, %v401_v34  ;;  %v366_v37 = vld [vmem:[%s9431_s30 + $0xc8] sm:$0xff] }
 0x18f   : > { %8401 = vmatpush3.bf16.msra.mxu1 %v9123_v36  ;;  %v7261_v36 = vcombine.high %v365_v33, %v401_v34  ;;  %v9192_v33 = vld [vmem:[%s9395_s26 + $0xe40] sm:$0xff]  }
 0x190   : > { %8402 = vmatprep.subr.bf16.mxu1 %v9125_v38  ;;  %8381 = vmatpush3.bf16.msra.mxu0 %v9126_v39  ;;  %v402_v38 = vld [vmem:[%s9431_s30 + $0x1e8] sm:$0xff]  ;;  %v9193_v34 = vld [vmem:[%s9395_s26 + $0xec0] sm:$0xff]  }
 0x191   : > { %8410 = vmatprep.subr.bf16.mxu0 %v9128_v49  ;;  %v7262_v39 = vcombine.low %v366_v37, %v402_v38  ;;  %v9168_v49 = vld [vmem:[%s9395_s26 + $0xd50] sm:$0xff]  }
 0x193   : > { %8403 = vmatpush3.bf16.msra.mxu1 %v9127_v40  ;;  %6323 = vmatmul.mubr.bf16.vlgmr.msra.gmra.mrb[44].mxu0 %v7256_v44  ;;  %v7263_v40 = vcombine.high %v366_v37, %v402_v38  ;;  %v9163_v44 = vld [vmem:[%s9395_s26 + $0xd80] sm:$0xff]   ;;  %v9196_v37 = vld [vmem:[%s9395_s26 + $0xe48] sm:$0xff]  }
 0x194   : > { %8432 = vmatprep.subr.bf16.mxu1 %v9129_v50  ;;  %8411 = vmatpush3.bf16.msra.mxu0 %v9130_v51  ;;  %v9169_v50 = vld [vmem:[%s9395_s26 + $0xdd0] sm:$0xff]   ;;  %v9197_v38 = vld [vmem:[%s9395_s26 + $0xec8] sm:$0xff]  }
 0x195   : > { %8412 = vmatprep.subr.bf16.mxu0 %v9132_v53  ;;  %6404 = vmatprep.mubr.bf16.mxu0 %v7261_v36  ;;  %v9170_v51 = vld [vmem:[%s9395_s26 + $0xd10] sm:$0xff]   ;;  %v9172_v53 = vld [vmem:[%s9395_s26 + $0xd58] sm:$0xff]   ;;  %v9195_v36 = vld [vmem:[%s9395_s26 + $0xe80] sm:$0xff]  }
 0x196   : > { %6364 = vmatmul.mubr.bf16.vlgmr.msra.gmra.mrb[44].mxu1 %v7258_v47  ;;  %v9166_v47 = vld [vmem:[%s9395_s26 + $0xd08] sm:$0xff]  }
 0x197   : > { %8433 = vmatpush3.bf16.msra.mxu1 %v9131_v52  ;;  %6445 = vmatprep.mubr.bf16.mxu1 %v7263_v40  ;;  %v9171_v52 = vld [vmem:[%s9395_s26 + $0xd90] sm:$0xff]   ;;  %v9199_v40 = vld [vmem:[%s9395_s26 + $0xe88] sm:$0xff]  }
 0x198   : > { %8434 = vmatprep.subr.bf16.mxu1 %v9133_v54  ;;  %8413 = vmatpush3.bf16.msra.mxu0 %v9134_v55  ;;  %v9173_v54 = vld [vmem:[%s9395_s26 + $0xdd8] sm:$0xff]  }
 0x199   : > { %8414 = vmatprep.subr.bf16.mxu0 %v9136_v57 }
 0x19b   : > { %8435 = vmatpush3.bf16.msra.mxu1 %v9135_v56  ;;  %v9174_v56 = vld [vmem:[%s9395_s26 + $0xd18] sm:$0xff]  }
 0x19c   : > { %8436 = vmatprep.subr.bf16.mxu1 %v9137_v58  ;;  %8415 = vmatpush3.bf16.msra.mxu0 %v9138_v59  ;;  %v9175_v58 = vld [vmem:[%s9395_s26 + $0xd98] sm:$0xff]  }
 0x19d   : > { %8416 = vmatprep.subr.bf16.mxu0 %v9140_v61 }
 0x19f   : > { %8437 = vmatpush3.bf16.msra.mxu1 %v9139_v60  ;;  %v9176_v60 = vld [vmem:[%s9395_s26 + $0xd60] sm:$0xff]  }
 0x1a0   : > { %8438 = vmatprep.subr.bf16.mxu1 %v9141_v62  ;;  %8417 = vmatpush3.bf16.msra.mxu0 %v9142_v0 }
 0x1a1   : > { %8418 = vmatprep.subr.bf16.mxu0 %v9144_v4 }
 0x1a3   : > { %8439 = vmatpush3.bf16.msra.mxu1 %v9143_v2  ;;  %v9178_v2 = vld [vmem:[%s9395_s26 + $0xd20] sm:$0xff]  }
 0x1a4   : > { %8440 = vmatprep.subr.bf16.mxu1 %v9145_v7  ;;  %8419 = vmatpush3.bf16.msra.mxu0 %v9146_v10 }
 0x1a5   : > { %8420 = vmatprep.subr.bf16.mxu0 %v9148_v16 }
 0x1a6   : > { %v8118_v63 = vpop.f32.mrb[20].mxu0 }
 0x1a7   : > { %v8140_v1 = vpop.f32.mrb[20].mxu1  ;;  %v8119_v3 = vpop.f32.mrb[21].mxu0  ;;  %8441 = vmatpush3.bf16.msra.mxu1 %v9147_v13  ;;  %v9182_v13 = vld [vmem:[%s9395_s26 + $0xd28] sm:$0xff]  }
 0x1a8   : > { %v8120_v5 = vadd.f32 %v8119_v3, %v8118_v63  ;;  %v8141_v6 = vpop.f32.mrb[21].mxu1  ;;  %v8121_v9 = vpop.f32.mrb[22].mxu0  ;;  %8442 = vmatprep.subr.bf16.mxu1 %v9149_v19  ;;  %8421 = vmatpush3.bf16.msra.mxu0 %v9150_v21  ;;  %v9177_v63 = vld [vmem:[%s9395_s26 + $0xde0] sm:$0xff]   ;;  %v9186_v19 = vld [vmem:[%s9395_s26 + $0xd30] sm:$0xff]   ;;  %v9188_v21 = vld [vmem:[%s9395_s26 + $0xd78] sm:$0xff]  }
 0x1a9   : > { %v8142_v8 = vadd.f32 %v8141_v6, %v8140_v1  ;;  %v8143_v12 = vpop.f32.mrb[22].mxu1  ;;  %v8122_v14 = vpop.f32.mrb[23].mxu0  ;;  %8422 = vmatprep.subr.bf16.mxu0 %v9152_v25  ;;  %v367_v25 = vld [vmem:[%s9431_s30 + $0xd0] sm:$0xff] }
 0x1aa   : > { %v5833_v11 = vadd.f32 %v8120_v5, %v9846_v23  ;;  %v8123_v17 = vadd.f32 %v8122_v14, %v8121_v9  ;;  %v8144_v18 = vpop.f32.mrb[23].mxu1  ;;  %v9151_v23 = vld [vmem:[%s9395_s26 + $0xca8] sm:$0xff]   ;;  %v9179_v5 = vld [vmem:[%s9395_s26 + $0xda0] sm:$0xff]  }
 0x1ab   : > { %v8145_v20 = vadd.f32 %v8144_v18, %v8143_v12  ;;  %8443 = vmatpush3.bf16.msra.mxu1 %v9151_v23  ;;  %v9185_v18 = vld [vmem:[%s9395_s26 + $0xdf0] sm:$0xff]   ;;  %v9190_v23 = vld [vmem:[%s9395_s26 + $0xd38] sm:$0xff]  }
 0x1ac   : > { %v9888_v15 = vadd.f32 %v8142_v8, %v5833_v11  ;;  %v5836_v22 = vadd.f32 %v8123_v17, %v9853_v32  ;;  %8444 = vmatprep.subr.bf16.mxu1 %v9153_v26  ;;  %8423 = vmatpush3.bf16.msra.mxu0 %v9154_v27  ;;  %v9159_v32 = vld [vmem:[%s9395_s26 + $0xcb8] sm:$0xff]   ;;  %v9180_v8 = vld [vmem:[%s9395_s26 + $0xd68] sm:$0xff]   ;;  %v9184_v17 = vld [vmem:[%s9395_s26 + $0xd70] sm:$0xff]  }
 0x1ad   : > { %8424 = vmatprep.subr.bf16.mxu0 %v9156_v29  ;;  %v9181_v11 = vld [vmem:[%s9395_s26 + $0xde8] sm:$0xff]   ;;  %v403_v26 = vld [vmem:[%s9431_s30 + $0x1f0] sm:$0xff]  ;;  %v368_v27 = vld [vmem:[%s9431_s30 + $0xd8] sm:$0xff] }
 0x1ae   : > { %v9895_v24 = vadd.f32 %v8145_v20, %v5836_v22  ;;  %v9187_v20 = vld [vmem:[%s9395_s26 + $0xdb0] sm:$0xff]   ;;  %v9189_v22 = vld [vmem:[%s9395_s26 + $0xdf8] sm:$0xff]   ;;  %v7264_v29 = vcombine.low %v367_v25, %v403_v26 }
 0x1af   : > { %8445 = vmatpush3.bf16.msra.mxu1 %v9155_v28  ;;  %v404_v28 = vld [vmem:[%s9431_s30 + $0x1f8] sm:$0xff] }
 0x1b0   : > { %8446 = vmatprep.subr.bf16.mxu1 %v9157_v30  ;;  %8425 = vmatpush3.bf16.msra.mxu0 %v9158_v31  ;;  %v7265_v30 = vcombine.high %v367_v25, %v403_v26  ;;  %v7266_v31 = vcombine.low %v368_v27, %v404_v28  ;;  %v9224_v25 = vld [vmem:[%s9395_s26 + $0xf40] sm:$0xff]  }
 0x1b1   : > { %8454 = vmatprep.subr.bf16.mxu0 %v9160_v41  ;;  %v9200_v41 = vld [vmem:[%s9395_s26 + $0xe50] sm:$0xff]   ;;  %v9225_v26 = vld [vmem:[%s9395_s26 + $0xfc0] sm:$0xff]  }
 0x1b3   : > { %8447 = vmatpush3.bf16.msra.mxu1 %v9159_v32  ;;  %6405 = vmatmul.mubr.bf16.vlgmr.msra.gmra.mrb[48].mxu0 %v7260_v35  ;;  %v7267_v32 = vcombine.high %v368_v27, %v404_v28  ;;  %v9194_v35 = vld [vmem:[%s9395_s26 + $0xe00] sm:$0xff]  }
 0x1b4   : > { %8476 = vmatprep.subr.bf16.mxu1 %v9161_v42  ;;  %8455 = vmatpush3.bf16.msra.mxu0 %v9162_v43  ;;  %v9201_v42 = vld [vmem:[%s9395_s26 + $0xed0] sm:$0xff]   ;;  %v9226_v27 = vld [vmem:[%s9395_s26 + $0xf00] sm:$0xff]  }
 0x1b5   : > { %8456 = vmatprep.subr.bf16.mxu0 %v9164_v45  ;;  %6486 = vmatprep.mubr.bf16.mxu0 %v7265_v30  ;;  %v9202_v43 = vld [vmem:[%s9395_s26 + $0xe10] sm:$0xff]   ;;  %v9204_v45 = vld [vmem:[%s9395_s26 + $0xe58] sm:$0xff]   ;;  %v9227_v28 = vld [vmem:[%s9395_s26 + $0xf80] sm:$0xff]  }
 0x1b6   : > { %6446 = vmatmul.mubr.bf16.vlgmr.msra.gmra.mrb[48].mxu1 %v7262_v39  ;;  %v9198_v39 = vld [vmem:[%s9395_s26 + $0xe08] sm:$0xff]  }
 0x1b7   : > { %8477 = vmatpush3.bf16.msra.mxu1 %v9163_v44  ;;  %6527 = vmatprep.mubr.bf16.mxu1 %v7267_v32  ;;  %v9203_v44 = vld [vmem:[%s9395_s26 + $0xe90] sm:$0xff]   ;;  %v9229_v30 = vld [vmem:[%s9395_s26 + $0xfc8] sm:$0xff]  }
 0x1b8   : > { %8478 = vmatprep.subr.bf16.mxu1 %v9165_v46  ;;  %8457 = vmatpush3.bf16.msra.mxu0 %v9166_v47  ;;  %v9205_v46 = vld [vmem:[%s9395_s26 + $0xed8] sm:$0xff]   ;;  %v9231_v32 = vld [vmem:[%s9395_s26 + $0xf88] sm:$0xff]  }
 0x1b9   : > { %8458 = vmatprep.subr.bf16.mxu0 %v9168_v49  ;;  %v9206_v47 = vld [vmem:[%s9395_s26 + $0xe18] sm:$0xff]  }
 0x1ba   : > { %v9207_v49 = vld [vmem:[%s9395_s26 + $0xe98] sm:$0xff]  }
 0x1bb   : > { %8479 = vmatpush3.bf16.msra.mxu1 %v9167_v48 }
 0x1bc   : > { %8480 = vmatprep.subr.bf16.mxu1 %v9169_v50  ;;  %8459 = vmatpush3.bf16.msra.mxu0 %v9170_v51  ;;  %v9208_v51 = vld [vmem:[%s9395_s26 + $0xe60] sm:$0xff]  }
 0x1bd   : > { %8460 = vmatprep.subr.bf16.mxu0 %v9172_v53  ;;  %v9209_v53 = vld [vmem:[%s9395_s26 + $0xee0] sm:$0xff]  }
 0x1bf   : > { %8481 = vmatpush3.bf16.msra.mxu1 %v9171_v52 }
 0x1c0   : > { %8482 = vmatprep.subr.bf16.mxu1 %v9173_v54  ;;  %8461 = vmatpush3.bf16.msra.mxu0 %v9174_v56  ;;  %v9210_v56 = vld [vmem:[%s9395_s26 + $0xe20] sm:$0xff]  }
 0x1c1   : > { %8462 = vmatprep.subr.bf16.mxu0 %v9176_v60 }
 0x1c3   : > { %8483 = vmatpush3.bf16.msra.mxu1 %v9175_v58 }
 0x1c4   : > { %8484 = vmatprep.subr.bf16.mxu1 %v9177_v63  ;;  %8463 = vmatpush3.bf16.msra.mxu0 %v9178_v2 }
 0x1c5   : > { %8464 = vmatprep.subr.bf16.mxu0 %v9180_v8  ;;  %v9216_v8 = vld [vmem:[%s9395_s26 + $0xe70] sm:$0xff]  }
 0x1c6   : > { %v8162_v55 = vpop.f32.mrb[24].mxu0 }
 0x1c7   : > { %v8184_v57 = vpop.f32.mrb[24].mxu1  ;;  %v8163_v59 = vpop.f32.mrb[25].mxu0  ;;  %8485 = vmatpush3.bf16.msra.mxu1 %v9179_v5 }
 0x1c8   : > { %v8164_v61 = vadd.f32 %v8163_v59, %v8162_v55  ;;  %v8185_v62 = vpop.f32.mrb[25].mxu1  ;;  %v8165_v1 = vpop.f32.mrb[26].mxu0  ;;  %8486 = vmatprep.subr.bf16.mxu1 %v9181_v11  ;;  %8465 = vmatpush3.bf16.msra.mxu0 %v9182_v13  ;;  %v9211_v59 = vld [vmem:[%s9395_s26 + $0xea0] sm:$0xff]   ;;  %v9218_v11 = vld [vmem:[%s9395_s26 + $0xe30] sm:$0xff]   ;;  %v9220_v13 = vld [vmem:[%s9395_s26 + $0xe78] sm:$0xff]  }
 0x1c9   : > { %v8186_v0 = vadd.f32 %v8185_v62, %v8184_v57  ;;  %v8187_v4 = vpop.f32.mrb[26].mxu1  ;;  %v8166_v6 = vpop.f32.mrb[27].mxu0  ;;  %8466 = vmatprep.subr.bf16.mxu0 %v9184_v17  ;;  %v9212_v62 = vld [vmem:[%s9395_s26 + $0xe68] sm:$0xff]   ;;  %v369_v17 = vld [vmem:[%s9431_s30 + $0xe0] sm:$0xff] }
 0x1ca   : > { %v5915_v3 = vadd.f32 %v8164_v61, %v9888_v15  ;;  %v8167_v9 = vadd.f32 %v8166_v6, %v8165_v1  ;;  %v8188_v10 = vpop.f32.mrb[27].mxu1  ;;  %v9183_v15 = vld [vmem:[%s9395_s26 + $0xda8] sm:$0xff]  }
 0x1cb   : > { %v8189_v12 = vadd.f32 %v8188_v10, %v8187_v4  ;;  %8487 = vmatpush3.bf16.msra.mxu1 %v9183_v15  ;;  %v9213_v1 = vld [vmem:[%s9395_s26 + $0xee8] sm:$0xff]   ;;  %v9217_v10 = vld [vmem:[%s9395_s26 + $0xef0] sm:$0xff]   ;;  %v9222_v15 = vld [vmem:[%s9395_s26 + $0xe38] sm:$0xff]  }
 0x1cc   : > { %v9930_v7 = vadd.f32 %v8186_v0, %v5915_v3  ;;  %v5918_v14 = vadd.f32 %v8167_v9, %v9895_v24  ;;  %8488 = vmatprep.subr.bf16.mxu1 %v9185_v18  ;;  %8467 = vmatpush3.bf16.msra.mxu0 %v9186_v19  ;;  %v9191_v24 = vld [vmem:[%s9395_s26 + $0xdb8] sm:$0xff]   ;;  %v9214_v4 = vld [vmem:[%s9395_s26 + $0xe28] sm:$0xff]   ;;  %v405_v18 = vld [vmem:[%s9431_s30 + $0x200] sm:$0xff] }
 0x1cd   : > { %8468 = vmatprep.subr.bf16.mxu0 %v9188_v21  ;;  %v9215_v6 = vld [vmem:[%s9395_s26 + $0xea8] sm:$0xff]   ;;  %v7269_v21 = vcombine.high %v369_v17, %v405_v18 }
 0x1ce   : > { %v9937_v16 = vadd.f32 %v8189_v12, %v5918_v14  ;;  %v9219_v12 = vld [vmem:[%s9395_s26 + $0xeb0] sm:$0xff]   ;;  %v9221_v14 = vld [vmem:[%s9395_s26 + $0xef8] sm:$0xff]   ;;  %v370_v19 = vld [vmem:[%s9431_s30 + $0xe8] sm:$0xff] }
 0x1cf   : > { %8489 = vmatpush3.bf16.msra.mxu1 %v9187_v20  ;;  %v7268_v20 = vcombine.low %v369_v17, %v405_v18  ;;  %v9256_v17 = vld [vmem:[%s9395_s26 + $0x1040] sm:$0xff]  }
 0x1d0   : > { %8490 = vmatprep.subr.bf16.mxu1 %v9189_v22  ;;  %8469 = vmatpush3.bf16.msra.mxu0 %v9190_v23  ;;  %v406_v22 = vld [vmem:[%s9431_s30 + $0x208] sm:$0xff]  ;;  %v9257_v18 = vld [vmem:[%s9395_s26 + $0x10c0] sm:$0xff]  }
 0x1d1   : > { %8498 = vmatprep.subr.bf16.mxu0 %v9192_v33  ;;  %v7270_v23 = vcombine.low %v370_v19, %v406_v22  ;;  %v9232_v33 = vld [vmem:[%s9395_s26 + $0xf50] sm:$0xff]  }
 0x1d3   : > { %8491 = vmatpush3.bf16.msra.mxu1 %v9191_v24  ;;  %6487 = vmatmul.mubr.bf16.vlgmr.msra.gmra.mrb[52].mxu0 %v7264_v29  ;;  %v7271_v24 = vcombine.high %v370_v19, %v406_v22  ;;  %v9228_v29 = vld [vmem:[%s9395_s26 + $0xf48] sm:$0xff]   ;;  %v9258_v19 = vld [vmem:[%s9395_s26 + $0x1000] sm:$0xff]  }
 0x1d4   : > { %8520 = vmatprep.subr.bf16.mxu1 %v9193_v34  ;;  %8499 = vmatpush3.bf16.msra.mxu0 %v9194_v35  ;;  %v9233_v34 = vld [vmem:[%s9395_s26 + $0xfd0] sm:$0xff]   ;;  %v9261_v22 = vld [vmem:[%s9395_s26 + $0x10c8] sm:$0xff]  }
 0x1d5   : > { %8500 = vmatprep.subr.bf16.mxu0 %v9196_v37  ;;  %6568 = vmatprep.mubr.bf16.mxu0 %v7269_v21  ;;  %v9234_v35 = vld [vmem:[%s9395_s26 + $0xf10] sm:$0xff]   ;;  %v9236_v37 = vld [vmem:[%s9395_s26 + $0xf58] sm:$0xff]   ;;  %v9260_v21 = vld [vmem:[%s9395_s26 + $0x1048] sm:$0xff]  }
 0x1d6   : > { %6528 = vmatmul.mubr.bf16.vlgmr.msra.gmra.mrb[52].mxu1 %v7266_v31  ;;  %v9230_v31 = vld [vmem:[%s9395_s26 + $0xf08] sm:$0xff]  }
 0x1d7   : > { %8521 = vmatpush3.bf16.msra.mxu1 %v9195_v36  ;;  %6609 = vmatprep.mubr.bf16.mxu1 %v7271_v24  ;;  %v9235_v36 = vld [vmem:[%s9395_s26 + $0xf90] sm:$0xff]   ;;  %v9263_v24 = vld [vmem:[%s9395_s26 + $0x1088] sm:$0xff]  }
 0x1d8   : > { %8522 = vmatprep.subr.bf16.mxu1 %v9197_v38  ;;  %8501 = vmatpush3.bf16.msra.mxu0 %v9198_v39  ;;  %v9237_v38 = vld [vmem:[%s9395_s26 + $0xfd8] sm:$0xff]  }
 0x1d9   : > { %8502 = vmatprep.subr.bf16.mxu0 %v9200_v41 }
 0x1db   : > { %8523 = vmatpush3.bf16.msra.mxu1 %v9199_v40  ;;  %v9238_v40 = vld [vmem:[%s9395_s26 + $0xf18] sm:$0xff]  }
 0x1dc   : > { %8524 = vmatprep.subr.bf16.mxu1 %v9201_v42  ;;  %8503 = vmatpush3.bf16.msra.mxu0 %v9202_v43  ;;  %v9239_v42 = vld [vmem:[%s9395_s26 + $0xf98] sm:$0xff]  }
 0x1dd   : > { %8504 = vmatprep.subr.bf16.mxu0 %v9204_v45 }
 0x1df   : > { %8525 = vmatpush3.bf16.msra.mxu1 %v9203_v44  ;;  %v9240_v44 = vld [vmem:[%s9395_s26 + $0xf60] sm:$0xff]  }
 0x1e0   : > { %8526 = vmatprep.subr.bf16.mxu1 %v9205_v46  ;;  %8505 = vmatpush3.bf16.msra.mxu0 %v9206_v47  ;;  %v9241_v47 = vld [vmem:[%s9395_s26 + $0xfe0] sm:$0xff]  }
 0x1e1   : > { %8506 = vmatprep.subr.bf16.mxu0 %v9208_v51 }
 0x1e3   : > { %8527 = vmatpush3.bf16.msra.mxu1 %v9207_v49 }
 0x1e4   : > { %8528 = vmatprep.subr.bf16.mxu1 %v9209_v53  ;;  %8507 = vmatpush3.bf16.msra.mxu0 %v9210_v56  ;;  %v9243_v53 = vld [vmem:[%s9395_s26 + $0xfa0] sm:$0xff]   ;;  %v9244_v56 = vld [vmem:[%s9395_s26 + $0xf68] sm:$0xff]  }
 0x1e5   : > { %8508 = vmatprep.subr.bf16.mxu0 %v9212_v62 }
 0x1e6   : > { %v8206_v48 = vpop.f32.mrb[28].mxu0 }
 0x1e7   : > { %v8228_v50 = vpop.f32.mrb[28].mxu1  ;;  %v8207_v52 = vpop.f32.mrb[29].mxu0  ;;  %8529 = vmatpush3.bf16.msra.mxu1 %v9211_v59  ;;  %v9245_v59 = vld [vmem:[%s9395_s26 + $0xfe8] sm:$0xff]  }
 0x1e8   : > { %v8208_v54 = vadd.f32 %v8207_v52, %v8206_v48  ;;  %v8229_v55 = vpop.f32.mrb[29].mxu1  ;;  %v8209_v58 = vpop.f32.mrb[30].mxu0  ;;  %8530 = vmatprep.subr.bf16.mxu1 %v9213_v1  ;;  %8509 = vmatpush3.bf16.msra.mxu0 %v9214_v4  ;;  %v9248_v1 = vld [vmem:[%s9395_s26 + $0xf70] sm:$0xff]  }
 0x1e9   : > { %v8230_v57 = vadd.f32 %v8229_v55, %v8228_v50  ;;  %v8231_v61 = vpop.f32.mrb[30].mxu1  ;;  %v8210_v63 = vpop.f32.mrb[31].mxu0  ;;  %8510 = vmatprep.subr.bf16.mxu0 %v9216_v8  ;;  %v9242_v50 = vld [vmem:[%s9395_s26 + $0xf20] sm:$0xff]   ;;  %v9251_v4 = vld [vmem:[%s9395_s26 + $0xfb0] sm:$0xff]   ;;  %v9255_v8 = vld [vmem:[%s9395_s26 + $0xfb8] sm:$0xff]  }
 0x1ea   : > { %v5997_v60 = vadd.f32 %v8208_v54, %v9930_v7  ;;  %v8211_v2 = vadd.f32 %v8210_v63, %v8209_v58  ;;  %v8232_v3 = vpop.f32.mrb[31].mxu1  ;;  %v9247_v63 = vld [vmem:[%s9395_s26 + $0xfa8] sm:$0xff]  }
 0x1eb   : > { %v8233_v5 = vadd.f32 %v8232_v3, %v8231_v61  ;;  %8531 = vmatpush3.bf16.msra.mxu1 %v9215_v6  ;;  %v9246_v61 = vld [vmem:[%s9395_s26 + $0xf28] sm:$0xff]   ;;  %v9250_v3 = vld [vmem:[%s9395_s26 + $0xf30] sm:$0xff]   ;;  %v9253_v6 = vld [vmem:[%s9395_s26 + $0xff8] sm:$0xff]  }
 0x1ec   : > { %v9973_v0 = vadd.f32 %v8230_v57, %v5997_v60  ;;  %v6000_v7 = vadd.f32 %v8211_v2, %v9937_v16  ;;  %8532 = vmatprep.subr.bf16.mxu1 %v9217_v10  ;;  %8511 = vmatpush3.bf16.msra.mxu0 %v9218_v11  ;;  %v9223_v16 = vld [vmem:[%s9395_s26 + $0xeb8] sm:$0xff]   ;;  %v9249_v2 = vld [vmem:[%s9395_s26 + $0xff0] sm:$0xff]  }
 0x1ed   : > { %8512 = vmatprep.subr.bf16.mxu0 %v9220_v13  ;;  %v407_v10 = vld [vmem:[%s9431_s30 + $0x210] sm:$0xff]  ;;  %v372_v13 = vld [vmem:[%s9431_s30 + $0xf8] sm:$0xff] }
 0x1ee   : > { %v9980_v9 = vadd.f32 %v8233_v5, %v6000_v7  ;;  %v9252_v5 = vld [vmem:[%s9395_s26 + $0xf78] sm:$0xff]  }
 0x1ef   : > { %8533 = vmatpush3.bf16.msra.mxu1 %v9219_v12  ;;  %v9254_v7 = vld [vmem:[%s9395_s26 + $0xf38] sm:$0xff]  }
 0x1f0   : > { %8534 = vmatprep.subr.bf16.mxu1 %v9221_v14  ;;  %8513 = vmatpush3.bf16.msra.mxu0 %v9222_v15  ;;  %v408_v14 = vld [vmem:[%s9431_s30 + $0x218] sm:$0xff] }
 0x1f1   : > { %8542 = vmatprep.subr.bf16.mxu0 %v9224_v25  ;;  %v7274_v15 = vcombine.low %v372_v13, %v408_v14  ;;  %v9264_v25 = vld [vmem:[%s9395_s26 + $0x1050] sm:$0xff]  }
 0x1f3   : > { %8535 = vmatpush3.bf16.msra.mxu1 %v9223_v16  ;;  %6569 = vmatmul.mubr.bf16.vlgmr.msra.gmra.mrb[56].mxu0 %v7268_v20  ;;  %v7275_v16 = vcombine.high %v372_v13, %v408_v14  ;;  %v9259_v20 = vld [vmem:[%s9395_s26 + $0x1080] sm:$0xff]   ;;  %v9292_v13 = vld [vmem:[%s9395_s26 + $0x1148] sm:$0xff]  }
 0x1f4   : > { %8564 = vmatprep.subr.bf16.mxu1 %v9225_v26  ;;  %8543 = vmatpush3.bf16.msra.mxu0 %v9226_v27  ;;  %v9265_v26 = vld [vmem:[%s9395_s26 + $0x10d0] sm:$0xff]   ;;  %v9293_v14 = vld [vmem:[%s9395_s26 + $0x11c8] sm:$0xff]  }
 0x1f5   : > { %8544 = vmatprep.subr.bf16.mxu0 %v9228_v29  ;;  %v9266_v27 = vld [vmem:[%s9395_s26 + $0x1010] sm:$0xff]   ;;  %v9268_v29 = vld [vmem:[%s9395_s26 + $0x1058] sm:$0xff]  }
 0x1f6   : > { %6610 = vmatmul.mubr.bf16.vlgmr.msra.gmra.mrb[56].mxu1 %v7270_v23  ;;  %v9262_v23 = vld [vmem:[%s9395_s26 + $0x1008] sm:$0xff]  }
 0x1f7   : > { %8565 = vmatpush3.bf16.msra.mxu1 %v9227_v28  ;;  %6691 = vmatprep.mubr.bf16.mxu1 %v7275_v16  ;;  %v9267_v28 = vld [vmem:[%s9395_s26 + $0x1090] sm:$0xff]   ;;  %v9295_v16 = vld [vmem:[%s9395_s26 + $0x1188] sm:$0xff]  }
 0x1f8   : > { %8566 = vmatprep.subr.bf16.mxu1 %v9229_v30  ;;  %8545 = vmatpush3.bf16.msra.mxu0 %v9230_v31  ;;  %v9269_v30 = vld [vmem:[%s9395_s26 + $0x10d8] sm:$0xff]  }
 0x1f9   : > { %8546 = vmatprep.subr.bf16.mxu0 %v9232_v33 }
 0x1fb   : > { %8567 = vmatpush3.bf16.msra.mxu1 %v9231_v32  ;;  %v9270_v32 = vld [vmem:[%s9395_s26 + $0x1018] sm:$0xff]  }
 0x1fc   : > { %8568 = vmatprep.subr.bf16.mxu1 %v9233_v34  ;;  %8547 = vmatpush3.bf16.msra.mxu0 %v9234_v35  ;;  %v9271_v34 = vld [vmem:[%s9395_s26 + $0x1098] sm:$0xff]  }
 0x1fd   : > { %8548 = vmatprep.subr.bf16.mxu0 %v9236_v37 }
 0x1ff   : > { %8569 = vmatpush3.bf16.msra.mxu1 %v9235_v36  ;;  %v9272_v36 = vld [vmem:[%s9395_s26 + $0x1060] sm:$0xff]  }
 0x200   : > { %8570 = vmatprep.subr.bf16.mxu1 %v9237_v38  ;;  %8549 = vmatpush3.bf16.msra.mxu0 %v9238_v40 }
 0x201   : > { %8550 = vmatprep.subr.bf16.mxu0 %v9240_v44 }
 0x203   : > { %8571 = vmatpush3.bf16.msra.mxu1 %v9239_v42  ;;  %v9274_v42 = vld [vmem:[%s9395_s26 + $0x1020] sm:$0xff]  }
 0x204   : > { %8572 = vmatprep.subr.bf16.mxu1 %v9241_v47  ;;  %8551 = vmatpush3.bf16.msra.mxu0 %v9242_v50 }
 0x205   : > { %8552 = vmatprep.subr.bf16.mxu0 %v9244_v56 }
 0x206   : > { %v8250_v39 = vpop.f32.mrb[32].mxu0 }
 0x207   : > { %v8272_v41 = vpop.f32.mrb[32].mxu1  ;;  %v8251_v43 = vpop.f32.mrb[33].mxu0  ;;  %8573 = vmatpush3.bf16.msra.mxu1 %v9243_v53  ;;  %v9278_v53 = vld [vmem:[%s9395_s26 + $0x1028] sm:$0xff]  }
 0x208   : > { %v8252_v45 = vadd.f32 %v8251_v43, %v8250_v39  ;;  %v8273_v46 = vpop.f32.mrb[33].mxu1  ;;  %v8253_v49 = vpop.f32.mrb[34].mxu0  ;;  %8574 = vmatprep.subr.bf16.mxu1 %v9245_v59  ;;  %8553 = vmatpush3.bf16.msra.mxu0 %v9246_v61  ;;  %v9273_v39 = vld [vmem:[%s9395_s26 + $0x10e0] sm:$0xff]   ;;  %v9282_v59 = vld [vmem:[%s9395_s26 + $0x1030] sm:$0xff]   ;;  %v9284_v61 = vld [vmem:[%s9395_s26 + $0x1078] sm:$0xff]  }
 0x209   : > { %v8274_v48 = vadd.f32 %v8273_v46, %v8272_v41  ;;  %v8275_v52 = vpop.f32.mrb[34].mxu1  ;;  %v8254_v54 = vpop.f32.mrb[35].mxu0  ;;  %8554 = vmatprep.subr.bf16.mxu0 %v9248_v1  ;;  %v373_v1 = vld [vmem:[%s9431_s30 + $0x100] sm:$0xff] }
 0x20a   : > { %v6079_v51 = vadd.f32 %v8252_v45, %v9973_v0  ;;  %v8255_v57 = vadd.f32 %v8254_v54, %v8253_v49  ;;  %v8276_v58 = vpop.f32.mrb[35].mxu1  ;;  %v9275_v45 = vld [vmem:[%s9395_s26 + $0x10a0] sm:$0xff]  }
 0x20b   : > { %v8277_v60 = vadd.f32 %v8276_v58, %v8275_v52  ;;  %8575 = vmatpush3.bf16.msra.mxu1 %v9247_v63  ;;  %v9281_v58 = vld [vmem:[%s9395_s26 + $0x10f0] sm:$0xff]   ;;  %v9286_v63 = vld [vmem:[%s9395_s26 + $0x1038] sm:$0xff]  }
 0x20c   : > { %v10014_v55 = vadd.f32 %v8274_v48, %v6079_v51  ;;  %v6082_v62 = vadd.f32 %v8255_v57, %v9980_v9  ;;  %8576 = vmatprep.subr.bf16.mxu1 %v9249_v2  ;;  %8555 = vmatpush3.bf16.msra.mxu0 %v9250_v3  ;;  %v371_v9 = vld [vmem:[%s9431_s30 + $0xf0] sm:$0xff]  ;;  %v9276_v48 = vld [vmem:[%s9395_s26 + $0x1068] sm:$0xff]   ;;  %v409_v2 = vld [vmem:[%s9431_s30 + $0x220] sm:$0xff] }
 0x20d   : > { %8556 = vmatprep.subr.bf16.mxu0 %v9252_v5  ;;  %v7272_v11 = vcombine.low %v371_v9, %v407_v10  ;;  %v7273_v12 = vcombine.high %v371_v9, %v407_v10  ;;  %v9277_v51 = vld [vmem:[%s9395_s26 + $0x10e8] sm:$0xff]   ;;  %v9280_v57 = vld [vmem:[%s9395_s26 + $0x1070] sm:$0xff]   ;;  %v7276_v5 = vcombine.low %v373_v1, %v409_v2  ;;  %v9288_v9 = vld [vmem:[%s9395_s26 + $0x1140] sm:$0xff]  }
 0x20e   : > { %v10021_v0 = vadd.f32 %v8277_v60, %v6082_v62  ;;  %v9283_v60 = vld [vmem:[%s9395_s26 + $0x10b0] sm:$0xff]   ;;  %v9285_v62 = vld [vmem:[%s9395_s26 + $0x10f8] sm:$0xff]   ;;  %v374_v3 = vld [vmem:[%s9431_s30 + $0x108] sm:$0xff] }
 0x20f   : > { %8577 = vmatpush3.bf16.msra.mxu1 %v9251_v4  ;;  %6650 = vmatprep.mubr.bf16.mxu0 %v7273_v12  ;;  %v410_v4 = vld [vmem:[%s9431_s30 + $0x228] sm:$0xff]  ;;  %v9289_v10 = vld [vmem:[%s9395_s26 + $0x11c0] sm:$0xff]  }
 0x210   : > { %8578 = vmatprep.subr.bf16.mxu1 %v9253_v6  ;;  %8557 = vmatpush3.bf16.msra.mxu0 %v9254_v7  ;;  %v7277_v6 = vcombine.high %v373_v1, %v409_v2  ;;  %v7278_v7 = vcombine.low %v374_v3, %v410_v4  ;;  %v9291_v12 = vld [vmem:[%s9395_s26 + $0x1180] sm:$0xff]  }
 0x211   : > { %8586 = vmatprep.subr.bf16.mxu0 %v9256_v17  ;;  %v9296_v17 = vld [vmem:[%s9395_s26 + $0x1150] sm:$0xff]  }
 0x213   : > { %8579 = vmatpush3.bf16.msra.mxu1 %v9255_v8  ;;  %6651 = vmatmul.mubr.bf16.vlgmr.msra.gmra.mrb[60].mxu0 %v7272_v11  ;;  %v7279_v8 = vcombine.high %v374_v3, %v410_v4  ;;  %v9290_v11 = vld [vmem:[%s9395_s26 + $0x1100] sm:$0xff]  }
 0x214   : > { %8608 = vmatprep.subr.bf16.mxu1 %v9257_v18  ;;  %8587 = vmatpush3.bf16.msra.mxu0 %v9258_v19  ;;  %v9297_v18 = vld [vmem:[%s9395_s26 + $0x11d0] sm:$0xff]  }
 0x215   : > { %8588 = vmatprep.subr.bf16.mxu0 %v9260_v21  ;;  %6732 = vmatprep.mubr.bf16.mxu0 %v7277_v6  ;;  %v9298_v19 = vld [vmem:[%s9395_s26 + $0x1110] sm:$0xff]   ;;  %v9300_v21 = vld [vmem:[%s9395_s26 + $0x1158] sm:$0xff]  }
 0x216   : > { %6692 = vmatmul.mubr.bf16.vlgmr.msra.gmra.mrb[60].mxu1 %v7274_v15  ;;  %v9294_v15 = vld [vmem:[%s9395_s26 + $0x1108] sm:$0xff]  }
 0x217   : > { %8609 = vmatpush3.bf16.msra.mxu1 %v9259_v20  ;;  %6773 = vmatprep.mubr.bf16.mxu1 %v7279_v8  ;;  %v9299_v20 = vld [vmem:[%s9395_s26 + $0x1190] sm:$0xff]  }
 0x218   : > { %8610 = vmatprep.subr.bf16.mxu1 %v9261_v22  ;;  %8589 = vmatpush3.bf16.msra.mxu0 %v9262_v23  ;;  %v9301_v22 = vld [vmem:[%s9395_s26 + $0x11d8] sm:$0xff]  }
 0x219   : > { %8590 = vmatprep.subr.bf16.mxu0 %v9264_v25  ;;  %v9302_v23 = vld [vmem:[%s9395_s26 + $0x1118] sm:$0xff]  }
 0x21a   : > { %v9303_v25 = vld [vmem:[%s9395_s26 + $0x1198] sm:$0xff]  }
 0x21b   : > { %8611 = vmatpush3.bf16.msra.mxu1 %v9263_v24 }
 0x21c   : > { %8612 = vmatprep.subr.bf16.mxu1 %v9265_v26  ;;  %8591 = vmatpush3.bf16.msra.mxu0 %v9266_v27  ;;  %v9304_v27 = vld [vmem:[%s9395_s26 + $0x1160] sm:$0xff]  }
 0x21d   : > { %8592 = vmatprep.subr.bf16.mxu0 %v9268_v29  ;;  %v9305_v29 = vld [vmem:[%s9395_s26 + $0x11e0] sm:$0xff]  }
 0x21f   : > { %8613 = vmatpush3.bf16.msra.mxu1 %v9267_v28 }
 0x220   : > { %8614 = vmatprep.subr.bf16.mxu1 %v9269_v30  ;;  %8593 = vmatpush3.bf16.msra.mxu0 %v9270_v32  ;;  %v9306_v32 = vld [vmem:[%s9395_s26 + $0x1120] sm:$0xff]  }
 0x221   : > { %8594 = vmatprep.subr.bf16.mxu0 %v9272_v36 }
 0x223   : > { %8615 = vmatpush3.bf16.msra.mxu1 %v9271_v34 }
 0x224   : > { %8616 = vmatprep.subr.bf16.mxu1 %v9273_v39  ;;  %8595 = vmatpush3.bf16.msra.mxu0 %v9274_v42 }
 0x225   : > { %8596 = vmatprep.subr.bf16.mxu0 %v9276_v48  ;;  %v9312_v48 = vld [vmem:[%s9395_s26 + $0x1170] sm:$0xff]  }
 0x226   : > { %v8294_v31 = vpop.f32.mrb[36].mxu0 }
 0x227   : > { %v8295_v35 = vpop.f32.mrb[37].mxu0  ;;  %8617 = vmatpush3.bf16.msra.mxu1 %v9275_v45 }
 0x228   : > { %v8296_v37 = vadd.f32 %v8295_v35, %v8294_v31  ;;  %v8297_v41 = vpop.f32.mrb[38].mxu0  ;;  %8618 = vmatprep.subr.bf16.mxu1 %v9277_v51  ;;  %8597 = vmatpush3.bf16.msra.mxu0 %v9278_v53  ;;  %v9307_v35 = vld [vmem:[%s9395_s26 + $0x11a0] sm:$0xff]   ;;  %v9314_v51 = vld [vmem:[%s9395_s26 + $0x1130] sm:$0xff]   ;;  %v9316_v53 = vld [vmem:[%s9395_s26 + $0x1178] sm:$0xff]  }
 0x229   : > { %v8316_v33 = vpop.f32.mrb[36].mxu1  ;;  %v8298_v46 = vpop.f32.mrb[39].mxu0  ;;  %8598 = vmatprep.subr.bf16.mxu0 %v9280_v57  ;;  %v375_v57 = vld [vmem:[%s9431_s30 + $0x110] sm:$0xff] }
 0x22a   : > { %v8317_v38 = vpop.f32.mrb[37].mxu1  ;;  %v6161_v43 = vadd.f32 %v8296_v37, %v10014_v55  ;;  %v8299_v49 = vadd.f32 %v8298_v46, %v8297_v41  ;;  %v9279_v55 = vld [vmem:[%s9395_s26 + $0x10a8] sm:$0xff]  }
 0x22b   : > { %v8318_v40 = vadd.f32 %v8317_v38, %v8316_v33  ;;  %v8319_v44 = vpop.f32.mrb[38].mxu1  ;;  %8619 = vmatpush3.bf16.msra.mxu1 %v9279_v55  ;;  %v9308_v38 = vld [vmem:[%s9395_s26 + $0x1168] sm:$0xff]   ;;  %v9318_v55 = vld [vmem:[%s9395_s26 + $0x1138] sm:$0xff]  }
 0x22c   : > { %v8320_v50 = vpop.f32.mrb[39].mxu1  ;;  %v6164_v54 = vadd.f32 %v8299_v49, %v10021_v0  ;;  %8620 = vmatprep.subr.bf16.mxu1 %v9281_v58  ;;  %8599 = vmatpush3.bf16.msra.mxu0 %v9282_v59  ;;  %v9287_v0 = vld [vmem:[%s9395_s26 + $0x10b8] sm:$0xff]   ;;  %v9309_v41 = vld [vmem:[%s9395_s26 + $0x11e8] sm:$0xff]   ;;  %v411_v58 = vld [vmem:[%s9431_s30 + $0x230] sm:$0xff] }
 0x22d   : > { %v10056_v47 = vadd.f32 %v8318_v40, %v6161_v43  ;;  %v8321_v52 = vadd.f32 %v8320_v50, %v8319_v44  ;;  %8600 = vmatprep.subr.bf16.mxu0 %v9284_v61  ;;  %v9310_v44 = vld [vmem:[%s9395_s26 + $0x1128] sm:$0xff]   ;;  %v9313_v50 = vld [vmem:[%s9395_s26 + $0x11f0] sm:$0xff]   ;;  %v376_v59 = vld [vmem:[%s9431_s30 + $0x118] sm:$0xff]  ;;  %v7281_v61 = vcombine.high %v375_v57, %v411_v58 }
 0x22e   : > { %v9311_v46 = vld [vmem:[%s9395_s26 + $0x11a8] sm:$0xff]  }
 0x22f   : > { %v10063_v56 = vadd.f32 %v8321_v52, %v6164_v54  ;;  %8621 = vmatpush3.bf16.msra.mxu1 %v9283_v60  ;;  %v9315_v52 = vld [vmem:[%s9395_s26 + $0x11b0] sm:$0xff]   ;;  %v9317_v54 = vld [vmem:[%s9395_s26 + $0x11f8] sm:$0xff]   ;;  %v7280_v60 = vcombine.low %v375_v57, %v411_v58  ;;  %v9328_v58 = vld [vmem:[%s10147_s16] sm:$0xff]  }
 0x230   : > { %8622 = vmatprep.subr.bf16.mxu1 %v9285_v62  ;;  %8601 = vmatpush3.bf16.msra.mxu0 %v9286_v63  ;;  %v412_v62 = vld [vmem:[%s9431_s30 + $0x238] sm:$0xff] }
 0x231   : > { %8630 = vmatprep.subr.bf16.mxu0 %v9288_v9  ;;  %v7282_v63 = vcombine.low %v376_v59, %v412_v62  ;;  %v9327_v57 = vld [vmem:[%s10122_s13 + $0x38] sm:$0xff]  }
 0x233   : > { %8623 = vmatpush3.bf16.msra.mxu1 %v9287_v0  ;;  %6733 = vmatmul.mubr.bf16.vlgmr.msra.gmra.mrb[64].mxu0 %v7276_v5  ;;  %v7283_v0 = vcombine.high %v376_v59, %v412_v62  ;;  %v9329_v59 = vld [vmem:[%s10147_s16 + $0x8] sm:$0xff]  }
 0x234   : > { %8652 = vmatprep.subr.bf16.mxu1 %v9289_v10  ;;  %8631 = vmatpush3.bf16.msra.mxu0 %v9290_v11 }
 0x235   : > { %8632 = vmatprep.subr.bf16.mxu0 %v9292_v13  ;;  %6814 = vmatprep.mubr.bf16.mxu0 %v7281_v61  ;;  %v9331_v61 = vld [vmem:[%s10147_s16 + $0x18] sm:$0xff]  }
 0x236   : > { %6774 = vmatmul.mubr.bf16.vlgmr.msra.gmra.mrb[64].mxu1 %v7278_v7 }
 0x237   : > { %8653 = vmatpush3.bf16.msra.mxu1 %v9291_v12  ;;  %6855 = vmatprep.mubr.bf16.mxu1 %v7283_v0 }
 0x238   : > { %8654 = vmatprep.subr.bf16.mxu1 %v9293_v14  ;;  %8633 = vmatpush3.bf16.msra.mxu0 %v9294_v15 }
 0x239   : > { %8634 = vmatprep.subr.bf16.mxu0 %v9296_v17 }
 0x23b   : > { %8655 = vmatpush3.bf16.msra.mxu1 %v9295_v16 }
 0x23c   : > { %8656 = vmatprep.subr.bf16.mxu1 %v9297_v18  ;;  %8635 = vmatpush3.bf16.msra.mxu0 %v9298_v19 }
 0x23d   : > { %8636 = vmatprep.subr.bf16.mxu0 %v9300_v21 }
 0x23f   : > { %8657 = vmatpush3.bf16.msra.mxu1 %v9299_v20 }
 0x240   : > { %8658 = vmatprep.subr.bf16.mxu1 %v9301_v22  ;;  %8637 = vmatpush3.bf16.msra.mxu0 %v9302_v23 }
 0x241   : > { %8638 = vmatprep.subr.bf16.mxu0 %v9304_v27 }
 0x243   : > { %8659 = vmatpush3.bf16.msra.mxu1 %v9303_v25 }
 0x244   : > { %8660 = vmatprep.subr.bf16.mxu1 %v9305_v29  ;;  %8639 = vmatpush3.bf16.msra.mxu0 %v9306_v32 }
 0x245   : > { %8640 = vmatprep.subr.bf16.mxu0 %v9308_v38  ;;  %v9324_v38 = vld [vmem:[%s10122_s13 + $0x20] sm:$0xff]  }
 0x246   : > { %v8338_v24 = vpop.f32.mrb[40].mxu0 }
 0x247   : > { %v8339_v28 = vpop.f32.mrb[41].mxu0  ;;  %8661 = vmatpush3.bf16.msra.mxu1 %v9307_v35  ;;  %v9321_v35 = vld [vmem:[%s10122_s13 + $0x8] sm:$0xff]  }
 0x248   : > { %v8340_v30 = vadd.f32 %v8339_v28, %v8338_v24  ;;  %v8341_v34 = vpop.f32.mrb[42].mxu0  ;;  %8662 = vmatprep.subr.bf16.mxu1 %v9309_v41  ;;  %8641 = vmatpush3.bf16.msra.mxu0 %v9310_v44 }
 0x249   : > { %v8360_v26 = vpop.f32.mrb[40].mxu1  ;;  %v8342_v39 = vpop.f32.mrb[43].mxu0  ;;  %8642 = vmatprep.subr.bf16.mxu0 %v9312_v48 }
 0x24a   : > { %v8361_v31 = vpop.f32.mrb[41].mxu1  ;;  %v6243_v36 = vadd.f32 %v8340_v30, %v10056_v47  ;;  %v8343_v42 = vadd.f32 %v8342_v39, %v8341_v34  ;;  %v9320_v34 = vld [vmem:[%s10122_s13] sm:$0xff]  }
 0x24b   : > { %v8362_v33 = vadd.f32 %v8361_v31, %v8360_v26  ;;  %v8363_v37 = vpop.f32.mrb[42].mxu1  ;;  %8663 = vmatpush3.bf16.msra.mxu1 %v9311_v46 }
 0x24c   : > { %v8364_v43 = vpop.f32.mrb[43].mxu1  ;;  %v6246_v47 = vadd.f32 %v8343_v42, %v10063_v56  ;;  %8664 = vmatprep.subr.bf16.mxu1 %v9313_v50  ;;  %8643 = vmatpush3.bf16.msra.mxu0 %v9314_v51  ;;  %v9319_v56 = vld [vmem:[%s9395_s26 + $0x11b8] sm:$0xff]  }
 0x24d   : > { %v6284_v40 = vadd.f32 %v8362_v33, %v6243_v36  ;;  %v8365_v45 = vadd.f32 %v8364_v43, %v8363_v37  ;;  %8644 = vmatprep.subr.bf16.mxu0 %v9316_v53  ;;  %v9344_v33 = vmov 0.0   ;;  %v9322_v36 = vld [vmem:[%s10122_s13 + $0x10] sm:$0xff]   ;;  %v9323_v37 = vld [vmem:[%s10122_s13 + $0x18] sm:$0xff]  }
 0x24f   : > { %v6287_v49 = vadd.f32 %v8365_v45, %v6246_v47  ;;  %8665 = vmatpush3.bf16.msra.mxu1 %v9315_v52 }
 0x250   : > { %8666 = vmatprep.subr.bf16.mxu1 %v9317_v54  ;;  %8645 = vmatpush3.bf16.msra.mxu0 %v9318_v55  ;;  %v9325_v54 = vld [vmem:[%s10122_s13 + $0x28] sm:$0xff]  }
 0x251   : > { %8692 = vmatprep.subr.bf16.mxu0 %v9344_v33 }
 0x253   : > { %8667 = vmatpush3.bf16.msra.mxu1 %v9319_v56  ;;  %6815 = vmatmul.mubr.bf16.vlgmr.msra.gmra.mrb[68].mxu0 %v7280_v60  ;;  %v9326_v56 = vld [vmem:[%s10122_s13 + $0x30] sm:$0xff]  }
 0x254   : > { %8712 = vmatprep.subr.bf16.mxu1 %v9344_v33  ;;  %8693 = vmatpush3.bf16.msra.mxu0 %v9320_v34  ;;  %v9330_v60 = vld [vmem:[%s10147_s16 + $0x10] sm:$0xff]  }
 0x255   : > { %8694 = vmatprep.subr.bf16.mxu0 %v9344_v33  ;;  %8708 = vmatprep.mubr.msk.bf16.mxu0 %vm9345_vm0, %v9344_v33 }
 0x256   : > { %6856 = vmatmul.mubr.bf16.vlgmr.msra.gmra.mrb[68].mxu1 %v7282_v63 }
 0x257   : > { %8728 = vmatprep.mubr.msk.bf16.mxu1 %vm9345_vm0, %v9344_v33  ;;  %8713 = vmatpush3.bf16.msra.mxu1 %v9328_v58 }
 0x258   : > { %8695 = vmatpush3.bf16.msra.mxu0 %v9321_v35  ;;  %8714 = vmatprep.subr.bf16.mxu1 %v9344_v33 }
 0x259   : > { %8696 = vmatprep.subr.bf16.mxu0 %v9344_v33 }
 0x25b   : > { %8715 = vmatpush3.bf16.msra.mxu1 %v9329_v59 }
 0x25c   : > { %8697 = vmatpush3.bf16.msra.mxu0 %v9322_v36  ;;  %8716 = vmatprep.subr.bf16.mxu1 %v9344_v33 }
 0x25d   : > { %8698 = vmatprep.subr.bf16.mxu0 %v9344_v33 }
 0x25f   : > { %8717 = vmatpush3.bf16.msra.mxu1 %v9330_v60 }
 0x260   : > { %8699 = vmatpush3.bf16.msra.mxu0 %v9323_v37  ;;  %8718 = vmatprep.subr.bf16.mxu1 %v9344_v33 }
 0x261   : > { %8700 = vmatprep.subr.bf16.mxu0 %v9344_v33 }
 0x263   : > { %8719 = vmatpush3.bf16.msra.mxu1 %v9331_v61 }
 0x264   : > { %8701 = vmatpush3.bf16.msra.mxu0 %v9324_v38  ;;  %8720 = vmatprep.subr.bf16.mxu1 %v9344_v33 }
 0x265   : > { %8702 = vmatprep.subr.bf16.mxu0 %v9344_v33 }
 0x266   : > { %v8382_v1 = vpop.f32.mrb[44].mxu0 }
 0x267   : > { %v8383_v3 = vpop.f32.mrb[45].mxu0 }
 0x268   : > { %v8384_v4 = vadd.f32 %v8383_v3, %v8382_v1  ;;  %v8385_v6 = vpop.f32.mrb[46].mxu0  ;;  %8703 = vmatpush3.bf16.msra.mxu0 %v9325_v54  ;;  %v9332_v1 = vld [vmem:[%s10147_s16 + $0x20] sm:$0xff]  }
 0x269   : > { %v8404_v2 = vpop.f32.mrb[44].mxu1  ;;  %v8386_v9 = vpop.f32.mrb[47].mxu0  ;;  %8704 = vmatprep.subr.bf16.mxu0 %v9344_v33  ;;  %8721 = vmatpush3.bf16.msra.mxu1 %v9332_v1 }
 0x26a   : > { %v8405_v5 = vpop.f32.mrb[45].mxu1  ;;  %v6325_v10 = vadd.f32 %v8384_v4, %v6284_v40  ;;  %v8387_v11 = vadd.f32 %v8386_v9, %v8385_v6  ;;  %8722 = vmatprep.subr.bf16.mxu1 %v9344_v33 }
 0x26b   : > { %v8406_v7 = vadd.f32 %v8405_v5, %v8404_v2  ;;  %v8407_v8 = vpop.f32.mrb[46].mxu1 }
 0x26c   : > { %v8408_v12 = vpop.f32.mrb[47].mxu1  ;;  %v6328_v15 = vadd.f32 %v8387_v11, %v6287_v49  ;;  %8705 = vmatpush3.bf16.msra.mxu0 %v9326_v56 }
 0x26d   : > { %v8409_v13 = vadd.f32 %v8408_v12, %v8407_v8  ;;  %v6366_v14 = vadd.f32 %v8406_v7, %v6325_v10  ;;  %8706 = vmatprep.subr.bf16.mxu0 %v9344_v33  ;;  %v9333_v12 = vld [vmem:[%s10147_s16 + $0x28] sm:$0xff]  }
 0x26e   : > { %8723 = vmatpush3.bf16.msra.mxu1 %v9333_v12 }
 0x26f   : > { %v6369_v16 = vadd.f32 %v8409_v13, %v6328_v15  ;;  %8724 = vmatprep.subr.bf16.mxu1 %v9344_v33 }
 0x270   : > { %8707 = vmatpush3.bf16.msra.mxu0 %v9327_v57 }
 0x286   : > { %v8426_v17 = vpop.f32.mrb[48].mxu0 }
 0x287   : > { %v8427_v19 = vpop.f32.mrb[49].mxu0 }
 0x288   : > { %v8428_v20 = vadd.f32 %v8427_v19, %v8426_v17  ;;  %v8429_v22 = vpop.f32.mrb[50].mxu0 }
 0x289   : > { %v8448_v18 = vpop.f32.mrb[48].mxu1  ;;  %v8430_v25 = vpop.f32.mrb[51].mxu0 }
 0x28a   : > { %v8449_v21 = vpop.f32.mrb[49].mxu1  ;;  %v6407_v26 = vadd.f32 %v8428_v20, %v6366_v14  ;;  %v8431_v27 = vadd.f32 %v8430_v25, %v8429_v22 }
 0x28b   : > { %v8450_v23 = vadd.f32 %v8449_v21, %v8448_v18  ;;  %v8451_v24 = vpop.f32.mrb[50].mxu1 }
 0x28c   : > { %v8452_v28 = vpop.f32.mrb[51].mxu1  ;;  %v6410_v31 = vadd.f32 %v8431_v27, %v6369_v16 }
 0x28d   : > { %v8453_v29 = vadd.f32 %v8452_v28, %v8451_v24  ;;  %v6448_v30 = vadd.f32 %v8450_v23, %v6407_v26 }
 0x28f   : > { %v6451_v32 = vadd.f32 %v8453_v29, %v6410_v31 }
 0x2a6   : > { %v8470_v39 = vpop.f32.mrb[52].mxu0 }
 0x2a7   : > { %v8471_v41 = vpop.f32.mrb[53].mxu0 }
 0x2a8   : > { %v8472_v43 = vadd.f32 %v8471_v41, %v8470_v39  ;;  %v8473_v45 = vpop.f32.mrb[54].mxu0 }
 0x2a9   : > { %v8492_v40 = vpop.f32.mrb[52].mxu1  ;;  %v8474_v47 = vpop.f32.mrb[55].mxu0 }
 0x2aa   : > { %v8493_v42 = vpop.f32.mrb[53].mxu1  ;;  %v6489_v49 = vadd.f32 %v8472_v43, %v6448_v30  ;;  %v8475_v50 = vadd.f32 %v8474_v47, %v8473_v45 }
 0x2ab   : > { %v8494_v44 = vadd.f32 %v8493_v42, %v8492_v40  ;;  %v8495_v46 = vpop.f32.mrb[54].mxu1 }
 0x2ac   : > { %v8496_v48 = vpop.f32.mrb[55].mxu1  ;;  %v6492_v53 = vadd.f32 %v8475_v50, %v6451_v32 }
 0x2ad   : > { %v8497_v51 = vadd.f32 %v8496_v48, %v8495_v46  ;;  %v6530_v52 = vadd.f32 %v8494_v44, %v6489_v49 }
 0x2af   : > { %v6533_v55 = vadd.f32 %v8497_v51, %v6492_v53 }
 0x2c6   : > { %v8514_v62 = vpop.f32.mrb[56].mxu0 }
 0x2c7   : > { %v8515_v0 = vpop.f32.mrb[57].mxu0 }
 0x2c8   : > { %v8516_v2 = vadd.f32 %v8515_v0, %v8514_v62  ;;  %v8517_v4 = vpop.f32.mrb[58].mxu0 }
 0x2c9   : > { %v8536_v63 = vpop.f32.mrb[56].mxu1  ;;  %v8518_v7 = vpop.f32.mrb[59].mxu0 }
 0x2ca   : > { %v8537_v3 = vpop.f32.mrb[57].mxu1  ;;  %v6571_v8 = vadd.f32 %v8516_v2, %v6530_v52  ;;  %v8519_v9 = vadd.f32 %v8518_v7, %v8517_v4  ;;  %v9334_v4 = vld [vmem:[%s10147_s16 + $0x30] sm:$0xff]  }
 0x2cb   : > { %v8538_v5 = vadd.f32 %v8537_v3, %v8536_v63  ;;  %v8539_v6 = vpop.f32.mrb[58].mxu1  ;;  %8725 = vmatpush3.bf16.msra.mxu1 %v9334_v4 }
 0x2cc   : > { %v8540_v10 = vpop.f32.mrb[59].mxu1  ;;  %v6574_v14 = vadd.f32 %v8519_v9, %v6533_v55  ;;  %8726 = vmatprep.subr.bf16.mxu1 %v9344_v33 }
 0x2cd   : > { %v8541_v11 = vadd.f32 %v8540_v10, %v8539_v6  ;;  %v6612_v13 = vadd.f32 %v8538_v5, %v6571_v8  ;;  %v9335_v5 = vld [vmem:[%s10147_s16 + $0x38] sm:$0xff]   ;;  %v7860_v6 = vld [vmem:[%s329_s19] ss:$0 sm:$0xff] }
 0x2cf   : > { %v6615_v15 = vadd.f32 %v8541_v11, %v6574_v14  ;;  %8727 = vmatpush3.bf16.msra.mxu1 %v9335_v5 }
 0x2e6   : > { %v8558_v16 = vpop.f32.mrb[60].mxu0 }
 0x2e7   : > { %v8559_v18 = vpop.f32.mrb[61].mxu0 }
 0x2e8   : > { %v8560_v19 = vadd.f32 %v8559_v18, %v8558_v16  ;;  %v8561_v21 = vpop.f32.mrb[62].mxu0 }
 0x2e9   : > { %v8580_v17 = vpop.f32.mrb[60].mxu1  ;;  %v8562_v24 = vpop.f32.mrb[63].mxu0 }
 0x2ea   : > { %v8581_v20 = vpop.f32.mrb[61].mxu1  ;;  %v6653_v25 = vadd.f32 %v8560_v19, %v6612_v13  ;;  %v8563_v26 = vadd.f32 %v8562_v24, %v8561_v21 }
 0x2eb   : > { %v8582_v22 = vadd.f32 %v8581_v20, %v8580_v17  ;;  %v8583_v23 = vpop.f32.mrb[62].mxu1 }
 0x2ec   : > { %v8584_v27 = vpop.f32.mrb[63].mxu1  ;;  %v6656_v30 = vadd.f32 %v8563_v26, %v6615_v15 }
 0x2ed   : > { %v8585_v28 = vadd.f32 %v8584_v27, %v8583_v23  ;;  %v6694_v29 = vadd.f32 %v8582_v22, %v6653_v25 }
 0x2ef   : > { %v6697_v31 = vadd.f32 %v8585_v28, %v6656_v30 }
 0x306   : > { %v8602_v32 = vpop.f32.mrb[64].mxu0 }
 0x307   : > { %v8603_v35 = vpop.f32.mrb[65].mxu0 }
 0x308   : > { %v8604_v37 = vadd.f32 %v8603_v35, %v8602_v32  ;;  %v8605_v39 = vpop.f32.mrb[66].mxu0 }
 0x309   : > { %v8624_v34 = vpop.f32.mrb[64].mxu1  ;;  %v8606_v41 = vpop.f32.mrb[67].mxu0 }
 0x30a   : > { %v8625_v36 = vpop.f32.mrb[65].mxu1  ;;  %v6735_v43 = vadd.f32 %v8604_v37, %v6694_v29  ;;  %v8607_v44 = vadd.f32 %v8606_v41, %v8605_v39 }
 0x30b   : > { %v8626_v38 = vadd.f32 %v8625_v36, %v8624_v34  ;;  %v8627_v40 = vpop.f32.mrb[66].mxu1 }
 0x30c   : > { %v8628_v42 = vpop.f32.mrb[67].mxu1  ;;  %v6738_v47 = vadd.f32 %v8607_v44, %v6697_v31 }
 0x30d   : > { %v8629_v45 = vadd.f32 %v8628_v42, %v8627_v40  ;;  %v6776_v46 = vadd.f32 %v8626_v38, %v6735_v43 }
 0x30f   : > { %v6779_v48 = vadd.f32 %v8629_v45, %v6738_v47 }
 0x326   : > { %v8646_v49 = vpop.f32.mrb[68].mxu0 }
 0x327   : > { %v8647_v51 = vpop.f32.mrb[69].mxu0 }
 0x328   : > { %v8648_v52 = vadd.f32 %v8647_v51, %v8646_v49  ;;  %v8649_v54 = vpop.f32.mrb[70].mxu0 }
 0x329   : > { %v8668_v50 = vpop.f32.mrb[68].mxu1  ;;  %v8650_v57 = vpop.f32.mrb[71].mxu0 }
 0x32a   : > { %v8669_v53 = vpop.f32.mrb[69].mxu1  ;;  %v6817_v58 = vadd.f32 %v8648_v52, %v6776_v46  ;;  %v8651_v59 = vadd.f32 %v8650_v57, %v8649_v54 }
 0x32b   : > { %v8670_v55 = vadd.f32 %v8669_v53, %v8668_v50  ;;  %v8671_v56 = vpop.f32.mrb[70].mxu1 }
 0x32c   : > { %v8672_v60 = vpop.f32.mrb[71].mxu1  ;;  %v6820_v63 = vadd.f32 %v8651_v59, %v6779_v48 }
 0x32d   : > { %v8673_v61 = vadd.f32 %v8672_v60, %v8671_v56  ;;  %v6858_v62 = vadd.f32 %v8670_v55, %v6817_v58 }
 0x32f   : > { %v6861_v0 = vadd.f32 %v8673_v61, %v6820_v63  ;;  %v6864_v1 = vmax.f32 %v6858_v62, 0.0 }
 0x331   : > { %v6865_v2 = vmax.f32 %v6861_v0, 0.0 }
 0x333   : > { %v6866_v3 = vpack.c.bf16 %v6865_v2, %v6864_v1 }
 0x335   : > { %8709 = vmatmul.mubr.bf16.vlgmr.msra.gmra.mrb[72].mxu0 %v6866_v3 }
 0x408   : > { %v6972_v7 = vpop.f32.mrb[72].mxu0 }
 0x409   : > { %v6973_v8 = vadd.f32 %v7860_v6, %v6972_v7  ;;  %v8710_v9 = vpop.f32.mrb[73].mxu0 }
 0x40a   : > { %v6975_v10 = vpop.f32.mrb[74].mxu0 }
 0x40b   : > { %v6976_v11 = vadd.f32 %v7860_v6, %v6975_v10  ;;  %v8711_v12 = vpop.f32.mrb[75].mxu0  ;;  %v6979_v13 = vmax.f32 %v6973_v8, 0.0 }
 0x40d   : > { %v6980_v14 = vmax.f32 %v6976_v11, 0.0 }
 0x40f   : > { %v6981_v15 = vpack.c.bf16 %v6980_v14, %v6979_v13 }
 0x411   : > { %8729 = vmatmul.mubr.bf16.vlgmr.msra.gmra.mrb[72].mxu1 %v6981_v15 }
 0x4e4   : > { %v7080_v33 = vpop.f32.mrb[72].mxu1 }
 0x4e5   : > { %7087 = vst [vmem:[%s339_s25] sm:$0xff] %v7080_v33  ;;  %v8730_v16 = vpop.f32.mrb[73].mxu1 }
 0x4e6   : > { %v7083_v17 = vpop.f32.mrb[74].mxu1 }
 0x4e7   : > { %7088 = vst [vmem:[%s339_s25 + $0x8] sm:$0xff] %v7083_v17  ;;  %v8731_v18 = vpop.f32.mrb[75].mxu1 }
 0x4e8 PF: > { %s16_s21 = sadd.s32 1, %s9342_s21  }
 0x4e9   : > { %p13_p4 = scmp.ge.s32.totalorder %s16_s21, 4  }
 0x4eb   :  { %15 = sbr.rel (!%p13_p4) target bundleno = 1 (0x1), region = 89 }

</bundles_post_ra>
